<compile_context>
chip_gen: v7x
topology: tpu7x:2x2x1
jax: 0.10.0
libtpu: 0.0.40
codegen_flags: <defaults>
</compile_context>

<pallas_src>
import functools

import numpy as np
import jax
import jax.numpy as jnp
from jax.experimental import pallas as pl
from jax.experimental.pallas import tpu as pltpu


LANE = 128
_VMEM_LIMIT = 32 * 1024 * 1024   # safe on v5e/v6e (128 MiB) and v7x (64 MiB physical)


def _round_up(x, m):
    return (x + m - 1) // m * m


def _pad128(c):
    return _round_up(c, LANE)


def _choose_m_tiling(m):
    """(m_padded, tile_m): tile_m multiple of 8, >= 2 grid steps whenever possible
    so v7x can shard the 'parallel' axis across both TensorCores."""
    m_pad = _round_up(max(m, 16), 16)
    if m_pad >= 2048:
        tm = 512
    elif m_pad >= 512:
        tm = 256
    elif m_pad >= 256:
        tm = 128
    else:
        tm = m_pad // 2          # multiple of 8, gives exactly 2 steps
    m_pad = _round_up(m_pad, tm)
    return m_pad, tm


def _pick_group_tile(g):
    """Largest divisor of g that still leaves >= 2 grid steps (cap 8)."""
    cap = max(1, min(8, g // 2)) if g >= 2 else 1
    for t in range(cap, 0, -1):
        if g % t == 0:
            return t
    return 1


# ----------------------------------------------------------------------------- #
# Pallas kernels
# ----------------------------------------------------------------------------- #
def _matmul_bias_act_kernel(x_ref, w_ref, b_ref, o_ref, *, activation):
    # bf16 operands -> f32 accumulate on the MXU; bias + activation in f32 on the VPU.
    acc = jnp.dot(x_ref[...], w_ref[...], preferred_element_type=jnp.float32)
    acc = acc + b_ref[...]                       # (1, N) bias broadcast over rows
    if activation == "gelu":
        # tanh approximation (EUP friendly); PyTorch nn.GELU default is erf.
        acc = jax.nn.gelu(acc, approximate=True)
    elif activation == "relu":
        acc = jnp.maximum(acc, 0.0)
    o_ref[...] = acc.astype(o_ref.dtype)


def _decode_head_kernel(f0_ref, u1_ref, u2_ref, u3_ref,
                        wp_ref, bp_ref, w1_ref, b1_ref, w2_ref, b2_ref, o_ref):
    # Fused decoder tail: scale-0 projection (1x1 conv + GELU) + multi-scale sum +
    # (task 1x1 conv + GELU) -> (head 1x1 conv) for BOTH tasks.  Three chained MXU
    # dots, a single lane-dense HBM store; w1 stacks the two per-task convs side by
    # side, w2 is block-diagonal over the two heads with output columns zero-padded
    # to 128.
    p0 = jnp.dot(f0_ref[...], wp_ref[...], preferred_element_type=jnp.float32)
    p0 = jax.nn.gelu(p0 + bp_ref[...], approximate=True)
    fused = (p0
             + u1_ref[...].astype(jnp.float32)
             + u2_ref[...].astype(jnp.float32)
             + u3_ref[...].astype(jnp.float32))
    h = jnp.dot(fused.astype(jnp.bfloat16), w1_ref[...],
                preferred_element_type=jnp.float32)
    h = jax.nn.gelu(h + b1_ref[...], approximate=True)
    y = jnp.dot(h.astype(jnp.bfloat16), w2_ref[...],
                preferred_element_type=jnp.float32)
    o_ref[...] = (y + b2_ref[...]).astype(o_ref.dtype)


def _interp_kernel(r_ref, x_ref, o_ref):
    # o[g, o, n] = sum_k r[o, k] * x[g, k, n]   (channels stay in the lane dim; the
    # contraction axis is the small spatial axis).  tile_g <= 8, so a static unrolled
    # loop of dots avoids materializing a broadcast of r.
    r = r_ref[...]
    for g in range(x_ref.shape[0]):
        acc = jnp.dot(r, x_ref[g], preferred_element_type=jnp.float32)
        o_ref[g] = acc.astype(o_ref.dtype)


# ----------------------------------------------------------------------------- #
# Kernel wrappers
# ----------------------------------------------------------------------------- #
def matmul_bias_act(x, w, b, activation="none", out_dtype=jnp.float32):
    """y = act(x @ w + b). x:(M,K), w:(K,N), b:(N,).

    Operands are cast to bf16 (f32 accumulate / epilogue).  N is padded to a multiple
    of 128 so stores are lane-dense (pad columns of zero-padded w/b come out exactly 0
    for gelu/relu/none); padded rows (M) are trimmed before returning."""
    m, k = x.shape
    k2, n = w.shape
    assert k == k2 and b.shape == (n,)
    n_pad = _round_up(n, LANE)
    if n_pad != n:
        w = jnp.pad(w, ((0, 0), (0, n_pad - n)))
        b = jnp.pad(b, (0, n_pad - n))
    m_pad, tm = _choose_m_tiling(m)
    if m_pad != m:
        x = jnp.pad(x, ((0, m_pad - m), (0, 0)))
    kern = functools.partial(_matmul_bias_act_kernel, activation=activation)
    y = pl.pallas_call(
        kern,
        grid=(m_pad // tm,),
        in_specs=[
            pl.BlockSpec((tm, k), lambda i: (i, 0)),
            pl.BlockSpec((k, n_pad), lambda i: (0, 0)),
            pl.BlockSpec((1, n_pad), lambda i: (0, 0)),
        ],
        out_specs=pl.BlockSpec((tm, n_pad), lambda i: (i, 0)),
        out_shape=jax.ShapeDtypeStruct((m_pad, n_pad), out_dtype),
        compiler_params=pltpu.CompilerParams(
            dimension_semantics=("parallel",), vmem_limit_bytes=_VMEM_LIMIT),
    )(x.astype(jnp.bfloat16), w.astype(jnp.bfloat16),
      b.reshape(1, n_pad).astype(jnp.float32))
    return y[:m] if m_pad != m else y


def decode_and_heads(f0_tok, u1, u2, u3, wp, bp, w1, b1, w2, b2):
    """Fused decoder tail over tokens.

    f0_tok:(M, C0_pad) scale-0 backbone feature tokens; u1/u2/u3:(M, DEC_PAD)
    already-projected+upsampled scale-1..3 features.  Returns (M, 128) f32 where
    columns [0:21] are semseg logits and [21:22] is depth."""
    m, c0 = f0_tok.shape
    cdec = wp.shape[1]
    hdim = w1.shape[1]
    n_pad = w2.shape[1]
    m_pad, tm = _choose_m_tiling(m)

    def _pad_rows(a):
        return jnp.pad(a, ((0, m_pad - a.shape[0]), (0, 0))) if m_pad != m else a

    f0_tok, u1, u2, u3 = map(_pad_rows, (f0_tok, u1, u2, u3))
    y = pl.pallas_call(
        _decode_head_kernel,
        grid=(m_pad // tm,),
        in_specs=[
            pl.BlockSpec((tm, c0), lambda i: (i, 0)),
            pl.BlockSpec((tm, cdec), lambda i: (i, 0)),
            pl.BlockSpec((tm, cdec), lambda i: (i, 0)),
            pl.BlockSpec((tm, cdec), lambda i: (i, 0)),
            pl.BlockSpec((c0, cdec), lambda i: (0, 0)),
            pl.BlockSpec((1, cdec), lambda i: (0, 0)),
            pl.BlockSpec((cdec, hdim), lambda i: (0, 0)),
            pl.BlockSpec((1, hdim), lambda i: (0, 0)),
            pl.BlockSpec((hdim, n_pad), lambda i: (0, 0)),
            pl.BlockSpec((1, n_pad), lambda i: (0, 0)),
        ],
        out_specs=pl.BlockSpec((tm, n_pad), lambda i: (i, 0)),
        out_shape=jax.ShapeDtypeStruct((m_pad, n_pad), jnp.float32),
        compiler_params=pltpu.CompilerParams(
            dimension_semantics=("parallel",), vmem_limit_bytes=_VMEM_LIMIT),
    )(f0_tok.astype(jnp.bfloat16), u1.astype(jnp.bfloat16),
      u2.astype(jnp.bfloat16), u3.astype(jnp.bfloat16),
      wp.astype(jnp.bfloat16), bp.reshape(1, cdec).astype(jnp.float32),
      w1.astype(jnp.bfloat16), b1.reshape(1, hdim).astype(jnp.float32),
      w2.astype(jnp.bfloat16), b2.reshape(1, n_pad).astype(jnp.float32))
    return y[:m] if m_pad != m else y


def _interp_rows(r, x):
    """'ok,gkn->gon': interpolate axis 1 of x:(G,K,N) with matrix r:(O,K).
    N is a multiple of 128 -> lane-dense in/out; the contraction is over the small
    spatial axis, not the lane axis."""
    g, k, n = x.shape
    o = r.shape[0]
    tg = _pick_group_tile(g)
    return pl.pallas_call(
        _interp_kernel,
        grid=(g // tg,),
        in_specs=[
            pl.BlockSpec((o, k), lambda i: (0, 0)),
            pl.BlockSpec((tg, k, n), lambda i: (i, 0, 0)),
        ],
        out_specs=pl.BlockSpec((tg, o, n), lambda i: (i, 0, 0)),
        out_shape=jax.ShapeDtypeStruct((g, o, n), x.dtype),
        compiler_params=pltpu.CompilerParams(
            dimension_semantics=("parallel",), vmem_limit_bytes=_VMEM_LIMIT),
    )(r.astype(x.dtype), x)


# ----------------------------------------------------------------------------- #
# Conv / interpolation wrappers (glue is jitted JAX, compute is Pallas)
# ----------------------------------------------------------------------------- #
def conv_patchify(x_nhwc, w, b, patch, activation="gelu", out_dtype=jnp.bfloat16):
    """Conv2d with kernel_size == stride == patch (patch embed / merge).
    Weight rows are ordered (kh, kw, cin_padded)."""
    # TODO(synk): im2col is a jitted HBM reshape/transpose (on bf16 data) feeding the
    # matmul kernel; a BlockSpec-driven in-kernel patchification would avoid this pass.
    bsz, h, wd, c = x_nhwc.shape
    ho, wo = h // patch, wd // patch
    xp = x_nhwc.astype(jnp.bfloat16)
    xp = xp.reshape(bsz, ho, patch, wo, patch, c).transpose(0, 1, 3, 2, 4, 5)
    xp = xp.reshape(bsz * ho * wo, patch * patch * c)
    y = matmul_bias_act(xp, w, b, activation, out_dtype=out_dtype)
    return y.reshape(bsz, ho, wo, -1)


def conv1x1(x_nhwc, w, b, activation="none", out_dtype=jnp.bfloat16):
    bsz, h, wd, c = x_nhwc.shape
    y = matmul_bias_act(x_nhwc.reshape(bsz * h * wd, c), w, b, activation,
                        out_dtype=out_dtype)
    return y.reshape(bsz, h, wd, -1)


@functools.lru_cache(maxsize=None)
def _bilinear_matrix(in_size, out_size):
    """(out_size, in_size) interpolation matrix matching
    F.interpolate(mode='bilinear', align_corners=False); built with numpy at trace
    time so it constant-folds under jit."""
    scale = in_size / out_size
    i = np.arange(out_size, dtype=np.float64)
    src = np.maximum((i + 0.5) * scale - 0.5, 0.0)
    i0 = np.clip(np.floor(src).astype(np.int64), 0, in_size - 1)
    i1 = np.minimum(i0 + 1, in_size - 1)
    l1 = src - i0
    l0 = 1.0 - l1
    m = np.zeros((out_size, in_size), np.float64)
    np.add.at(m, (np.arange(out_size), i0), l0)
    np.add.at(m, (np.arange(out_size), i1), l1)
    return jnp.asarray(m, dtype=jnp.float32)


def bilinear_resize_nhwc(x, out_h, out_w):
    """F.interpolate(..., mode='bilinear', align_corners=False) on NHWC input whose
    channel count is a multiple of 128.  Two separable passes; the reshapes only
    merge/split leading dims or the lane-aligned (w, c) pair, so no HBM transposes."""
    # TODO(synk): fusing the H and W passes into one pallas_call would save the
    # intermediate HBM slab, but needs an in-kernel (OH,W,C) relayout; kept separable.
    b, h, w, c = x.shape
    if h != out_h:
        if h == 1:                                    # bilinear from a single row = copy
            x = jnp.broadcast_to(x, (b, out_h, w, c))
        else:
            ry = _bilinear_matrix(h, out_h)
            y = _interp_rows(ry, x.reshape(b, h, w * c))
            x = y.reshape(b, out_h, w, c)
    if w != out_w:
        if w == 1:
            x = jnp.broadcast_to(x, (b, out_h, out_w, c))
        else:
            rx = _bilinear_matrix(w, out_w)
            y = _interp_rows(rx, x.reshape(b * out_h, w, c))
            x = y.reshape(b, out_h, out_w, c)
    return x


# ----------------------------------------------------------------------------- #
# Model definition (parameters created deterministically in-script)
# ----------------------------------------------------------------------------- #
TASKS = ("semseg", "depth")
HEAD_CHANNELS = {"semseg": 21, "depth": 1}
CHANNELS = [96, 192, 384, 768]                 # swin_s channel plan (real)
CHANNELS_PAD = [_pad128(c) for c in CHANNELS]  # [128, 256, 384, 768]
DECODER_DIM = 96
DEC_PAD = _pad128(DECODER_DIM)                 # 128


class _ParamBank:
    def __init__(self, seed=0):
        self._key = jax.random.PRNGKey(seed)
        self._i = 0

    def _next(self):
        k = jax.random.fold_in(self._key, self._i)
        self._i += 1
        return k

    def dense(self, k_in, k_out, k_in_pad=None, k_out_pad=None):
        """Random (k_in, k_out) weight/bias, zero-padded to (k_in_pad, k_out_pad) so
        padded output channels stay exactly zero through bias/GELU."""
        k_in_pad = k_in_pad or k_in
        k_out_pad = k_out_pad or k_out
        w = jax.random.normal(self._next(), (k_in, k_out), jnp.float32)
        w = w / jnp.sqrt(float(k_in))
        b = 0.01 * jax.random.normal(self._next(), (k_out,), jnp.float32)
        w = jnp.pad(w, ((0, k_in_pad - k_in), (0, k_out_pad - k_out)))
        b = jnp.pad(b, (0, k_out_pad - k_out))
        return w, b

    def patch_conv(self, patch, cin, cin_pad, cout, cout_pad):
        """Patchify conv weight with rows ordered (kh, kw, cin_pad)."""
        w = jax.random.normal(self._next(), (patch, patch, cin, cout), jnp.float32)
        w = w / jnp.sqrt(float(patch * patch * cin))
        b = 0.01 * jax.random.normal(self._next(), (cout,), jnp.float32)
        w = jnp.pad(w, ((0, 0), (0, 0), (0, cin_pad - cin), (0, cout_pad - cout)))
        b = jnp.pad(b, (0, cout_pad - cout))
        return w.reshape(patch * patch * cin_pad, cout_pad), b


def init_params(seed=0):
    bank = _ParamBank(seed)
    p = {}
    # backbone stand-in: patch embed (4x4, 3->96) + three 2x2 patch merges
    p["stage0"] = bank.patch_conv(4, 3, 3, CHANNELS[0], CHANNELS_PAD[0])
    p["stage1"] = bank.patch_conv(2, CHANNELS[0], CHANNELS_PAD[0], CHANNELS[1], CHANNELS_PAD[1])
    p["stage2"] = bank.patch_conv(2, CHANNELS[1], CHANNELS_PAD[1], CHANNELS[2], CHANNELS_PAD[2])
    p["stage3"] = bank.patch_conv(2, CHANNELS[2], CHANNELS_PAD[2], CHANNELS[3], CHANNELS_PAD[3])
    # decoder stand-in: per-scale 1x1 projection to DECODER_DIM (padded to 128 lanes)
    for i in range(4):
        p[f"proj{i}"] = bank.dense(CHANNELS[i], DECODER_DIM, CHANNELS_PAD[i], DEC_PAD)
    # fused task+head parameters: w1 stacks the per-task 96->96 convs, w2 is the
    # block-diagonal stack of the per-task heads (output padded to 128 lanes).
    hdim = len(TASKS) * DECODER_DIM
    n_out_pad = _pad128(sum(HEAD_CHANNELS[t] for t in TASKS))
    w1 = jnp.zeros((DEC_PAD, hdim), jnp.float32)
    b1 = jnp.zeros((hdim,), jnp.float32)
    w2 = jnp.zeros((hdim, n_out_pad), jnp.float32)
    b2 = jnp.zeros((n_out_pad,), jnp.float32)
    row, col = 0, 0
    for t in TASKS:
        wt, bt = bank.dense(DECODER_DIM, DECODER_DIM)            # task feature conv
        wh, bh = bank.dense(DECODER_DIM, HEAD_CHANNELS[t])       # task head conv
        c_t = HEAD_CHANNELS[t]
        w1 = w1.at[:DECODER_DIM, row:row + DECODER_DIM].set(wt)
        b1 = b1.at[row:row + DECODER_DIM].set(bt)
        w2 = w2.at[row:row + DECODER_DIM, col:col + c_t].set(wh)
        b2 = b2.at[col:col + c_t].set(bh)
        row += DECODER_DIM
        col += c_t
    p["task_head_w1"], p["task_head_b1"] = w1, b1
    p["task_head_w2"], p["task_head_b2"] = w2, b2
    return p


def transformer_net_forward(params, x_nchw):
    img_h, img_w = x_nchw.shape[-2], x_nchw.shape[-1]
    x = jnp.transpose(x_nchw, (0, 2, 3, 1)).astype(jnp.bfloat16)   # NCHW -> NHWC, bf16

    # ---- backbone stand-in: 4 feature scales (/4, /8, /16, /32), bf16, padded C ----
    f0 = conv_patchify(x, *params["stage0"], patch=4)
    f1 = conv_patchify(f0, *params["stage1"], patch=2)
    f2 = conv_patchify(f1, *params["stage2"], patch=2)
    f3 = conv_patchify(f2, *params["stage3"], patch=2)

    # ---- decoder stand-in: scales 1-3 projected (1x1 + GELU) then upsampled to /4 ----
    bsz, th, tw, c0 = f0.shape
    ups = []
    for i, f in enumerate((f1, f2, f3), start=1):
        pr = conv1x1(f, *params[f"proj{i}"], activation="gelu")
        if (pr.shape[1], pr.shape[2]) != (th, tw):
            pr = bilinear_resize_nhwc(pr, th, tw)
        ups.append(pr.reshape(bsz * th * tw, -1))

    # ---- fused decoder tail: proj0 + multi-scale sum + both task/head chains ----
    wp0, bp0 = params["proj0"]
    pred = decode_and_heads(f0.reshape(bsz * th * tw, c0), ups[0], ups[1], ups[2],
                            wp0, bp0,
                            params["task_head_w1"], params["task_head_b1"],
                            params["task_head_w2"], params["task_head_b2"])
    pred = pred.reshape(bsz, th, tw, -1)   # (B, H/4, W/4, 128); cols 22.. are zero pad

    # ---- final bilinear upsample to img_size (f32), then split per task -> NCHW ----
    up = bilinear_resize_nhwc(pred, img_h, img_w)
    out = {}
    off = 0
    for t in TASKS:
        c_t = HEAD_CHANNELS[t]
        out[t] = jnp.transpose(up[..., off:off + c_t], (0, 3, 1, 2)).astype(jnp.float32)
        off += c_t
    return out


# ----------------------------------------------------------------------------- #
if __name__ == "__main__":
    key = jax.random.PRNGKey(0)
    x = jax.random.normal(key, (2, 3, 32, 32), dtype=jnp.float32)   # NCHW input
    params = init_params(seed=0)

    fwd = jax.jit(transformer_net_forward)
    out = jax.block_until_ready(fwd(params, x))

    assert out["semseg"].shape == (2, HEAD_CHANNELS["semseg"], 32, 32)
    assert out["depth"].shape == (2, HEAD_CHANNELS["depth"], 32, 32)
    assert all(bool(jnp.all(jnp.isfinite(v))) for v in out.values())
    print("KERNEL_OK")
</pallas_src>

<mosaic_0001>
module attributes {stable_mosaic.version = 11 : i64} {
  func.func @_matmul_bias_act_kernel(%arg0: i32, %arg1: memref<64x48xbf16, #tpu.memory_space<vmem>>, %arg2: memref<48x128xbf16, #tpu.memory_space<vmem>>, %arg3: memref<1x128xf32, #tpu.memory_space<vmem>>, %arg4: memref<64x128xbf16, #tpu.memory_space<vmem>>) attributes {dimension_semantics = [#tpu.dimension_semantics<parallel>], iteration_bounds = array<i64: 2>, scalar_prefetch = 0 : i64, scratch_operands = 0 : i64, tpu.core_type = #tpu.core_type<tc>, window_params = [{transform_indices = @transform_0, window_bounds = array<i64: 64, 48>}, {pipeline_mode = #tpu.pipeline_mode<synchronous>, transform_indices = @transform_1, window_bounds = array<i64: 48, 128>}, {pipeline_mode = #tpu.pipeline_mode<synchronous>, transform_indices = @transform_2, window_bounds = array<i64: 1, 128>}, {transform_indices = @transform_3, window_bounds = array<i64: 64, 128>}]} {
    %c0 = arith.constant 0 : index
    %c0_0 = arith.constant 0 : index
    %0 = vector.load %arg1[%c0, %c0_0] : memref<64x48xbf16, #tpu.memory_space<vmem>>, vector<64x48xbf16>
    %c0_1 = arith.constant 0 : index
    %c0_2 = arith.constant 0 : index
    %1 = vector.load %arg2[%c0_1, %c0_2] : memref<48x128xbf16, #tpu.memory_space<vmem>>, vector<48x128xbf16>
    %cst = arith.constant dense<0.000000e+00> : vector<64x128xf32>
    %2 = tpu.matmul %0, %1, %cst {dimension_numbers = #tpu.dot_dimension_numbers<[1], [0], [0], [1], [0, 0, 1, 1], [], []>} : vector<64x48xbf16>, vector<48x128xbf16>, vector<64x128xf32> -> vector<64x128xf32>
    %c0_3 = arith.constant 0 : index
    %c0_4 = arith.constant 0 : index
    %3 = vector.load %arg3[%c0_3, %c0_4] : memref<1x128xf32, #tpu.memory_space<vmem>>, vector<1x128xf32>
    %4 = vector.broadcast %3 : vector<1x128xf32> to vector<64x128xf32>
    %5 = arith.addf %2, %4 : vector<64x128xf32>
    %6 = arith.mulf %5, %5 : vector<64x128xf32>
    %7 = arith.mulf %5, %6 : vector<64x128xf32>
    %cst_5 = arith.constant 4.471500e-02 : f32
    %8 = vector.broadcast %cst_5 : f32 to vector<64x128xf32>
    %9 = arith.mulf %8, %7 : vector<64x128xf32>
    %10 = arith.addf %5, %9 : vector<64x128xf32>
    %cst_6 = arith.constant 0.797884583 : f32
    %11 = vector.broadcast %cst_6 : f32 to vector<64x128xf32>
    %12 = arith.mulf %11, %10 : vector<64x128xf32>
    %13 = math.tanh %12 : vector<64x128xf32>
    %cst_7 = arith.constant 1.000000e+00 : f32
    %14 = vector.broadcast %cst_7 : f32 to vector<64x128xf32>
    %15 = arith.addf %14, %13 : vector<64x128xf32>
    %cst_8 = arith.constant 5.000000e-01 : f32
    %16 = vector.broadcast %cst_8 : f32 to vector<64x128xf32>
    %17 = arith.mulf %16, %15 : vector<64x128xf32>
    %18 = arith.mulf %5, %17 : vector<64x128xf32>
    %19 = arith.truncf %18 : vector<64x128xf32> to vector<64x128xbf16>
    %c0_9 = arith.constant 0 : index
    %c0_10 = arith.constant 0 : index
    %20 = vector.load %arg4[%c0_9, %c0_10] : memref<64x128xbf16, #tpu.memory_space<vmem>>, vector<64x128xbf16>
    tpu.vector_store %arg4[%c0_9, %c0_10], %19 {strides = array<i32>} : memref<64x128xbf16, #tpu.memory_space<vmem>>, vector<64x128xbf16>,
    return
  }
  func.func @transform_0(%arg0: i32) -> (i32, i32) {
    %c0_i32 = arith.constant 0 : i32
    %c0_i32_0 = arith.constant 0 : i32
    return %arg0, %c0_i32 : i32, i32
  }
  func.func @transform_1(%arg0: i32) -> (i32, i32) {
    %c0_i32 = arith.constant 0 : i32
    %c0_i32_0 = arith.constant 0 : i32
    %c0_i32_1 = arith.constant 0 : i32
    return %c0_i32, %c0_i32_0 : i32, i32
  }
  func.func @transform_2(%arg0: i32) -> (i32, i32) {
    %c0_i32 = arith.constant 0 : i32
    %c0_i32_0 = arith.constant 0 : i32
    %c0_i32_1 = arith.constant 0 : i32
    return %c0_i32, %c0_i32_0 : i32, i32
  }
  func.func @transform_3(%arg0: i32) -> (i32, i32) {
    %c0_i32 = arith.constant 0 : i32
    %c0_i32_0 = arith.constant 0 : i32
    return %arg0, %c0_i32 : i32, i32
  }
}

module attributes {stable_mosaic.version = 11 : i64} {
  func.func @_matmul_bias_act_kernel(%arg0: i32, %arg1: memref<16x512xbf16, #tpu.memory_space<vmem>>, %arg2: memref<512x256xbf16, #tpu.memory_space<vmem>>, %arg3: memref<1x256xf32, #tpu.memory_space<vmem>>, %arg4: memref<16x256xbf16, #tpu.memory_space<vmem>>) attributes {dimension_semantics = [#tpu.dimension_semantics<parallel>], iteration_bounds = array<i64: 2>, scalar_prefetch = 0 : i64, scratch_operands = 0 : i64, tpu.core_type = #tpu.core_type<tc>, window_params = [{transform_indices = @transform_0, window_bounds = array<i64: 16, 512>}, {pipeline_mode = #tpu.pipeline_mode<synchronous>, transform_indices = @transform_1, window_bounds = array<i64: 512, 256>}, {pipeline_mode = #tpu.pipeline_mode<synchronous>, transform_indices = @transform_2, window_bounds = array<i64: 1, 256>}, {transform_indices = @transform_3, window_bounds = array<i64: 16, 256>}]} {
    %c0 = arith.constant 0 : index
    %c0_0 = arith.constant 0 : index
    %0 = vector.load %arg1[%c0, %c0_0] : memref<16x512xbf16, #tpu.memory_space<vmem>>, vector<16x512xbf16>
    %c0_1 = arith.constant 0 : index
    %c0_2 = arith.constant 0 : index
    %1 = vector.load %arg2[%c0_1, %c0_2] : memref<512x256xbf16, #tpu.memory_space<vmem>>, vector<512x256xbf16>
    %cst = arith.constant dense<0.000000e+00> : vector<16x256xf32>
    %2 = tpu.matmul %0, %1, %cst {dimension_numbers = #tpu.dot_dimension_numbers<[1], [0], [0], [1], [0, 0, 1, 1], [], []>} : vector<16x512xbf16>, vector<512x256xbf16>, vector<16x256xf32> -> vector<16x256xf32>
    %c0_3 = arith.constant 0 : index
    %c0_4 = arith.constant 0 : index
    %3 = vector.load %arg3[%c0_3, %c0_4] : memref<1x256xf32, #tpu.memory_space<vmem>>, vector<1x256xf32>
    %4 = vector.broadcast %3 : vector<1x256xf32> to vector<16x256xf32>
    %5 = arith.addf %2, %4 : vector<16x256xf32>
    %6 = arith.mulf %5, %5 : vector<16x256xf32>
    %7 = arith.mulf %5, %6 : vector<16x256xf32>
    %cst_5 = arith.constant 4.471500e-02 : f32
    %8 = vector.broadcast %cst_5 : f32 to vector<16x256xf32>
    %9 = arith.mulf %8, %7 : vector<16x256xf32>
    %10 = arith.addf %5, %9 : vector<16x256xf32>
    %cst_6 = arith.constant 0.797884583 : f32
    %11 = vector.broadcast %cst_6 : f32 to vector<16x256xf32>
    %12 = arith.mulf %11, %10 : vector<16x256xf32>
    %13 = math.tanh %12 : vector<16x256xf32>
    %cst_7 = arith.constant 1.000000e+00 : f32
    %14 = vector.broadcast %cst_7 : f32 to vector<16x256xf32>
    %15 = arith.addf %14, %13 : vector<16x256xf32>
    %cst_8 = arith.constant 5.000000e-01 : f32
    %16 = vector.broadcast %cst_8 : f32 to vector<16x256xf32>
    %17 = arith.mulf %16, %15 : vector<16x256xf32>
    %18 = arith.mulf %5, %17 : vector<16x256xf32>
    %19 = arith.truncf %18 : vector<16x256xf32> to vector<16x256xbf16>
    %c0_9 = arith.constant 0 : index
    %c0_10 = arith.constant 0 : index
    %20 = vector.load %arg4[%c0_9, %c0_10] : memref<16x256xbf16, #tpu.memory_space<vmem>>, vector<16x256xbf16>
    tpu.vector_store %arg4[%c0_9, %c0_10], %19 {strides = array<i32>} : memref<16x256xbf16, #tpu.memory_space<vmem>>, vector<16x256xbf16>,
    return
  }
  func.func @transform_0(%arg0: i32) -> (i32, i32) {
    %c0_i32 = arith.constant 0 : i32
    %c0_i32_0 = arith.constant 0 : i32
    return %arg0, %c0_i32 : i32, i32
  }
  func.func @transform_1(%arg0: i32) -> (i32, i32) {
    %c0_i32 = arith.constant 0 : i32
    %c0_i32_0 = arith.constant 0 : i32
    %c0_i32_1 = arith.constant 0 : i32
    return %c0_i32, %c0_i32_0 : i32, i32
  }
  func.func @transform_2(%arg0: i32) -> (i32, i32) {
    %c0_i32 = arith.constant 0 : i32
    %c0_i32_0 = arith.constant 0 : i32
    %c0_i32_1 = arith.constant 0 : i32
    return %c0_i32, %c0_i32_0 : i32, i32
  }
  func.func @transform_3(%arg0: i32) -> (i32, i32) {
    %c0_i32 = arith.constant 0 : i32
    %c0_i32_0 = arith.constant 0 : i32
    return %arg0, %c0_i32 : i32, i32
  }
}

module attributes {stable_mosaic.version = 11 : i64} {
  func.func @_matmul_bias_act_kernel(%arg0: i32, %arg1: memref<8x1024xbf16, #tpu.memory_space<vmem>>, %arg2: memref<1024x384xbf16, #tpu.memory_space<vmem>>, %arg3: memref<1x384xf32, #tpu.memory_space<vmem>>, %arg4: memref<8x384xbf16, #tpu.memory_space<vmem>>) attributes {dimension_semantics = [#tpu.dimension_semantics<parallel>], iteration_bounds = array<i64: 2>, scalar_prefetch = 0 : i64, scratch_operands = 0 : i64, tpu.core_type = #tpu.core_type<tc>, window_params = [{transform_indices = @transform_0, window_bounds = array<i64: 8, 1024>}, {pipeline_mode = #tpu.pipeline_mode<synchronous>, transform_indices = @transform_1, window_bounds = array<i64: 1024, 384>}, {pipeline_mode = #tpu.pipeline_mode<synchronous>, transform_indices = @transform_2, window_bounds = array<i64: 1, 384>}, {transform_indices = @transform_3, window_bounds = array<i64: 8, 384>}]} {
    %c0 = arith.constant 0 : index
    %c0_0 = arith.constant 0 : index
    %0 = vector.load %arg1[%c0, %c0_0] : memref<8x1024xbf16, #tpu.memory_space<vmem>>, vector<8x1024xbf16>
    %c0_1 = arith.constant 0 : index
    %c0_2 = arith.constant 0 : index
    %1 = vector.load %arg2[%c0_1, %c0_2] : memref<1024x384xbf16, #tpu.memory_space<vmem>>, vector<1024x384xbf16>
    %cst = arith.constant dense<0.000000e+00> : vector<8x384xf32>
    %2 = tpu.matmul %0, %1, %cst {dimension_numbers = #tpu.dot_dimension_numbers<[1], [0], [0], [1], [0, 0, 1, 1], [], []>} : vector<8x1024xbf16>, vector<1024x384xbf16>, vector<8x384xf32> -> vector<8x384xf32>
    %c0_3 = arith.constant 0 : index
    %c0_4 = arith.constant 0 : index
    %3 = vector.load %arg3[%c0_3, %c0_4] : memref<1x384xf32, #tpu.memory_space<vmem>>, vector<1x384xf32>
    %4 = vector.broadcast %3 : vector<1x384xf32> to vector<8x384xf32>
    %5 = arith.addf %2, %4 : vector<8x384xf32>
    %6 = arith.mulf %5, %5 : vector<8x384xf32>
    %7 = arith.mulf %5, %6 : vector<8x384xf32>
    %cst_5 = arith.constant 4.471500e-02 : f32
    %8 = vector.broadcast %cst_5 : f32 to vector<8x384xf32>
    %9 = arith.mulf %8, %7 : vector<8x384xf32>
    %10 = arith.addf %5, %9 : vector<8x384xf32>
    %cst_6 = arith.constant 0.797884583 : f32
    %11 = vector.broadcast %cst_6 : f32 to vector<8x384xf32>
    %12 = arith.mulf %11, %10 : vector<8x384xf32>
    %13 = math.tanh %12 : vector<8x384xf32>
    %cst_7 = arith.constant 1.000000e+00 : f32
    %14 = vector.broadcast %cst_7 : f32 to vector<8x384xf32>
    %15 = arith.addf %14, %13 : vector<8x384xf32>
    %cst_8 = arith.constant 5.000000e-01 : f32
    %16 = vector.broadcast %cst_8 : f32 to vector<8x384xf32>
    %17 = arith.mulf %16, %15 : vector<8x384xf32>
    %18 = arith.mulf %5, %17 : vector<8x384xf32>
    %19 = arith.truncf %18 : vector<8x384xf32> to vector<8x384xbf16>
    %c0_9 = arith.constant 0 : index
    %c0_10 = arith.constant 0 : index
    %20 = vector.load %arg4[%c0_9, %c0_10] : memref<8x384xbf16, #tpu.memory_space<vmem>>, vector<8x384xbf16>
    tpu.vector_store %arg4[%c0_9, %c0_10], %19 {strides = array<i32>} : memref<8x384xbf16, #tpu.memory_space<vmem>>, vector<8x384xbf16>,
    return
  }
  func.func @transform_0(%arg0: i32) -> (i32, i32) {
    %c0_i32 = arith.constant 0 : i32
    %c0_i32_0 = arith.constant 0 : i32
    return %arg0, %c0_i32 : i32, i32
  }
  func.func @transform_1(%arg0: i32) -> (i32, i32) {
    %c0_i32 = arith.constant 0 : i32
    %c0_i32_0 = arith.constant 0 : i32
    %c0_i32_1 = arith.constant 0 : i32
    return %c0_i32, %c0_i32_0 : i32, i32
  }
  func.func @transform_2(%arg0: i32) -> (i32, i32) {
    %c0_i32 = arith.constant 0 : i32
    %c0_i32_0 = arith.constant 0 : i32
    %c0_i32_1 = arith.constant 0 : i32
    return %c0_i32, %c0_i32_0 : i32, i32
  }
  func.func @transform_3(%arg0: i32) -> (i32, i32) {
    %c0_i32 = arith.constant 0 : i32
    %c0_i32_0 = arith.constant 0 : i32
    return %arg0, %c0_i32 : i32, i32
  }
}

module attributes {stable_mosaic.version = 11 : i64} {
  func.func @_matmul_bias_act_kernel(%arg0: i32, %arg1: memref<8x1536xbf16, #tpu.memory_space<vmem>>, %arg2: memref<1536x768xbf16, #tpu.memory_space<vmem>>, %arg3: memref<1x768xf32, #tpu.memory_space<vmem>>, %arg4: memref<8x768xbf16, #tpu.memory_space<vmem>>) attributes {dimension_semantics = [#tpu.dimension_semantics<parallel>], iteration_bounds = array<i64: 2>, scalar_prefetch = 0 : i64, scratch_operands = 0 : i64, tpu.core_type = #tpu.core_type<tc>, window_params = [{transform_indices = @transform_0, window_bounds = array<i64: 8, 1536>}, {pipeline_mode = #tpu.pipeline_mode<synchronous>, transform_indices = @transform_1, window_bounds = array<i64: 1536, 768>}, {pipeline_mode = #tpu.pipeline_mode<synchronous>, transform_indices = @transform_2, window_bounds = array<i64: 1, 768>}, {transform_indices = @transform_3, window_bounds = array<i64: 8, 768>}]} {
    %c0 = arith.constant 0 : index
    %c0_0 = arith.constant 0 : index
    %0 = vector.load %arg1[%c0, %c0_0] : memref<8x1536xbf16, #tpu.memory_space<vmem>>, vector<8x1536xbf16>
    %c0_1 = arith.constant 0 : index
    %c0_2 = arith.constant 0 : index
    %1 = vector.load %arg2[%c0_1, %c0_2] : memref<1536x768xbf16, #tpu.memory_space<vmem>>, vector<1536x768xbf16>
    %cst = arith.constant dense<0.000000e+00> : vector<8x768xf32>
    %2 = tpu.matmul %0, %1, %cst {dimension_numbers = #tpu.dot_dimension_numbers<[1], [0], [0], [1], [0, 0, 1, 1], [], []>} : vector<8x1536xbf16>, vector<1536x768xbf16>, vector<8x768xf32> -> vector<8x768xf32>
    %c0_3 = arith.constant 0 : index
    %c0_4 = arith.constant 0 : index
    %3 = vector.load %arg3[%c0_3, %c0_4] : memref<1x768xf32, #tpu.memory_space<vmem>>, vector<1x768xf32>
    %4 = vector.broadcast %3 : vector<1x768xf32> to vector<8x768xf32>
    %5 = arith.addf %2, %4 : vector<8x768xf32>
    %6 = arith.mulf %5, %5 : vector<8x768xf32>
    %7 = arith.mulf %5, %6 : vector<8x768xf32>
    %cst_5 = arith.constant 4.471500e-02 : f32
    %8 = vector.broadcast %cst_5 : f32 to vector<8x768xf32>
    %9 = arith.mulf %8, %7 : vector<8x768xf32>
    %10 = arith.addf %5, %9 : vector<8x768xf32>
    %cst_6 = arith.constant 0.797884583 : f32
    %11 = vector.broadcast %cst_6 : f32 to vector<8x768xf32>
    %12 = arith.mulf %11, %10 : vector<8x768xf32>
    %13 = math.tanh %12 : vector<8x768xf32>
    %cst_7 = arith.constant 1.000000e+00 : f32
    %14 = vector.broadcast %cst_7 : f32 to vector<8x768xf32>
    %15 = arith.addf %14, %13 : vector<8x768xf32>
    %cst_8 = arith.constant 5.000000e-01 : f32
    %16 = vector.broadcast %cst_8 : f32 to vector<8x768xf32>
    %17 = arith.mulf %16, %15 : vector<8x768xf32>
    %18 = arith.mulf %5, %17 : vector<8x768xf32>
    %19 = arith.truncf %18 : vector<8x768xf32> to vector<8x768xbf16>
    %c0_9 = arith.constant 0 : index
    %c0_10 = arith.constant 0 : index
    %20 = vector.load %arg4[%c0_9, %c0_10] : memref<8x768xbf16, #tpu.memory_space<vmem>>, vector<8x768xbf16>
    tpu.vector_store %arg4[%c0_9, %c0_10], %19 {strides = array<i32>} : memref<8x768xbf16, #tpu.memory_space<vmem>>, vector<8x768xbf16>,
    return
  }
  func.func @transform_0(%arg0: i32) -> (i32, i32) {
    %c0_i32 = arith.constant 0 : i32
    %c0_i32_0 = arith.constant 0 : i32
    return %arg0, %c0_i32 : i32, i32
  }
  func.func @transform_1(%arg0: i32) -> (i32, i32) {
    %c0_i32 = arith.constant 0 : i32
    %c0_i32_0 = arith.constant 0 : i32
    %c0_i32_1 = arith.constant 0 : i32
    return %c0_i32, %c0_i32_0 : i32, i32
  }
  func.func @transform_2(%arg0: i32) -> (i32, i32) {
    %c0_i32 = arith.constant 0 : i32
    %c0_i32_0 = arith.constant 0 : i32
    %c0_i32_1 = arith.constant 0 : i32
    return %c0_i32, %c0_i32_0 : i32, i32
  }
  func.func @transform_3(%arg0: i32) -> (i32, i32) {
    %c0_i32 = arith.constant 0 : i32
    %c0_i32_0 = arith.constant 0 : i32
    return %arg0, %c0_i32 : i32, i32
  }
}

module attributes {stable_mosaic.version = 11 : i64} {
  func.func @_matmul_bias_act_kernel(%arg0: i32, %arg1: memref<8x768xbf16, #tpu.memory_space<vmem>>, %arg2: memref<768x128xbf16, #tpu.memory_space<vmem>>, %arg3: memref<1x128xf32, #tpu.memory_space<vmem>>, %arg4: memref<8x128xbf16, #tpu.memory_space<vmem>>) attributes {dimension_semantics = [#tpu.dimension_semantics<parallel>], iteration_bounds = array<i64: 2>, scalar_prefetch = 0 : i64, scratch_operands = 0 : i64, tpu.core_type = #tpu.core_type<tc>, window_params = [{transform_indices = @transform_0, window_bounds = array<i64: 8, 768>}, {pipeline_mode = #tpu.pipeline_mode<synchronous>, transform_indices = @transform_1, window_bounds = array<i64: 768, 128>}, {pipeline_mode = #tpu.pipeline_mode<synchronous>, transform_indices = @transform_2, window_bounds = array<i64: 1, 128>}, {transform_indices = @transform_3, window_bounds = array<i64: 8, 128>}]} {
    %c0 = arith.constant 0 : index
    %c0_0 = arith.constant 0 : index
    %0 = vector.load %arg1[%c0, %c0_0] : memref<8x768xbf16, #tpu.memory_space<vmem>>, vector<8x768xbf16>
    %c0_1 = arith.constant 0 : index
    %c0_2 = arith.constant 0 : index
    %1 = vector.load %arg2[%c0_1, %c0_2] : memref<768x128xbf16, #tpu.memory_space<vmem>>, vector<768x128xbf16>
    %cst = arith.constant dense<0.000000e+00> : vector<8x128xf32>
    %2 = tpu.matmul %0, %1, %cst {dimension_numbers = #tpu.dot_dimension_numbers<[1], [0], [0], [1], [0, 0, 1, 1], [], []>} : vector<8x768xbf16>, vector<768x128xbf16>, vector<8x128xf32> -> vector<8x128xf32>
    %c0_3 = arith.constant 0 : index
    %c0_4 = arith.constant 0 : index
    %3 = vector.load %arg3[%c0_3, %c0_4] : memref<1x128xf32, #tpu.memory_space<vmem>>, vector<1x128xf32>
    %4 = vector.broadcast %3 : vector<1x128xf32> to vector<8x128xf32>
    %5 = arith.addf %2, %4 : vector<8x128xf32>
    %6 = arith.mulf %5, %5 : vector<8x128xf32>
    %7 = arith.mulf %5, %6 : vector<8x128xf32>
    %cst_5 = arith.constant 4.471500e-02 : f32
    %8 = vector.broadcast %cst_5 : f32 to vector<8x128xf32>
    %9 = arith.mulf %8, %7 : vector<8x128xf32>
    %10 = arith.addf %5, %9 : vector<8x128xf32>
    %cst_6 = arith.constant 0.797884583 : f32
    %11 = vector.broadcast %cst_6 : f32 to vector<8x128xf32>
    %12 = arith.mulf %11, %10 : vector<8x128xf32>
    %13 = math.tanh %12 : vector<8x128xf32>
    %cst_7 = arith.constant 1.000000e+00 : f32
    %14 = vector.broadcast %cst_7 : f32 to vector<8x128xf32>
    %15 = arith.addf %14, %13 : vector<8x128xf32>
    %cst_8 = arith.constant 5.000000e-01 : f32
    %16 = vector.broadcast %cst_8 : f32 to vector<8x128xf32>
    %17 = arith.mulf %16, %15 : vector<8x128xf32>
    %18 = arith.mulf %5, %17 : vector<8x128xf32>
    %19 = arith.truncf %18 : vector<8x128xf32> to vector<8x128xbf16>
    %c0_9 = arith.constant 0 : index
    %c0_10 = arith.constant 0 : index
    %20 = vector.load %arg4[%c0_9, %c0_10] : memref<8x128xbf16, #tpu.memory_space<vmem>>, vector<8x128xbf16>
    tpu.vector_store %arg4[%c0_9, %c0_10], %19 {strides = array<i32>} : memref<8x128xbf16, #tpu.memory_space<vmem>>, vector<8x128xbf16>,
    return
  }
  func.func @transform_0(%arg0: i32) -> (i32, i32) {
    %c0_i32 = arith.constant 0 : i32
    %c0_i32_0 = arith.constant 0 : i32
    return %arg0, %c0_i32 : i32, i32
  }
  func.func @transform_1(%arg0: i32) -> (i32, i32) {
    %c0_i32 = arith.constant 0 : i32
    %c0_i32_0 = arith.constant 0 : i32
    %c0_i32_1 = arith.constant 0 : i32
    return %c0_i32, %c0_i32_0 : i32, i32
  }
  func.func @transform_2(%arg0: i32) -> (i32, i32) {
    %c0_i32 = arith.constant 0 : i32
    %c0_i32_0 = arith.constant 0 : i32
    %c0_i32_1 = arith.constant 0 : i32
    return %c0_i32, %c0_i32_0 : i32, i32
  }
  func.func @transform_3(%arg0: i32) -> (i32, i32) {
    %c0_i32 = arith.constant 0 : i32
    %c0_i32_0 = arith.constant 0 : i32
    return %arg0, %c0_i32 : i32, i32
  }
}

module attributes {stable_mosaic.version = 11 : i64} {
  func.func @_matmul_bias_act_kernel(%arg0: i32, %arg1: memref<8x384xbf16, #tpu.memory_space<vmem>>, %arg2: memref<384x128xbf16, #tpu.memory_space<vmem>>, %arg3: memref<1x128xf32, #tpu.memory_space<vmem>>, %arg4: memref<8x128xbf16, #tpu.memory_space<vmem>>) attributes {dimension_semantics = [#tpu.dimension_semantics<parallel>], iteration_bounds = array<i64: 2>, scalar_prefetch = 0 : i64, scratch_operands = 0 : i64, tpu.core_type = #tpu.core_type<tc>, window_params = [{transform_indices = @transform_0, window_bounds = array<i64: 8, 384>}, {pipeline_mode = #tpu.pipeline_mode<synchronous>, transform_indices = @transform_1, window_bounds = array<i64: 384, 128>}, {pipeline_mode = #tpu.pipeline_mode<synchronous>, transform_indices = @transform_2, window_bounds = array<i64: 1, 128>}, {transform_indices = @transform_3, window_bounds = array<i64: 8, 128>}]} {
    %c0 = arith.constant 0 : index
    %c0_0 = arith.constant 0 : index
    %0 = vector.load %arg1[%c0, %c0_0] : memref<8x384xbf16, #tpu.memory_space<vmem>>, vector<8x384xbf16>
    %c0_1 = arith.constant 0 : index
    %c0_2 = arith.constant 0 : index
    %1 = vector.load %arg2[%c0_1, %c0_2] : memref<384x128xbf16, #tpu.memory_space<vmem>>, vector<384x128xbf16>
    %cst = arith.constant dense<0.000000e+00> : vector<8x128xf32>
    %2 = tpu.matmul %0, %1, %cst {dimension_numbers = #tpu.dot_dimension_numbers<[1], [0], [0], [1], [0, 0, 1, 1], [], []>} : vector<8x384xbf16>, vector<384x128xbf16>, vector<8x128xf32> -> vector<8x128xf32>
    %c0_3 = arith.constant 0 : index
    %c0_4 = arith.constant 0 : index
    %3 = vector.load %arg3[%c0_3, %c0_4] : memref<1x128xf32, #tpu.memory_space<vmem>>, vector<1x128xf32>
    %4 = vector.broadcast %3 : vector<1x128xf32> to vector<8x128xf32>
    %5 = arith.addf %2, %4 : vector<8x128xf32>
    %6 = arith.mulf %5, %5 : vector<8x128xf32>
    %7 = arith.mulf %5, %6 : vector<8x128xf32>
    %cst_5 = arith.constant 4.471500e-02 : f32
    %8 = vector.broadcast %cst_5 : f32 to vector<8x128xf32>
    %9 = arith.mulf %8, %7 : vector<8x128xf32>
    %10 = arith.addf %5, %9 : vector<8x128xf32>
    %cst_6 = arith.constant 0.797884583 : f32
    %11 = vector.broadcast %cst_6 : f32 to vector<8x128xf32>
    %12 = arith.mulf %11, %10 : vector<8x128xf32>
    %13 = math.tanh %12 : vector<8x128xf32>
    %cst_7 = arith.constant 1.000000e+00 : f32
    %14 = vector.broadcast %cst_7 : f32 to vector<8x128xf32>
    %15 = arith.addf %14, %13 : vector<8x128xf32>
    %cst_8 = arith.constant 5.000000e-01 : f32
    %16 = vector.broadcast %cst_8 : f32 to vector<8x128xf32>
    %17 = arith.mulf %16, %15 : vector<8x128xf32>
    %18 = arith.mulf %5, %17 : vector<8x128xf32>
    %19 = arith.truncf %18 : vector<8x128xf32> to vector<8x128xbf16>
    %c0_9 = arith.constant 0 : index
    %c0_10 = arith.constant 0 : index
    %20 = vector.load %arg4[%c0_9, %c0_10] : memref<8x128xbf16, #tpu.memory_space<vmem>>, vector<8x128xbf16>
    tpu.vector_store %arg4[%c0_9, %c0_10], %19 {strides = array<i32>} : memref<8x128xbf16, #tpu.memory_space<vmem>>, vector<8x128xbf16>,
    return
  }
  func.func @transform_0(%arg0: i32) -> (i32, i32) {
    %c0_i32 = arith.constant 0 : i32
    %c0_i32_0 = arith.constant 0 : i32
    return %arg0, %c0_i32 : i32, i32
  }
  func.func @transform_1(%arg0: i32) -> (i32, i32) {
    %c0_i32 = arith.constant 0 : i32
    %c0_i32_0 = arith.constant 0 : i32
    %c0_i32_1 = arith.constant 0 : i32
    return %c0_i32, %c0_i32_0 : i32, i32
  }
  func.func @transform_2(%arg0: i32) -> (i32, i32) {
    %c0_i32 = arith.constant 0 : i32
    %c0_i32_0 = arith.constant 0 : i32
    %c0_i32_1 = arith.constant 0 : i32
    return %c0_i32, %c0_i32_0 : i32, i32
  }
  func.func @transform_3(%arg0: i32) -> (i32, i32) {
    %c0_i32 = arith.constant 0 : i32
    %c0_i32_0 = arith.constant 0 : i32
    return %arg0, %c0_i32 : i32, i32
  }
}

module attributes {stable_mosaic.version = 11 : i64} {
  func.func @_interp_kernel(%arg0: i32, %arg1: memref<8x2xbf16, #tpu.memory_space<vmem>>, %arg2: memref<1x2x256xbf16, #tpu.memory_space<vmem>>, %arg3: memref<1x8x256xbf16, #tpu.memory_space<vmem>>) attributes {dimension_semantics = [#tpu.dimension_semantics<parallel>], iteration_bounds = array<i64: 2>, scalar_prefetch = 0 : i64, scratch_operands = 0 : i64, tpu.core_type = #tpu.core_type<tc>, window_params = [{pipeline_mode = #tpu.pipeline_mode<synchronous>, transform_indices = @transform_0, window_bounds = array<i64: 8, 2>}, {transform_indices = @transform_1, window_bounds = array<i64: 1, 2, 256>}, {transform_indices = @transform_2, window_bounds = array<i64: 1, 8, 256>}]} {
    %c0 = arith.constant 0 : index
    %c0_0 = arith.constant 0 : index
    %0 = vector.load %arg1[%c0, %c0_0] : memref<8x2xbf16, #tpu.memory_space<vmem>>, vector<8x2xbf16>
    %c0_1 = arith.constant 0 : index
    %c0_2 = arith.constant 0 : index
    %c0_3 = arith.constant 0 : index
    %1 = vector.load %arg2[%c0_1, %c0_2, %c0_3] : memref<1x2x256xbf16, #tpu.memory_space<vmem>>, vector<1x2x256xbf16>
    %2 = vector.shape_cast %1 : vector<1x2x256xbf16> to vector<2x256xbf16>
    %cst = arith.constant dense<0.000000e+00> : vector<8x256xf32>
    %3 = tpu.matmul %0, %2, %cst {dimension_numbers = #tpu.dot_dimension_numbers<[1], [0], [0], [1], [0, 0, 1, 1], [], []>} : vector<8x2xbf16>, vector<2x256xbf16>, vector<8x256xf32> -> vector<8x256xf32>
    %4 = arith.truncf %3 : vector<8x256xf32> to vector<8x256xbf16>
    %c0_4 = arith.constant 0 : index
    %c0_5 = arith.constant 0 : index
    %c0_6 = arith.constant 0 : index
    %5 = vector.load %arg3[%c0_4, %c0_5, %c0_6] : memref<1x8x256xbf16, #tpu.memory_space<vmem>>, vector<1x8x256xbf16>
    %6 = vector.shape_cast %5 : vector<1x8x256xbf16> to vector<8x256xbf16>
    %7 = vector.shape_cast %4 : vector<8x256xbf16> to vector<1x8x256xbf16>
    tpu.vector_store %arg3[%c0_4, %c0_5, %c0_6], %7 {strides = array<i32>} : memref<1x8x256xbf16, #tpu.memory_space<vmem>>, vector<1x8x256xbf16>,
    return
  }
  func.func @transform_0(%arg0: i32) -> (i32, i32) {
    %c0_i32 = arith.constant 0 : i32
    %c0_i32_0 = arith.constant 0 : i32
    %c0_i32_1 = arith.constant 0 : i32
    return %c0_i32, %c0_i32_0 : i32, i32
  }
  func.func @transform_1(%arg0: i32) -> (i32, i32, i32) {
    %c0_i32 = arith.constant 0 : i32
    %c0_i32_0 = arith.constant 0 : i32
    %c0_i32_1 = arith.constant 0 : i32
    return %arg0, %c0_i32, %c0_i32_0 : i32, i32, i32
  }
  func.func @transform_2(%arg0: i32) -> (i32, i32, i32) {
    %c0_i32 = arith.constant 0 : i32
    %c0_i32_0 = arith.constant 0 : i32
    %c0_i32_1 = arith.constant 0 : i32
    return %arg0, %c0_i32, %c0_i32_0 : i32, i32, i32
  }
}

module attributes {stable_mosaic.version = 11 : i64} {
  func.func @_interp_kernel(%arg0: i32, %arg1: memref<8x2xbf16, #tpu.memory_space<vmem>>, %arg2: memref<8x2x128xbf16, #tpu.memory_space<vmem>>, %arg3: memref<8x8x128xbf16, #tpu.memory_space<vmem>>) attributes {dimension_semantics = [#tpu.dimension_semantics<parallel>], iteration_bounds = array<i64: 2>, scalar_prefetch = 0 : i64, scratch_operands = 0 : i64, tpu.core_type = #tpu.core_type<tc>, window_params = [{pipeline_mode = #tpu.pipeline_mode<synchronous>, transform_indices = @transform_0, window_bounds = array<i64: 8, 2>}, {transform_indices = @transform_1, window_bounds = array<i64: 8, 2, 128>}, {transform_indices = @transform_2, window_bounds = array<i64: 8, 8, 128>}]} {
    %c0 = arith.constant 0 : index
    %c0_0 = arith.constant 0 : index
    %0 = vector.load %arg1[%c0, %c0_0] : memref<8x2xbf16, #tpu.memory_space<vmem>>, vector<8x2xbf16>
    %c0_1 = arith.constant 0 : index
    %c0_2 = arith.constant 0 : index
    %c0_3 = arith.constant 0 : index
    %1 = vector.load %arg2[%c0_1, %c0_2, %c0_3] : memref<8x2x128xbf16, #tpu.memory_space<vmem>>, vector<1x2x128xbf16>
    %2 = vector.shape_cast %1 : vector<1x2x128xbf16> to vector<2x128xbf16>
    %cst = arith.constant dense<0.000000e+00> : vector<8x128xf32>
    %3 = tpu.matmul %0, %2, %cst {dimension_numbers = #tpu.dot_dimension_numbers<[1], [0], [0], [1], [0, 0, 1, 1], [], []>} : vector<8x2xbf16>, vector<2x128xbf16>, vector<8x128xf32> -> vector<8x128xf32>
    %4 = arith.truncf %3 : vector<8x128xf32> to vector<8x128xbf16>
    %c0_4 = arith.constant 0 : index
    %c0_5 = arith.constant 0 : index
    %c0_6 = arith.constant 0 : index
    %5 = vector.load %arg3[%c0_4, %c0_5, %c0_6] : memref<8x8x128xbf16, #tpu.memory_space<vmem>>, vector<1x8x128xbf16>
    %6 = vector.shape_cast %5 : vector<1x8x128xbf16> to vector<8x128xbf16>
    %7 = vector.shape_cast %4 : vector<8x128xbf16> to vector<1x8x128xbf16>
    tpu.vector_store %arg3[%c0_4, %c0_5, %c0_6], %7 {strides = array<i32>} : memref<8x8x128xbf16, #tpu.memory_space<vmem>>, vector<1x8x128xbf16>,
    %c1 = arith.constant 1 : index
    %c0_7 = arith.constant 0 : index
    %c0_8 = arith.constant 0 : index
    %8 = vector.load %arg2[%c1, %c0_7, %c0_8] : memref<8x2x128xbf16, #tpu.memory_space<vmem>>, vector<1x2x128xbf16>
    %9 = vector.shape_cast %8 : vector<1x2x128xbf16> to vector<2x128xbf16>
    %cst_9 = arith.constant dense<0.000000e+00> : vector<8x128xf32>
    %10 = tpu.matmul %0, %9, %cst_9 {dimension_numbers = #tpu.dot_dimension_numbers<[1], [0], [0], [1], [0, 0, 1, 1], [], []>} : vector<8x2xbf16>, vector<2x128xbf16>, vector<8x128xf32> -> vector<8x128xf32>
    %11 = arith.truncf %10 : vector<8x128xf32> to vector<8x128xbf16>
    %c1_10 = arith.constant 1 : index
    %c0_11 = arith.constant 0 : index
    %c0_12 = arith.constant 0 : index
    %12 = vector.load %arg3[%c1_10, %c0_11, %c0_12] : memref<8x8x128xbf16, #tpu.memory_space<vmem>>, vector<1x8x128xbf16>
    %13 = vector.shape_cast %12 : vector<1x8x128xbf16> to vector<8x128xbf16>
    %14 = vector.shape_cast %11 : vector<8x128xbf16> to vector<1x8x128xbf16>
    tpu.vector_store %arg3[%c1_10, %c0_11, %c0_12], %14 {strides = array<i32>} : memref<8x8x128xbf16, #tpu.memory_space<vmem>>, vector<1x8x128xbf16>,
    %c2 = arith.constant 2 : index
    %c0_13 = arith.constant 0 : index
    %c0_14 = arith.constant 0 : index
    %15 = vector.load %arg2[%c2, %c0_13, %c0_14] : memref<8x2x128xbf16, #tpu.memory_space<vmem>>, vector<1x2x128xbf16>
    %16 = vector.shape_cast %15 : vector<1x2x128xbf16> to vector<2x128xbf16>
    %cst_15 = arith.constant dense<0.000000e+00> : vector<8x128xf32>
    %17 = tpu.matmul %0, %16, %cst_15 {dimension_numbers = #tpu.dot_dimension_numbers<[1], [0], [0], [1], [0, 0, 1, 1], [], []>} : vector<8x2xbf16>, vector<2x128xbf16>, vector<8x128xf32> -> vector<8x128xf32>
    %18 = arith.truncf %17 : vector<8x128xf32> to vector<8x128xbf16>
    %c2_16 = arith.constant 2 : index
    %c0_17 = arith.constant 0 : index
    %c0_18 = arith.constant 0 : index
    %19 = vector.load %arg3[%c2_16, %c0_17, %c0_18] : memref<8x8x128xbf16, #tpu.memory_space<vmem>>, vector<1x8x128xbf16>
    %20 = vector.shape_cast %19 : vector<1x8x128xbf16> to vector<8x128xbf16>
    %21 = vector.shape_cast %18 : vector<8x128xbf16> to vector<1x8x128xbf16>
    tpu.vector_store %arg3[%c2_16, %c0_17, %c0_18], %21 {strides = array<i32>} : memref<8x8x128xbf16, #tpu.memory_space<vmem>>, vector<1x8x128xbf16>,
    %c3 = arith.constant 3 : index
    %c0_19 = arith.constant 0 : index
    %c0_20 = arith.constant 0 : index
    %22 = vector.load %arg2[%c3, %c0_19, %c0_20] : memref<8x2x128xbf16, #tpu.memory_space<vmem>>, vector<1x2x128xbf16>
    %23 = vector.shape_cast %22 : vector<1x2x128xbf16> to vector<2x128xbf16>
    %cst_21 = arith.constant dense<0.000000e+00> : vector<8x128xf32>
    %24 = tpu.matmul %0, %23, %cst_21 {dimension_numbers = #tpu.dot_dimension_numbers<[1], [0], [0], [1], [0, 0, 1, 1], [], []>} : vector<8x2xbf16>, vector<2x128xbf16>, vector<8x128xf32> -> vector<8x128xf32>
    %25 = arith.truncf %24 : vector<8x128xf32> to vector<8x128xbf16>
    %c3_22 = arith.constant 3 : index
    %c0_23 = arith.constant 0 : index
    %c0_24 = arith.constant 0 : index
    %26 = vector.load %arg3[%c3_22, %c0_23, %c0_24] : memref<8x8x128xbf16, #tpu.memory_space<vmem>>, vector<1x8x128xbf16>
    %27 = vector.shape_cast %26 : vector<1x8x128xbf16> to vector<8x128xbf16>
    %28 = vector.shape_cast %25 : vector<8x128xbf16> to vector<1x8x128xbf16>
    tpu.vector_store %arg3[%c3_22, %c0_23, %c0_24], %28 {strides = array<i32>} : memref<8x8x128xbf16, #tpu.memory_space<vmem>>, vector<1x8x128xbf16>,
    %c4 = arith.constant 4 : index
    %c0_25 = arith.constant 0 : index
    %c0_26 = arith.constant 0 : index
    %29 = vector.load %arg2[%c4, %c0_25, %c0_26] : memref<8x2x128xbf16, #tpu.memory_space<vmem>>, vector<1x2x128xbf16>
    %30 = vector.shape_cast %29 : vector<1x2x128xbf16> to vector<2x128xbf16>
    %cst_27 = arith.constant dense<0.000000e+00> : vector<8x128xf32>
    %31 = tpu.matmul %0, %30, %cst_27 {dimension_numbers = #tpu.dot_dimension_numbers<[1], [0], [0], [1], [0, 0, 1, 1], [], []>} : vector<8x2xbf16>, vector<2x128xbf16>, vector<8x128xf32> -> vector<8x128xf32>
    %32 = arith.truncf %31 : vector<8x128xf32> to vector<8x128xbf16>
    %c4_28 = arith.constant 4 : index
    %c0_29 = arith.constant 0 : index
    %c0_30 = arith.constant 0 : index
    %33 = vector.load %arg3[%c4_28, %c0_29, %c0_30] : memref<8x8x128xbf16, #tpu.memory_space<vmem>>, vector<1x8x128xbf16>
    %34 = vector.shape_cast %33 : vector<1x8x128xbf16> to vector<8x128xbf16>
    %35 = vector.shape_cast %32 : vector<8x128xbf16> to vector<1x8x128xbf16>
    tpu.vector_store %arg3[%c4_28, %c0_29, %c0_30], %35 {strides = array<i32>} : memref<8x8x128xbf16, #tpu.memory_space<vmem>>, vector<1x8x128xbf16>,
    %c5 = arith.constant 5 : index
    %c0_31 = arith.constant 0 : index
    %c0_32 = arith.constant 0 : index
    %36 = vector.load %arg2[%c5, %c0_31, %c0_32] : memref<8x2x128xbf16, #tpu.memory_space<vmem>>, vector<1x2x128xbf16>
    %37 = vector.shape_cast %36 : vector<1x2x128xbf16> to vector<2x128xbf16>
    %cst_33 = arith.constant dense<0.000000e+00> : vector<8x128xf32>
    %38 = tpu.matmul %0, %37, %cst_33 {dimension_numbers = #tpu.dot_dimension_numbers<[1], [0], [0], [1], [0, 0, 1, 1], [], []>} : vector<8x2xbf16>, vector<2x128xbf16>, vector<8x128xf32> -> vector<8x128xf32>
    %39 = arith.truncf %38 : vector<8x128xf32> to vector<8x128xbf16>
    %c5_34 = arith.constant 5 : index
    %c0_35 = arith.constant 0 : index
    %c0_36 = arith.constant 0 : index
    %40 = vector.load %arg3[%c5_34, %c0_35, %c0_36] : memref<8x8x128xbf16, #tpu.memory_space<vmem>>, vector<1x8x128xbf16>
    %41 = vector.shape_cast %40 : vector<1x8x128xbf16> to vector<8x128xbf16>
    %42 = vector.shape_cast %39 : vector<8x128xbf16> to vector<1x8x128xbf16>
    tpu.vector_store %arg3[%c5_34, %c0_35, %c0_36], %42 {strides = array<i32>} : memref<8x8x128xbf16, #tpu.memory_space<vmem>>, vector<1x8x128xbf16>,
    %c6 = arith.constant 6 : index
    %c0_37 = arith.constant 0 : index
    %c0_38 = arith.constant 0 : index
    %43 = vector.load %arg2[%c6, %c0_37, %c0_38] : memref<8x2x128xbf16, #tpu.memory_space<vmem>>, vector<1x2x128xbf16>
    %44 = vector.shape_cast %43 : vector<1x2x128xbf16> to vector<2x128xbf16>
    %cst_39 = arith.constant dense<0.000000e+00> : vector<8x128xf32>
    %45 = tpu.matmul %0, %44, %cst_39 {dimension_numbers = #tpu.dot_dimension_numbers<[1], [0], [0], [1], [0, 0, 1, 1], [], []>} : vector<8x2xbf16>, vector<2x128xbf16>, vector<8x128xf32> -> vector<8x128xf32>
    %46 = arith.truncf %45 : vector<8x128xf32> to vector<8x128xbf16>
    %c6_40 = arith.constant 6 : index
    %c0_41 = arith.constant 0 : index
    %c0_42 = arith.constant 0 : index
    %47 = vector.load %arg3[%c6_40, %c0_41, %c0_42] : memref<8x8x128xbf16, #tpu.memory_space<vmem>>, vector<1x8x128xbf16>
    %48 = vector.shape_cast %47 : vector<1x8x128xbf16> to vector<8x128xbf16>
    %49 = vector.shape_cast %46 : vector<8x128xbf16> to vector<1x8x128xbf16>
    tpu.vector_store %arg3[%c6_40, %c0_41, %c0_42], %49 {strides = array<i32>} : memref<8x8x128xbf16, #tpu.memory_space<vmem>>, vector<1x8x128xbf16>,
    %c7 = arith.constant 7 : index
    %c0_43 = arith.constant 0 : index
    %c0_44 = arith.constant 0 : index
    %50 = vector.load %arg2[%c7, %c0_43, %c0_44] : memref<8x2x128xbf16, #tpu.memory_space<vmem>>, vector<1x2x128xbf16>
    %51 = vector.shape_cast %50 : vector<1x2x128xbf16> to vector<2x128xbf16>
    %cst_45 = arith.constant dense<0.000000e+00> : vector<8x128xf32>
    %52 = tpu.matmul %0, %51, %cst_45 {dimension_numbers = #tpu.dot_dimension_numbers<[1], [0], [0], [1], [0, 0, 1, 1], [], []>} : vector<8x2xbf16>, vector<2x128xbf16>, vector<8x128xf32> -> vector<8x128xf32>
    %53 = arith.truncf %52 : vector<8x128xf32> to vector<8x128xbf16>
    %c7_46 = arith.constant 7 : index
    %c0_47 = arith.constant 0 : index
    %c0_48 = arith.constant 0 : index
    %54 = vector.load %arg3[%c7_46, %c0_47, %c0_48] : memref<8x8x128xbf16, #tpu.memory_space<vmem>>, vector<1x8x128xbf16>
    %55 = vector.shape_cast %54 : vector<1x8x128xbf16> to vector<8x128xbf16>
    %56 = vector.shape_cast %53 : vector<8x128xbf16> to vector<1x8x128xbf16>
    tpu.vector_store %arg3[%c7_46, %c0_47, %c0_48], %56 {strides = array<i32>} : memref<8x8x128xbf16, #tpu.memory_space<vmem>>, vector<1x8x128xbf16>,
    return
  }
  func.func @transform_0(%arg0: i32) -> (i32, i32) {
    %c0_i32 = arith.constant 0 : i32
    %c0_i32_0 = arith.constant 0 : i32
    %c0_i32_1 = arith.constant 0 : i32
    return %c0_i32, %c0_i32_0 : i32, i32
  }
  func.func @transform_1(%arg0: i32) -> (i32, i32, i32) {
    %c0_i32 = arith.constant 0 : i32
    %c0_i32_0 = arith.constant 0 : i32
    %c0_i32_1 = arith.constant 0 : i32
    return %arg0, %c0_i32, %c0_i32_0 : i32, i32, i32
  }
  func.func @transform_2(%arg0: i32) -> (i32, i32, i32) {
    %c0_i32 = arith.constant 0 : i32
    %c0_i32_0 = arith.constant 0 : i32
    %c0_i32_1 = arith.constant 0 : i32
    return %arg0, %c0_i32, %c0_i32_0 : i32, i32, i32
  }
}

module attributes {stable_mosaic.version = 11 : i64} {
  func.func @_interp_kernel(%arg0: i32, %arg1: memref<8x4xbf16, #tpu.memory_space<vmem>>, %arg2: memref<1x4x512xbf16, #tpu.memory_space<vmem>>, %arg3: memref<1x8x512xbf16, #tpu.memory_space<vmem>>) attributes {dimension_semantics = [#tpu.dimension_semantics<parallel>], iteration_bounds = array<i64: 2>, scalar_prefetch = 0 : i64, scratch_operands = 0 : i64, tpu.core_type = #tpu.core_type<tc>, window_params = [{pipeline_mode = #tpu.pipeline_mode<synchronous>, transform_indices = @transform_0, window_bounds = array<i64: 8, 4>}, {transform_indices = @transform_1, window_bounds = array<i64: 1, 4, 512>}, {transform_indices = @transform_2, window_bounds = array<i64: 1, 8, 512>}]} {
    %c0 = arith.constant 0 : index
    %c0_0 = arith.constant 0 : index
    %0 = vector.load %arg1[%c0, %c0_0] : memref<8x4xbf16, #tpu.memory_space<vmem>>, vector<8x4xbf16>
    %c0_1 = arith.constant 0 : index
    %c0_2 = arith.constant 0 : index
    %c0_3 = arith.constant 0 : index
    %1 = vector.load %arg2[%c0_1, %c0_2, %c0_3] : memref<1x4x512xbf16, #tpu.memory_space<vmem>>, vector<1x4x512xbf16>
    %2 = vector.shape_cast %1 : vector<1x4x512xbf16> to vector<4x512xbf16>
    %cst = arith.constant dense<0.000000e+00> : vector<8x512xf32>
    %3 = tpu.matmul %0, %2, %cst {dimension_numbers = #tpu.dot_dimension_numbers<[1], [0], [0], [1], [0, 0, 1, 1], [], []>} : vector<8x4xbf16>, vector<4x512xbf16>, vector<8x512xf32> -> vector<8x512xf32>
    %4 = arith.truncf %3 : vector<8x512xf32> to vector<8x512xbf16>
    %c0_4 = arith.constant 0 : index
    %c0_5 = arith.constant 0 : index
    %c0_6 = arith.constant 0 : index
    %5 = vector.load %arg3[%c0_4, %c0_5, %c0_6] : memref<1x8x512xbf16, #tpu.memory_space<vmem>>, vector<1x8x512xbf16>
    %6 = vector.shape_cast %5 : vector<1x8x512xbf16> to vector<8x512xbf16>
    %7 = vector.shape_cast %4 : vector<8x512xbf16> to vector<1x8x512xbf16>
    tpu.vector_store %arg3[%c0_4, %c0_5, %c0_6], %7 {strides = array<i32>} : memref<1x8x512xbf16, #tpu.memory_space<vmem>>, vector<1x8x512xbf16>,
    return
  }
  func.func @transform_0(%arg0: i32) -> (i32, i32) {
    %c0_i32 = arith.constant 0 : i32
    %c0_i32_0 = arith.constant 0 : i32
    %c0_i32_1 = arith.constant 0 : i32
    return %c0_i32, %c0_i32_0 : i32, i32
  }
  func.func @transform_1(%arg0: i32) -> (i32, i32, i32) {
    %c0_i32 = arith.constant 0 : i32
    %c0_i32_0 = arith.constant 0 : i32
    %c0_i32_1 = arith.constant 0 : i32
    return %arg0, %c0_i32, %c0_i32_0 : i32, i32, i32
  }
  func.func @transform_2(%arg0: i32) -> (i32, i32, i32) {
    %c0_i32 = arith.constant 0 : i32
    %c0_i32_0 = arith.constant 0 : i32
    %c0_i32_1 = arith.constant 0 : i32
    return %arg0, %c0_i32, %c0_i32_0 : i32, i32, i32
  }
}

module attributes {stable_mosaic.version = 11 : i64} {
  func.func @_matmul_bias_act_kernel(%arg0: i32, %arg1: memref<16x256xbf16, #tpu.memory_space<vmem>>, %arg2: memref<256x128xbf16, #tpu.memory_space<vmem>>, %arg3: memref<1x128xf32, #tpu.memory_space<vmem>>, %arg4: memref<16x128xbf16, #tpu.memory_space<vmem>>) attributes {dimension_semantics = [#tpu.dimension_semantics<parallel>], iteration_bounds = array<i64: 2>, scalar_prefetch = 0 : i64, scratch_operands = 0 : i64, tpu.core_type = #tpu.core_type<tc>, window_params = [{transform_indices = @transform_0, window_bounds = array<i64: 16, 256>}, {pipeline_mode = #tpu.pipeline_mode<synchronous>, transform_indices = @transform_1, window_bounds = array<i64: 256, 128>}, {pipeline_mode = #tpu.pipeline_mode<synchronous>, transform_indices = @transform_2, window_bounds = array<i64: 1, 128>}, {transform_indices = @transform_3, window_bounds = array<i64: 16, 128>}]} {
    %c0 = arith.constant 0 : index
    %c0_0 = arith.constant 0 : index
    %0 = vector.load %arg1[%c0, %c0_0] : memref<16x256xbf16, #tpu.memory_space<vmem>>, vector<16x256xbf16>
    %c0_1 = arith.constant 0 : index
    %c0_2 = arith.constant 0 : index
    %1 = vector.load %arg2[%c0_1, %c0_2] : memref<256x128xbf16, #tpu.memory_space<vmem>>, vector<256x128xbf16>
    %cst = arith.constant dense<0.000000e+00> : vector<16x128xf32>
    %2 = tpu.matmul %0, %1, %cst {dimension_numbers = #tpu.dot_dimension_numbers<[1], [0], [0], [1], [0, 0, 1, 1], [], []>} : vector<16x256xbf16>, vector<256x128xbf16>, vector<16x128xf32> -> vector<16x128xf32>
    %c0_3 = arith.constant 0 : index
    %c0_4 = arith.constant 0 : index
    %3 = vector.load %arg3[%c0_3, %c0_4] : memref<1x128xf32, #tpu.memory_space<vmem>>, vector<1x128xf32>
    %4 = vector.broadcast %3 : vector<1x128xf32> to vector<16x128xf32>
    %5 = arith.addf %2, %4 : vector<16x128xf32>
    %6 = arith.mulf %5, %5 : vector<16x128xf32>
    %7 = arith.mulf %5, %6 : vector<16x128xf32>
    %cst_5 = arith.constant 4.471500e-02 : f32
    %8 = vector.broadcast %cst_5 : f32 to vector<16x128xf32>
    %9 = arith.mulf %8, %7 : vector<16x128xf32>
    %10 = arith.addf %5, %9 : vector<16x128xf32>
    %cst_6 = arith.constant 0.797884583 : f32
    %11 = vector.broadcast %cst_6 : f32 to vector<16x128xf32>
    %12 = arith.mulf %11, %10 : vector<16x128xf32>
    %13 = math.tanh %12 : vector<16x128xf32>
    %cst_7 = arith.constant 1.000000e+00 : f32
    %14 = vector.broadcast %cst_7 : f32 to vector<16x128xf32>
    %15 = arith.addf %14, %13 : vector<16x128xf32>
    %cst_8 = arith.constant 5.000000e-01 : f32
    %16 = vector.broadcast %cst_8 : f32 to vector<16x128xf32>
    %17 = arith.mulf %16, %15 : vector<16x128xf32>
    %18 = arith.mulf %5, %17 : vector<16x128xf32>
    %19 = arith.truncf %18 : vector<16x128xf32> to vector<16x128xbf16>
    %c0_9 = arith.constant 0 : index
    %c0_10 = arith.constant 0 : index
    %20 = vector.load %arg4[%c0_9, %c0_10] : memref<16x128xbf16, #tpu.memory_space<vmem>>, vector<16x128xbf16>
    tpu.vector_store %arg4[%c0_9, %c0_10], %19 {strides = array<i32>} : memref<16x128xbf16, #tpu.memory_space<vmem>>, vector<16x128xbf16>,
    return
  }
  func.func @transform_0(%arg0: i32) -> (i32, i32) {
    %c0_i32 = arith.constant 0 : i32
    %c0_i32_0 = arith.constant 0 : i32
    return %arg0, %c0_i32 : i32, i32
  }
  func.func @transform_1(%arg0: i32) -> (i32, i32) {
    %c0_i32 = arith.constant 0 : i32
    %c0_i32_0 = arith.constant 0 : i32
    %c0_i32_1 = arith.constant 0 : i32
    return %c0_i32, %c0_i32_0 : i32, i32
  }
  func.func @transform_2(%arg0: i32) -> (i32, i32) {
    %c0_i32 = arith.constant 0 : i32
    %c0_i32_0 = arith.constant 0 : i32
    %c0_i32_1 = arith.constant 0 : i32
    return %c0_i32, %c0_i32_0 : i32, i32
  }
  func.func @transform_3(%arg0: i32) -> (i32, i32) {
    %c0_i32 = arith.constant 0 : i32
    %c0_i32_0 = arith.constant 0 : i32
    return %arg0, %c0_i32 : i32, i32
  }
}

module attributes {stable_mosaic.version = 11 : i64} {
  func.func @_interp_kernel(%arg0: i32, %arg1: memref<8x4xbf16, #tpu.memory_space<vmem>>, %arg2: memref<8x4x128xbf16, #tpu.memory_space<vmem>>, %arg3: memref<8x8x128xbf16, #tpu.memory_space<vmem>>) attributes {dimension_semantics = [#tpu.dimension_semantics<parallel>], iteration_bounds = array<i64: 2>, scalar_prefetch = 0 : i64, scratch_operands = 0 : i64, tpu.core_type = #tpu.core_type<tc>, window_params = [{pipeline_mode = #tpu.pipeline_mode<synchronous>, transform_indices = @transform_0, window_bounds = array<i64: 8, 4>}, {transform_indices = @transform_1, window_bounds = array<i64: 8, 4, 128>}, {transform_indices = @transform_2, window_bounds = array<i64: 8, 8, 128>}]} {
    %c0 = arith.constant 0 : index
    %c0_0 = arith.constant 0 : index
    %0 = vector.load %arg1[%c0, %c0_0] : memref<8x4xbf16, #tpu.memory_space<vmem>>, vector<8x4xbf16>
    %c0_1 = arith.constant 0 : index
    %c0_2 = arith.constant 0 : index
    %c0_3 = arith.constant 0 : index
    %1 = vector.load %arg2[%c0_1, %c0_2, %c0_3] : memref<8x4x128xbf16, #tpu.memory_space<vmem>>, vector<1x4x128xbf16>
    %2 = vector.shape_cast %1 : vector<1x4x128xbf16> to vector<4x128xbf16>
    %cst = arith.constant dense<0.000000e+00> : vector<8x128xf32>
    %3 = tpu.matmul %0, %2, %cst {dimension_numbers = #tpu.dot_dimension_numbers<[1], [0], [0], [1], [0, 0, 1, 1], [], []>} : vector<8x4xbf16>, vector<4x128xbf16>, vector<8x128xf32> -> vector<8x128xf32>
    %4 = arith.truncf %3 : vector<8x128xf32> to vector<8x128xbf16>
    %c0_4 = arith.constant 0 : index
    %c0_5 = arith.constant 0 : index
    %c0_6 = arith.constant 0 : index
    %5 = vector.load %arg3[%c0_4, %c0_5, %c0_6] : memref<8x8x128xbf16, #tpu.memory_space<vmem>>, vector<1x8x128xbf16>
    %6 = vector.shape_cast %5 : vector<1x8x128xbf16> to vector<8x128xbf16>
    %7 = vector.shape_cast %4 : vector<8x128xbf16> to vector<1x8x128xbf16>
    tpu.vector_store %arg3[%c0_4, %c0_5, %c0_6], %7 {strides = array<i32>} : memref<8x8x128xbf16, #tpu.memory_space<vmem>>, vector<1x8x128xbf16>,
    %c1 = arith.constant 1 : index
    %c0_7 = arith.constant 0 : index
    %c0_8 = arith.constant 0 : index
    %8 = vector.load %arg2[%c1, %c0_7, %c0_8] : memref<8x4x128xbf16, #tpu.memory_space<vmem>>, vector<1x4x128xbf16>
    %9 = vector.shape_cast %8 : vector<1x4x128xbf16> to vector<4x128xbf16>
    %cst_9 = arith.constant dense<0.000000e+00> : vector<8x128xf32>
    %10 = tpu.matmul %0, %9, %cst_9 {dimension_numbers = #tpu.dot_dimension_numbers<[1], [0], [0], [1], [0, 0, 1, 1], [], []>} : vector<8x4xbf16>, vector<4x128xbf16>, vector<8x128xf32> -> vector<8x128xf32>
    %11 = arith.truncf %10 : vector<8x128xf32> to vector<8x128xbf16>
    %c1_10 = arith.constant 1 : index
    %c0_11 = arith.constant 0 : index
    %c0_12 = arith.constant 0 : index
    %12 = vector.load %arg3[%c1_10, %c0_11, %c0_12] : memref<8x8x128xbf16, #tpu.memory_space<vmem>>, vector<1x8x128xbf16>
    %13 = vector.shape_cast %12 : vector<1x8x128xbf16> to vector<8x128xbf16>
    %14 = vector.shape_cast %11 : vector<8x128xbf16> to vector<1x8x128xbf16>
    tpu.vector_store %arg3[%c1_10, %c0_11, %c0_12], %14 {strides = array<i32>} : memref<8x8x128xbf16, #tpu.memory_space<vmem>>, vector<1x8x128xbf16>,
    %c2 = arith.constant 2 : index
    %c0_13 = arith.constant 0 : index
    %c0_14 = arith.constant 0 : index
    %15 = vector.load %arg2[%c2, %c0_13, %c0_14] : memref<8x4x128xbf16, #tpu.memory_space<vmem>>, vector<1x4x128xbf16>
    %16 = vector.shape_cast %15 : vector<1x4x128xbf16> to vector<4x128xbf16>
    %cst_15 = arith.constant dense<0.000000e+00> : vector<8x128xf32>
    %17 = tpu.matmul %0, %16, %cst_15 {dimension_numbers = #tpu.dot_dimension_numbers<[1], [0], [0], [1], [0, 0, 1, 1], [], []>} : vector<8x4xbf16>, vector<4x128xbf16>, vector<8x128xf32> -> vector<8x128xf32>
    %18 = arith.truncf %17 : vector<8x128xf32> to vector<8x128xbf16>
    %c2_16 = arith.constant 2 : index
    %c0_17 = arith.constant 0 : index
    %c0_18 = arith.constant 0 : index
    %19 = vector.load %arg3[%c2_16, %c0_17, %c0_18] : memref<8x8x128xbf16, #tpu.memory_space<vmem>>, vector<1x8x128xbf16>
    %20 = vector.shape_cast %19 : vector<1x8x128xbf16> to vector<8x128xbf16>
    %21 = vector.shape_cast %18 : vector<8x128xbf16> to vector<1x8x128xbf16>
    tpu.vector_store %arg3[%c2_16, %c0_17, %c0_18], %21 {strides = array<i32>} : memref<8x8x128xbf16, #tpu.memory_space<vmem>>, vector<1x8x128xbf16>,
    %c3 = arith.constant 3 : index
    %c0_19 = arith.constant 0 : index
    %c0_20 = arith.constant 0 : index
    %22 = vector.load %arg2[%c3, %c0_19, %c0_20] : memref<8x4x128xbf16, #tpu.memory_space<vmem>>, vector<1x4x128xbf16>
    %23 = vector.shape_cast %22 : vector<1x4x128xbf16> to vector<4x128xbf16>
    %cst_21 = arith.constant dense<0.000000e+00> : vector<8x128xf32>
    %24 = tpu.matmul %0, %23, %cst_21 {dimension_numbers = #tpu.dot_dimension_numbers<[1], [0], [0], [1], [0, 0, 1, 1], [], []>} : vector<8x4xbf16>, vector<4x128xbf16>, vector<8x128xf32> -> vector<8x128xf32>
    %25 = arith.truncf %24 : vector<8x128xf32> to vector<8x128xbf16>
    %c3_22 = arith.constant 3 : index
    %c0_23 = arith.constant 0 : index
    %c0_24 = arith.constant 0 : index
    %26 = vector.load %arg3[%c3_22, %c0_23, %c0_24] : memref<8x8x128xbf16, #tpu.memory_space<vmem>>, vector<1x8x128xbf16>
    %27 = vector.shape_cast %26 : vector<1x8x128xbf16> to vector<8x128xbf16>
    %28 = vector.shape_cast %25 : vector<8x128xbf16> to vector<1x8x128xbf16>
    tpu.vector_store %arg3[%c3_22, %c0_23, %c0_24], %28 {strides = array<i32>} : memref<8x8x128xbf16, #tpu.memory_space<vmem>>, vector<1x8x128xbf16>,
    %c4 = arith.constant 4 : index
    %c0_25 = arith.constant 0 : index
    %c0_26 = arith.constant 0 : index
    %29 = vector.load %arg2[%c4, %c0_25, %c0_26] : memref<8x4x128xbf16, #tpu.memory_space<vmem>>, vector<1x4x128xbf16>
    %30 = vector.shape_cast %29 : vector<1x4x128xbf16> to vector<4x128xbf16>
    %cst_27 = arith.constant dense<0.000000e+00> : vector<8x128xf32>
    %31 = tpu.matmul %0, %30, %cst_27 {dimension_numbers = #tpu.dot_dimension_numbers<[1], [0], [0], [1], [0, 0, 1, 1], [], []>} : vector<8x4xbf16>, vector<4x128xbf16>, vector<8x128xf32> -> vector<8x128xf32>
    %32 = arith.truncf %31 : vector<8x128xf32> to vector<8x128xbf16>
    %c4_28 = arith.constant 4 : index
    %c0_29 = arith.constant 0 : index
    %c0_30 = arith.constant 0 : index
    %33 = vector.load %arg3[%c4_28, %c0_29, %c0_30] : memref<8x8x128xbf16, #tpu.memory_space<vmem>>, vector<1x8x128xbf16>
    %34 = vector.shape_cast %33 : vector<1x8x128xbf16> to vector<8x128xbf16>
    %35 = vector.shape_cast %32 : vector<8x128xbf16> to vector<1x8x128xbf16>
    tpu.vector_store %arg3[%c4_28, %c0_29, %c0_30], %35 {strides = array<i32>} : memref<8x8x128xbf16, #tpu.memory_space<vmem>>, vector<1x8x128xbf16>,
    %c5 = arith.constant 5 : index
    %c0_31 = arith.constant 0 : index
    %c0_32 = arith.constant 0 : index
    %36 = vector.load %arg2[%c5, %c0_31, %c0_32] : memref<8x4x128xbf16, #tpu.memory_space<vmem>>, vector<1x4x128xbf16>
    %37 = vector.shape_cast %36 : vector<1x4x128xbf16> to vector<4x128xbf16>
    %cst_33 = arith.constant dense<0.000000e+00> : vector<8x128xf32>
    %38 = tpu.matmul %0, %37, %cst_33 {dimension_numbers = #tpu.dot_dimension_numbers<[1], [0], [0], [1], [0, 0, 1, 1], [], []>} : vector<8x4xbf16>, vector<4x128xbf16>, vector<8x128xf32> -> vector<8x128xf32>
    %39 = arith.truncf %38 : vector<8x128xf32> to vector<8x128xbf16>
    %c5_34 = arith.constant 5 : index
    %c0_35 = arith.constant 0 : index
    %c0_36 = arith.constant 0 : index
    %40 = vector.load %arg3[%c5_34, %c0_35, %c0_36] : memref<8x8x128xbf16, #tpu.memory_space<vmem>>, vector<1x8x128xbf16>
    %41 = vector.shape_cast %40 : vector<1x8x128xbf16> to vector<8x128xbf16>
    %42 = vector.shape_cast %39 : vector<8x128xbf16> to vector<1x8x128xbf16>
    tpu.vector_store %arg3[%c5_34, %c0_35, %c0_36], %42 {strides = array<i32>} : memref<8x8x128xbf16, #tpu.memory_space<vmem>>, vector<1x8x128xbf16>,
    %c6 = arith.constant 6 : index
    %c0_37 = arith.constant 0 : index
    %c0_38 = arith.constant 0 : index
    %43 = vector.load %arg2[%c6, %c0_37, %c0_38] : memref<8x4x128xbf16, #tpu.memory_space<vmem>>, vector<1x4x128xbf16>
    %44 = vector.shape_cast %43 : vector<1x4x128xbf16> to vector<4x128xbf16>
    %cst_39 = arith.constant dense<0.000000e+00> : vector<8x128xf32>
    %45 = tpu.matmul %0, %44, %cst_39 {dimension_numbers = #tpu.dot_dimension_numbers<[1], [0], [0], [1], [0, 0, 1, 1], [], []>} : vector<8x4xbf16>, vector<4x128xbf16>, vector<8x128xf32> -> vector<8x128xf32>
    %46 = arith.truncf %45 : vector<8x128xf32> to vector<8x128xbf16>
    %c6_40 = arith.constant 6 : index
    %c0_41 = arith.constant 0 : index
    %c0_42 = arith.constant 0 : index
    %47 = vector.load %arg3[%c6_40, %c0_41, %c0_42] : memref<8x8x128xbf16, #tpu.memory_space<vmem>>, vector<1x8x128xbf16>
    %48 = vector.shape_cast %47 : vector<1x8x128xbf16> to vector<8x128xbf16>
    %49 = vector.shape_cast %46 : vector<8x128xbf16> to vector<1x8x128xbf16>
    tpu.vector_store %arg3[%c6_40, %c0_41, %c0_42], %49 {strides = array<i32>} : memref<8x8x128xbf16, #tpu.memory_space<vmem>>, vector<1x8x128xbf16>,
    %c7 = arith.constant 7 : index
    %c0_43 = arith.constant 0 : index
    %c0_44 = arith.constant 0 : index
    %50 = vector.load %arg2[%c7, %c0_43, %c0_44] : memref<8x4x128xbf16, #tpu.memory_space<vmem>>, vector<1x4x128xbf16>
    %51 = vector.shape_cast %50 : vector<1x4x128xbf16> to vector<4x128xbf16>
    %cst_45 = arith.constant dense<0.000000e+00> : vector<8x128xf32>
    %52 = tpu.matmul %0, %51, %cst_45 {dimension_numbers = #tpu.dot_dimension_numbers<[1], [0], [0], [1], [0, 0, 1, 1], [], []>} : vector<8x4xbf16>, vector<4x128xbf16>, vector<8x128xf32> -> vector<8x128xf32>
    %53 = arith.truncf %52 : vector<8x128xf32> to vector<8x128xbf16>
    %c7_46 = arith.constant 7 : index
    %c0_47 = arith.constant 0 : index
    %c0_48 = arith.constant 0 : index
    %54 = vector.load %arg3[%c7_46, %c0_47, %c0_48] : memref<8x8x128xbf16, #tpu.memory_space<vmem>>, vector<1x8x128xbf16>
    %55 = vector.shape_cast %54 : vector<1x8x128xbf16> to vector<8x128xbf16>
    %56 = vector.shape_cast %53 : vector<8x128xbf16> to vector<1x8x128xbf16>
    tpu.vector_store %arg3[%c7_46, %c0_47, %c0_48], %56 {strides = array<i32>} : memref<8x8x128xbf16, #tpu.memory_space<vmem>>, vector<1x8x128xbf16>,
    return
  }
  func.func @transform_0(%arg0: i32) -> (i32, i32) {
    %c0_i32 = arith.constant 0 : i32
    %c0_i32_0 = arith.constant 0 : i32
    %c0_i32_1 = arith.constant 0 : i32
    return %c0_i32, %c0_i32_0 : i32, i32
  }
  func.func @transform_1(%arg0: i32) -> (i32, i32, i32) {
    %c0_i32 = arith.constant 0 : i32
    %c0_i32_0 = arith.constant 0 : i32
    %c0_i32_1 = arith.constant 0 : i32
    return %arg0, %c0_i32, %c0_i32_0 : i32, i32, i32
  }
  func.func @transform_2(%arg0: i32) -> (i32, i32, i32) {
    %c0_i32 = arith.constant 0 : i32
    %c0_i32_0 = arith.constant 0 : i32
    %c0_i32_1 = arith.constant 0 : i32
    return %arg0, %c0_i32, %c0_i32_0 : i32, i32, i32
  }
}

module attributes {stable_mosaic.version = 11 : i64} {
  func.func @_interp_kernel(%arg0: i32, %arg1: memref<32x8xf32, #tpu.memory_space<vmem>>, %arg2: memref<1x8x1024xf32, #tpu.memory_space<vmem>>, %arg3: memref<1x32x1024xf32, #tpu.memory_space<vmem>>) attributes {dimension_semantics = [#tpu.dimension_semantics<parallel>], iteration_bounds = array<i64: 2>, scalar_prefetch = 0 : i64, scratch_operands = 0 : i64, tpu.core_type = #tpu.core_type<tc>, window_params = [{pipeline_mode = #tpu.pipeline_mode<synchronous>, transform_indices = @transform_0, window_bounds = array<i64: 32, 8>}, {transform_indices = @transform_1, window_bounds = array<i64: 1, 8, 1024>}, {transform_indices = @transform_2, window_bounds = array<i64: 1, 32, 1024>}]} {
    %c0 = arith.constant 0 : index
    %c0_0 = arith.constant 0 : index
    %0 = vector.load %arg1[%c0, %c0_0] : memref<32x8xf32, #tpu.memory_space<vmem>>, vector<32x8xf32>
    %c0_1 = arith.constant 0 : index
    %c0_2 = arith.constant 0 : index
    %c0_3 = arith.constant 0 : index
    %1 = vector.load %arg2[%c0_1, %c0_2, %c0_3] : memref<1x8x1024xf32, #tpu.memory_space<vmem>>, vector<1x8x1024xf32>
    %2 = vector.shape_cast %1 : vector<1x8x1024xf32> to vector<8x1024xf32>
    %cst = arith.constant dense<0.000000e+00> : vector<32x1024xf32>
    %3 = tpu.matmul %0, %2, %cst {dimension_numbers = #tpu.dot_dimension_numbers<[1], [0], [0], [1], [0, 0, 1, 1], [], []>} : vector<32x8xf32>, vector<8x1024xf32>, vector<32x1024xf32> -> vector<32x1024xf32>
    %c0_4 = arith.constant 0 : index
    %c0_5 = arith.constant 0 : index
    %c0_6 = arith.constant 0 : index
    %4 = vector.load %arg3[%c0_4, %c0_5, %c0_6] : memref<1x32x1024xf32, #tpu.memory_space<vmem>>, vector<1x32x1024xf32>
    %5 = vector.shape_cast %4 : vector<1x32x1024xf32> to vector<32x1024xf32>
    %6 = vector.shape_cast %3 : vector<32x1024xf32> to vector<1x32x1024xf32>
    tpu.vector_store %arg3[%c0_4, %c0_5, %c0_6], %6 {strides = array<i32>} : memref<1x32x1024xf32, #tpu.memory_space<vmem>>, vector<1x32x1024xf32>,
    return
  }
  func.func @transform_0(%arg0: i32) -> (i32, i32) {
    %c0_i32 = arith.constant 0 : i32
    %c0_i32_0 = arith.constant 0 : i32
    %c0_i32_1 = arith.constant 0 : i32
    return %c0_i32, %c0_i32_0 : i32, i32
  }
  func.func @transform_1(%arg0: i32) -> (i32, i32, i32) {
    %c0_i32 = arith.constant 0 : i32
    %c0_i32_0 = arith.constant 0 : i32
    %c0_i32_1 = arith.constant 0 : i32
    return %arg0, %c0_i32, %c0_i32_0 : i32, i32, i32
  }
  func.func @transform_2(%arg0: i32) -> (i32, i32, i32) {
    %c0_i32 = arith.constant 0 : i32
    %c0_i32_0 = arith.constant 0 : i32
    %c0_i32_1 = arith.constant 0 : i32
    return %arg0, %c0_i32, %c0_i32_0 : i32, i32, i32
  }
}

module attributes {stable_mosaic.version = 11 : i64} {
  func.func @_decode_head_kernel(%arg0: i32, %arg1: memref<64x128xbf16, #tpu.memory_space<vmem>>, %arg2: memref<64x128xbf16, #tpu.memory_space<vmem>>, %arg3: memref<64x128xbf16, #tpu.memory_space<vmem>>, %arg4: memref<64x128xbf16, #tpu.memory_space<vmem>>, %arg5: memref<128x128xbf16, #tpu.memory_space<vmem>>, %arg6: memref<1x128xf32, #tpu.memory_space<vmem>>, %arg7: memref<128x192xbf16, #tpu.memory_space<vmem>>, %arg8: memref<1x192xf32, #tpu.memory_space<vmem>>, %arg9: memref<192x128xbf16, #tpu.memory_space<vmem>>, %arg10: memref<1x128xf32, #tpu.memory_space<vmem>>, %arg11: memref<64x128xf32, #tpu.memory_space<vmem>>) attributes {dimension_semantics = [#tpu.dimension_semantics<parallel>], iteration_bounds = array<i64: 2>, scalar_prefetch = 0 : i64, scratch_operands = 0 : i64, tpu.core_type = #tpu.core_type<tc>, window_params = [{transform_indices = @transform_0, window_bounds = array<i64: 64, 128>}, {transform_indices = @transform_1, window_bounds = array<i64: 64, 128>}, {transform_indices = @transform_2, window_bounds = array<i64: 64, 128>}, {transform_indices = @transform_3, window_bounds = array<i64: 64, 128>}, {pipeline_mode = #tpu.pipeline_mode<synchronous>, transform_indices = @transform_4, window_bounds = array<i64: 128, 128>}, {pipeline_mode = #tpu.pipeline_mode<synchronous>, transform_indices = @transform_5, window_bounds = array<i64: 1, 128>}, {pipeline_mode = #tpu.pipeline_mode<synchronous>, transform_indices = @transform_6, window_bounds = array<i64: 128, 192>}, {pipeline_mode = #tpu.pipeline_mode<synchronous>, transform_indices = @transform_7, window_bounds = array<i64: 1, 192>}, {pipeline_mode = #tpu.pipeline_mode<synchronous>, transform_indices = @transform_8, window_bounds = array<i64: 192, 128>}, {pipeline_mode = #tpu.pipeline_mode<synchronous>, transform_indices = @transform_9, window_bounds = array<i64: 1, 128>}, {transform_indices = @transform_10, window_bounds = array<i64: 64, 128>}]} {
    %c0 = arith.constant 0 : index
    %c0_0 = arith.constant 0 : index
    %0 = vector.load %arg1[%c0, %c0_0] : memref<64x128xbf16, #tpu.memory_space<vmem>>, vector<64x128xbf16>
    %c0_1 = arith.constant 0 : index
    %c0_2 = arith.constant 0 : index
    %1 = vector.load %arg5[%c0_1, %c0_2] : memref<128x128xbf16, #tpu.memory_space<vmem>>, vector<128x128xbf16>
    %cst = arith.constant dense<0.000000e+00> : vector<64x128xf32>
    %2 = tpu.matmul %0, %1, %cst {dimension_numbers = #tpu.dot_dimension_numbers<[1], [0], [0], [1], [0, 0, 1, 1], [], []>} : vector<64x128xbf16>, vector<128x128xbf16>, vector<64x128xf32> -> vector<64x128xf32>
    %c0_3 = arith.constant 0 : index
    %c0_4 = arith.constant 0 : index
    %3 = vector.load %arg6[%c0_3, %c0_4] : memref<1x128xf32, #tpu.memory_space<vmem>>, vector<1x128xf32>
    %4 = vector.broadcast %3 : vector<1x128xf32> to vector<64x128xf32>
    %5 = arith.addf %2, %4 : vector<64x128xf32>
    %6 = arith.mulf %5, %5 : vector<64x128xf32>
    %7 = arith.mulf %5, %6 : vector<64x128xf32>
    %cst_5 = arith.constant 4.471500e-02 : f32
    %8 = vector.broadcast %cst_5 : f32 to vector<64x128xf32>
    %9 = arith.mulf %8, %7 : vector<64x128xf32>
    %10 = arith.addf %5, %9 : vector<64x128xf32>
    %cst_6 = arith.constant 0.797884583 : f32
    %11 = vector.broadcast %cst_6 : f32 to vector<64x128xf32>
    %12 = arith.mulf %11, %10 : vector<64x128xf32>
    %13 = math.tanh %12 : vector<64x128xf32>
    %cst_7 = arith.constant 1.000000e+00 : f32
    %14 = vector.broadcast %cst_7 : f32 to vector<64x128xf32>
    %15 = arith.addf %14, %13 : vector<64x128xf32>
    %cst_8 = arith.constant 5.000000e-01 : f32
    %16 = vector.broadcast %cst_8 : f32 to vector<64x128xf32>
    %17 = arith.mulf %16, %15 : vector<64x128xf32>
    %18 = arith.mulf %5, %17 : vector<64x128xf32>
    %c0_9 = arith.constant 0 : index
    %c0_10 = arith.constant 0 : index
    %19 = vector.load %arg2[%c0_9, %c0_10] : memref<64x128xbf16, #tpu.memory_space<vmem>>, vector<64x128xbf16>
    %20 = arith.extf %19 : vector<64x128xbf16> to vector<64x128xf32>
    %21 = arith.addf %18, %20 : vector<64x128xf32>
    %c0_11 = arith.constant 0 : index
    %c0_12 = arith.constant 0 : index
    %22 = vector.load %arg3[%c0_11, %c0_12] : memref<64x128xbf16, #tpu.memory_space<vmem>>, vector<64x128xbf16>
    %23 = arith.extf %22 : vector<64x128xbf16> to vector<64x128xf32>
    %24 = arith.addf %21, %23 : vector<64x128xf32>
    %c0_13 = arith.constant 0 : index
    %c0_14 = arith.constant 0 : index
    %25 = vector.load %arg4[%c0_13, %c0_14] : memref<64x128xbf16, #tpu.memory_space<vmem>>, vector<64x128xbf16>
    %26 = arith.extf %25 : vector<64x128xbf16> to vector<64x128xf32>
    %27 = arith.addf %24, %26 : vector<64x128xf32>
    %28 = arith.truncf %27 : vector<64x128xf32> to vector<64x128xbf16>
    %c0_15 = arith.constant 0 : index
    %c0_16 = arith.constant 0 : index
    %29 = vector.load %arg7[%c0_15, %c0_16] : memref<128x192xbf16, #tpu.memory_space<vmem>>, vector<128x192xbf16>
    %cst_17 = arith.constant dense<0.000000e+00> : vector<64x192xf32>
    %30 = tpu.matmul %28, %29, %cst_17 {dimension_numbers = #tpu.dot_dimension_numbers<[1], [0], [0], [1], [0, 0, 1, 1], [], []>} : vector<64x128xbf16>, vector<128x192xbf16>, vector<64x192xf32> -> vector<64x192xf32>
    %c0_18 = arith.constant 0 : index
    %c0_19 = arith.constant 0 : index
    %31 = vector.load %arg8[%c0_18, %c0_19] : memref<1x192xf32, #tpu.memory_space<vmem>>, vector<1x192xf32>
    %32 = vector.broadcast %31 : vector<1x192xf32> to vector<64x192xf32>
    %33 = arith.addf %30, %32 : vector<64x192xf32>
    %34 = arith.mulf %33, %33 : vector<64x192xf32>
    %35 = arith.mulf %33, %34 : vector<64x192xf32>
    %cst_20 = arith.constant 4.471500e-02 : f32
    %36 = vector.broadcast %cst_20 : f32 to vector<64x192xf32>
    %37 = arith.mulf %36, %35 : vector<64x192xf32>
    %38 = arith.addf %33, %37 : vector<64x192xf32>
    %cst_21 = arith.constant 0.797884583 : f32
    %39 = vector.broadcast %cst_21 : f32 to vector<64x192xf32>
    %40 = arith.mulf %39, %38 : vector<64x192xf32>
    %41 = math.tanh %40 : vector<64x192xf32>
    %cst_22 = arith.constant 1.000000e+00 : f32
    %42 = vector.broadcast %cst_22 : f32 to vector<64x192xf32>
    %43 = arith.addf %42, %41 : vector<64x192xf32>
    %cst_23 = arith.constant 5.000000e-01 : f32
    %44 = vector.broadcast %cst_23 : f32 to vector<64x192xf32>
    %45 = arith.mulf %44, %43 : vector<64x192xf32>
    %46 = arith.mulf %33, %45 : vector<64x192xf32>
    %47 = arith.truncf %46 : vector<64x192xf32> to vector<64x192xbf16>
    %c0_24 = arith.constant 0 : index
    %c0_25 = arith.constant 0 : index
    %48 = vector.load %arg9[%c0_24, %c0_25] : memref<192x128xbf16, #tpu.memory_space<vmem>>, vector<192x128xbf16>
    %cst_26 = arith.constant dense<0.000000e+00> : vector<64x128xf32>
    %49 = tpu.matmul %47, %48, %cst_26 {dimension_numbers = #tpu.dot_dimension_numbers<[1], [0], [0], [1], [0, 0, 1, 1], [], []>} : vector<64x192xbf16>, vector<192x128xbf16>, vector<64x128xf32> -> vector<64x128xf32>
    %c0_27 = arith.constant 0 : index
    %c0_28 = arith.constant 0 : index
    %50 = vector.load %arg10[%c0_27, %c0_28] : memref<1x128xf32, #tpu.memory_space<vmem>>, vector<1x128xf32>
    %51 = vector.broadcast %50 : vector<1x128xf32> to vector<64x128xf32>
    %52 = arith.addf %49, %51 : vector<64x128xf32>
    %c0_29 = arith.constant 0 : index
    %c0_30 = arith.constant 0 : index
    %53 = vector.load %arg11[%c0_29, %c0_30] : memref<64x128xf32, #tpu.memory_space<vmem>>, vector<64x128xf32>
    tpu.vector_store %arg11[%c0_29, %c0_30], %52 {strides = array<i32>} : memref<64x128xf32, #tpu.memory_space<vmem>>, vector<64x128xf32>,
    return
  }
  func.func @transform_0(%arg0: i32) -> (i32, i32) {
    %c0_i32 = arith.constant 0 : i32
    %c0_i32_0 = arith.constant 0 : i32
    return %arg0, %c0_i32 : i32, i32
  }
  func.func @transform_1(%arg0: i32) -> (i32, i32) {
    %c0_i32 = arith.constant 0 : i32
    %c0_i32_0 = arith.constant 0 : i32
    return %arg0, %c0_i32 : i32, i32
  }
  func.func @transform_2(%arg0: i32) -> (i32, i32) {
    %c0_i32 = arith.constant 0 : i32
    %c0_i32_0 = arith.constant 0 : i32
    return %arg0, %c0_i32 : i32, i32
  }
  func.func @transform_3(%arg0: i32) -> (i32, i32) {
    %c0_i32 = arith.constant 0 : i32
    %c0_i32_0 = arith.constant 0 : i32
    return %arg0, %c0_i32 : i32, i32
  }
  func.func @transform_4(%arg0: i32) -> (i32, i32) {
    %c0_i32 = arith.constant 0 : i32
    %c0_i32_0 = arith.constant 0 : i32
    %c0_i32_1 = arith.constant 0 : i32
    return %c0_i32, %c0_i32_0 : i32, i32
  }
  func.func @transform_5(%arg0: i32) -> (i32, i32) {
    %c0_i32 = arith.constant 0 : i32
    %c0_i32_0 = arith.constant 0 : i32
    %c0_i32_1 = arith.constant 0 : i32
    return %c0_i32, %c0_i32_0 : i32, i32
  }
  func.func @transform_6(%arg0: i32) -> (i32, i32) {
    %c0_i32 = arith.constant 0 : i32
    %c0_i32_0 = arith.constant 0 : i32
    %c0_i32_1 = arith.constant 0 : i32
    return %c0_i32, %c0_i32_0 : i32, i32
  }
  func.func @transform_7(%arg0: i32) -> (i32, i32) {
    %c0_i32 = arith.constant 0 : i32
    %c0_i32_0 = arith.constant 0 : i32
    %c0_i32_1 = arith.constant 0 : i32
    return %c0_i32, %c0_i32_0 : i32, i32
  }
  func.func @transform_8(%arg0: i32) -> (i32, i32) {
    %c0_i32 = arith.constant 0 : i32
    %c0_i32_0 = arith.constant 0 : i32
    %c0_i32_1 = arith.constant 0 : i32
    return %c0_i32, %c0_i32_0 : i32, i32
  }
  func.func @transform_9(%arg0: i32) -> (i32, i32) {
    %c0_i32 = arith.constant 0 : i32
    %c0_i32_0 = arith.constant 0 : i32
    %c0_i32_1 = arith.constant 0 : i32
    return %c0_i32, %c0_i32_0 : i32, i32
  }
  func.func @transform_10(%arg0: i32) -> (i32, i32) {
    %c0_i32 = arith.constant 0 : i32
    %c0_i32_0 = arith.constant 0 : i32
    return %arg0, %c0_i32 : i32, i32
  }
}

module attributes {stable_mosaic.version = 11 : i64} {
  func.func @_interp_kernel(%arg0: i32, %arg1: memref<32x8xf32, #tpu.memory_space<vmem>>, %arg2: memref<8x8x128xf32, #tpu.memory_space<vmem>>, %arg3: memref<8x32x128xf32, #tpu.memory_space<vmem>>) attributes {dimension_semantics = [#tpu.dimension_semantics<parallel>], iteration_bounds = array<i64: 8>, scalar_prefetch = 0 : i64, scratch_operands = 0 : i64, tpu.core_type = #tpu.core_type<tc>, window_params = [{pipeline_mode = #tpu.pipeline_mode<synchronous>, transform_indices = @transform_0, window_bounds = array<i64: 32, 8>}, {transform_indices = @transform_1, window_bounds = array<i64: 8, 8, 128>}, {transform_indices = @transform_2, window_bounds = array<i64: 8, 32, 128>}]} {
    %c0 = arith.constant 0 : index
    %c0_0 = arith.constant 0 : index
    %0 = vector.load %arg1[%c0, %c0_0] : memref<32x8xf32, #tpu.memory_space<vmem>>, vector<32x8xf32>
    %c0_1 = arith.constant 0 : index
    %c0_2 = arith.constant 0 : index
    %c0_3 = arith.constant 0 : index
    %1 = vector.load %arg2[%c0_1, %c0_2, %c0_3] : memref<8x8x128xf32, #tpu.memory_space<vmem>>, vector<1x8x128xf32>
    %2 = vector.shape_cast %1 : vector<1x8x128xf32> to vector<8x128xf32>
    %cst = arith.constant dense<0.000000e+00> : vector<32x128xf32>
    %3 = tpu.matmul %0, %2, %cst {dimension_numbers = #tpu.dot_dimension_numbers<[1], [0], [0], [1], [0, 0, 1, 1], [], []>} : vector<32x8xf32>, vector<8x128xf32>, vector<32x128xf32> -> vector<32x128xf32>
    %c0_4 = arith.constant 0 : index
    %c0_5 = arith.constant 0 : index
    %c0_6 = arith.constant 0 : index
    %4 = vector.load %arg3[%c0_4, %c0_5, %c0_6] : memref<8x32x128xf32, #tpu.memory_space<vmem>>, vector<1x32x128xf32>
    %5 = vector.shape_cast %4 : vector<1x32x128xf32> to vector<32x128xf32>
    %6 = vector.shape_cast %3 : vector<32x128xf32> to vector<1x32x128xf32>
    tpu.vector_store %arg3[%c0_4, %c0_5, %c0_6], %6 {strides = array<i32>} : memref<8x32x128xf32, #tpu.memory_space<vmem>>, vector<1x32x128xf32>,
    %c1 = arith.constant 1 : index
    %c0_7 = arith.constant 0 : index
    %c0_8 = arith.constant 0 : index
    %7 = vector.load %arg2[%c1, %c0_7, %c0_8] : memref<8x8x128xf32, #tpu.memory_space<vmem>>, vector<1x8x128xf32>
    %8 = vector.shape_cast %7 : vector<1x8x128xf32> to vector<8x128xf32>
    %cst_9 = arith.constant dense<0.000000e+00> : vector<32x128xf32>
    %9 = tpu.matmul %0, %8, %cst_9 {dimension_numbers = #tpu.dot_dimension_numbers<[1], [0], [0], [1], [0, 0, 1, 1], [], []>} : vector<32x8xf32>, vector<8x128xf32>, vector<32x128xf32> -> vector<32x128xf32>
    %c1_10 = arith.constant 1 : index
    %c0_11 = arith.constant 0 : index
    %c0_12 = arith.constant 0 : index
    %10 = vector.load %arg3[%c1_10, %c0_11, %c0_12] : memref<8x32x128xf32, #tpu.memory_space<vmem>>, vector<1x32x128xf32>
    %11 = vector.shape_cast %10 : vector<1x32x128xf32> to vector<32x128xf32>
    %12 = vector.shape_cast %9 : vector<32x128xf32> to vector<1x32x128xf32>
    tpu.vector_store %arg3[%c1_10, %c0_11, %c0_12], %12 {strides = array<i32>} : memref<8x32x128xf32, #tpu.memory_space<vmem>>, vector<1x32x128xf32>,
    %c2 = arith.constant 2 : index
    %c0_13 = arith.constant 0 : index
    %c0_14 = arith.constant 0 : index
    %13 = vector.load %arg2[%c2, %c0_13, %c0_14] : memref<8x8x128xf32, #tpu.memory_space<vmem>>, vector<1x8x128xf32>
    %14 = vector.shape_cast %13 : vector<1x8x128xf32> to vector<8x128xf32>
    %cst_15 = arith.constant dense<0.000000e+00> : vector<32x128xf32>
    %15 = tpu.matmul %0, %14, %cst_15 {dimension_numbers = #tpu.dot_dimension_numbers<[1], [0], [0], [1], [0, 0, 1, 1], [], []>} : vector<32x8xf32>, vector<8x128xf32>, vector<32x128xf32> -> vector<32x128xf32>
    %c2_16 = arith.constant 2 : index
    %c0_17 = arith.constant 0 : index
    %c0_18 = arith.constant 0 : index
    %16 = vector.load %arg3[%c2_16, %c0_17, %c0_18] : memref<8x32x128xf32, #tpu.memory_space<vmem>>, vector<1x32x128xf32>
    %17 = vector.shape_cast %16 : vector<1x32x128xf32> to vector<32x128xf32>
    %18 = vector.shape_cast %15 : vector<32x128xf32> to vector<1x32x128xf32>
    tpu.vector_store %arg3[%c2_16, %c0_17, %c0_18], %18 {strides = array<i32>} : memref<8x32x128xf32, #tpu.memory_space<vmem>>, vector<1x32x128xf32>,
    %c3 = arith.constant 3 : index
    %c0_19 = arith.constant 0 : index
    %c0_20 = arith.constant 0 : index
    %19 = vector.load %arg2[%c3, %c0_19, %c0_20] : memref<8x8x128xf32, #tpu.memory_space<vmem>>, vector<1x8x128xf32>
    %20 = vector.shape_cast %19 : vector<1x8x128xf32> to vector<8x128xf32>
    %cst_21 = arith.constant dense<0.000000e+00> : vector<32x128xf32>
    %21 = tpu.matmul %0, %20, %cst_21 {dimension_numbers = #tpu.dot_dimension_numbers<[1], [0], [0], [1], [0, 0, 1, 1], [], []>} : vector<32x8xf32>, vector<8x128xf32>, vector<32x128xf32> -> vector<32x128xf32>
    %c3_22 = arith.constant 3 : index
    %c0_23 = arith.constant 0 : index
    %c0_24 = arith.constant 0 : index
    %22 = vector.load %arg3[%c3_22, %c0_23, %c0_24] : memref<8x32x128xf32, #tpu.memory_space<vmem>>, vector<1x32x128xf32>
    %23 = vector.shape_cast %22 : vector<1x32x128xf32> to vector<32x128xf32>
    %24 = vector.shape_cast %21 : vector<32x128xf32> to vector<1x32x128xf32>
    tpu.vector_store %arg3[%c3_22, %c0_23, %c0_24], %24 {strides = array<i32>} : memref<8x32x128xf32, #tpu.memory_space<vmem>>, vector<1x32x128xf32>,
    %c4 = arith.constant 4 : index
    %c0_25 = arith.constant 0 : index
    %c0_26 = arith.constant 0 : index
    %25 = vector.load %arg2[%c4, %c0_25, %c0_26] : memref<8x8x128xf32, #tpu.memory_space<vmem>>, vector<1x8x128xf32>
    %26 = vector.shape_cast %25 : vector<1x8x128xf32> to vector<8x128xf32>
    %cst_27 = arith.constant dense<0.000000e+00> : vector<32x128xf32>
    %27 = tpu.matmul %0, %26, %cst_27 {dimension_numbers = #tpu.dot_dimension_numbers<[1], [0], [0], [1], [0, 0, 1, 1], [], []>} : vector<32x8xf32>, vector<8x128xf32>, vector<32x128xf32> -> vector<32x128xf32>
    %c4_28 = arith.constant 4 : index
    %c0_29 = arith.constant 0 : index
    %c0_30 = arith.constant 0 : index
    %28 = vector.load %arg3[%c4_28, %c0_29, %c0_30] : memref<8x32x128xf32, #tpu.memory_space<vmem>>, vector<1x32x128xf32>
    %29 = vector.shape_cast %28 : vector<1x32x128xf32> to vector<32x128xf32>
    %30 = vector.shape_cast %27 : vector<32x128xf32> to vector<1x32x128xf32>
    tpu.vector_store %arg3[%c4_28, %c0_29, %c0_30], %30 {strides = array<i32>} : memref<8x32x128xf32, #tpu.memory_space<vmem>>, vector<1x32x128xf32>,
    %c5 = arith.constant 5 : index
    %c0_31 = arith.constant 0 : index
    %c0_32 = arith.constant 0 : index
    %31 = vector.load %arg2[%c5, %c0_31, %c0_32] : memref<8x8x128xf32, #tpu.memory_space<vmem>>, vector<1x8x128xf32>
    %32 = vector.shape_cast %31 : vector<1x8x128xf32> to vector<8x128xf32>
    %cst_33 = arith.constant dense<0.000000e+00> : vector<32x128xf32>
    %33 = tpu.matmul %0, %32, %cst_33 {dimension_numbers = #tpu.dot_dimension_numbers<[1], [0], [0], [1], [0, 0, 1, 1], [], []>} : vector<32x8xf32>, vector<8x128xf32>, vector<32x128xf32> -> vector<32x128xf32>
    %c5_34 = arith.constant 5 : index
    %c0_35 = arith.constant 0 : index
    %c0_36 = arith.constant 0 : index
    %34 = vector.load %arg3[%c5_34, %c0_35, %c0_36] : memref<8x32x128xf32, #tpu.memory_space<vmem>>, vector<1x32x128xf32>
    %35 = vector.shape_cast %34 : vector<1x32x128xf32> to vector<32x128xf32>
    %36 = vector.shape_cast %33 : vector<32x128xf32> to vector<1x32x128xf32>
    tpu.vector_store %arg3[%c5_34, %c0_35, %c0_36], %36 {strides = array<i32>} : memref<8x32x128xf32, #tpu.memory_space<vmem>>, vector<1x32x128xf32>,
    %c6 = arith.constant 6 : index
    %c0_37 = arith.constant 0 : index
    %c0_38 = arith.constant 0 : index
    %37 = vector.load %arg2[%c6, %c0_37, %c0_38] : memref<8x8x128xf32, #tpu.memory_space<vmem>>, vector<1x8x128xf32>
    %38 = vector.shape_cast %37 : vector<1x8x128xf32> to vector<8x128xf32>
    %cst_39 = arith.constant dense<0.000000e+00> : vector<32x128xf32>
    %39 = tpu.matmul %0, %38, %cst_39 {dimension_numbers = #tpu.dot_dimension_numbers<[1], [0], [0], [1], [0, 0, 1, 1], [], []>} : vector<32x8xf32>, vector<8x128xf32>, vector<32x128xf32> -> vector<32x128xf32>
    %c6_40 = arith.constant 6 : index
    %c0_41 = arith.constant 0 : index
    %c0_42 = arith.constant 0 : index
    %40 = vector.load %arg3[%c6_40, %c0_41, %c0_42] : memref<8x32x128xf32, #tpu.memory_space<vmem>>, vector<1x32x128xf32>
    %41 = vector.shape_cast %40 : vector<1x32x128xf32> to vector<32x128xf32>
    %42 = vector.shape_cast %39 : vector<32x128xf32> to vector<1x32x128xf32>
    tpu.vector_store %arg3[%c6_40, %c0_41, %c0_42], %42 {strides = array<i32>} : memref<8x32x128xf32, #tpu.memory_space<vmem>>, vector<1x32x128xf32>,
    %c7 = arith.constant 7 : index
    %c0_43 = arith.constant 0 : index
    %c0_44 = arith.constant 0 : index
    %43 = vector.load %arg2[%c7, %c0_43, %c0_44] : memref<8x8x128xf32, #tpu.memory_space<vmem>>, vector<1x8x128xf32>
    %44 = vector.shape_cast %43 : vector<1x8x128xf32> to vector<8x128xf32>
    %cst_45 = arith.constant dense<0.000000e+00> : vector<32x128xf32>
    %45 = tpu.matmul %0, %44, %cst_45 {dimension_numbers = #tpu.dot_dimension_numbers<[1], [0], [0], [1], [0, 0, 1, 1], [], []>} : vector<32x8xf32>, vector<8x128xf32>, vector<32x128xf32> -> vector<32x128xf32>
    %c7_46 = arith.constant 7 : index
    %c0_47 = arith.constant 0 : index
    %c0_48 = arith.constant 0 : index
    %46 = vector.load %arg3[%c7_46, %c0_47, %c0_48] : memref<8x32x128xf32, #tpu.memory_space<vmem>>, vector<1x32x128xf32>
    %47 = vector.shape_cast %46 : vector<1x32x128xf32> to vector<32x128xf32>
    %48 = vector.shape_cast %45 : vector<32x128xf32> to vector<1x32x128xf32>
    tpu.vector_store %arg3[%c7_46, %c0_47, %c0_48], %48 {strides = array<i32>} : memref<8x32x128xf32, #tpu.memory_space<vmem>>, vector<1x32x128xf32>,
    return
  }
  func.func @transform_0(%arg0: i32) -> (i32, i32) {
    %c0_i32 = arith.constant 0 : i32
    %c0_i32_0 = arith.constant 0 : i32
    %c0_i32_1 = arith.constant 0 : i32
    return %c0_i32, %c0_i32_0 : i32, i32
  }
  func.func @transform_1(%arg0: i32) -> (i32, i32, i32) {
    %c0_i32 = arith.constant 0 : i32
    %c0_i32_0 = arith.constant 0 : i32
    %c0_i32_1 = arith.constant 0 : i32
    return %arg0, %c0_i32, %c0_i32_0 : i32, i32, i32
  }
  func.func @transform_2(%arg0: i32) -> (i32, i32, i32) {
    %c0_i32 = arith.constant 0 : i32
    %c0_i32_0 = arith.constant 0 : i32
    %c0_i32_1 = arith.constant 0 : i32
    return %arg0, %c0_i32, %c0_i32_0 : i32, i32, i32
  }
}

</mosaic_0001>

<bundles_post_ra>
// kernel: transformer_net_forward.14
= control target key start
LH: loop header
LB: loop body
LE: loop exit
PB: predicated region body
PF: predicated region fallthrough
CT: control target
= control target key end

     0   :  { %8 = vsyncpa [#allocation3], 0  ;;  %s699_s12 = smov 0   ;;  %s834_s0 = inlined_call_operand.vmem [shape: bf16[128,48], index: 0, kind: input, shape index: {}]   ;;  %s835_s1 = inlined_call_operand.vmem [shape: bf16[48,128], index: 1, kind: input, shape index: {}]   ;;  %s836_s2 = inlined_call_operand.hbm [shape: f32[1,128], index: 2, kind: input, shape index: {}]   ;;  %s837_s3 = inlined_call_operand.vmem [shape: bf16[128,128], index: 3, kind: output, shape index: {}]  }
   0x1 LB: > { %s505_s13 = sadd.s32 4294967295, %s676_s12   ;;  %p507_p0 = scmp.ge.s32.totalorder %s676_s12, 1  ;;  %s676_s12 = sphi %s699_s12, %s14_s12  }
   0x2   : > { %p113_p1 = scmp.lt.s32.totalorder %s676_s12, 3  ;;  %p713_p3 = scmp.eq.s32.totalorder %s505_s13, 0 }
   0x3   : > { %s678_s16 = smov [#allocation2]   ;;  %s638_s21 = scalar_lea.hbm %s836_s2, 16 }
   0x4   : > { %p707_p2 = pnand %p507_p0, %p113_p1  ;;  %s129_s17 = sshll.u32 %s678_s16, 4  ;;  %s130_s17 = int_to_ptr.vmem [resolvable:$true] %s129_s17 }
   0x5   : > { %s842_s15 = scalar_select %p713_p3, 1, 0 }
   0x6   : > { %s841_s14 = scalar_select %p707_p2, 1, 0 }
   0x7   : > { %p600_p4 = pneg %p707_p2  ;;  %p639_p6 = scmp.ne.s32.totalorder %s836_s2, %s638_s21 }
   0x8   : > { %p645_p10 = scmp.lt.u32.totalorder %s638_s21, %s836_s2 }
   0x9   : > { %p721_p5 = pnand %p713_p3, %p600_p4 }
   0xb   : > { %p640_p7 = pneg %p721_p5 }
   0xd   : > { %p641_p8 = pnand %p640_p7, %p639_p6 }
   0xf   : > { %p642_p9 = pneg %p641_p8 }
  0x11   : > { %p647_p11 = pnand %p645_p10, %p642_p9 }
  0x13   : > { %650 = shalt.err (!%p647_p11)
}
  0x14   : > { %s651_s26 = scalar_lea.vmem %s130_s17, 16  ;;  %s658_s27 = scalar_lea.vmem %s130_s17, 32 }
  0x15   : > { %p652_p12 = scmp.ne.s32.totalorder %s130_s17, %s651_s26  ;;  %p659_p1 = scmp.lt.s32.totalorder %s130_s17, %s130_s17 }
  0x16   : > { %p660_p4 = scmp.lt.s32.totalorder %s658_s27, %s651_s26 }
  0x17   : > { %p654_p13 = pnand %p652_p12, %p640_p7 }
  0x18   : > { %p661_p3 = por %p660_p4, %p659_p1 }
  0x19   : > { %p655_p0 = pneg %p654_p13 }
  0x1b   : > { %p662_p2 = pnand %p661_p3, %p655_p0 }
  0x1d   : > { %665 = shalt.err (!%p662_p2)
}
  0x1e   : > { %603 = dma.hbm_to_vmem [thread:$0]  (!%p721_p5), %s836_s2, 16, %s130_s17, [#allocation3]  }
  0x1f   : > { %p844_p6 = scmp.ne.s32.totalorder %s841_s14, 0 }
  0x20   : > { %p845_p8 = scmp.ne.s32.totalorder (!%p844_p6), %s842_s15, 0 }
  0x21   : > { %151 = sbr.rel (%p844_p6) target bundleno = 305 (0x131), region = 32 }
  0x28   : > { %671 = dma.done.wait (%p845_p8), [#allocation3], 16  }
  0x29   : > { %673 = vsyncadd (%p845_p8), [#allocation3], 4294967280  ;;  %s512_s30 = sshll.u32 %s505_s13, 3  ;;  %v615_v0 = vld [vmem:[%s835_s1] sm:$0xff]   ;;  %v616_v1 = vld [vmem:[%s835_s1 + $0x8] sm:$0xff]   ;;  %vm247_vm0 = vcmask 392192  }
  0x2a   : > { %p176_p3 = scmp.lt.s32.totalorder %s512_s30, 15  ;;  %576 = vmatprep.subr.bf16.mxu0 %v615_v0  ;;  %590 = vmatprep.subr.bf16.mxu1 %v615_v0  ;;  %v617_v2 = vld [vmem:[%s835_s1 + $0x10] sm:$0xff]   ;;  %v516_v7 = vld [vmem:[#allocation2] ss:$0 sm:$0xff] }
  0x2b   : > { %577 = vmatpush3.bf16.msra.mxu0 %v615_v0  ;;  %593 = vmatpush3.bf16.msra.mxu1 %v615_v0 }
  0x2c   : > { %s847_s30 = smov (!%p176_p3, %s512_s30), 15  ;;  %578 = vmatprep.subr.bf16.mxu0 %v616_v1  ;;  %591 = vmatprep.subr.bf16.mxu1 %v616_v1 }
  0x2d   : > { %s513_s4 = sshll.u32 %s847_s30, 2 }
  0x2e   : > { %s179_s9 = scalar_lea.vmem %s834_s0, %s513_s4  ;;  %s185_s17 = scalar_lea.vmem %s837_s3, %s513_s4 }
  0x2f   : > { %v618_v3 = vld [vmem:[%s179_s9] sm:$0xff]   ;;  %v619_v4 = vld [vmem:[%s179_s9 + $0x10] sm:$0xff]   ;;  %579 = vmatpush3.bf16.msra.mxu0 %v616_v1  ;;  %594 = vmatpush3.bf16.msra.mxu1 %v616_v1  ;;  %v620_v5 = vld [vmem:[%s179_s9 + $0x8] sm:$0xff]  }
  0x30   : > { %582 = vmatprep.mubr.msk.bf16.mxu0 %vm247_vm0, %v618_v3  ;;  %586 = vmatprep.mubr.msk.bf16.mxu1 %vm247_vm0, %v619_v4  ;;  %v621_v6 = vld [vmem:[%s179_s9 + $0x18] sm:$0xff]  }
  0x31   : > { %580 = vmatprep.subr.bf16.mxu0 %v617_v2  ;;  %592 = vmatprep.subr.bf16.mxu1 %v617_v2 }
  0x33   : > { %581 = vmatpush3.bf16.msra.mxu0 %v617_v2  ;;  %595 = vmatpush3.bf16.msra.mxu1 %v617_v2 }
  0x36   : > { %583 = vmatmul.mubr.msk.bf16.vlgmr.msra.gmra.mrb[0].mxu0 %vm247_vm0, %v620_v5  ;;  %587 = vmatmul.mubr.msk.bf16.vlgmr.msra.gmra.mrb[0].mxu1 %vm247_vm0, %v621_v6 }
 0x109   : > { %v584_v8 = vpop.f32.mrb[0].mxu0  ;;  %v588_v9 = vpop.f32.mrb[0].mxu1 }
 0x10a   : > { %v770_v10 = vadd.f32 %v584_v8, %v516_v7  ;;  %v772_v11 = vadd.f32 %v588_v9, %v516_v7  ;;  %v294_v12 = vpop.f32.mrb[1].mxu0  ;;  %v310_v13 = vpop.f32.mrb[1].mxu1 }
 0x10b   : > { %v774_v14 = vadd.f32 %v516_v7, %v294_v12  ;;  %v776_v15 = vadd.f32 %v516_v7, %v310_v13  ;;  %v585_v16 = vpop.f32.mrb[2].mxu0  ;;  %v589_v17 = vpop.f32.mrb[2].mxu1 }
 0x10c   : > { %v327_v18 = vmul.f32 %v770_v10, %v770_v10  ;;  %v331_v19 = vmul.f32 %v772_v11, %v772_v11  ;;  %v782_v20 = vadd.f32 %v585_v16, %v516_v7  ;;  %v784_v21 = vadd.f32 %v589_v17, %v516_v7  ;;  %v297_v22 = vpop.f32.mrb[3].mxu0  ;;  %v313_v23 = vpop.f32.mrb[3].mxu1 }
 0x10d   : > { %v325_v24 = vmul.f32 %v774_v14, %v774_v14  ;;  %v329_v25 = vmul.f32 %v776_v15, %v776_v15  ;;  %v790_v26 = vadd.f32 %v516_v7, %v297_v22  ;;  %v792_v27 = vadd.f32 %v516_v7, %v313_v23 }
 0x10e   : > { %v335_v28 = vmul.f32 %v327_v18, %v770_v10  ;;  %v339_v29 = vmul.f32 %v331_v19, %v772_v11  ;;  %v328_v30 = vmul.f32 %v782_v20, %v782_v20  ;;  %v332_v31 = vmul.f32 %v784_v21, %v784_v21 }
 0x10f   : > { %v333_v32 = vmul.f32 %v325_v24, %v774_v14  ;;  %v337_v33 = vmul.f32 %v329_v25, %v776_v15  ;;  %v326_v34 = vmul.f32 %v790_v26, %v790_v26  ;;  %v330_v35 = vmul.f32 %v792_v27, %v792_v27 }
 0x110   : > { %v343_v36 = vmul.f32 0.044715, %v335_v28  ;;  %v347_v37 = vmul.f32 0.044715, %v339_v29  ;;  %v336_v38 = vmul.f32 %v328_v30, %v782_v20  ;;  %v340_v39 = vmul.f32 %v332_v31, %v784_v21 }
 0x111   : > { %v341_v40 = vmul.f32 0.044715, %v333_v32  ;;  %v345_v41 = vmul.f32 0.044715, %v337_v33  ;;  %v334_v42 = vmul.f32 %v326_v34, %v790_v26  ;;  %v338_v43 = vmul.f32 %v330_v35, %v792_v27 }
 0x112   : > { %v351_v44 = vadd.f32 %v343_v36, %v770_v10  ;;  %v355_v45 = vadd.f32 %v347_v37, %v772_v11  ;;  %v344_v46 = vmul.f32 0.044715, %v336_v38  ;;  %v348_v47 = vmul.f32 0.044715, %v340_v39 }
 0x113   : > { %v349_v48 = vadd.f32 %v341_v40, %v774_v14  ;;  %v353_v49 = vadd.f32 %v345_v41, %v776_v15  ;;  %v342_v50 = vmul.f32 0.044715, %v334_v42  ;;  %v346_v51 = vmul.f32 0.044715, %v338_v43 }
 0x114   : > { %v359_v52 = vmul.f32 0.7978846, %v351_v44  ;;  %v363_v53 = vmul.f32 0.7978846, %v355_v45  ;;  %v352_v54 = vadd.f32 %v344_v46, %v782_v20  ;;  %v356_v55 = vadd.f32 %v348_v47, %v784_v21 }
 0x115   : > { %v357_v56 = vmul.f32 0.7978846, %v349_v48  ;;  %v361_v57 = vmul.f32 0.7978846, %v353_v49  ;;  %v350_v58 = vadd.f32 %v342_v50, %v790_v26  ;;  %v354_v59 = vadd.f32 %v346_v51, %v792_v27 }
 0x116   : > { %622 = vtanh.f32 %v359_v52  ;;  %v360_v60 = vmul.f32 0.7978846, %v352_v54  ;;  %v364_v61 = vmul.f32 0.7978846, %v356_v55 }
 0x117   : > { %624 = vtanh.f32 %v363_v53  ;;  %v358_v62 = vmul.f32 0.7978846, %v350_v58  ;;  %v362_v63 = vmul.f32 0.7978846, %v354_v59 }
 0x118   : > { %626 = vtanh.f32 %v357_v56 }
 0x119   : > { %628 = vtanh.f32 %v361_v57 }
 0x11a   : > { %630 = vtanh.f32 %v360_v60 }
 0x11b   : > { %632 = vtanh.f32 %v364_v61 }
 0x11c   : > { %634 = vtanh.f32 %v358_v62 }
 0x11d   : > { %636 = vtanh.f32 %v362_v63 }
 0x120   : > { %v623_v0 = vpop.eup %622 }
 0x121   : > { %v625_v1 = vpop.eup %624  ;;  %v375_v2 = vadd.f32 1.0, %v623_v0 }
 0x122   : > { %v627_v3 = vpop.eup %626  ;;  %v379_v4 = vadd.f32 1.0, %v625_v1 }
 0x123   : > { %v629_v5 = vpop.eup %628  ;;  %v373_v6 = vadd.f32 1.0, %v627_v3  ;;  %v383_v12 = vmul.f32 0.5, %v375_v2 }
 0x124   : > { %v631_v7 = vpop.eup %630  ;;  %v377_v8 = vadd.f32 1.0, %v629_v5  ;;  %v387_v17 = vmul.f32 0.5, %v379_v4 }
 0x125   : > { %v633_v9 = vpop.eup %632  ;;  %v376_v13 = vadd.f32 1.0, %v631_v7  ;;  %v381_v22 = vmul.f32 0.5, %v373_v6  ;;  %v391_v30 = vmul.f32 %v383_v12, %v770_v10 }
 0x126   : > { %v635_v16 = vpop.eup %634  ;;  %v380_v18 = vadd.f32 1.0, %v633_v9  ;;  %v385_v25 = vmul.f32 0.5, %v377_v8  ;;  %v395_v33 = vmul.f32 %v387_v17, %v772_v11 }
 0x127   : > { %v637_v19 = vpop.eup %636  ;;  %v384_v23 = vmul.f32 0.5, %v376_v13  ;;  %v374_v24 = vadd.f32 1.0, %v635_v16  ;;  %v389_v36 = vmul.f32 %v381_v22, %v774_v14 }
 0x128   : > { %v388_v28 = vmul.f32 0.5, %v380_v18  ;;  %v378_v29 = vadd.f32 1.0, %v637_v19  ;;  %v393_v10 = vmul.f32 %v385_v25, %v776_v15 }
 0x129   : > { %v392_v31 = vmul.f32 %v384_v23, %v782_v20  ;;  %v382_v32 = vmul.f32 0.5, %v374_v24 }
 0x12a   : > { %v396_v34 = vmul.f32 %v388_v28, %v784_v21  ;;  %v386_v35 = vmul.f32 0.5, %v378_v29 }
 0x12b   : > { %v554_v37 = vpack.c.bf16 %v392_v31, %v391_v30  ;;  %v390_v38 = vmul.f32 %v382_v32, %v790_v26 }
 0x12c   : > { %v564_v39 = vpack.c.bf16 %v396_v34, %v395_v33  ;;  %v394_v20 = vmul.f32 %v386_v35, %v792_v27 }
 0x12d   : > { %566 = vst [vmem:[%s185_s17 + $0x8] sm:$0xff] %v554_v37   ;;  %v549_v11 = vpack.c.bf16 %v390_v38, %v389_v36 }
 0x12e   : > { %568 = vst [vmem:[%s185_s17 + $0x18] sm:$0xff] %v564_v39   ;;  %v559_v40 = vpack.c.bf16 %v394_v20, %v393_v10 }
 0x12f   : > { %550 = vst [vmem:[%s185_s17] sm:$0xff] %v549_v11  }
 0x130   : > { %567 = vst [vmem:[%s185_s17 + $0x10] sm:$0xff] %v559_v40  }
 0x131 PF: > { %s14_s12 = sadd.s32 1, %s676_s12  }
 0x132   : > { %p11_p2 = scmp.ge.s32.totalorder %s14_s12, 4  }
 0x134   :  { %13 = sbr.rel (!%p11_p2) target bundleno = 1 (0x1), region = 67 }
 0x13b   :  { %459 = vsyncpa [#allocation3], 1 }
 0x13c   :  { %461 = vsyncpa [#allocation3 + $0x1], 1 }

// kernel: transformer_net_forward.15
= control target key start
LH: loop header
LB: loop body
LE: loop exit
PB: predicated region body
PF: predicated region fallthrough
CT: control target
= control target key end

     0   :  { %s1034_s12 = smov 0   ;;  %s1258_s0 = inlined_call_operand.vmem [shape: bf16[32,512], index: 0, kind: input, shape index: {}]   ;;  %s1259_s1 = inlined_call_operand.vmem [shape: bf16[512,256], index: 1, kind: input, shape index: {}]   ;;  %s1260_s2 = inlined_call_operand.vmem [shape: f32[1,256], index: 2, kind: input, shape index: {}]   ;;  %s1261_s3 = inlined_call_operand.vmem [shape: bf16[32,256], index: 3, kind: output, shape index: {}]  }
   0x1 LB: > { %s793_s13 = sadd.s32 4294967295, %s1012_s12   ;;  %p797_p0 = scmp.ge.s32.totalorder %s1012_s12, 1  ;;  %s1012_s12 = sphi %s1034_s12, %s13_s12  }
   0x2   : > { %p139_p1 = scmp.lt.s32.totalorder %s1012_s12, 3 }
   0x4   : > { %p140_p2 = pnand %p797_p0, %p139_p1 }
   0x5   : > { %v896_v0 = vld [vmem:[%s1259_s1 + $0x4] ss:$8 sps:$4 sm:$0xff] (!%p140_p2)   ;;  %v900_v2 = vld [vmem:[%s1259_s1] ss:$8 sps:$4 sm:$0xff] (!%p140_p2)   ;;  %v902_v4 = vld [vmem:[%s1259_s1 + $0x14] ss:$8 sps:$4 sm:$0xff] (!%p140_p2)  }
   0x6   : > { %143 = sbr.rel (%p140_p2) target bundleno = 319 (0x13f), region = 32  ;;  %v898_v1 = vld [vmem:[%s1259_s1 + $0x104] ss:$8 sps:$4 sm:$0xff] (!%p140_p2)   ;;  %599 = vmatprep.subr.bf16.mxu1 (!%p140_p2), %v896_v0  ;;  %v901_v3 = vld [vmem:[%s1259_s1 + $0x100] ss:$8 sps:$4 sm:$0xff] (!%p140_p2)   ;;  %s798_s24 = sshll.u32 (!%p140_p2), %s793_s13, 1 }
   0x7   : > { %642 = vmatprep.subr.bf16.mxu0 (!%p140_p2), %v898_v1  ;;  %600 = vmatpush1.bf16.msra.mxu1 (!%p140_p2), %v900_v2  ;;  %v904_v5 = vld [vmem:[%s1259_s1 + $0x114] ss:$8 sps:$4 sm:$0xff] (!%p140_p2)   ;;  %v906_v6 = vld [vmem:[%s1259_s1 + $0x10] ss:$8 sps:$4 sm:$0xff] (!%p140_p2)   ;;  %v908_v8 = vld [vmem:[%s1259_s1 + $0x24] ss:$8 sps:$4 sm:$0xff] (!%p140_p2)  }
   0x8   : > { %643 = vmatpush1.bf16.msra.mxu0 (!%p140_p2), %v901_v3  ;;  %601 = vmatprep.subr.bf16.mxu1 (!%p140_p2), %v902_v4  ;;  %v907_v7 = vld [vmem:[%s1259_s1 + $0x110] ss:$8 sps:$4 sm:$0xff] (!%p140_p2)   ;;  %v910_v9 = vld [vmem:[%s1259_s1 + $0x124] ss:$8 sps:$4 sm:$0xff] (!%p140_p2)   ;;  %v912_v10 = vld [vmem:[%s1259_s1 + $0x20] ss:$8 sps:$4 sm:$0xff] (!%p140_p2)   ;;  %v249_v4 = vlaneseq (!%p140_p2) }
   0x9   : > { %644 = vmatprep.subr.bf16.mxu0 (!%p140_p2), %v904_v5  ;;  %v913_v11 = vld [vmem:[%s1259_s1 + $0x120] ss:$8 sps:$4 sm:$0xff] (!%p140_p2)   ;;  %v914_v12 = vld [vmem:[%s1259_s1 + $0x34] ss:$8 sps:$4 sm:$0xff] (!%p140_p2)   ;;  %v918_v14 = vld [vmem:[%s1259_s1 + $0x30] ss:$8 sps:$4 sm:$0xff] (!%p140_p2)  }
   0xa   : > { %v916_v13 = vld [vmem:[%s1259_s1 + $0x134] ss:$8 sps:$4 sm:$0xff] (!%p140_p2)   ;;  %v919_v15 = vld [vmem:[%s1259_s1 + $0x130] ss:$8 sps:$4 sm:$0xff] (!%p140_p2)   ;;  %v920_v16 = vld [vmem:[%s1259_s1 + $0x44] ss:$8 sps:$4 sm:$0xff] (!%p140_p2)  }
   0xb   : > { %602 = vmatpush1.bf16.msra.mxu1 (!%p140_p2), %v906_v6  ;;  %v922_v17 = vld [vmem:[%s1259_s1 + $0x144] ss:$8 sps:$4 sm:$0xff] (!%p140_p2)   ;;  %v924_v18 = vld [vmem:[%s1259_s1 + $0x40] ss:$8 sps:$4 sm:$0xff] (!%p140_p2)   ;;  %v926_v20 = vld [vmem:[%s1259_s1 + $0x54] ss:$8 sps:$4 sm:$0xff] (!%p140_p2)  }
   0xc   : > { %645 = vmatpush1.bf16.msra.mxu0 (!%p140_p2), %v907_v7  ;;  %603 = vmatprep.subr.bf16.mxu1 (!%p140_p2), %v908_v8  ;;  %v925_v19 = vld [vmem:[%s1259_s1 + $0x140] ss:$8 sps:$4 sm:$0xff] (!%p140_p2)   ;;  %v928_v21 = vld [vmem:[%s1259_s1 + $0x154] ss:$8 sps:$4 sm:$0xff] (!%p140_p2)   ;;  %v930_v22 = vld [vmem:[%s1259_s1 + $0x50] ss:$8 sps:$4 sm:$0xff] (!%p140_p2)  }
   0xd   : > { %646 = vmatprep.subr.bf16.mxu0 %v910_v9  ;;  %v931_v23 = vld [vmem:[%s1259_s1 + $0x150] ss:$8 sps:$4 sm:$0xff]   ;;  %v932_v24 = vld [vmem:[%s1259_s1 + $0x64] ss:$8 sps:$4 sm:$0xff]   ;;  %v936_v26 = vld [vmem:[%s1259_s1 + $0x60] ss:$8 sps:$4 sm:$0xff]  }
   0xe   : > { %v934_v25 = vld [vmem:[%s1259_s1 + $0x164] ss:$8 sps:$4 sm:$0xff]   ;;  %v937_v27 = vld [vmem:[%s1259_s1 + $0x160] ss:$8 sps:$4 sm:$0xff]   ;;  %v938_v28 = vld [vmem:[%s1259_s1 + $0x74] ss:$8 sps:$4 sm:$0xff]  }
   0xf   : > { %604 = vmatpush1.bf16.msra.mxu1 %v912_v10  ;;  %v940_v29 = vld [vmem:[%s1259_s1 + $0x174] ss:$8 sps:$4 sm:$0xff]   ;;  %v942_v30 = vld [vmem:[%s1259_s1 + $0x70] ss:$8 sps:$4 sm:$0xff]   ;;  %v944_v32 = vld [vmem:[%s1259_s1 + $0x84] ss:$8 sps:$4 sm:$0xff]  }
  0x10   : > { %647 = vmatpush1.bf16.msra.mxu0 %v913_v11  ;;  %605 = vmatprep.subr.bf16.mxu1 %v914_v12  ;;  %v943_v31 = vld [vmem:[%s1259_s1 + $0x170] ss:$8 sps:$4 sm:$0xff]   ;;  %v946_v33 = vld [vmem:[%s1259_s1 + $0x184] ss:$8 sps:$4 sm:$0xff]   ;;  %p166_p3 = scmp.lt.s32.totalorder %s798_s24, 3  ;;  %v250_v5 = vshrl.u32 %v249_v4, 7 }
  0x11   : > { %648 = vmatprep.subr.bf16.mxu0 %v916_v13  ;;  %v948_v34 = vld [vmem:[%s1259_s1 + $0x80] ss:$8 sps:$4 sm:$0xff]   ;;  %v950_v36 = vld [vmem:[%s1259_s1 + $0x94] ss:$8 sps:$4 sm:$0xff]   ;;  %v954_v38 = vld [vmem:[%s1259_s1 + $0x90] ss:$8 sps:$4 sm:$0xff]  }
  0x12   : > { %v949_v35 = vld [vmem:[%s1259_s1 + $0x180] ss:$8 sps:$4 sm:$0xff]   ;;  %v952_v37 = vld [vmem:[%s1259_s1 + $0x194] ss:$8 sps:$4 sm:$0xff]   ;;  %s1263_s24 = smov (!%p166_p3, %s798_s24), 3  ;;  %v251_v6 = vsub.s32 0, %v250_v5 }
  0x13   : > { %606 = vmatpush1.bf16.msra.mxu1 %v918_v14  ;;  %v955_v39 = vld [vmem:[%s1259_s1 + $0x190] ss:$8 sps:$4 sm:$0xff]   ;;  %v956_v40 = vld [vmem:[%s1259_s1 + $0xa4] ss:$8 sps:$4 sm:$0xff]   ;;  %s876_s23 = sshll.u32 %s1263_s24, 4  ;;  %v255_v8 = vsub.s32 1, %v250_v5 }
  0x14   : > { %649 = vmatpush1.bf16.msra.mxu0 %v919_v15  ;;  %607 = vmatprep.subr.bf16.mxu1 %v920_v16  ;;  %v958_v41 = vld [vmem:[%s1259_s1 + $0x1a4] ss:$8 sps:$4 sm:$0xff]   ;;  %v960_v42 = vld [vmem:[%s1259_s1 + $0xa0] ss:$8 sps:$4 sm:$0xff]   ;;  %v962_v44 = vld [vmem:[%s1259_s1 + $0xb4] ss:$8 sps:$4 sm:$0xff]   ;;  %s1185_s13 = scalar_lea.vmem %s1258_s0, %s876_s23 }
  0x15   : > { %650 = vmatprep.subr.bf16.mxu0 %v922_v17  ;;  %v961_v43 = vld [vmem:[%s1259_s1 + $0x1a0] ss:$8 sps:$4 sm:$0xff]   ;;  %v964_v45 = vld [vmem:[%s1259_s1 + $0x1b4] ss:$8 sps:$4 sm:$0xff]   ;;  %v966_v46 = vld [vmem:[%s1259_s1 + $0xb0] ss:$8 sps:$4 sm:$0xff]  }
  0x16   : > { %v994_v47 = vld [vmem:[%s1185_s13 + $0x4] ss:$16 sps:$4 sm:$0xff]   ;;  %v967_v48 = vld [vmem:[%s1259_s1 + $0x1b0] ss:$8 sps:$4 sm:$0xff]   ;;  %v997_v51 = vld [vmem:[%s1185_s13 + $0xc] ss:$16 sps:$4 sm:$0xff]  }
  0x17   : > { %608 = vmatpush1.bf16.msra.mxu1 %v924_v18  ;;  %v968_v49 = vld [vmem:[%s1259_s1 + $0xc4] ss:$8 sps:$4 sm:$0xff]   ;;  %631 = vmatprep.mubr.bf16.mxu1 %v994_v47  ;;  %v972_v52 = vld [vmem:[%s1259_s1 + $0xc0] ss:$8 sps:$4 sm:$0xff]   ;;  %v974_v54 = vld [vmem:[%s1259_s1 + $0xd4] ss:$8 sps:$4 sm:$0xff]  }
  0x18   : > { %651 = vmatpush1.bf16.msra.mxu0 %v925_v19  ;;  %609 = vmatprep.subr.bf16.mxu1 %v926_v20  ;;  %v970_v50 = vld [vmem:[%s1259_s1 + $0x1c4] ss:$8 sps:$4 sm:$0xff]   ;;  %v973_v53 = vld [vmem:[%s1259_s1 + $0x1c0] ss:$8 sps:$4 sm:$0xff]   ;;  %v976_v55 = vld [vmem:[%s1259_s1 + $0x1d4] ss:$8 sps:$4 sm:$0xff]  }
  0x19   : > { %652 = vmatprep.subr.bf16.mxu0 %v928_v21  ;;  %674 = vmatprep.mubr.bf16.mxu0 %v997_v51  ;;  %v978_v56 = vld [vmem:[%s1259_s1 + $0xd0] ss:$8 sps:$4 sm:$0xff]   ;;  %v980_v58 = vld [vmem:[%s1259_s1 + $0xe4] ss:$8 sps:$4 sm:$0xff]   ;;  %v984_v60 = vld [vmem:[%s1259_s1 + $0xe0] ss:$8 sps:$4 sm:$0xff]  }
  0x1a   : > { %v979_v57 = vld [vmem:[%s1259_s1 + $0x1d0] ss:$8 sps:$4 sm:$0xff]   ;;  %v982_v59 = vld [vmem:[%s1259_s1 + $0x1e4] ss:$8 sps:$4 sm:$0xff]   ;;  %v985_v61 = vld [vmem:[%s1259_s1 + $0x1e0] ss:$8 sps:$4 sm:$0xff]  }
  0x1b   : > { %610 = vmatpush1.bf16.msra.mxu1 %v930_v22  ;;  %v986_v62 = vld [vmem:[%s1259_s1 + $0xf4] ss:$8 sps:$4 sm:$0xff]   ;;  %v990_v0 = vld [vmem:[%s1259_s1 + $0xf0] ss:$8 sps:$4 sm:$0xff]   ;;  %v247_v7 = vld [vmem:[%s1260_s2] sm:$0x3] }
  0x1c   : > { %653 = vmatpush1.bf16.msra.mxu0 %v931_v23  ;;  %611 = vmatprep.subr.bf16.mxu1 %v932_v24  ;;  %v988_v63 = vld [vmem:[%s1259_s1 + $0x1f4] ss:$8 sps:$4 sm:$0xff]   ;;  %v991_v1 = vld [vmem:[%s1259_s1 + $0x1f0] ss:$8 sps:$4 sm:$0xff]   ;;  %v252_v9 = vrot.slane %v247_v7, %v251_v6  ;;  %v256_v10 = vrot.slane %v247_v7, %v255_v8 }
  0x1d   : > { %654 = vmatprep.subr.bf16.mxu0 %v934_v25  ;;  %v992_v2 = vld [vmem:[%s1185_s13] ss:$16 sps:$4 sm:$0xff]   ;;  %v995_v3 = vld [vmem:[%s1185_s13 + $0x8] ss:$16 sps:$4 sm:$0xff]   ;;  %s877_s13 = sshll.u32 %s1263_s24, 3 }
  0x1e   : > { %s177_s27 = scalar_lea.vmem %s1261_s3, %s877_s13 }
  0x1f   : > { %612 = vmatpush1.bf16.msra.mxu1 %v936_v26 }
  0x20   : > { %655 = vmatpush1.bf16.msra.mxu0 %v937_v27  ;;  %613 = vmatprep.subr.bf16.mxu1 %v938_v28 }
  0x21   : > { %656 = vmatprep.subr.bf16.mxu0 %v940_v29 }
  0x23   : > { %614 = vmatpush1.bf16.msra.mxu1 %v942_v30 }
  0x24   : > { %657 = vmatpush1.bf16.msra.mxu0 %v943_v31  ;;  %615 = vmatprep.subr.bf16.mxu1 %v944_v32 }
  0x25   : > { %658 = vmatprep.subr.bf16.mxu0 %v946_v33 }
  0x27   : > { %616 = vmatpush1.bf16.msra.mxu1 %v948_v34 }
  0x28   : > { %659 = vmatpush1.bf16.msra.mxu0 %v949_v35  ;;  %617 = vmatprep.subr.bf16.mxu1 %v950_v36 }
  0x29   : > { %660 = vmatprep.subr.bf16.mxu0 %v952_v37 }
  0x2b   : > { %618 = vmatpush1.bf16.msra.mxu1 %v954_v38 }
  0x2c   : > { %661 = vmatpush1.bf16.msra.mxu0 %v955_v39  ;;  %619 = vmatprep.subr.bf16.mxu1 %v956_v40 }
  0x2d   : > { %662 = vmatprep.subr.bf16.mxu0 %v958_v41 }
  0x2f   : > { %620 = vmatpush1.bf16.msra.mxu1 %v960_v42 }
  0x30   : > { %663 = vmatpush1.bf16.msra.mxu0 %v961_v43  ;;  %621 = vmatprep.subr.bf16.mxu1 %v962_v44 }
  0x31   : > { %664 = vmatprep.subr.bf16.mxu0 %v964_v45 }
  0x33   : > { %622 = vmatpush1.bf16.msra.mxu1 %v966_v46 }
  0x34   : > { %665 = vmatpush1.bf16.msra.mxu0 %v967_v48  ;;  %623 = vmatprep.subr.bf16.mxu1 %v968_v49 }
  0x35   : > { %666 = vmatprep.subr.bf16.mxu0 %v970_v50 }
  0x37   : > { %624 = vmatpush1.bf16.msra.mxu1 %v972_v52 }
  0x38   : > { %667 = vmatpush1.bf16.msra.mxu0 %v973_v53  ;;  %625 = vmatprep.subr.bf16.mxu1 %v974_v54 }
  0x39   : > { %668 = vmatprep.subr.bf16.mxu0 %v976_v55 }
  0x3b   : > { %626 = vmatpush1.bf16.msra.mxu1 %v978_v56 }
  0x3c   : > { %669 = vmatpush1.bf16.msra.mxu0 %v979_v57  ;;  %627 = vmatprep.subr.bf16.mxu1 %v980_v58 }
  0x3d   : > { %670 = vmatprep.subr.bf16.mxu0 %v982_v59 }
  0x3f   : > { %628 = vmatpush1.bf16.msra.mxu1 %v984_v60 }
  0x40   : > { %671 = vmatpush1.bf16.msra.mxu0 %v985_v61  ;;  %629 = vmatprep.subr.bf16.mxu1 %v986_v62 }
  0x41   : > { %672 = vmatprep.subr.bf16.mxu0 %v988_v63 }
  0x43   : > { %630 = vmatpush1.bf16.msra.mxu1 %v990_v0 }
  0x44   : > { %673 = vmatpush1.bf16.msra.mxu0 %v991_v1 }
  0x46   : > { %632 = vmatmul.mubr.bf16.vlgmr.msra.gmra.mrb[0].mxu1 %v992_v2 }
  0x47   : > { %675 = vmatmul.mubr.bf16.vlgmr.msra.gmra.mrb[0].mxu0 %v995_v3 }
 0x119   : > { %v633_v11 = vpop.f32.mrb[0].mxu1 }
 0x11a   : > { %v676_v12 = vpop.f32.mrb[0].mxu0  ;;  %v634_v13 = vadd.f32 %v633_v11, %v252_v9  ;;  %v635_v14 = vpop.f32.mrb[1].mxu1 }
 0x11b   : > { %v678_v15 = vpop.f32.mrb[1].mxu0  ;;  %v636_v16 = vadd.f32 %v635_v14, %v256_v10  ;;  %v637_v17 = vpop.f32.mrb[2].mxu1 }
 0x11c   : > { %v680_v18 = vpop.f32.mrb[2].mxu0  ;;  %v677_v19 = vadd.f32 %v676_v12, %v634_v13  ;;  %v638_v20 = vadd.f32 %v637_v17, %v252_v9  ;;  %v639_v21 = vpop.f32.mrb[3].mxu1 }
 0x11d   : > { %v682_v22 = vpop.f32.mrb[3].mxu0  ;;  %v679_v23 = vadd.f32 %v678_v15, %v636_v16  ;;  %v640_v24 = vadd.f32 %v639_v21, %v256_v10 }
 0x11e   : > { %v685_v25 = vmul.f32 %v677_v19, %v677_v19  ;;  %v681_v26 = vadd.f32 %v680_v18, %v638_v20 }
 0x11f   : > { %v686_v27 = vmul.f32 %v679_v23, %v679_v23  ;;  %v683_v28 = vadd.f32 %v682_v22, %v640_v24 }
 0x120   : > { %v689_v29 = vmul.f32 %v685_v25, %v677_v19  ;;  %v687_v30 = vmul.f32 %v681_v26, %v681_v26 }
 0x121   : > { %v690_v31 = vmul.f32 %v686_v27, %v679_v23  ;;  %v688_v32 = vmul.f32 %v683_v28, %v683_v28 }
 0x122   : > { %v693_v33 = vmul.f32 0.044715, %v689_v29  ;;  %v691_v34 = vmul.f32 %v687_v30, %v681_v26 }
 0x123   : > { %v694_v35 = vmul.f32 0.044715, %v690_v31  ;;  %v692_v36 = vmul.f32 %v688_v32, %v683_v28 }
 0x124   : > { %v697_v37 = vadd.f32 %v693_v33, %v677_v19  ;;  %v695_v38 = vmul.f32 0.044715, %v691_v34 }
 0x125   : > { %v698_v39 = vadd.f32 %v694_v35, %v679_v23  ;;  %v696_v40 = vmul.f32 0.044715, %v692_v36 }
 0x126   : > { %v701_v41 = vmul.f32 0.7978846, %v697_v37  ;;  %v699_v42 = vadd.f32 %v695_v38, %v681_v26 }
 0x127   : > { %v702_v43 = vmul.f32 0.7978846, %v698_v39  ;;  %v700_v44 = vadd.f32 %v696_v40, %v683_v28 }
 0x128   : > { %998 = vtanh.f32 %v701_v41  ;;  %v703_v45 = vmul.f32 0.7978846, %v699_v42 }
 0x129   : > { %1000 = vtanh.f32 %v702_v43  ;;  %v704_v46 = vmul.f32 0.7978846, %v700_v44 }
 0x12a   : > { %1002 = vtanh.f32 %v703_v45 }
 0x12b   : > { %1004 = vtanh.f32 %v704_v46 }
 0x132   : > { %v999_v47 = vpop.eup %998 }
 0x133   : > { %v1001_v48 = vpop.eup %1000  ;;  %v709_v49 = vadd.f32 1.0, %v999_v47 }
 0x134   : > { %v1003_v50 = vpop.eup %1002  ;;  %v710_v51 = vadd.f32 1.0, %v1001_v48 }
 0x135   : > { %v1005_v52 = vpop.eup %1004  ;;  %v713_v53 = vmul.f32 0.5, %v709_v49  ;;  %v711_v54 = vadd.f32 1.0, %v1003_v50 }
 0x136   : > { %v714_v55 = vmul.f32 0.5, %v710_v51  ;;  %v712_v56 = vadd.f32 1.0, %v1005_v52 }
 0x137   : > { %v717_v57 = vmul.f32 %v713_v53, %v677_v19  ;;  %v715_v58 = vmul.f32 0.5, %v711_v54 }
 0x138   : > { %v718_v59 = vmul.f32 %v714_v55, %v679_v23  ;;  %v716_v60 = vmul.f32 0.5, %v712_v56 }
 0x139   : > { %v719_v61 = vmul.f32 %v715_v58, %v681_v26 }
 0x13a   : > { %v878_v62 = vpack.c.bf16 %v718_v59, %v717_v57  ;;  %v720_v63 = vmul.f32 %v716_v60, %v683_v28 }
 0x13c   : > { %733 = vst [vmem:[%s177_s27] sm:$0xff] %v878_v62  ;;  %v879_v0 = vpack.c.bf16 %v720_v63, %v719_v61 }
 0x13e   : > { %734 = vst [vmem:[%s177_s27 + $0x8] sm:$0xff] %v879_v0 }
 0x13f PF: > { %s13_s12 = sadd.s32 1, %s1012_s12  }
 0x140   : > { %p10_p4 = scmp.ge.s32.totalorder %s13_s12, 4  }
 0x142   :  { %12 = sbr.rel (!%p10_p4) target bundleno = 1 (0x1), region = 62 }

// kernel: transformer_net_forward.16
= control target key start
LH: loop header
LB: loop body
LE: loop exit
PB: predicated region body
PF: predicated region fallthrough
CT: control target
= control target key end

     0   :  { %s2544_s12 = smov 0   ;;  %s3190_s0 = inlined_call_operand.vmem [shape: bf16[16,1024], index: 0, kind: input, shape index: {}]   ;;  %s3191_s1 = inlined_call_operand.vmem [shape: bf16[1024,384], index: 1, kind: input, shape index: {}]   ;;  %s3192_s2 = inlined_call_operand.vmem [shape: f32[1,384], index: 2, kind: input, shape index: {}]   ;;  %s3193_s3 = inlined_call_operand.vmem [shape: bf16[16,384], index: 3, kind: output, shape index: {}]  }
   0x1 LB: > { %s1922_s13 = sadd.s32 4294967295, %s2522_s12   ;;  %p1926_p0 = scmp.ge.s32.totalorder %s2522_s12, 1  ;;  %s2522_s12 = sphi %s2544_s12, %s13_s12  }
   0x2   : > { %p137_p1 = scmp.lt.s32.totalorder %s2522_s12, 3 }
   0x4   : > { %p138_p2 = pnand %p1926_p0, %p137_p1 }
   0x5   : > { %v2246_v0 = vld [vmem:[%s3191_s1 + $0x4] ss:$12 sps:$4 sm:$0xff] (!%p138_p2)   ;;  %v2250_v2 = vld [vmem:[%s3191_s1] ss:$12 sps:$4 sm:$0xff] (!%p138_p2)   ;;  %v2252_v4 = vld [vmem:[%s3191_s1 + $0x1c] ss:$12 sps:$4 sm:$0xff] (!%p138_p2)  }
   0x6   : > { %141 = sbr.rel (%p138_p2) target bundleno = 445 (0x1bd), region = 32  ;;  %v2248_v1 = vld [vmem:[%s3191_s1 + $0x184] ss:$12 sps:$4 sm:$0xff] (!%p138_p2)   ;;  %1501 = vmatprep.subr.bf16.mxu1 (!%p138_p2), %v2246_v0  ;;  %v2251_v3 = vld [vmem:[%s3191_s1 + $0x180] ss:$12 sps:$4 sm:$0xff] (!%p138_p2)   ;;  %p161_p3 = scmp.lt.s32.totalorder (!%p138_p2), %s1922_s13, 1 }
   0x7   : > { %1542 = vmatprep.subr.bf16.mxu0 (!%p138_p2), %v2248_v1  ;;  %1502 = vmatpush1.bf16.msra.mxu1 (!%p138_p2), %v2250_v2  ;;  %v2254_v5 = vld [vmem:[%s3191_s1 + $0x19c] ss:$12 sps:$4 sm:$0xff] (!%p138_p2)   ;;  %v2256_v6 = vld [vmem:[%s3191_s1 + $0x18] ss:$12 sps:$4 sm:$0xff] (!%p138_p2)   ;;  %v2258_v8 = vld [vmem:[%s3191_s1 + $0x34] ss:$12 sps:$4 sm:$0xff] (!%p138_p2)  }
   0x8   : > { %1543 = vmatpush1.bf16.msra.mxu0 (!%p138_p2), %v2251_v3  ;;  %1503 = vmatprep.subr.bf16.mxu1 (!%p138_p2), %v2252_v4  ;;  %v2257_v7 = vld [vmem:[%s3191_s1 + $0x198] ss:$12 sps:$4 sm:$0xff] (!%p138_p2)   ;;  %v2260_v9 = vld [vmem:[%s3191_s1 + $0x1b4] ss:$12 sps:$4 sm:$0xff] (!%p138_p2)   ;;  %v2262_v10 = vld [vmem:[%s3191_s1 + $0x30] ss:$12 sps:$4 sm:$0xff] (!%p138_p2)  }
   0x9   : > { %1544 = vmatprep.subr.bf16.mxu0 (!%p138_p2), %v2254_v5  ;;  %v2263_v11 = vld [vmem:[%s3191_s1 + $0x1b0] ss:$12 sps:$4 sm:$0xff] (!%p138_p2)   ;;  %v2264_v12 = vld [vmem:[%s3191_s1 + $0x4c] ss:$12 sps:$4 sm:$0xff] (!%p138_p2)   ;;  %v2268_v14 = vld [vmem:[%s3191_s1 + $0x48] ss:$12 sps:$4 sm:$0xff] (!%p138_p2)  }
   0xa   : > { %v2266_v13 = vld [vmem:[%s3191_s1 + $0x1cc] ss:$12 sps:$4 sm:$0xff] (!%p138_p2)   ;;  %v2269_v15 = vld [vmem:[%s3191_s1 + $0x1c8] ss:$12 sps:$4 sm:$0xff] (!%p138_p2)   ;;  %v2270_v16 = vld [vmem:[%s3191_s1 + $0x64] ss:$12 sps:$4 sm:$0xff] (!%p138_p2)  }
   0xb   : > { %1504 = vmatpush1.bf16.msra.mxu1 (!%p138_p2), %v2256_v6  ;;  %v2272_v17 = vld [vmem:[%s3191_s1 + $0x1e4] ss:$12 sps:$4 sm:$0xff] (!%p138_p2)   ;;  %v2274_v18 = vld [vmem:[%s3191_s1 + $0x60] ss:$12 sps:$4 sm:$0xff] (!%p138_p2)   ;;  %v2276_v20 = vld [vmem:[%s3191_s1 + $0x7c] ss:$12 sps:$4 sm:$0xff] (!%p138_p2)  }
   0xc   : > { %1545 = vmatpush1.bf16.msra.mxu0 (!%p138_p2), %v2257_v7  ;;  %1505 = vmatprep.subr.bf16.mxu1 (!%p138_p2), %v2258_v8  ;;  %v2275_v19 = vld [vmem:[%s3191_s1 + $0x1e0] ss:$12 sps:$4 sm:$0xff] (!%p138_p2)   ;;  %v2278_v21 = vld [vmem:[%s3191_s1 + $0x1fc] ss:$12 sps:$4 sm:$0xff] (!%p138_p2)   ;;  %v2280_v22 = vld [vmem:[%s3191_s1 + $0x78] ss:$12 sps:$4 sm:$0xff] (!%p138_p2)  }
   0xd   : > { %1546 = vmatprep.subr.bf16.mxu0 %v2260_v9  ;;  %v2281_v23 = vld [vmem:[%s3191_s1 + $0x1f8] ss:$12 sps:$4 sm:$0xff]   ;;  %v2282_v24 = vld [vmem:[%s3191_s1 + $0x94] ss:$12 sps:$4 sm:$0xff]   ;;  %v2286_v26 = vld [vmem:[%s3191_s1 + $0x90] ss:$12 sps:$4 sm:$0xff]  }
   0xe   : > { %v2284_v25 = vld [vmem:[%s3191_s1 + $0x214] ss:$12 sps:$4 sm:$0xff]   ;;  %v2287_v27 = vld [vmem:[%s3191_s1 + $0x210] ss:$12 sps:$4 sm:$0xff]   ;;  %v2288_v28 = vld [vmem:[%s3191_s1 + $0xac] ss:$12 sps:$4 sm:$0xff]  }
   0xf   : > { %1506 = vmatpush1.bf16.msra.mxu1 %v2262_v10  ;;  %v2290_v29 = vld [vmem:[%s3191_s1 + $0x22c] ss:$12 sps:$4 sm:$0xff]   ;;  %v2292_v30 = vld [vmem:[%s3191_s1 + $0xa8] ss:$12 sps:$4 sm:$0xff]   ;;  %v2294_v32 = vld [vmem:[%s3191_s1 + $0xc4] ss:$12 sps:$4 sm:$0xff]  }
  0x10   : > { %1547 = vmatpush1.bf16.msra.mxu0 %v2263_v11  ;;  %1507 = vmatprep.subr.bf16.mxu1 %v2264_v12  ;;  %v2293_v31 = vld [vmem:[%s3191_s1 + $0x228] ss:$12 sps:$4 sm:$0xff]   ;;  %v2296_v33 = vld [vmem:[%s3191_s1 + $0x244] ss:$12 sps:$4 sm:$0xff]   ;;  %v2298_v34 = vld [vmem:[%s3191_s1 + $0xc0] ss:$12 sps:$4 sm:$0xff]  }
  0x11   : > { %1548 = vmatprep.subr.bf16.mxu0 %v2266_v13  ;;  %v2299_v35 = vld [vmem:[%s3191_s1 + $0x240] ss:$12 sps:$4 sm:$0xff]   ;;  %v2300_v36 = vld [vmem:[%s3191_s1 + $0xdc] ss:$12 sps:$4 sm:$0xff]   ;;  %s3195_s13 = smov (!%p161_p3, %s1922_s13), 1 }
  0x12   : > { %v2302_v37 = vld [vmem:[%s3191_s1 + $0x25c] ss:$12 sps:$4 sm:$0xff]   ;;  %v2304_v38 = vld [vmem:[%s3191_s1 + $0xd8] ss:$12 sps:$4 sm:$0xff]   ;;  %v2306_v40 = vld [vmem:[%s3191_s1 + $0xf4] ss:$12 sps:$4 sm:$0xff]  }
  0x13   : > { %1508 = vmatpush1.bf16.msra.mxu1 %v2268_v14  ;;  %v2305_v39 = vld [vmem:[%s3191_s1 + $0x258] ss:$12 sps:$4 sm:$0xff]   ;;  %s2134_s21 = sshll.u32 %s3195_s13, 5  ;;  %v2308_v41 = vld [vmem:[%s3191_s1 + $0x274] ss:$12 sps:$4 sm:$0xff]   ;;  %s2237_s11 = smul.u32 12, %s3195_s13 }
  0x14   : > { %1549 = vmatpush1.bf16.msra.mxu0 %v2269_v15  ;;  %1509 = vmatprep.subr.bf16.mxu1 %v2270_v16  ;;  %v2310_v42 = vld [vmem:[%s3191_s1 + $0xf0] ss:$12 sps:$4 sm:$0xff]   ;;  %s2694_s30 = scalar_lea.vmem %s3190_s0, %s2134_s21  ;;  %v2312_v44 = vld [vmem:[%s3191_s1 + $0x10c] ss:$12 sps:$4 sm:$0xff]   ;;  %v2316_v46 = vld [vmem:[%s3191_s1 + $0x108] ss:$12 sps:$4 sm:$0xff]  }
  0x15   : > { %1550 = vmatprep.subr.bf16.mxu0 %v2272_v17  ;;  %v2311_v43 = vld [vmem:[%s3191_s1 + $0x270] ss:$12 sps:$4 sm:$0xff]   ;;  %v2314_v45 = vld [vmem:[%s3191_s1 + $0x28c] ss:$12 sps:$4 sm:$0xff]   ;;  %v172_v47 = vld [vmem:[%s2694_s30] sm:$0xff] }
  0x16   : > { %v2706_v48 = vcombine.high %v172_v47, %v172_v47  ;;  %v173_v49 = vld [vmem:[%s2694_s30 + $0x8] sm:$0xff]  ;;  %v2318_v51 = vld [vmem:[%s3191_s1 + $0x124] ss:$12 sps:$4 sm:$0xff]   ;;  %v2330_v60 = vld [vmem:[%s3191_s1 + $0x154] ss:$12 sps:$4 sm:$0xff]   ;;  %v2770_v6 = vcombine.low %v172_v47, %v172_v47 }
  0x17   : > { %1510 = vmatpush1.bf16.msra.mxu1 %v2274_v18  ;;  %v2317_v50 = vld [vmem:[%s3191_s1 + $0x288] ss:$12 sps:$4 sm:$0xff]   ;;  %v2715_v52 = vcombine.high %v173_v49, %v173_v49  ;;  %v2320_v53 = vld [vmem:[%s3191_s1 + $0x2a4] ss:$12 sps:$4 sm:$0xff]   ;;  %v2322_v54 = vld [vmem:[%s3191_s1 + $0x120] ss:$12 sps:$4 sm:$0xff]   ;;  %v2772_v7 = vcombine.low %v173_v49, %v173_v49 }
  0x18   : > { %1551 = vmatpush1.bf16.msra.mxu0 %v2275_v19  ;;  %1511 = vmatprep.subr.bf16.mxu1 %v2276_v20  ;;  %v2323_v55 = vld [vmem:[%s3191_s1 + $0x2a0] ss:$12 sps:$4 sm:$0xff]   ;;  %v2324_v56 = vld [vmem:[%s3191_s1 + $0x13c] ss:$12 sps:$4 sm:$0xff]   ;;  %v2328_v58 = vld [vmem:[%s3191_s1 + $0x138] ss:$12 sps:$4 sm:$0xff]  }
  0x19   : > { %1552 = vmatprep.subr.bf16.mxu0 %v2278_v21  ;;  %1533 = vmatprep.mubr.bf16.mxu1 %v2706_v48  ;;  %v2326_v57 = vld [vmem:[%s3191_s1 + $0x2bc] ss:$12 sps:$4 sm:$0xff]   ;;  %v2329_v59 = vld [vmem:[%s3191_s1 + $0x2b8] ss:$12 sps:$4 sm:$0xff]   ;;  %v2332_v61 = vld [vmem:[%s3191_s1 + $0x2d4] ss:$12 sps:$4 sm:$0xff]  }
  0x1a   : > { %1574 = vmatprep.mubr.bf16.mxu0 %v2715_v52  ;;  %v2334_v62 = vld [vmem:[%s3191_s1 + $0x150] ss:$12 sps:$4 sm:$0xff]   ;;  %v2336_v0 = vld [vmem:[%s3191_s1 + $0x16c] ss:$12 sps:$4 sm:$0xff]   ;;  %v2340_v2 = vld [vmem:[%s3191_s1 + $0x168] ss:$12 sps:$4 sm:$0xff]  }
  0x1b   : > { %1512 = vmatpush1.bf16.msra.mxu1 %v2280_v22  ;;  %v2335_v63 = vld [vmem:[%s3191_s1 + $0x2d0] ss:$12 sps:$4 sm:$0xff]   ;;  %v2338_v1 = vld [vmem:[%s3191_s1 + $0x2ec] ss:$12 sps:$4 sm:$0xff]   ;;  %v2341_v3 = vld [vmem:[%s3191_s1 + $0x2e8] ss:$12 sps:$4 sm:$0xff]  }
  0x1c   : > { %1553 = vmatpush1.bf16.msra.mxu0 %v2281_v23  ;;  %1513 = vmatprep.subr.bf16.mxu1 %v2282_v24  ;;  %v2348_v4 = vld [vmem:[%s3191_s1 + $0x304] ss:$12 sps:$4 sm:$0xff]   ;;  %v2349_v5 = vld [vmem:[%s3191_s1 + $0xc8] ss:$12 sps:$4 sm:$0xff]   ;;  %v2346_v8 = vld [vmem:[%s3191_s1 + $0x300] ss:$12 sps:$4 sm:$0xff]  }
  0x1d   : > { %1554 = vmatprep.subr.bf16.mxu0 %v2284_v25  ;;  %v2350_v9 = vld [vmem:[%s3191_s1 + $0x8] ss:$12 sps:$4 sm:$0xff]   ;;  %v2354_v11 = vld [vmem:[%s3191_s1 + $0xe0] ss:$12 sps:$4 sm:$0xff]   ;;  %v2351_v12 = vld [vmem:[%s3191_s1 + $0x318] ss:$12 sps:$4 sm:$0xff]  }
  0x1e   : > { %v2353_v10 = vld [vmem:[%s3191_s1 + $0x31c] ss:$12 sps:$4 sm:$0xff]   ;;  %v2355_v13 = vld [vmem:[%s3191_s1 + $0x20] ss:$12 sps:$4 sm:$0xff]   ;;  %v2359_v15 = vld [vmem:[%s3191_s1 + $0xf8] ss:$12 sps:$4 sm:$0xff]  }
  0x1f   : > { %1514 = vmatpush1.bf16.msra.mxu1 %v2286_v26  ;;  %v2358_v14 = vld [vmem:[%s3191_s1 + $0x334] ss:$12 sps:$4 sm:$0xff]   ;;  %v2356_v16 = vld [vmem:[%s3191_s1 + $0x330] ss:$12 sps:$4 sm:$0xff]   ;;  %v2360_v17 = vld [vmem:[%s3191_s1 + $0x38] ss:$12 sps:$4 sm:$0xff]  }
  0x20   : > { %1555 = vmatpush1.bf16.msra.mxu0 %v2287_v27  ;;  %1515 = vmatprep.subr.bf16.mxu1 %v2288_v28  ;;  %v2363_v18 = vld [vmem:[%s3191_s1 + $0x34c] ss:$12 sps:$4 sm:$0xff]   ;;  %v2364_v19 = vld [vmem:[%s3191_s1 + $0x110] ss:$12 sps:$4 sm:$0xff]   ;;  %v2361_v20 = vld [vmem:[%s3191_s1 + $0x348] ss:$12 sps:$4 sm:$0xff]  }
  0x21   : > { %1556 = vmatprep.subr.bf16.mxu0 %v2290_v29  ;;  %v2365_v21 = vld [vmem:[%s3191_s1 + $0x50] ss:$12 sps:$4 sm:$0xff]   ;;  %v2369_v23 = vld [vmem:[%s3191_s1 + $0x128] ss:$12 sps:$4 sm:$0xff]   ;;  %v2366_v24 = vld [vmem:[%s3191_s1 + $0x360] ss:$12 sps:$4 sm:$0xff]  }
  0x22   : > { %v2368_v22 = vld [vmem:[%s3191_s1 + $0x364] ss:$12 sps:$4 sm:$0xff]   ;;  %v2370_v25 = vld [vmem:[%s3191_s1 + $0x68] ss:$12 sps:$4 sm:$0xff]   ;;  %v2374_v27 = vld [vmem:[%s3191_s1 + $0x140] ss:$12 sps:$4 sm:$0xff]  }
  0x23   : > { %1516 = vmatpush1.bf16.msra.mxu1 %v2292_v30  ;;  %v2373_v26 = vld [vmem:[%s3191_s1 + $0x37c] ss:$12 sps:$4 sm:$0xff]   ;;  %v2371_v28 = vld [vmem:[%s3191_s1 + $0x378] ss:$12 sps:$4 sm:$0xff]   ;;  %v2375_v29 = vld [vmem:[%s3191_s1 + $0x80] ss:$12 sps:$4 sm:$0xff]  }
  0x24   : > { %1557 = vmatpush1.bf16.msra.mxu0 %v2293_v31  ;;  %1517 = vmatprep.subr.bf16.mxu1 %v2294_v32  ;;  %v2378_v30 = vld [vmem:[%s3191_s1 + $0x394] ss:$12 sps:$4 sm:$0xff]   ;;  %v2379_v31 = vld [vmem:[%s3191_s1 + $0x158] ss:$12 sps:$4 sm:$0xff]   ;;  %v2376_v32 = vld [vmem:[%s3191_s1 + $0x390] ss:$12 sps:$4 sm:$0xff]  }
  0x25   : > { %1558 = vmatprep.subr.bf16.mxu0 %v2296_v33  ;;  %v2380_v33 = vld [vmem:[%s3191_s1 + $0x98] ss:$12 sps:$4 sm:$0xff]   ;;  %v2395_v47 = vld [vmem:[%s3191_s1 + $0x1a0] ss:$12 sps:$4 sm:$0xff]  }
  0x26   : > { %v2399_v49 = vld [vmem:[%s3191_s1 + $0x278] ss:$12 sps:$4 sm:$0xff]  }
  0x27   : > { %1518 = vmatpush1.bf16.msra.mxu1 %v2298_v34  ;;  %v2383_v34 = vld [vmem:[%s3191_s1 + $0x3ac] ss:$12 sps:$4 sm:$0xff]  }
  0x28   : > { %1559 = vmatpush1.bf16.msra.mxu0 %v2299_v35  ;;  %1519 = vmatprep.subr.bf16.mxu1 %v2300_v36  ;;  %v2384_v35 = vld [vmem:[%s3191_s1 + $0x170] ss:$12 sps:$4 sm:$0xff]   ;;  %v2381_v36 = vld [vmem:[%s3191_s1 + $0x3a8] ss:$12 sps:$4 sm:$0xff]  }
  0x29   : > { %1560 = vmatprep.subr.bf16.mxu0 %v2302_v37  ;;  %v2385_v37 = vld [vmem:[%s3191_s1 + $0xb0] ss:$12 sps:$4 sm:$0xff]  }
  0x2b   : > { %1520 = vmatpush1.bf16.msra.mxu1 %v2304_v38  ;;  %v2388_v38 = vld [vmem:[%s3191_s1 + $0x3c4] ss:$12 sps:$4 sm:$0xff]  }
  0x2c   : > { %1561 = vmatpush1.bf16.msra.mxu0 %v2305_v39  ;;  %1521 = vmatprep.subr.bf16.mxu1 %v2306_v40  ;;  %v2389_v39 = vld [vmem:[%s3191_s1 + $0x248] ss:$12 sps:$4 sm:$0xff]   ;;  %v2386_v40 = vld [vmem:[%s3191_s1 + $0x3c0] ss:$12 sps:$4 sm:$0xff]  }
  0x2d   : > { %1562 = vmatprep.subr.bf16.mxu0 %v2308_v41  ;;  %v2390_v41 = vld [vmem:[%s3191_s1 + $0x188] ss:$12 sps:$4 sm:$0xff]  }
  0x2f   : > { %1522 = vmatpush1.bf16.msra.mxu1 %v2310_v42  ;;  %v2393_v42 = vld [vmem:[%s3191_s1 + $0x3dc] ss:$12 sps:$4 sm:$0xff]  }
  0x30   : > { %1563 = vmatpush1.bf16.msra.mxu0 %v2311_v43  ;;  %1523 = vmatprep.subr.bf16.mxu1 %v2312_v44  ;;  %v2883_v43 = vld [vmem:[%s2694_s30 + $0x10] sm:$0xff]  ;;  %v2394_v44 = vld [vmem:[%s3191_s1 + $0x260] ss:$12 sps:$4 sm:$0xff]  }
  0x31   : > { %1564 = vmatprep.subr.bf16.mxu0 %v2314_v45  ;;  %v2890_v45 = vcombine.high %v2883_v43, %v2883_v43 }
  0x33   : > { %1524 = vmatpush1.bf16.msra.mxu1 %v2316_v46  ;;  %v2391_v46 = vld [vmem:[%s3191_s1 + $0x3d8] ss:$12 sps:$4 sm:$0xff]  }
  0x34   : > { %1565 = vmatpush1.bf16.msra.mxu0 %v2317_v50  ;;  %1525 = vmatprep.subr.bf16.mxu1 %v2318_v51  ;;  %v2396_v50 = vld [vmem:[%s3191_s1 + $0x3f0] ss:$12 sps:$4 sm:$0xff]   ;;  %v2400_v51 = vld [vmem:[%s3191_s1 + $0x1b8] ss:$12 sps:$4 sm:$0xff]  }
  0x35   : > { %1566 = vmatprep.subr.bf16.mxu0 %v2320_v53  ;;  %v2403_v53 = vld [vmem:[%s3191_s1 + $0x40c] ss:$12 sps:$4 sm:$0xff]  }
  0x37   : > { %1526 = vmatpush1.bf16.msra.mxu1 %v2322_v54  ;;  %v2401_v54 = vld [vmem:[%s3191_s1 + $0x408] ss:$12 sps:$4 sm:$0xff]  }
  0x38   : > { %1567 = vmatpush1.bf16.msra.mxu0 %v2323_v55  ;;  %1527 = vmatprep.subr.bf16.mxu1 %v2324_v56  ;;  %v2405_v55 = vld [vmem:[%s3191_s1 + $0x1d0] ss:$12 sps:$4 sm:$0xff]  }
  0x39   : > { %1568 = vmatprep.subr.bf16.mxu0 %v2326_v57  ;;  %v2408_v56 = vld [vmem:[%s3191_s1 + $0x424] ss:$12 sps:$4 sm:$0xff]   ;;  %v2409_v57 = vld [vmem:[%s3191_s1 + $0x2a8] ss:$12 sps:$4 sm:$0xff]  }
  0x3b   : > { %1528 = vmatpush1.bf16.msra.mxu1 %v2328_v58  ;;  %v2406_v58 = vld [vmem:[%s3191_s1 + $0x420] ss:$12 sps:$4 sm:$0xff]  }
  0x3c   : > { %1569 = vmatpush1.bf16.msra.mxu0 %v2329_v59  ;;  %1529 = vmatprep.subr.bf16.mxu1 %v2330_v60  ;;  %v2410_v59 = vld [vmem:[%s3191_s1 + $0x1e8] ss:$12 sps:$4 sm:$0xff]  }
  0x3d   : > { %1570 = vmatprep.subr.bf16.mxu0 %v2332_v61  ;;  %v2413_v60 = vld [vmem:[%s3191_s1 + $0x43c] ss:$12 sps:$4 sm:$0xff]   ;;  %v2414_v61 = vld [vmem:[%s3191_s1 + $0x2c0] ss:$12 sps:$4 sm:$0xff]  }
  0x3f   : > { %1530 = vmatpush1.bf16.msra.mxu1 %v2334_v62  ;;  %v2411_v62 = vld [vmem:[%s3191_s1 + $0x438] ss:$12 sps:$4 sm:$0xff]  }
  0x40   : > { %1571 = vmatpush1.bf16.msra.mxu0 %v2335_v63  ;;  %1531 = vmatprep.subr.bf16.mxu1 %v2336_v0  ;;  %v2415_v63 = vld [vmem:[%s3191_s1 + $0x200] ss:$12 sps:$4 sm:$0xff]  }
  0x41   : > { %1572 = vmatprep.subr.bf16.mxu0 %v2338_v1  ;;  %v2418_v0 = vld [vmem:[%s3191_s1 + $0x454] ss:$12 sps:$4 sm:$0xff]   ;;  %v2419_v1 = vld [vmem:[%s3191_s1 + $0x2d8] ss:$12 sps:$4 sm:$0xff]  }
  0x43   : > { %1532 = vmatpush1.bf16.msra.mxu1 %v2340_v2  ;;  %v2416_v2 = vld [vmem:[%s3191_s1 + $0x450] ss:$12 sps:$4 sm:$0xff]  }
  0x44   : > { %1573 = vmatpush1.bf16.msra.mxu0 %v2341_v3  ;;  %2137 = vmatprep.subr.bf16.mxu1 %v2349_v5  ;;  %v2420_v3 = vld [vmem:[%s3191_s1 + $0x218] ss:$12 sps:$4 sm:$0xff]   ;;  %v2424_v5 = vld [vmem:[%s3191_s1 + $0x2f0] ss:$12 sps:$4 sm:$0xff]  }
  0x45   : > { %1583 = vmatprep.subr.bf16.mxu0 %v2348_v4  ;;  %v2423_v4 = vld [vmem:[%s3191_s1 + $0x46c] ss:$12 sps:$4 sm:$0xff]  }
  0x46   : > { %1534 = vmatmul.mubr.bf16.vlgmr.msra.gmra.mrb[0].mxu1 %v2770_v6 }
  0x47   : > { %1575 = vmatmul.mubr.bf16.vlgmr.msra.gmra.mrb[0].mxu0 %v2772_v7  ;;  %2138 = vmatpush3.bf16.msra.mxu1 %v2350_v9  ;;  %v2430_v9 = vld [vmem:[%s3191_s1 + $0x484] ss:$12 sps:$4 sm:$0xff]  }
  0x48   : > { %1584 = vmatpush1.bf16.msra.mxu0 %v2346_v8  ;;  %2139 = vmatprep.subr.bf16.mxu1 %v2354_v11  ;;  %v2425_v8 = vld [vmem:[%s3191_s1 + $0x230] ss:$12 sps:$4 sm:$0xff]   ;;  %v2428_v11 = vld [vmem:[%s3191_s1 + $0x480] ss:$12 sps:$4 sm:$0xff]  }
  0x49   : > { %1585 = vmatprep.subr.bf16.mxu0 %v2353_v10  ;;  %1697 = vmatprep.mubr.bf16.mxu1 %v2706_v48  ;;  %v2398_v48 = vld [vmem:[%s3191_s1 + $0x3f4] ss:$12 sps:$4 sm:$0xff]  }
  0x4a   : > { %1615 = vmatprep.mubr.bf16.mxu0 %v2890_v45  ;;  %v2431_v10 = vld [vmem:[%s3191_s1 + $0x3c8] ss:$12 sps:$4 sm:$0xff]  }
  0x4b   : > { %2140 = vmatpush3.bf16.msra.mxu1 %v2355_v13  ;;  %v2432_v13 = vld [vmem:[%s3191_s1 + $0x308] ss:$12 sps:$4 sm:$0xff]  }
  0x4c   : > { %1586 = vmatpush1.bf16.msra.mxu0 %v2351_v12  ;;  %2141 = vmatprep.subr.bf16.mxu1 %v2359_v15  ;;  %v2984_v12 = vcombine.low %v2883_v43, %v2883_v43  ;;  %v2436_v15 = vld [vmem:[%s3191_s1 + $0x3e0] ss:$12 sps:$4 sm:$0xff]   ;;  %v2470_v43 = vld [vmem:[%s3191_s1 + $0x544] ss:$12 sps:$4 sm:$0xff]  }
  0x4d   : > { %1587 = vmatprep.subr.bf16.mxu0 %v2358_v14  ;;  %v2435_v14 = vld [vmem:[%s3191_s1 + $0x49c] ss:$12 sps:$4 sm:$0xff]  }
  0x4f   : > { %2142 = vmatpush3.bf16.msra.mxu1 %v2360_v17  ;;  %v2437_v17 = vld [vmem:[%s3191_s1 + $0x320] ss:$12 sps:$4 sm:$0xff]  }
  0x50   : > { %1588 = vmatpush1.bf16.msra.mxu0 %v2356_v16  ;;  %2143 = vmatprep.subr.bf16.mxu1 %v2364_v19  ;;  %v2433_v16 = vld [vmem:[%s3191_s1 + $0x498] ss:$12 sps:$4 sm:$0xff]   ;;  %v2438_v19 = vld [vmem:[%s3191_s1 + $0x4b0] ss:$12 sps:$4 sm:$0xff]  }
  0x51   : > { %1589 = vmatprep.subr.bf16.mxu0 %v2363_v18  ;;  %v2440_v18 = vld [vmem:[%s3191_s1 + $0x4b4] ss:$12 sps:$4 sm:$0xff]  }
  0x53   : > { %2144 = vmatpush3.bf16.msra.mxu1 %v2365_v21  ;;  %v2445_v21 = vld [vmem:[%s3191_s1 + $0x4cc] ss:$12 sps:$4 sm:$0xff]  }
  0x54   : > { %1590 = vmatpush1.bf16.msra.mxu0 %v2361_v20  ;;  %2145 = vmatprep.subr.bf16.mxu1 %v2369_v23  ;;  %v2442_v20 = vld [vmem:[%s3191_s1 + $0x338] ss:$12 sps:$4 sm:$0xff]   ;;  %v2443_v23 = vld [vmem:[%s3191_s1 + $0x4c8] ss:$12 sps:$4 sm:$0xff]  }
  0x55   : > { %1591 = vmatprep.subr.bf16.mxu0 %v2368_v22  ;;  %v2446_v22 = vld [vmem:[%s3191_s1 + $0x410] ss:$12 sps:$4 sm:$0xff]  }
  0x57   : > { %2146 = vmatpush3.bf16.msra.mxu1 %v2370_v25  ;;  %v2450_v25 = vld [vmem:[%s3191_s1 + $0x4e4] ss:$12 sps:$4 sm:$0xff]  }
  0x58   : > { %1592 = vmatpush1.bf16.msra.mxu0 %v2366_v24  ;;  %2147 = vmatprep.subr.bf16.mxu1 %v2374_v27  ;;  %v2447_v24 = vld [vmem:[%s3191_s1 + $0x350] ss:$12 sps:$4 sm:$0xff]   ;;  %v2448_v27 = vld [vmem:[%s3191_s1 + $0x4e0] ss:$12 sps:$4 sm:$0xff]  }
  0x59   : > { %1593 = vmatprep.subr.bf16.mxu0 %v2373_v26  ;;  %v2451_v26 = vld [vmem:[%s3191_s1 + $0x428] ss:$12 sps:$4 sm:$0xff]  }
  0x5b   : > { %2148 = vmatpush3.bf16.msra.mxu1 %v2375_v29  ;;  %v2455_v29 = vld [vmem:[%s3191_s1 + $0x4fc] ss:$12 sps:$4 sm:$0xff]  }
  0x5c   : > { %1594 = vmatpush1.bf16.msra.mxu0 %v2371_v28  ;;  %2149 = vmatprep.subr.bf16.mxu1 %v2379_v31  ;;  %v2452_v28 = vld [vmem:[%s3191_s1 + $0x368] ss:$12 sps:$4 sm:$0xff]   ;;  %v2453_v31 = vld [vmem:[%s3191_s1 + $0x4f8] ss:$12 sps:$4 sm:$0xff]  }
  0x5d   : > { %1595 = vmatprep.subr.bf16.mxu0 %v2378_v30  ;;  %v2456_v30 = vld [vmem:[%s3191_s1 + $0x440] ss:$12 sps:$4 sm:$0xff]  }
  0x5f   : > { %2150 = vmatpush3.bf16.msra.mxu1 %v2380_v33  ;;  %v2460_v33 = vld [vmem:[%s3191_s1 + $0x514] ss:$12 sps:$4 sm:$0xff]  }
  0x60   : > { %1596 = vmatpush1.bf16.msra.mxu0 %v2376_v32  ;;  %2151 = vmatprep.subr.bf16.mxu1 %v2384_v35  ;;  %v2457_v32 = vld [vmem:[%s3191_s1 + $0x380] ss:$12 sps:$4 sm:$0xff]   ;;  %v3059_v35 = vld [vmem:[%s2694_s30 + $0x18] sm:$0xff]  ;;  %s170_s30 = scalar_lea.vmem %s3193_s3, %s2237_s11 }
  0x61   : > { %1597 = vmatprep.subr.bf16.mxu0 %v2383_v34  ;;  %v2461_v34 = vld [vmem:[%s3191_s1 + $0x458] ss:$12 sps:$4 sm:$0xff]  }
  0x63   : > { %2152 = vmatpush3.bf16.msra.mxu1 %v2385_v37  ;;  %v2458_v37 = vld [vmem:[%s3191_s1 + $0x510] ss:$12 sps:$4 sm:$0xff]  }
  0x64   : > { %1598 = vmatpush1.bf16.msra.mxu0 %v2381_v36  ;;  %2159 = vmatprep.subr.bf16.mxu1 %v2389_v39  ;;  %v1937_v36 = vcombine.high %v3059_v35, %v3059_v35  ;;  %v2465_v39 = vld [vmem:[%s3191_s1 + $0x52c] ss:$12 sps:$4 sm:$0xff]  }
  0x65   : > { %1599 = vmatprep.subr.bf16.mxu0 %v2388_v38  ;;  %v2462_v38 = vld [vmem:[%s3191_s1 + $0x398] ss:$12 sps:$4 sm:$0xff]  }
  0x66   : > { %1698 = vmatmul.mubr.bf16.vlgmr.msra.gmra.mrb[4].mxu1 %v2770_v6  ;;  %v2421_v6 = vld [vmem:[%s3191_s1 + $0x468] ss:$12 sps:$4 sm:$0xff]  }
  0x67   : > { %2160 = vmatpush3.bf16.msra.mxu1 %v2390_v41  ;;  %1737 = vmatprep.mubr.bf16.mxu1 %v2715_v52  ;;  %v2404_v52 = vld [vmem:[%s3191_s1 + $0x290] ss:$12 sps:$4 sm:$0xff]   ;;  %v2463_v41 = vld [vmem:[%s3191_s1 + $0x528] ss:$12 sps:$4 sm:$0xff]  }
  0x68   : > { %1600 = vmatpush1.bf16.msra.mxu0 %v2386_v40  ;;  %2161 = vmatprep.subr.bf16.mxu1 %v2394_v44  ;;  %v2466_v40 = vld [vmem:[%s3191_s1 + $0x470] ss:$12 sps:$4 sm:$0xff]   ;;  %v2471_v44 = vld [vmem:[%s3191_s1 + $0x548] ss:$12 sps:$4 sm:$0xff]  }
  0x69   : > { %1601 = vmatprep.subr.bf16.mxu0 %v2393_v42  ;;  %v2467_v42 = vld [vmem:[%s3191_s1 + $0x3b0] ss:$12 sps:$4 sm:$0xff]  }
  0x6b   : > { %2162 = vmatpush3.bf16.msra.mxu1 %v2395_v47  ;;  %v2475_v47 = vld [vmem:[%s3191_s1 + $0x55c] ss:$12 sps:$4 sm:$0xff]  }
  0x6c   : > { %1602 = vmatpush1.bf16.msra.mxu0 %v2391_v46  ;;  %2163 = vmatprep.subr.bf16.mxu1 %v2399_v49  ;;  %v2472_v46 = vld [vmem:[%s3191_s1 + $0x488] ss:$12 sps:$4 sm:$0xff]   ;;  %v2473_v49 = vld [vmem:[%s3191_s1 + $0x558] ss:$12 sps:$4 sm:$0xff]  }
  0x6d   : > { %1603 = vmatprep.subr.bf16.mxu0 %v2398_v48  ;;  %v2476_v48 = vld [vmem:[%s3191_s1 + $0x560] ss:$12 sps:$4 sm:$0xff]  }
  0x6f   : > { %2164 = vmatpush3.bf16.msra.mxu1 %v2400_v51  ;;  %v2480_v51 = vld [vmem:[%s3191_s1 + $0x574] ss:$12 sps:$4 sm:$0xff]  }
  0x70   : > { %1604 = vmatpush1.bf16.msra.mxu0 %v2396_v50  ;;  %2165 = vmatprep.subr.bf16.mxu1 %v2404_v52  ;;  %v2477_v50 = vld [vmem:[%s3191_s1 + $0x4a0] ss:$12 sps:$4 sm:$0xff]   ;;  %v2478_v52 = vld [vmem:[%s3191_s1 + $0x570] ss:$12 sps:$4 sm:$0xff]  }
  0x71   : > { %1605 = vmatprep.subr.bf16.mxu0 %v2403_v53  ;;  %v2481_v53 = vld [vmem:[%s3191_s1 + $0x578] ss:$12 sps:$4 sm:$0xff]  }
  0x73   : > { %2166 = vmatpush3.bf16.msra.mxu1 %v2405_v55  ;;  %v2485_v55 = vld [vmem:[%s3191_s1 + $0x58c] ss:$12 sps:$4 sm:$0xff]  }
  0x74   : > { %1606 = vmatpush1.bf16.msra.mxu0 %v2401_v54  ;;  %2167 = vmatprep.subr.bf16.mxu1 %v2409_v57  ;;  %v2482_v54 = vld [vmem:[%s3191_s1 + $0x4b8] ss:$12 sps:$4 sm:$0xff]   ;;  %v2483_v57 = vld [vmem:[%s3191_s1 + $0x588] ss:$12 sps:$4 sm:$0xff]  }
  0x75   : > { %1607 = vmatprep.subr.bf16.mxu0 %v2408_v56  ;;  %v2486_v56 = vld [vmem:[%s3191_s1 + $0x590] ss:$12 sps:$4 sm:$0xff]  }
  0x77   : > { %2168 = vmatpush3.bf16.msra.mxu1 %v2410_v59  ;;  %v2490_v59 = vld [vmem:[%s3191_s1 + $0x5a4] ss:$12 sps:$4 sm:$0xff]  }
  0x78   : > { %1608 = vmatpush1.bf16.msra.mxu0 %v2406_v58  ;;  %2169 = vmatprep.subr.bf16.mxu1 %v2414_v61  ;;  %v2487_v58 = vld [vmem:[%s3191_s1 + $0x4d0] ss:$12 sps:$4 sm:$0xff]   ;;  %v2488_v61 = vld [vmem:[%s3191_s1 + $0x5a0] ss:$12 sps:$4 sm:$0xff]  }
  0x79   : > { %1609 = vmatprep.subr.bf16.mxu0 %v2413_v60  ;;  %v2491_v60 = vld [vmem:[%s3191_s1 + $0x5a8] ss:$12 sps:$4 sm:$0xff]  }
  0x7b   : > { %2170 = vmatpush3.bf16.msra.mxu1 %v2415_v63  ;;  %v2495_v63 = vld [vmem:[%s3191_s1 + $0x5bc] ss:$12 sps:$4 sm:$0xff]  }
  0x7c   : > { %1610 = vmatpush1.bf16.msra.mxu0 %v2411_v62  ;;  %2171 = vmatprep.subr.bf16.mxu1 %v2419_v1  ;;  %v2492_v62 = vld [vmem:[%s3191_s1 + $0x4e8] ss:$12 sps:$4 sm:$0xff]   ;;  %v2493_v1 = vld [vmem:[%s3191_s1 + $0x5b8] ss:$12 sps:$4 sm:$0xff]  }
  0x7d   : > { %1611 = vmatprep.subr.bf16.mxu0 %v2418_v0  ;;  %v2496_v0 = vld [vmem:[%s3191_s1 + $0x5c0] ss:$12 sps:$4 sm:$0xff]  }
  0x7f   : > { %2172 = vmatpush3.bf16.msra.mxu1 %v2420_v3  ;;  %v2500_v3 = vld [vmem:[%s3191_s1 + $0x5d4] ss:$12 sps:$4 sm:$0xff]  }
  0x80   : > { %1612 = vmatpush1.bf16.msra.mxu0 %v2416_v2  ;;  %2173 = vmatprep.subr.bf16.mxu1 %v2424_v5  ;;  %v2497_v2 = vld [vmem:[%s3191_s1 + $0x500] ss:$12 sps:$4 sm:$0xff]   ;;  %v2498_v5 = vld [vmem:[%s3191_s1 + $0x5d0] ss:$12 sps:$4 sm:$0xff]  }
  0x81   : > { %1613 = vmatprep.subr.bf16.mxu0 %v2423_v4  ;;  %v2501_v4 = vld [vmem:[%s3191_s1 + $0x5d8] ss:$12 sps:$4 sm:$0xff]  }
  0x83   : > { %2174 = vmatpush3.bf16.msra.mxu1 %v2425_v8  ;;  %v2505_v8 = vld [vmem:[%s3191_s1 + $0x5ec] ss:$12 sps:$4 sm:$0xff]  }
  0x84   : > { %1614 = vmatpush1.bf16.msra.mxu0 %v2421_v6  ;;  %2181 = vmatprep.subr.bf16.mxu1 %v2431_v10  ;;  %v2502_v6 = vld [vmem:[%s3191_s1 + $0x518] ss:$12 sps:$4 sm:$0xff]   ;;  %v2503_v10 = vld [vmem:[%s3191_s1 + $0x5e8] ss:$12 sps:$4 sm:$0xff]  }
  0x85   : > { %1624 = vmatprep.subr.bf16.mxu0 %v2430_v9  ;;  %v2506_v9 = vld [vmem:[%s3191_s1 + $0x5f0] ss:$12 sps:$4 sm:$0xff]  }
  0x86   : > { %1738 = vmatmul.mubr.bf16.vlgmr.msra.gmra.mrb[8].mxu1 %v2772_v7  ;;  %v2441_v7 = vld [vmem:[%s3191_s1 + $0x3f8] ss:$12 sps:$4 sm:$0xff]  }
  0x87   : > { %1616 = vmatmul.mubr.bf16.vlgmr.msra.gmra.mrb[0].mxu0 %v2984_v12  ;;  %2182 = vmatpush3.bf16.msra.mxu1 %v2432_v13 }
  0x88   : > { %1625 = vmatpush1.bf16.msra.mxu0 %v2428_v11  ;;  %2183 = vmatprep.subr.bf16.mxu1 %v2436_v15  ;;  %v2507_v11 = vld [vmem:[%s3191_s1 + $0x530] ss:$12 sps:$4 sm:$0xff]  }
  0x89   : > { %1626 = vmatprep.subr.bf16.mxu0 %v2435_v14  ;;  %1777 = vmatprep.mubr.bf16.mxu1 %v2890_v45  ;;  %v2468_v45 = vld [vmem:[%s3191_s1 + $0x540] ss:$12 sps:$4 sm:$0xff]  }
  0x8a   : > { %1656 = vmatprep.mubr.bf16.mxu0 %v1937_v36 }
  0x8b   : > { %2184 = vmatpush3.bf16.msra.mxu1 %v2437_v17 }
  0x8c   : > { %1627 = vmatpush1.bf16.msra.mxu0 %v2433_v16  ;;  %2185 = vmatprep.subr.bf16.mxu1 %v2441_v7 }
  0x8d   : > { %1628 = vmatprep.subr.bf16.mxu0 %v2440_v18 }
  0x8f   : > { %2186 = vmatpush3.bf16.msra.mxu1 %v2442_v20 }
  0x90   : > { %1629 = vmatpush1.bf16.msra.mxu0 %v2438_v19  ;;  %2187 = vmatprep.subr.bf16.mxu1 %v2446_v22 }
  0x91   : > { %1630 = vmatprep.subr.bf16.mxu0 %v2445_v21  ;;  %v434_v21 = vlaneseq }
  0x93   : > { %2188 = vmatpush3.bf16.msra.mxu1 %v2447_v24  ;;  %v435_v22 = vshrl.u32 %v434_v21, 7  ;;  %v432_v24 = vld [vmem:[%s3192_s2] sm:$0x7] }
  0x94   : > { %1631 = vmatpush1.bf16.msra.mxu0 %v2443_v23  ;;  %2189 = vmatprep.subr.bf16.mxu1 %v2451_v26 }
  0x95   : > { %1632 = vmatprep.subr.bf16.mxu0 %v2450_v25  ;;  %v444_v23 = vsub.s32 2, %v435_v22 }
  0x97   : > { %2190 = vmatpush3.bf16.msra.mxu1 %v2452_v28  ;;  %v445_v25 = vrot.slane %v432_v24, %v444_v23 }
  0x98   : > { %1633 = vmatpush1.bf16.msra.mxu0 %v2448_v27  ;;  %2191 = vmatprep.subr.bf16.mxu1 %v2456_v30 }
  0x99   : > { %1634 = vmatprep.subr.bf16.mxu0 %v2455_v29 }
  0x9b   : > { %2192 = vmatpush3.bf16.msra.mxu1 %v2457_v32 }
  0x9c   : > { %1635 = vmatpush1.bf16.msra.mxu0 %v2453_v31  ;;  %2193 = vmatprep.subr.bf16.mxu1 %v2461_v34 }
  0x9d   : > { %1636 = vmatprep.subr.bf16.mxu0 %v2460_v33 }
  0x9f   : > { %2194 = vmatpush3.bf16.msra.mxu1 %v2462_v38 }
  0xa0   : > { %1637 = vmatpush1.bf16.msra.mxu0 %v2458_v37  ;;  %2195 = vmatprep.subr.bf16.mxu1 %v2466_v40  ;;  %v440_v40 = vsub.s32 1, %v435_v22 }
  0xa1   : > { %1638 = vmatprep.subr.bf16.mxu0 %v2465_v39  ;;  %v436_v39 = vsub.s32 0, %v435_v22 }
  0xa3   : > { %2196 = vmatpush3.bf16.msra.mxu1 %v2467_v42  ;;  %v441_v42 = vrot.slane %v432_v24, %v440_v40 }
  0xa4   : > { %1639 = vmatpush1.bf16.msra.mxu0 %v2463_v41  ;;  %2203 = vmatprep.subr.bf16.mxu1 %v2471_v44  ;;  %v437_v41 = vrot.slane %v432_v24, %v436_v39 }
  0xa5   : > { %1640 = vmatprep.subr.bf16.mxu0 %v2470_v43 }
  0xa6   : > { %1778 = vmatmul.mubr.bf16.vlgmr.msra.gmra.mrb[12].mxu1 %v2984_v12  ;;  %v1936_v12 = vcombine.low %v3059_v35, %v3059_v35 }
  0xa7   : > { %2204 = vmatpush3.bf16.msra.mxu1 %v2472_v46  ;;  %1817 = vmatprep.mubr.bf16.mxu1 %v1937_v36 }
  0xa8   : > { %1641 = vmatpush1.bf16.msra.mxu0 %v2468_v45  ;;  %2205 = vmatprep.subr.bf16.mxu1 %v2476_v48 }
  0xa9   : > { %1642 = vmatprep.subr.bf16.mxu0 %v2475_v47 }
  0xab   : > { %2206 = vmatpush3.bf16.msra.mxu1 %v2477_v50 }
  0xac   : > { %1643 = vmatpush1.bf16.msra.mxu0 %v2473_v49  ;;  %2207 = vmatprep.subr.bf16.mxu1 %v2481_v53 }
  0xad   : > { %1644 = vmatprep.subr.bf16.mxu0 %v2480_v51 }
  0xaf   : > { %2208 = vmatpush3.bf16.msra.mxu1 %v2482_v54 }
  0xb0   : > { %1645 = vmatpush1.bf16.msra.mxu0 %v2478_v52  ;;  %2209 = vmatprep.subr.bf16.mxu1 %v2486_v56 }
  0xb1   : > { %1646 = vmatprep.subr.bf16.mxu0 %v2485_v55 }
  0xb3   : > { %2210 = vmatpush3.bf16.msra.mxu1 %v2487_v58 }
  0xb4   : > { %1647 = vmatpush1.bf16.msra.mxu0 %v2483_v57  ;;  %2211 = vmatprep.subr.bf16.mxu1 %v2491_v60 }
  0xb5   : > { %1648 = vmatprep.subr.bf16.mxu0 %v2490_v59 }
  0xb7   : > { %2212 = vmatpush3.bf16.msra.mxu1 %v2492_v62 }
  0xb8   : > { %1649 = vmatpush1.bf16.msra.mxu0 %v2488_v61  ;;  %2213 = vmatprep.subr.bf16.mxu1 %v2496_v0 }
  0xb9   : > { %1650 = vmatprep.subr.bf16.mxu0 %v2495_v63 }
  0xbb   : > { %2214 = vmatpush3.bf16.msra.mxu1 %v2497_v2 }
  0xbc   : > { %1651 = vmatpush1.bf16.msra.mxu0 %v2493_v1  ;;  %2215 = vmatprep.subr.bf16.mxu1 %v2501_v4 }
  0xbd   : > { %1652 = vmatprep.subr.bf16.mxu0 %v2500_v3 }
  0xbf   : > { %2216 = vmatpush3.bf16.msra.mxu1 %v2502_v6 }
  0xc0   : > { %1653 = vmatpush1.bf16.msra.mxu0 %v2498_v5  ;;  %2217 = vmatprep.subr.bf16.mxu1 %v2506_v9 }
  0xc1   : > { %1654 = vmatprep.subr.bf16.mxu0 %v2505_v8 }
  0xc3   : > { %2218 = vmatpush3.bf16.msra.mxu1 %v2507_v11 }
  0xc4   : > { %1655 = vmatpush1.bf16.msra.mxu0 %v2503_v10 }
  0xc6   : > { %1818 = vmatmul.mubr.bf16.vlgmr.msra.gmra.mrb[16].mxu1 %v1936_v12 }
  0xc7   : > { %1657 = vmatmul.mubr.bf16.vlgmr.msra.gmra.mrb[0].mxu0 %v1936_v12 }
 0x119   : > { %v1535_v13 = vpop.f32.mrb[0].mxu1 }
 0x11a   : > { %v1537_v14 = vpop.f32.mrb[1].mxu1  ;;  %v1536_v43 = vadd.f32 %v1535_v13, %v437_v41 }
 0x11b   : > { %v1539_v15 = vpop.f32.mrb[2].mxu1  ;;  %v1538_v44 = vadd.f32 %v1537_v14, %v441_v42 }
 0x11c   : > { %v1540_v16 = vpop.f32.mrb[3].mxu1 }
 0x139   : > { %v2153_v17 = vpop.f32.mrb[4].mxu1 }
 0x13a   : > { %v2154_v18 = vpop.f32.mrb[5].mxu1 }
 0x13b   : > { %v2155_v7 = vadd.f32 %v2154_v18, %v2153_v17  ;;  %v2156_v19 = vpop.f32.mrb[6].mxu1 }
 0x13c   : > { %v2157_v20 = vpop.f32.mrb[7].mxu1 }
 0x13d   : > { %v1700_v28 = vadd.f32 %v2155_v7, %v445_v25 }
 0x159   : > { %v2175_v26 = vpop.f32.mrb[8].mxu1 }
 0x15a   : > { %v2176_v27 = vpop.f32.mrb[9].mxu1 }
 0x15b   : > { %v2177_v29 = vadd.f32 %v2176_v27, %v2175_v26  ;;  %v2178_v30 = vpop.f32.mrb[10].mxu1 }
 0x15c   : > { %v2179_v31 = vpop.f32.mrb[11].mxu1 }
 0x15d   : > { %v1740_v32 = vadd.f32 %v2177_v29, %v1700_v28 }
 0x179   : > { %v2197_v33 = vpop.f32.mrb[12].mxu1 }
 0x17a   : > { %v2198_v34 = vpop.f32.mrb[13].mxu1 }
 0x17b   : > { %v2199_v35 = vadd.f32 %v2198_v34, %v2197_v33  ;;  %v2200_v36 = vpop.f32.mrb[14].mxu1 }
 0x17c   : > { %v2201_v37 = vpop.f32.mrb[15].mxu1 }
 0x17d   : > { %v1780_v38 = vadd.f32 %v2199_v35, %v1740_v32 }
 0x199   : > { %v2219_v46 = vpop.f32.mrb[16].mxu1 }
 0x19a   : > { %v1658_v45 = vpop.f32.mrb[0].mxu0  ;;  %v2220_v49 = vpop.f32.mrb[17].mxu1 }
 0x19b   : > { %v2226_v47 = vadd.f32 %v1658_v45, %v1536_v43  ;;  %v1660_v48 = vpop.f32.mrb[1].mxu0  ;;  %v2221_v51 = vadd.f32 %v2220_v49, %v2219_v46  ;;  %v2222_v52 = vpop.f32.mrb[18].mxu1 }
 0x19c   : > { %v2228_v50 = vadd.f32 %v1660_v48, %v1538_v44  ;;  %v1662_v53 = vpop.f32.mrb[2].mxu0  ;;  %v2223_v56 = vpop.f32.mrb[19].mxu1 }
 0x19d   : > { %v1825_v54 = vmul.f32 %v2226_v47, %v2226_v47  ;;  %v1663_v55 = vpop.f32.mrb[3].mxu0  ;;  %v1820_v58 = vadd.f32 %v2221_v51, %v1780_v38 }
 0x19e   : > { %v1826_v57 = vmul.f32 %v2228_v50, %v2228_v50 }
 0x19f   : > { %v1828_v59 = vmul.f32 %v2226_v47, %v1825_v54  ;;  %v1827_v61 = vmul.f32 %v1820_v58, %v1820_v58 }
 0x1a0   : > { %v1829_v60 = vmul.f32 %v2228_v50, %v1826_v57 }
 0x1a1   : > { %v1831_v62 = vmul.f32 0.044715, %v1828_v59  ;;  %v1830_v0 = vmul.f32 %v1827_v61, %v1820_v58 }
 0x1a2   : > { %v1832_v63 = vmul.f32 0.044715, %v1829_v60 }
 0x1a3   : > { %v1834_v1 = vadd.f32 %v2226_v47, %v1831_v62  ;;  %v1833_v3 = vmul.f32 0.044715, %v1830_v0 }
 0x1a4   : > { %v1835_v2 = vadd.f32 %v2228_v50, %v1832_v63 }
 0x1a5   : > { %v1837_v4 = vmul.f32 0.7978846, %v1834_v1  ;;  %v1836_v6 = vadd.f32 %v1833_v3, %v1820_v58 }
 0x1a6   : > { %v1838_v5 = vmul.f32 0.7978846, %v1835_v2 }
 0x1a7   : > { %2510 = vtanh.f32 %v1837_v4  ;;  %v1839_v8 = vmul.f32 0.7978846, %v1836_v6 }
 0x1a8   : > { %2512 = vtanh.f32 %v1838_v5 }
 0x1a9   : > { %2514 = vtanh.f32 %v1839_v8 }
 0x1b1   : > { %v2511_v9 = vpop.eup %2510 }
 0x1b2   : > { %v2513_v10 = vpop.eup %2512  ;;  %v1843_v11 = vadd.f32 1.0, %v2511_v9 }
 0x1b3   : > { %v1844_v12 = vadd.f32 1.0, %v2513_v10  ;;  %v2515_v13 = vpop.eup %2514 }
 0x1b4   : > { %v1846_v14 = vmul.f32 0.5, %v1843_v11  ;;  %v1845_v16 = vadd.f32 1.0, %v2515_v13 }
 0x1b5   : > { %v1847_v15 = vmul.f32 0.5, %v1844_v12 }
 0x1b6   : > { %v1849_v17 = vmul.f32 %v2226_v47, %v1846_v14  ;;  %v1848_v7 = vmul.f32 0.5, %v1845_v16 }
 0x1b7   : > { %v1850_v18 = vmul.f32 %v2228_v50, %v1847_v15 }
 0x1b8   : > { %v1851_v20 = vmul.f32 %v1848_v7, %v1820_v58 }
 0x1b9   : > { %v2135_v19 = vpack.c.bf16 %v1850_v18, %v1849_v17 }
 0x1ba   : > { %v2136_v21 = vpack.c.bf16 %v1851_v20, %v1851_v20 }
 0x1bb   : > { %1865 = vst [vmem:[%s170_s30] sm:$0xff] %v2135_v19 }
 0x1bc   : > { %1866 = vst [vmem:[%s170_s30 + $0x8] sm:$0xf] %v2136_v21 }
 0x1bd PF: > { %s13_s12 = sadd.s32 1, %s2522_s12  }
 0x1be   : > { %p10_p4 = scmp.ge.s32.totalorder %s13_s12, 4  }
 0x1c0   :  { %12 = sbr.rel (!%p10_p4) target bundleno = 1 (0x1), region = 62 }

// kernel: transformer_net_forward.24
= control target key start
LH: loop header
LB: loop body
LE: loop exit
PB: predicated region body
PF: predicated region fallthrough
CT: control target
= control target key end

     0   :  { %s992_s12 = smov 0   ;;  %s1169_s0 = inlined_call_operand.vmem [shape: bf16[16,768], index: 0, kind: input, shape index: {}]   ;;  %s1170_s1 = inlined_call_operand.vmem [shape: bf16[768,128], index: 1, kind: input, shape index: {}]   ;;  %s1171_s2 = inlined_call_operand.vmem [shape: f32[1,128], index: 2, kind: input, shape index: {}]   ;;  %s1172_s3 = inlined_call_operand.vmem [shape: bf16[16,128], index: 3, kind: output, shape index: {}]  }
   0x1 LB: > { %s769_s13 = sadd.s32 4294967295, %s970_s12   ;;  %p773_p0 = scmp.ge.s32.totalorder %s970_s12, 1  ;;  %s970_s12 = sphi %s992_s12, %s13_s12  }
   0x2   : > { %p137_p1 = scmp.lt.s32.totalorder %s970_s12, 3 }
   0x4   : > { %p138_p2 = pnand %p773_p0, %p137_p1 }
   0x5   : > { %v908_v0 = vld [vmem:[%s1170_s1 + $0x40] sm:$0xff] (!%p138_p2)   ;;  %v912_v4 = vld [vmem:[%s1170_s1 + $0x48] sm:$0xff] (!%p138_p2)   ;;  %v916_v8 = vld [vmem:[%s1170_s1 + $0x50] sm:$0xff] (!%p138_p2)   ;;  %p160_p3 = scmp.lt.s32.totalorder (!%p138_p2), %s769_s13, 1 }
   0x6   : > { %141 = sbr.rel (%p138_p2) target bundleno = 317 (0x13d), region = 32  ;;  %v909_v1 = vld [vmem:[%s1170_s1] sm:$0xff] (!%p138_p2)   ;;  %833 = vmatprep.subr.bf16.mxu0 (!%p138_p2), %v908_v0  ;;  %v913_v5 = vld [vmem:[%s1170_s1 + $0x8] sm:$0xff] (!%p138_p2)   ;;  %v917_v9 = vld [vmem:[%s1170_s1 + $0x10] sm:$0xff] (!%p138_p2)  }
   0x7   : > { %v910_v2 = vld [vmem:[%s1170_s1 + $0xc0] sm:$0xff] (!%p138_p2)   ;;  %834 = vmatpush3.bf16.msra.mxu0 (!%p138_p2), %v909_v1  ;;  %v914_v6 = vld [vmem:[%s1170_s1 + $0xc8] sm:$0xff] (!%p138_p2)   ;;  %v918_v10 = vld [vmem:[%s1170_s1 + $0xd0] sm:$0xff] (!%p138_p2)  }
   0x8   : > { %v911_v3 = vld [vmem:[%s1170_s1 + $0x80] sm:$0xff] (!%p138_p2)   ;;  %855 = vmatprep.subr.bf16.mxu1 (!%p138_p2), %v910_v2  ;;  %835 = vmatprep.subr.bf16.mxu0 (!%p138_p2), %v912_v4  ;;  %v915_v7 = vld [vmem:[%s1170_s1 + $0x88] sm:$0xff] (!%p138_p2)   ;;  %v919_v11 = vld [vmem:[%s1170_s1 + $0x90] sm:$0xff] (!%p138_p2)  }
   0x9   : > { %856 = vmatpush3.bf16.msra.mxu1 (!%p138_p2), %v911_v3  ;;  %v920_v12 = vld [vmem:[%s1170_s1 + $0x58] sm:$0xff] (!%p138_p2)   ;;  %v924_v16 = vld [vmem:[%s1170_s1 + $0x60] sm:$0xff] (!%p138_p2)   ;;  %v928_v20 = vld [vmem:[%s1170_s1 + $0x68] sm:$0xff] (!%p138_p2)  }
   0xa   : > { %857 = vmatprep.subr.bf16.mxu1 (!%p138_p2), %v914_v6  ;;  %v921_v13 = vld [vmem:[%s1170_s1 + $0x18] sm:$0xff] (!%p138_p2)   ;;  %v925_v17 = vld [vmem:[%s1170_s1 + $0x20] sm:$0xff] (!%p138_p2)   ;;  %v929_v21 = vld [vmem:[%s1170_s1 + $0x28] sm:$0xff] (!%p138_p2)  }
   0xb   : > { %836 = vmatpush3.bf16.msra.mxu0 (!%p138_p2), %v913_v5  ;;  %v922_v14 = vld [vmem:[%s1170_s1 + $0xd8] sm:$0xff] (!%p138_p2)   ;;  %v926_v18 = vld [vmem:[%s1170_s1 + $0xe0] sm:$0xff] (!%p138_p2)   ;;  %v930_v22 = vld [vmem:[%s1170_s1 + $0xe8] sm:$0xff] (!%p138_p2)  }
   0xc   : > { %837 = vmatprep.subr.bf16.mxu0 (!%p138_p2), %v916_v8  ;;  %v923_v15 = vld [vmem:[%s1170_s1 + $0x98] sm:$0xff] (!%p138_p2)   ;;  %v927_v19 = vld [vmem:[%s1170_s1 + $0xa0] sm:$0xff] (!%p138_p2)   ;;  %v931_v23 = vld [vmem:[%s1170_s1 + $0xa8] sm:$0xff] (!%p138_p2)  }
   0xd   : > { %858 = vmatpush3.bf16.msra.mxu1 %v915_v7  ;;  %s1174_s13 = smov (!%p160_p3, %s769_s13), 1  ;;  %v932_v24 = vld [vmem:[%s1170_s1 + $0x70] sm:$0xff]   ;;  %v936_v28 = vld [vmem:[%s1170_s1 + $0x78] sm:$0xff]   ;;  %v942_v35 = vld [vmem:[%s1170_s1 + $0x140] sm:$0xff]  }
   0xe   : > { %859 = vmatprep.subr.bf16.mxu1 %v918_v10  ;;  %s899_s14 = smul.u32 24, %s1174_s13  ;;  %v933_v25 = vld [vmem:[%s1170_s1 + $0x30] sm:$0xff]   ;;  %v937_v29 = vld [vmem:[%s1170_s1 + $0x38] sm:$0xff]   ;;  %v945_v39 = vld [vmem:[%s1170_s1 + $0x100] sm:$0xff]   ;;  %s775_s16 = sshll.u32 %s1174_s13, 2 }
   0xf   : > { %838 = vmatpush3.bf16.msra.mxu0 %v917_v9  ;;  %v934_v26 = vld [vmem:[%s1170_s1 + $0xf0] sm:$0xff]   ;;  %v938_v30 = vld [vmem:[%s1170_s1 + $0xf8] sm:$0xff]   ;;  %v946_v40 = vld [vmem:[%s1170_s1 + $0x148] sm:$0xff]   ;;  %s168_s19 = scalar_lea.vmem %s1172_s3, %s775_s16 }
  0x10   : > { %839 = vmatprep.subr.bf16.mxu0 %v920_v12  ;;  %v935_v27 = vld [vmem:[%s1170_s1 + $0xb0] sm:$0xff]   ;;  %s1097_s25 = scalar_lea.vmem %s1169_s0, %s899_s14  ;;  %v941_v34 = vld [vmem:[%s1170_s1 + $0xb8] sm:$0xff]   ;;  %v947_v41 = vld [vmem:[%s1170_s1 + $0x108] sm:$0xff]  }
  0x11   : > { %860 = vmatpush3.bf16.msra.mxu1 %v919_v11  ;;  %v170_v31 = vld [vmem:[%s1097_s25] sm:$0xff]  ;;  %v171_v36 = vld [vmem:[%s1097_s25 + $0x8] sm:$0xff]  ;;  %v948_v42 = vld [vmem:[%s1170_s1 + $0x150] sm:$0xff]  }
  0x12   : > { %861 = vmatprep.subr.bf16.mxu1 %v922_v14  ;;  %v777_v32 = vcombine.low %v170_v31, %v170_v31  ;;  %v778_v33 = vcombine.high %v170_v31, %v170_v31  ;;  %v779_v37 = vcombine.low %v171_v36, %v171_v36  ;;  %v780_v38 = vcombine.high %v171_v36, %v171_v36  ;;  %v949_v43 = vld [vmem:[%s1170_s1 + $0x110] sm:$0xff]   ;;  %v950_v44 = vld [vmem:[%s1170_s1 + $0x158] sm:$0xff]   ;;  %v952_v46 = vld [vmem:[%s1170_s1 + $0x160] sm:$0xff]  }
  0x13   : > { %840 = vmatpush3.bf16.msra.mxu0 %v921_v13  ;;  %v951_v45 = vld [vmem:[%s1170_s1 + $0x118] sm:$0xff]   ;;  %v953_v47 = vld [vmem:[%s1170_s1 + $0x120] sm:$0xff]   ;;  %v172_v48 = vld [vmem:[%s1097_s25 + $0x10] sm:$0xff] }
  0x14   : > { %841 = vmatprep.subr.bf16.mxu0 %v924_v16  ;;  %617 = vmatprep.mubr.bf16.mxu0 %v778_v33  ;;  %v954_v49 = vld [vmem:[%s1170_s1 + $0x168] sm:$0xff]   ;;  %v782_v50 = vcombine.high %v172_v48, %v172_v48  ;;  %v956_v52 = vld [vmem:[%s1170_s1 + $0x170] sm:$0xff]   ;;  %v958_v54 = vld [vmem:[%s1170_s1 + $0x178] sm:$0xff]   ;;  %v781_v56 = vcombine.low %v172_v48, %v172_v48 }
  0x15   : > { %862 = vmatpush3.bf16.msra.mxu1 %v923_v15  ;;  %657 = vmatprep.mubr.bf16.mxu1 %v780_v38  ;;  %v955_v51 = vld [vmem:[%s1170_s1 + $0x128] sm:$0xff]   ;;  %v957_v53 = vld [vmem:[%s1170_s1 + $0x130] sm:$0xff]   ;;  %v959_v55 = vld [vmem:[%s1170_s1 + $0x138] sm:$0xff]  }
  0x16   : > { %863 = vmatprep.subr.bf16.mxu1 %v926_v18  ;;  %v776_v58 = vld [vmem:[%s1171_s2] ss:$0 sm:$0xff] }
  0x17   : > { %842 = vmatpush3.bf16.msra.mxu0 %v925_v17 }
  0x18   : > { %843 = vmatprep.subr.bf16.mxu0 %v928_v20 }
  0x19   : > { %864 = vmatpush3.bf16.msra.mxu1 %v927_v19 }
  0x1a   : > { %865 = vmatprep.subr.bf16.mxu1 %v930_v22 }
  0x1b   : > { %844 = vmatpush3.bf16.msra.mxu0 %v929_v21 }
  0x1c   : > { %845 = vmatprep.subr.bf16.mxu0 %v932_v24 }
  0x1d   : > { %866 = vmatpush3.bf16.msra.mxu1 %v931_v23 }
  0x1e   : > { %867 = vmatprep.subr.bf16.mxu1 %v934_v26 }
  0x1f   : > { %846 = vmatpush3.bf16.msra.mxu0 %v933_v25 }
  0x20   : > { %847 = vmatprep.subr.bf16.mxu0 %v936_v28 }
  0x21   : > { %868 = vmatpush3.bf16.msra.mxu1 %v935_v27 }
  0x22   : > { %869 = vmatprep.subr.bf16.mxu1 %v938_v30 }
  0x23   : > { %848 = vmatpush3.bf16.msra.mxu0 %v937_v29 }
  0x24   : > { %877 = vmatprep.subr.bf16.mxu0 %v942_v35 }
  0x25   : > { %870 = vmatpush3.bf16.msra.mxu1 %v941_v34 }
  0x26   : > { %618 = vmatmul.mubr.bf16.vlgmr.msra.gmra.mrb[0].mxu0 %v777_v32 }
  0x27   : > { %878 = vmatpush3.bf16.msra.mxu0 %v945_v39  ;;  %697 = vmatprep.mubr.bf16.mxu0 %v782_v50 }
  0x28   : > { %658 = vmatmul.mubr.bf16.vlgmr.msra.gmra.mrb[0].mxu1 %v779_v37  ;;  %879 = vmatprep.subr.bf16.mxu0 %v946_v40 }
  0x2b   : > { %880 = vmatpush3.bf16.msra.mxu0 %v947_v41 }
  0x2c   : > { %881 = vmatprep.subr.bf16.mxu0 %v948_v42 }
  0x2f   : > { %882 = vmatpush3.bf16.msra.mxu0 %v949_v43 }
  0x30   : > { %883 = vmatprep.subr.bf16.mxu0 %v950_v44 }
  0x33   : > { %884 = vmatpush3.bf16.msra.mxu0 %v951_v45 }
  0x34   : > { %885 = vmatprep.subr.bf16.mxu0 %v952_v46 }
  0x37   : > { %886 = vmatpush3.bf16.msra.mxu0 %v953_v47 }
  0x38   : > { %887 = vmatprep.subr.bf16.mxu0 %v954_v49 }
  0x3b   : > { %888 = vmatpush3.bf16.msra.mxu0 %v955_v51 }
  0x3c   : > { %889 = vmatprep.subr.bf16.mxu0 %v956_v52 }
  0x3f   : > { %890 = vmatpush3.bf16.msra.mxu0 %v957_v53 }
  0x40   : > { %891 = vmatprep.subr.bf16.mxu0 %v958_v54 }
  0x43   : > { %892 = vmatpush3.bf16.msra.mxu0 %v959_v55 }
  0x46   : > { %698 = vmatmul.mubr.bf16.vlgmr.msra.gmra.mrb[4].mxu0 %v781_v56 }
  0xf9   : > { %v849_v57 = vpop.f32.mrb[0].mxu0 }
  0xfa   : > { %v850_v59 = vpop.f32.mrb[1].mxu0 }
  0xfb   : > { %v851_v60 = vadd.f32 %v850_v59, %v849_v57  ;;  %v852_v61 = vpop.f32.mrb[2].mxu0  ;;  %v871_v62 = vpop.f32.mrb[0].mxu1 }
  0xfc   : > { %v853_v63 = vpop.f32.mrb[3].mxu0  ;;  %v872_v0 = vpop.f32.mrb[1].mxu1 }
  0xfd   : > { %v620_v1 = vadd.f32 %v851_v60, %v776_v58  ;;  %v873_v2 = vadd.f32 %v872_v0, %v871_v62  ;;  %v874_v3 = vpop.f32.mrb[2].mxu1 }
  0xfe   : > { %v875_v4 = vpop.f32.mrb[3].mxu1 }
  0xff   : > { %v660_v5 = vadd.f32 %v873_v2, %v620_v1 }
 0x119   : > { %v893_v6 = vpop.f32.mrb[4].mxu0 }
 0x11a   : > { %v894_v7 = vpop.f32.mrb[5].mxu0 }
 0x11b   : > { %v895_v8 = vadd.f32 %v894_v7, %v893_v6  ;;  %v896_v9 = vpop.f32.mrb[6].mxu0 }
 0x11c   : > { %v897_v10 = vpop.f32.mrb[7].mxu0 }
 0x11d   : > { %v700_v11 = vadd.f32 %v895_v8, %v660_v5 }
 0x11f   : > { %v705_v12 = vmul.f32 %v700_v11, %v700_v11 }
 0x121   : > { %v706_v13 = vmul.f32 %v705_v12, %v700_v11 }
 0x123   : > { %v707_v14 = vmul.f32 0.044715, %v706_v13 }
 0x125   : > { %v708_v15 = vadd.f32 %v707_v14, %v700_v11 }
 0x127   : > { %v709_v16 = vmul.f32 0.7978846, %v708_v15 }
 0x129   : > { %962 = vtanh.f32 %v709_v16 }
 0x133   : > { %v963_v17 = vpop.eup %962 }
 0x134   : > { %v711_v18 = vadd.f32 1.0, %v963_v17 }
 0x136   : > { %v712_v19 = vmul.f32 0.5, %v711_v18 }
 0x138   : > { %v713_v20 = vmul.f32 %v712_v19, %v700_v11 }
 0x13a   : > { %v714_v21 = vpack.c.bf16 %v713_v20, %v713_v20 }
 0x13c   : > { %715 = vst [vmem:[%s168_s19] sm:$0xf] %v714_v21 }
 0x13d PF: > { %s13_s12 = sadd.s32 1, %s970_s12  }
 0x13e   : > { %p10_p4 = scmp.ge.s32.totalorder %s13_s12, 4  }
 0x140   :  { %12 = sbr.rel (!%p10_p4) target bundleno = 1 (0x1), region = 62 }

// kernel: transformer_net_forward.21
= control target key start
LH: loop header
LB: loop body
LE: loop exit
PB: predicated region body
PF: predicated region fallthrough
CT: control target
= control target key end

     0   :  { %s684_s12 = smov 0   ;;  %s784_s0 = inlined_call_operand.vmem [shape: bf16[16,384], index: 0, kind: input, shape index: {}]   ;;  %s785_s1 = inlined_call_operand.vmem [shape: bf16[384,128], index: 1, kind: input, shape index: {}]   ;;  %s786_s2 = inlined_call_operand.vmem [shape: f32[1,128], index: 2, kind: input, shape index: {}]   ;;  %s787_s3 = inlined_call_operand.vmem [shape: bf16[16,128], index: 3, kind: output, shape index: {}]  }
   0x1 LB: > { %s526_s13 = sadd.s32 4294967295, %s660_s12   ;;  %p530_p0 = scmp.ge.s32.totalorder %s660_s12, 1  ;;  %s660_s12 = sphi %s684_s12, %s13_s12  }
   0x2   : > { %p137_p1 = scmp.lt.s32.totalorder %s660_s12, 3 }
   0x4   : > { %p138_p2 = pnand %p530_p0, %p137_p1 }
   0x5   : > { %v625_v0 = vld [vmem:[%s785_s1 + $0x40] sm:$0xff] (!%p138_p2)   ;;  %v662_v2 = vmov (!%p138_p2), 0.0   ;;  %v628_v4 = vld [vmem:[%s785_s1 + $0x48] sm:$0xff] (!%p138_p2)   ;;  %vm663_vm0 = vmmov (!%p138_p2), 0   ;;  %v631_v7 = vld [vmem:[%s785_s1 + $0x50] sm:$0xff] (!%p138_p2)   ;;  %p160_p3 = scmp.lt.s32.totalorder (!%p138_p2), %s526_s13, 1 }
   0x6   : > { %141 = sbr.rel (%p138_p2) target bundleno = 287 (0x11f), region = 32  ;;  %v626_v1 = vld [vmem:[%s785_s1] sm:$0xff] (!%p138_p2)   ;;  %594 = vmatprep.subr.bf16.mxu1 (!%p138_p2), %v662_v2  ;;  %563 = vmatprep.subr.bf16.mxu0 (!%p138_p2), %v625_v0  ;;  %v629_v5 = vld [vmem:[%s785_s1 + $0x8] sm:$0xff] (!%p138_p2)   ;;  %v632_v8 = vld [vmem:[%s785_s1 + $0x10] sm:$0xff] (!%p138_p2)  }
   0x7   : > { %v627_v3 = vld [vmem:[%s785_s1 + $0x80] sm:$0xff] (!%p138_p2)   ;;  %564 = vmatpush3.bf16.msra.mxu0 (!%p138_p2), %v626_v1  ;;  %610 = vmatprep.mubr.msk.bf16.mxu1 (!%p138_p2), %vm663_vm0, %v662_v2  ;;  %v630_v6 = vld [vmem:[%s785_s1 + $0x88] sm:$0xff] (!%p138_p2)   ;;  %v633_v9 = vld [vmem:[%s785_s1 + $0x90] sm:$0xff] (!%p138_p2)  }
   0x8   : > { %595 = vmatpush3.bf16.msra.mxu1 (!%p138_p2), %v627_v3  ;;  %565 = vmatprep.subr.bf16.mxu0 (!%p138_p2), %v628_v4  ;;  %v634_v10 = vld [vmem:[%s785_s1 + $0x58] sm:$0xff] (!%p138_p2)   ;;  %v637_v13 = vld [vmem:[%s785_s1 + $0x60] sm:$0xff] (!%p138_p2)   ;;  %v640_v16 = vld [vmem:[%s785_s1 + $0x68] sm:$0xff] (!%p138_p2)  }
   0x9   : > { %596 = vmatprep.subr.bf16.mxu1 (!%p138_p2), %v662_v2  ;;  %v635_v11 = vld [vmem:[%s785_s1 + $0x18] sm:$0xff] (!%p138_p2)   ;;  %v638_v14 = vld [vmem:[%s785_s1 + $0x20] sm:$0xff] (!%p138_p2)   ;;  %v641_v17 = vld [vmem:[%s785_s1 + $0x28] sm:$0xff] (!%p138_p2)  }
   0xa   : > { %v636_v12 = vld [vmem:[%s785_s1 + $0x98] sm:$0xff] (!%p138_p2)   ;;  %v639_v15 = vld [vmem:[%s785_s1 + $0xa0] sm:$0xff] (!%p138_p2)   ;;  %v642_v18 = vld [vmem:[%s785_s1 + $0xa8] sm:$0xff] (!%p138_p2)  }
   0xb   : > { %566 = vmatpush3.bf16.msra.mxu0 (!%p138_p2), %v629_v5  ;;  %v643_v19 = vld [vmem:[%s785_s1 + $0x70] sm:$0xff] (!%p138_p2)   ;;  %v646_v23 = vld [vmem:[%s785_s1 + $0x78] sm:$0xff] (!%p138_p2)   ;;  %v533_v31 = vld [vmem:[%s786_s2] ss:$0 sm:$0xff] (!%p138_p2) }
   0xc   : > { %597 = vmatpush3.bf16.msra.mxu1 (!%p138_p2), %v630_v6  ;;  %567 = vmatprep.subr.bf16.mxu0 (!%p138_p2), %v631_v7  ;;  %v644_v20 = vld [vmem:[%s785_s1 + $0x30] sm:$0xff] (!%p138_p2)   ;;  %v647_v25 = vld [vmem:[%s785_s1 + $0x38] sm:$0xff] (!%p138_p2)  }
   0xd   : > { %598 = vmatprep.subr.bf16.mxu1 %v662_v2  ;;  %s789_s13 = smov (!%p160_p3, %s526_s13), 1  ;;  %v645_v21 = vld [vmem:[%s785_s1 + $0xb0] sm:$0xff]   ;;  %v651_v26 = vld [vmem:[%s785_s1 + $0xb8] sm:$0xff]  }
   0xe   : > { %s614_s21 = smul.u32 12, %s789_s13  ;;  %s532_s18 = sshll.u32 %s789_s13, 2 }
   0xf   : > { %568 = vmatpush3.bf16.msra.mxu0 %v632_v8 }
  0x10   : > { %599 = vmatpush3.bf16.msra.mxu1 %v633_v9  ;;  %569 = vmatprep.subr.bf16.mxu0 %v634_v10  ;;  %s164_s30 = scalar_lea.vmem %s784_s0, %s614_s21  ;;  %s168_s21 = scalar_lea.vmem %s787_s3, %s532_s18 }
  0x11   : > { %600 = vmatprep.subr.bf16.mxu1 %v662_v2  ;;  %v170_v22 = vld [vmem:[%s164_s30] sm:$0xff]  ;;  %v650_v28 = vld [vmem:[%s164_s30 + $0x8] ss:$0 sps:$4 sm:$0xff]  }
  0x12   : > { %v535_v24 = vcombine.high %v170_v22, %v170_v22  ;;  %v534_v27 = vcombine.low %v170_v22, %v170_v22 }
  0x13   : > { %570 = vmatpush3.bf16.msra.mxu0 %v635_v11 }
  0x14   : > { %601 = vmatpush3.bf16.msra.mxu1 %v636_v12  ;;  %571 = vmatprep.subr.bf16.mxu0 %v637_v13 }
  0x15   : > { %602 = vmatprep.subr.bf16.mxu1 %v662_v2  ;;  %414 = vmatprep.mubr.bf16.mxu0 %v535_v24 }
  0x17   : > { %572 = vmatpush3.bf16.msra.mxu0 %v638_v14 }
  0x18   : > { %603 = vmatpush3.bf16.msra.mxu1 %v639_v15  ;;  %573 = vmatprep.subr.bf16.mxu0 %v640_v16 }
  0x19   : > { %604 = vmatprep.subr.bf16.mxu1 %v662_v2 }
  0x1b   : > { %574 = vmatpush3.bf16.msra.mxu0 %v641_v17 }
  0x1c   : > { %605 = vmatpush3.bf16.msra.mxu1 %v642_v18  ;;  %575 = vmatprep.subr.bf16.mxu0 %v643_v19 }
  0x1d   : > { %606 = vmatprep.subr.bf16.mxu1 %v662_v2 }
  0x1f   : > { %576 = vmatpush3.bf16.msra.mxu0 %v644_v20 }
  0x20   : > { %607 = vmatpush3.bf16.msra.mxu1 %v645_v21  ;;  %577 = vmatprep.subr.bf16.mxu0 %v646_v23 }
  0x21   : > { %608 = vmatprep.subr.bf16.mxu1 %v662_v2 }
  0x23   : > { %578 = vmatpush3.bf16.msra.mxu0 %v647_v25 }
  0x24   : > { %609 = vmatpush3.bf16.msra.mxu1 %v651_v26 }
  0x26   : > { %415 = vmatmul.mubr.bf16.vlgmr.msra.gmra.mrb[0].mxu0 %v534_v27 }
  0x27   : > { %611 = vmatmul.mubr.bf16.vlgmr.msra.gmra.mrb[0].mxu1 %v650_v28 }
  0xf9   : > { %v579_v29 = vpop.f32.mrb[0].mxu0 }
  0xfa   : > { %v580_v30 = vpop.f32.mrb[1].mxu0  ;;  %v456_v32 = vpop.f32.mrb[0].mxu1 }
  0xfb   : > { %v581_v33 = vadd.f32 %v580_v30, %v579_v29  ;;  %v582_v34 = vpop.f32.mrb[2].mxu0  ;;  %v612_v35 = vpop.f32.mrb[1].mxu1 }
  0xfc   : > { %v583_v36 = vpop.f32.mrb[3].mxu0  ;;  %v459_v37 = vpop.f32.mrb[2].mxu1 }
  0xfd   : > { %v417_v38 = vadd.f32 %v581_v33, %v533_v31  ;;  %v613_v39 = vpop.f32.mrb[3].mxu1 }
  0xff   : > { %v457_v40 = vadd.f32 %v456_v32, %v417_v38 }
 0x101   : > { %v462_v41 = vmul.f32 %v457_v40, %v457_v40 }
 0x103   : > { %v463_v42 = vmul.f32 %v462_v41, %v457_v40 }
 0x105   : > { %v464_v43 = vmul.f32 0.044715, %v463_v42 }
 0x107   : > { %v465_v44 = vadd.f32 %v464_v43, %v457_v40 }
 0x109   : > { %v466_v45 = vmul.f32 0.7978846, %v465_v44 }
 0x10b   : > { %652 = vtanh.f32 %v466_v45 }
 0x115   : > { %v653_v46 = vpop.eup %652 }
 0x116   : > { %v468_v47 = vadd.f32 1.0, %v653_v46 }
 0x118   : > { %v469_v48 = vmul.f32 0.5, %v468_v47 }
 0x11a   : > { %v470_v49 = vmul.f32 %v469_v48, %v457_v40 }
 0x11c   : > { %v471_v50 = vpack.c.bf16 %v470_v49, %v470_v49 }
 0x11e   : > { %472 = vst [vmem:[%s168_s21] sm:$0xf] %v471_v50 }
 0x11f PF: > { %s13_s12 = sadd.s32 1, %s660_s12  }
 0x120   : > { %p10_p4 = scmp.ge.s32.totalorder %s13_s12, 4  }
 0x122   :  { %12 = sbr.rel (!%p10_p4) target bundleno = 1 (0x1), region = 62 }

// kernel: transformer_net_forward.22
= control target key start
LH: loop header
LB: loop body
LE: loop exit
PB: predicated region body
PF: predicated region fallthrough
CT: control target
= control target key end

     0   :  { %s334_s9 = smov 0   ;;  %s354_s0 = inlined_call_operand.vmem [shape: bf16[8,2], index: 0, kind: input, shape index: {}]   ;;  %s355_s1 = inlined_call_operand.vmem [shape: bf16[2,2,256], index: 1, kind: input, shape index: {}]   ;;  %s356_s2 = inlined_call_operand.vmem [shape: bf16[2,8,256], index: 2, kind: output, shape index: {}]  }
   0x1 LB: > { %s283_s10 = sadd.s32 4294967295, %s315_s9   ;;  %p287_p0 = scmp.ge.s32.totalorder %s315_s9, 1  ;;  %s315_s9 = sphi %s334_s9, %s12_s9  }
   0x2   : > { %p111_p1 = scmp.lt.s32.totalorder %s315_s9, 3 }
   0x4   : > { %p112_p2 = pnand %p287_p0, %p111_p1 }
   0x5   : > { %p132_p3 = scmp.lt.s32.totalorder (!%p112_p2), %s283_s10, 1  ;;  %v156_v0 = vlaneseq (!%p112_p2)  ;;  %v317_v1 = vmov (!%p112_p2), 1966171168   ;;  %v318_v3 = vmov (!%p112_p2), 0   ;;  %vm171_vm0 = vcmask (!%p112_p2), 1040384  }
   0x6   : > { %115 = sbr.rel (%p112_p2) target bundleno = 241 (0xf1), region = 28  ;;  %v154_v2 = vunpack.c.l.s4 (!%p112_p2), %v317_v1  ;;  %210 = vmatprep.mubr.bf16.mxu0 (!%p112_p2), %v318_v3  ;;  %v142_v12 = vld [vmem:[%s354_s0] sm:$0xf] (!%p112_p2)  ;;  %vm167_vm1 = vcmask (!%p112_p2), 15360  }
   0x7   : > { %v157_v4 = vshrl.u32 (!%p112_p2), %v156_v0, 7 }
   0x8   : > { %v155_v5 = vunpack.c.0.s8 (!%p112_p2), %v154_v2 }
   0xa   : > { %v158_v6 = vsub.s32 (!%p112_p2), %v155_v5, %v157_v4 }
   0xd   : > { %s358_s10 = smov (!%p132_p3, %s283_s10), 1 }
   0xe   : > { %s288_s11 = sshll.u32 %s358_s10, 1  ;;  %s297_s17 = sshll.u32 %s358_s10, 3 }
   0xf   : > { %s135_s14 = scalar_lea.vmem %s355_s1, %s288_s11  ;;  %s140_s20 = scalar_lea.vmem %s356_s2, %s297_s17 }
  0x10   : > { %v291_v7 = vld.sshfl [vmem:[%s135_s14] sm:$0x11 pattern:$0x75316420] }
  0x11   : > { %v152_v8 = vcombine.high %v291_v7, %v291_v7  ;;  %v159_v9 = vrot.slane %v291_v7, %v158_v6 }
  0x13   : > { %v166_v10 = vrot.slane %v152_v8, %v158_v6  ;;  %v173_v11 = vsel %vm171_vm0, %v159_v9, 0 }
  0x15   : > { %292 = vmatprep.subr.msk.bf16.mxu0 %vm171_vm0, %v166_v10 }
  0x16   : > { %179 = vmatpush1.bf16.msra.mxu0 %v173_v11 }
  0x19   : > { %293 = vmatmul.mubr.msk.bf16.vlgmr.msra.gmra.mrb[0].mxu0 %vm167_vm1, %v142_v12 }
  0xec   : > { %v212_v13 = vpop.f32.mrb[0].mxu0 }
  0xed   : > { %v214_v14 = vpop.f32.mrb[1].mxu0 }
  0xee   : > { %v298_v15 = vpack.c.bf16 %v214_v14, %v212_v13  ;;  %v216_v16 = vpop.f32.mrb[2].mxu0 }
  0xef   : > { %v217_v17 = vpop.f32.mrb[3].mxu0 }
  0xf0   : > { %227 = vst [vmem:[%s140_s20] sm:$0xff] %v298_v15 }
  0xf1 PF: > { %s12_s9 = sadd.s32 1, %s315_s9  }
  0xf2   : > { %p9_p4 = scmp.ge.s32.totalorder %s12_s9, 4  }
  0xf4   :  { %11 = sbr.rel (!%p9_p4) target bundleno = 1 (0x1), region = 58 }

// kernel: transformer_net_forward.19
= control target key start
LH: loop header
LB: loop body
LE: loop exit
PB: predicated region body
PF: predicated region fallthrough
CT: control target
= control target key end

     0   :  { %s394_s9 = smov 0   ;;  %s414_s0 = inlined_call_operand.vmem [shape: bf16[8,4], index: 0, kind: input, shape index: {}]   ;;  %s415_s1 = inlined_call_operand.vmem [shape: bf16[2,4,512], index: 1, kind: input, shape index: {}]   ;;  %s416_s2 = inlined_call_operand.vmem [shape: bf16[2,8,512], index: 2, kind: output, shape index: {}]  }
   0x1 LB: > { %s337_s10 = sadd.s32 4294967295, %s375_s9   ;;  %p341_p0 = scmp.ge.s32.totalorder %s375_s9, 1  ;;  %s375_s9 = sphi %s394_s9, %s12_s9  }
   0x2   : > { %p112_p1 = scmp.lt.s32.totalorder %s375_s9, 3 }
   0x4   : > { %p113_p2 = pnand %p341_p0, %p112_p1 }
   0x5   : > { %p134_p3 = scmp.lt.s32.totalorder (!%p113_p2), %s337_s10, 1  ;;  %v152_v0 = vlaneseq (!%p113_p2)  ;;  %v377_v1 = vmov (!%p113_p2), 1983009808   ;;  %v378_v3 = vmov (!%p113_p2), 0   ;;  %vm169_vm0 = vcmask (!%p113_p2), 1041408  }
   0x6   : > { %116 = sbr.rel (%p113_p2) target bundleno = 243 (0xf3), region = 28  ;;  %v150_v2 = vunpack.c.l.s4 (!%p113_p2), %v377_v1  ;;  %214 = vmatprep.mubr.bf16.mxu0 (!%p113_p2), %v378_v3  ;;  %255 = vmatprep.mubr.bf16.mxu1 (!%p113_p2), %v378_v3  ;;  %v145_v15 = vld [vmem:[%s414_s0] sm:$0xf] (!%p113_p2)  ;;  %vm165_vm1 = vcmask (!%p113_p2), 31744  }
   0x7   : > { %v153_v4 = vshrl.u32 (!%p113_p2), %v152_v0, 7 }
   0x8   : > { %v151_v5 = vunpack.c.0.s8 (!%p113_p2), %v150_v2 }
   0xa   : > { %v154_v6 = vsub.s32 (!%p113_p2), %v151_v5, %v153_v4 }
   0xd   : > { %s418_s10 = smov (!%p134_p3, %s337_s10), 1 }
   0xe   : > { %s354_s11 = sshll.u32 %s418_s10, 3  ;;  %s355_s17 = sshll.u32 %s418_s10, 4 }
   0xf   : > { %s138_s14 = scalar_lea.vmem %s415_s1, %s354_s11  ;;  %s143_s20 = scalar_lea.vmem %s416_s2, %s355_s17 }
  0x10   : > { %v146_v7 = vld [vmem:[%s138_s14] sm:$0xff] }
  0x11   : > { %v155_v8 = vrot.slane %v146_v7, %v154_v6  ;;  %v148_v9 = vcombine.high %v146_v7, %v146_v7 }
  0x13   : > { %v163_v10 = vcombine.high %v155_v8, %v155_v8  ;;  %v171_v11 = vsel %vm169_vm0, %v155_v8, 0  ;;  %v162_v12 = vrot.slane %v148_v9, %v154_v6 }
  0x15   : > { %346 = vmatprep.subr.msk.bf16.mxu0 %vm169_vm0, %v163_v10  ;;  %v164_v13 = vcombine.high %v162_v12, %v162_v12  ;;  %v177_v14 = vsel %vm169_vm0, %v162_v12, 0 }
  0x16   : > { %183 = vmatpush1.bf16.msra.mxu0 %v171_v11 }
  0x17   : > { %348 = vmatprep.subr.msk.bf16.mxu1 %vm169_vm0, %v164_v13 }
  0x18   : > { %224 = vmatpush1.bf16.msra.mxu1 %v177_v14 }
  0x19   : > { %347 = vmatmul.mubr.msk.bf16.vlgmr.msra.gmra.mrb[0].mxu0 %vm165_vm1, %v145_v15 }
  0x1b   : > { %349 = vmatmul.mubr.msk.bf16.vlgmr.msra.gmra.mrb[0].mxu1 %vm165_vm1, %v145_v15 }
  0xec   : > { %v216_v16 = vpop.f32.mrb[0].mxu0 }
  0xed   : > { %v218_v17 = vpop.f32.mrb[1].mxu0 }
  0xee   : > { %v356_v18 = vpack.c.bf16 %v218_v17, %v216_v16  ;;  %v220_v19 = vpop.f32.mrb[2].mxu0  ;;  %v257_v20 = vpop.f32.mrb[0].mxu1 }
  0xef   : > { %v221_v21 = vpop.f32.mrb[3].mxu0  ;;  %v259_v22 = vpop.f32.mrb[1].mxu1 }
  0xf0   : > { %280 = vst [vmem:[%s143_s20] sm:$0xff] %v356_v18  ;;  %v357_v23 = vpack.c.bf16 %v259_v22, %v257_v20  ;;  %v261_v24 = vpop.f32.mrb[2].mxu1 }
  0xf1   : > { %v262_v25 = vpop.f32.mrb[3].mxu1 }
  0xf2   : > { %281 = vst [vmem:[%s143_s20 + $0x8] sm:$0xff] %v357_v23 }
  0xf3 PF: > { %s12_s9 = sadd.s32 1, %s375_s9  }
  0xf4   : > { %p9_p4 = scmp.ge.s32.totalorder %s12_s9, 4  }
  0xf6   :  { %11 = sbr.rel (!%p9_p4) target bundleno = 1 (0x1), region = 58 }

// kernel: transformer_net_forward.23
= control target key start
LH: loop header
LB: loop body
LE: loop exit
PB: predicated region body
PF: predicated region fallthrough
CT: control target
= control target key end

     0   :  { %s717_s9 = smov 0   ;;  %s785_s0 = inlined_call_operand.vmem [shape: bf16[8,2], index: 0, kind: input, shape index: {}]   ;;  %s786_s1 = inlined_call_operand.vmem [shape: bf16[16,2,128], index: 1, kind: input, shape index: {}]   ;;  %s787_s2 = inlined_call_operand.vmem [shape: bf16[16,8,128], index: 2, kind: output, shape index: {}]  }
   0x1 LB: > { %s586_s10 = sadd.s32 4294967295, %s698_s9   ;;  %p590_p0 = scmp.ge.s32.totalorder %s698_s9, 1  ;;  %s698_s9 = sphi %s717_s9, %s12_s9  }
   0x2   : > { %p112_p1 = scmp.lt.s32.totalorder %s698_s9, 3 }
   0x4   : > { %p113_p2 = pnand %p590_p0, %p112_p1 }
   0x5   : > { %s591_s11 = sshll.u32 (!%p113_p2), %s586_s10, 3  ;;  %v700_v0 = vmov (!%p113_p2), 0.0   ;;  %vm701_vm0 = vmmov (!%p113_p2), 0   ;;  %vm151_vm1 = vcmask (!%p113_p2), 1040384   ;;  %v145_v7 = vld [vmem:[%s785_s0] sm:$0xf] (!%p113_p2) }
   0x6   : > { %116 = sbr.rel (%p113_p2) target bundleno = 259 (0x103), region = 28  ;;  %634 = vmatprep.subr.bf16.mxu0 (!%p113_p2), %v700_v0  ;;  %640 = vmatprep.subr.bf16.mxu1 (!%p113_p2), %v700_v0  ;;  %p134_p3 = scmp.lt.s32.totalorder (!%p113_p2), %s591_s11, 15  ;;  %vm147_vm2 = vcmask (!%p113_p2), 15360  }
   0x7   : > { %636 = vmatprep.mubr.msk.bf16.mxu0 (!%p113_p2), %vm701_vm0, %v700_v0  ;;  %642 = vmatprep.mubr.msk.bf16.mxu1 (!%p113_p2), %vm701_vm0, %v700_v0 }
   0xd   : > { %s789_s11 = smov (!%p134_p3, %s591_s11), 15 }
   0xe   : > { %s733_s14 = scalar_lea.vmem %s786_s1, %s789_s11  ;;  %s593_s17 = sshll.u32 %s789_s11, 2 }
   0xf   : > { %v146_v1 = vld [vmem:[%s733_s14] sm:$0x1]  ;;  %v595_v2 = vld [vmem:[%s733_s14 + $0x1] sm:$0x1]  ;;  %v598_v3 = vld [vmem:[%s733_s14 + $0x2] sm:$0x1]  ;;  %s772_s20 = scalar_lea.vmem %s787_s2, %s593_s17 }
  0x10   : > { %v153_v4 = vsel %vm151_vm1, %v146_v1, 0  ;;  %v200_v5 = vsel %vm151_vm1, %v595_v2, 0  ;;  %v601_v6 = vld [vmem:[%s733_s14 + $0x3] sm:$0x1]  ;;  %v248_v8 = vsel %vm151_vm1, %v598_v3, 0 }
  0x11   : > { %635 = vmatpush3.bf16.msra.mxu0 %v153_v4  ;;  %641 = vmatpush3.bf16.msra.mxu1 %v200_v5  ;;  %v296_v9 = vsel %vm151_vm1, %v601_v6, 0  ;;  %v604_v10 = vld [vmem:[%s733_s14 + $0x4] sm:$0x1]  ;;  %v607_v11 = vld [vmem:[%s733_s14 + $0x5] sm:$0x1] }
  0x12   : > { %646 = vmatprep.subr.bf16.mxu0 %v700_v0  ;;  %652 = vmatprep.subr.bf16.mxu1 %v700_v0  ;;  %v344_v12 = vsel %vm151_vm1, %v604_v10, 0  ;;  %v392_v13 = vsel %vm151_vm1, %v607_v11, 0  ;;  %v610_v14 = vld [vmem:[%s733_s14 + $0x6] sm:$0x1]  ;;  %v613_v15 = vld [vmem:[%s733_s14 + $0x7] sm:$0x1] }
  0x13   : > { %v440_v16 = vsel %vm151_vm1, %v610_v14, 0  ;;  %v488_v17 = vsel %vm151_vm1, %v613_v15, 0 }
  0x14   : > { %637 = vmatmul.mubr.msk.bf16.vlgmr.msra.gmra.mrb[0].mxu0 %vm147_vm2, %v145_v7  ;;  %643 = vmatmul.mubr.msk.bf16.vlgmr.msra.gmra.mrb[0].mxu1 %vm147_vm2, %v145_v7 }
  0x15   : > { %647 = vmatpush3.bf16.msra.mxu0 %v248_v8  ;;  %653 = vmatpush3.bf16.msra.mxu1 %v296_v9 }
  0x16   : > { %648 = vmatprep.mubr.msk.bf16.mxu0 %vm701_vm0, %v700_v0  ;;  %654 = vmatprep.mubr.msk.bf16.mxu1 %vm701_vm0, %v700_v0 }
  0x17   : > { %658 = vmatprep.subr.bf16.mxu0 %v700_v0  ;;  %664 = vmatprep.subr.bf16.mxu1 %v700_v0 }
  0x1c   : > { %649 = vmatmul.mubr.msk.bf16.vlgmr.msra.gmra.mrb[4].mxu0 %vm147_vm2, %v145_v7  ;;  %655 = vmatmul.mubr.msk.bf16.vlgmr.msra.gmra.mrb[4].mxu1 %vm147_vm2, %v145_v7 }
  0x1d   : > { %659 = vmatpush3.bf16.msra.mxu0 %v344_v12  ;;  %665 = vmatpush3.bf16.msra.mxu1 %v392_v13 }
  0x1e   : > { %660 = vmatprep.mubr.msk.bf16.mxu0 %vm701_vm0, %v700_v0  ;;  %666 = vmatprep.mubr.msk.bf16.mxu1 %vm701_vm0, %v700_v0 }
  0x1f   : > { %670 = vmatprep.subr.bf16.mxu0 %v700_v0  ;;  %676 = vmatprep.subr.bf16.mxu1 %v700_v0 }
  0x24   : > { %661 = vmatmul.mubr.msk.bf16.vlgmr.msra.gmra.mrb[8].mxu0 %vm147_vm2, %v145_v7  ;;  %667 = vmatmul.mubr.msk.bf16.vlgmr.msra.gmra.mrb[8].mxu1 %vm147_vm2, %v145_v7 }
  0x25   : > { %671 = vmatpush3.bf16.msra.mxu0 %v440_v16  ;;  %677 = vmatpush3.bf16.msra.mxu1 %v488_v17 }
  0x26   : > { %672 = vmatprep.mubr.msk.bf16.mxu0 %vm701_vm0, %v700_v0  ;;  %678 = vmatprep.mubr.msk.bf16.mxu1 %vm701_vm0, %v700_v0 }
  0x2c   : > { %673 = vmatmul.mubr.msk.bf16.vlgmr.msra.gmra.mrb[12].mxu0 %vm147_vm2, %v145_v7  ;;  %679 = vmatmul.mubr.msk.bf16.vlgmr.msra.gmra.mrb[12].mxu1 %vm147_vm2, %v145_v7 }
  0xe7   : > { %v189_v18 = vpop.f32.mrb[0].mxu0  ;;  %v236_v19 = vpop.f32.mrb[0].mxu1 }
  0xe8   : > { %v195_v20 = vpack.c.bf16 %v189_v18, %v189_v18  ;;  %v242_v21 = vpack.c.bf16 %v236_v19, %v236_v19  ;;  %v638_v22 = vpop.f32.mrb[1].mxu0  ;;  %v644_v23 = vpop.f32.mrb[1].mxu1 }
  0xe9   : > { %v192_v24 = vpop.f32.mrb[2].mxu0  ;;  %v239_v25 = vpop.f32.mrb[2].mxu1 }
  0xea   : > { %196 = vst [vmem:[%s772_s20] sm:$0xf] %v195_v20  ;;  %597 = vst [vmem:[%s772_s20 + $0x4] sm:$0xf] %v242_v21  ;;  %v639_v26 = vpop.f32.mrb[3].mxu0  ;;  %v645_v27 = vpop.f32.mrb[3].mxu1 }
  0xef   : > { %v284_v28 = vpop.f32.mrb[4].mxu0  ;;  %v332_v29 = vpop.f32.mrb[4].mxu1 }
  0xf0   : > { %v290_v30 = vpack.c.bf16 %v284_v28, %v284_v28  ;;  %v338_v31 = vpack.c.bf16 %v332_v29, %v332_v29  ;;  %v650_v32 = vpop.f32.mrb[5].mxu0  ;;  %v656_v33 = vpop.f32.mrb[5].mxu1 }
  0xf1   : > { %v287_v34 = vpop.f32.mrb[6].mxu0  ;;  %v335_v35 = vpop.f32.mrb[6].mxu1 }
  0xf2   : > { %600 = vst [vmem:[%s772_s20 + $0x8] sm:$0xf] %v290_v30  ;;  %603 = vst [vmem:[%s772_s20 + $0xc] sm:$0xf] %v338_v31  ;;  %v651_v36 = vpop.f32.mrb[7].mxu0  ;;  %v657_v37 = vpop.f32.mrb[7].mxu1 }
  0xf7   : > { %v380_v38 = vpop.f32.mrb[8].mxu0  ;;  %v428_v39 = vpop.f32.mrb[8].mxu1 }
  0xf8   : > { %v386_v40 = vpack.c.bf16 %v380_v38, %v380_v38  ;;  %v434_v41 = vpack.c.bf16 %v428_v39, %v428_v39  ;;  %v662_v42 = vpop.f32.mrb[9].mxu0  ;;  %v668_v43 = vpop.f32.mrb[9].mxu1 }
  0xf9   : > { %v383_v44 = vpop.f32.mrb[10].mxu0  ;;  %v431_v45 = vpop.f32.mrb[10].mxu1 }
  0xfa   : > { %606 = vst [vmem:[%s772_s20 + $0x10] sm:$0xf] %v386_v40  ;;  %609 = vst [vmem:[%s772_s20 + $0x14] sm:$0xf] %v434_v41  ;;  %v663_v46 = vpop.f32.mrb[11].mxu0  ;;  %v669_v47 = vpop.f32.mrb[11].mxu1 }
  0xff   : > { %v476_v48 = vpop.f32.mrb[12].mxu0  ;;  %v524_v49 = vpop.f32.mrb[12].mxu1 }
 0x100   : > { %v482_v50 = vpack.c.bf16 %v476_v48, %v476_v48  ;;  %v530_v51 = vpack.c.bf16 %v524_v49, %v524_v49  ;;  %v674_v52 = vpop.f32.mrb[13].mxu0  ;;  %v680_v53 = vpop.f32.mrb[13].mxu1 }
 0x101   : > { %v479_v54 = vpop.f32.mrb[14].mxu0  ;;  %v527_v55 = vpop.f32.mrb[14].mxu1 }
 0x102   : > { %612 = vst [vmem:[%s772_s20 + $0x18] sm:$0xf] %v482_v50  ;;  %615 = vst [vmem:[%s772_s20 + $0x1c] sm:$0xf] %v530_v51  ;;  %v675_v56 = vpop.f32.mrb[15].mxu0  ;;  %v681_v57 = vpop.f32.mrb[15].mxu1 }
 0x103 PF: > { %s12_s9 = sadd.s32 1, %s698_s9  }
 0x104   : > { %p9_p4 = scmp.ge.s32.totalorder %s12_s9, 4  }
 0x106   :  { %11 = sbr.rel (!%p9_p4) target bundleno = 1 (0x1), region = 72 }

// kernel: transformer_net_forward.18
= control target key start
LH: loop header
LB: loop body
LE: loop exit
PB: predicated region body
PF: predicated region fallthrough
CT: control target
= control target key end

     0   :  { %s572_s12 = smov 0   ;;  %s644_s0 = inlined_call_operand.vmem [shape: bf16[32,256], index: 0, kind: input, shape index: {}]   ;;  %s645_s1 = inlined_call_operand.vmem [shape: bf16[256,128], index: 1, kind: input, shape index: {}]   ;;  %s646_s2 = inlined_call_operand.vmem [shape: f32[1,128], index: 2, kind: input, shape index: {}]   ;;  %s647_s3 = inlined_call_operand.vmem [shape: bf16[32,128], index: 3, kind: output, shape index: {}]  }
   0x1 LB: > { %s450_s13 = sadd.s32 4294967295, %s550_s12   ;;  %p454_p0 = scmp.ge.s32.totalorder %s550_s12, 1  ;;  %s550_s12 = sphi %s572_s12, %s13_s12  }
   0x2   : > { %p139_p1 = scmp.lt.s32.totalorder %s550_s12, 3 }
   0x4   : > { %p140_p2 = pnand %p454_p0, %p139_p1 }
   0x5   : > { %v521_v0 = vld [vmem:[%s645_s1 + $0x40] sm:$0xff] (!%p140_p2)   ;;  %s455_s16 = sshll.u32 (!%p140_p2), %s450_s13, 1  ;;  %v523_v2 = vld [vmem:[%s645_s1 + $0x48] sm:$0xff] (!%p140_p2)   ;;  %v525_v4 = vld [vmem:[%s645_s1 + $0x50] sm:$0xff] (!%p140_p2)  }
   0x6   : > { %143 = sbr.rel (%p140_p2) target bundleno = 287 (0x11f), region = 32  ;;  %v522_v1 = vld [vmem:[%s645_s1] sm:$0xff] (!%p140_p2)   ;;  %491 = vmatprep.subr.bf16.mxu0 (!%p140_p2), %v521_v0  ;;  %v524_v3 = vld [vmem:[%s645_s1 + $0x8] sm:$0xff] (!%p140_p2)   ;;  %p165_p3 = scmp.lt.s32.totalorder (!%p140_p2), %s455_s16, 3  ;;  %v526_v5 = vld [vmem:[%s645_s1 + $0x10] sm:$0xff] (!%p140_p2)  }
   0x7   : > { %492 = vmatpush3.bf16.msra.mxu0 (!%p140_p2), %v522_v1  ;;  %v527_v6 = vld [vmem:[%s645_s1 + $0x58] sm:$0xff] (!%p140_p2)   ;;  %v529_v8 = vld [vmem:[%s645_s1 + $0x60] sm:$0xff] (!%p140_p2)   ;;  %v531_v10 = vld [vmem:[%s645_s1 + $0x68] sm:$0xff] (!%p140_p2)  }
   0x8   : > { %493 = vmatprep.subr.bf16.mxu0 (!%p140_p2), %v523_v2  ;;  %v528_v7 = vld [vmem:[%s645_s1 + $0x18] sm:$0xff] (!%p140_p2)   ;;  %v530_v9 = vld [vmem:[%s645_s1 + $0x20] sm:$0xff] (!%p140_p2)   ;;  %v532_v12 = vld [vmem:[%s645_s1 + $0x28] sm:$0xff] (!%p140_p2)  }
   0x9   : > { %v533_v13 = vld [vmem:[%s645_s1 + $0x70] sm:$0xff] (!%p140_p2)   ;;  %v535_v15 = vld [vmem:[%s645_s1 + $0x78] sm:$0xff] (!%p140_p2)   ;;  %v460_v19 = vld [vmem:[%s646_s2] ss:$0 sm:$0xff] (!%p140_p2) }
   0xa   : > { %v534_v14 = vld [vmem:[%s645_s1 + $0x30] sm:$0xff] (!%p140_p2)   ;;  %v536_v16 = vld [vmem:[%s645_s1 + $0x38] sm:$0xff] (!%p140_p2)  }
   0xb   : > { %494 = vmatpush3.bf16.msra.mxu0 (!%p140_p2), %v524_v3 }
   0xc   : > { %495 = vmatprep.subr.bf16.mxu0 (!%p140_p2), %v525_v4 }
   0xd   : > { %s649_s16 = smov (!%p165_p3, %s455_s16), 3 }
   0xe   : > { %s483_s4 = sshll.u32 %s649_s16, 3  ;;  %s459_s28 = sshll.u32 %s649_s16, 2 }
   0xf   : > { %496 = vmatpush3.bf16.msra.mxu0 %v526_v5  ;;  %s169_s9 = scalar_lea.vmem %s644_s0, %s483_s4  ;;  %s175_s4 = scalar_lea.vmem %s647_s3, %s459_s28 }
  0x10   : > { %497 = vmatprep.subr.bf16.mxu0 %v527_v6  ;;  %v539_v11 = vld [vmem:[%s169_s9 + $0x4] ss:$8 sps:$4 sm:$0xff]   ;;  %v537_v17 = vld [vmem:[%s169_s9] ss:$8 sps:$4 sm:$0xff]  }
  0x11   : > { %357 = vmatprep.mubr.bf16.mxu0 %v539_v11 }
  0x13   : > { %498 = vmatpush3.bf16.msra.mxu0 %v528_v7 }
  0x14   : > { %499 = vmatprep.subr.bf16.mxu0 %v529_v8 }
  0x17   : > { %500 = vmatpush3.bf16.msra.mxu0 %v530_v9 }
  0x18   : > { %501 = vmatprep.subr.bf16.mxu0 %v531_v10 }
  0x1b   : > { %502 = vmatpush3.bf16.msra.mxu0 %v532_v12 }
  0x1c   : > { %503 = vmatprep.subr.bf16.mxu0 %v533_v13 }
  0x1f   : > { %504 = vmatpush3.bf16.msra.mxu0 %v534_v14 }
  0x20   : > { %505 = vmatprep.subr.bf16.mxu0 %v535_v15 }
  0x23   : > { %506 = vmatpush3.bf16.msra.mxu0 %v536_v16 }
  0x26   : > { %358 = vmatmul.mubr.bf16.vlgmr.msra.gmra.mrb[0].mxu0 %v537_v17 }
  0xf9   : > { %v507_v18 = vpop.f32.mrb[0].mxu0 }
  0xfa   : > { %v508_v20 = vpop.f32.mrb[1].mxu0 }
  0xfb   : > { %v509_v21 = vadd.f32 %v508_v20, %v507_v18  ;;  %v510_v22 = vpop.f32.mrb[2].mxu0 }
  0xfc   : > { %v511_v23 = vpop.f32.mrb[3].mxu0 }
  0xfd   : > { %v360_v24 = vadd.f32 %v509_v21, %v460_v19  ;;  %v512_v25 = vadd.f32 %v511_v23, %v510_v22 }
  0xff   : > { %v366_v26 = vmul.f32 %v360_v24, %v360_v24  ;;  %v363_v27 = vadd.f32 %v512_v25, %v460_v19 }
 0x101   : > { %v368_v28 = vmul.f32 %v366_v26, %v360_v24  ;;  %v367_v29 = vmul.f32 %v363_v27, %v363_v27 }
 0x103   : > { %v370_v30 = vmul.f32 0.044715, %v368_v28  ;;  %v369_v31 = vmul.f32 %v367_v29, %v363_v27 }
 0x105   : > { %v372_v32 = vadd.f32 %v370_v30, %v360_v24  ;;  %v371_v33 = vmul.f32 0.044715, %v369_v31 }
 0x107   : > { %v374_v34 = vmul.f32 0.7978846, %v372_v32  ;;  %v373_v35 = vadd.f32 %v371_v33, %v363_v27 }
 0x109   : > { %540 = vtanh.f32 %v374_v34  ;;  %v375_v36 = vmul.f32 0.7978846, %v373_v35 }
 0x10b   : > { %542 = vtanh.f32 %v375_v36 }
 0x113   : > { %v541_v37 = vpop.eup %540 }
 0x114   : > { %v378_v38 = vadd.f32 1.0, %v541_v37 }
 0x115   : > { %v543_v39 = vpop.eup %542 }
 0x116   : > { %v380_v40 = vmul.f32 0.5, %v378_v38  ;;  %v379_v41 = vadd.f32 1.0, %v543_v39 }
 0x118   : > { %v381_v42 = vmul.f32 0.5, %v379_v41  ;;  %v382_v43 = vmul.f32 %v380_v40, %v360_v24 }
 0x11a   : > { %v383_v44 = vmul.f32 %v381_v42, %v363_v27 }
 0x11c   : > { %v489_v45 = vpack.c.bf16 %v383_v44, %v382_v43 }
 0x11e   : > { %490 = vst [vmem:[%s175_s4] sm:$0xff] %v489_v45  }
 0x11f PF: > { %s13_s12 = sadd.s32 1, %s550_s12  }
 0x120   : > { %p10_p4 = scmp.ge.s32.totalorder %s13_s12, 4  }
 0x122   :  { %12 = sbr.rel (!%p10_p4) target bundleno = 1 (0x1), region = 62 }

// kernel: transformer_net_forward.17
= control target key start
LH: loop header
LB: loop body
LE: loop exit
PB: predicated region body
PF: predicated region fallthrough
CT: control target
= control target key end

     0   :  { %s6174_s12 = smov 0   ;;  %s8057_s0 = inlined_call_operand.vmem [shape: bf16[16,1536], index: 0, kind: input, shape index: {}]   ;;  %s8058_s1 = inlined_call_operand.vmem [shape: bf16[1536,768], index: 1, kind: input, shape index: {}]   ;;  %s8059_s2 = inlined_call_operand.vmem [shape: f32[1,768], index: 2, kind: input, shape index: {}]   ;;  %s8060_s3 = inlined_call_operand.vmem [shape: bf16[16,768], index: 3, kind: output, shape index: {}]  }
   0x1 LB: > { %s4581_s13 = sadd.s32 4294967295, %s6152_s12   ;;  %p4585_p0 = scmp.ge.s32.totalorder %s6152_s12, 1  ;;  %s6152_s12 = sphi %s6174_s12, %s13_s12  }
   0x2   : > { %p137_p1 = scmp.lt.s32.totalorder %s6152_s12, 3 }
   0x4   : > { %p138_p2 = pnand %p4585_p0, %p137_p1 }
   0x5   : > { %v5258_v0 = vld [vmem:[%s8058_s1 + $0x4] ss:$24 sps:$4 sm:$0xff] (!%p138_p2)   ;;  %v5262_v2 = vld [vmem:[%s8058_s1] ss:$24 sps:$4 sm:$0xff] (!%p138_p2)   ;;  %v5264_v4 = vld [vmem:[%s8058_s1 + $0x34] ss:$24 sps:$4 sm:$0xff] (!%p138_p2)  }
   0x6   : > { %141 = sbr.rel (%p138_p2) target bundleno = 829 (0x33d), region = 32  ;;  %v5260_v1 = vld [vmem:[%s8058_s1 + $0x904] ss:$24 sps:$4 sm:$0xff] (!%p138_p2)   ;;  %3707 = vmatprep.subr.bf16.mxu1 (!%p138_p2), %v5258_v0  ;;  %v5263_v3 = vld [vmem:[%s8058_s1 + $0x900] ss:$24 sps:$4 sm:$0xff] (!%p138_p2)   ;;  %p161_p3 = scmp.lt.s32.totalorder (!%p138_p2), %s4581_s13, 1 }
   0x7   : > { %3830 = vmatprep.subr.bf16.mxu0 (!%p138_p2), %v5260_v1  ;;  %3708 = vmatpush1.bf16.msra.mxu1 (!%p138_p2), %v5262_v2  ;;  %v5266_v5 = vld [vmem:[%s8058_s1 + $0x934] ss:$24 sps:$4 sm:$0xff] (!%p138_p2)   ;;  %v5268_v6 = vld [vmem:[%s8058_s1 + $0x30] ss:$24 sps:$4 sm:$0xff] (!%p138_p2)   ;;  %v5270_v8 = vld [vmem:[%s8058_s1 + $0x64] ss:$24 sps:$4 sm:$0xff] (!%p138_p2)  }
   0x8   : > { %3831 = vmatpush1.bf16.msra.mxu0 (!%p138_p2), %v5263_v3  ;;  %3709 = vmatprep.subr.bf16.mxu1 (!%p138_p2), %v5264_v4  ;;  %v5269_v7 = vld [vmem:[%s8058_s1 + $0x930] ss:$24 sps:$4 sm:$0xff] (!%p138_p2)   ;;  %v5272_v9 = vld [vmem:[%s8058_s1 + $0x964] ss:$24 sps:$4 sm:$0xff] (!%p138_p2)   ;;  %v5274_v10 = vld [vmem:[%s8058_s1 + $0x60] ss:$24 sps:$4 sm:$0xff] (!%p138_p2)  }
   0x9   : > { %3832 = vmatprep.subr.bf16.mxu0 (!%p138_p2), %v5266_v5  ;;  %v5275_v11 = vld [vmem:[%s8058_s1 + $0x960] ss:$24 sps:$4 sm:$0xff] (!%p138_p2)   ;;  %v5276_v12 = vld [vmem:[%s8058_s1 + $0x94] ss:$24 sps:$4 sm:$0xff] (!%p138_p2)   ;;  %v5280_v14 = vld [vmem:[%s8058_s1 + $0x90] ss:$24 sps:$4 sm:$0xff] (!%p138_p2)  }
   0xa   : > { %v5278_v13 = vld [vmem:[%s8058_s1 + $0x994] ss:$24 sps:$4 sm:$0xff] (!%p138_p2)   ;;  %v5281_v15 = vld [vmem:[%s8058_s1 + $0x990] ss:$24 sps:$4 sm:$0xff] (!%p138_p2)   ;;  %v5282_v16 = vld [vmem:[%s8058_s1 + $0xc4] ss:$24 sps:$4 sm:$0xff] (!%p138_p2)  }
   0xb   : > { %3710 = vmatpush1.bf16.msra.mxu1 (!%p138_p2), %v5268_v6  ;;  %v5284_v17 = vld [vmem:[%s8058_s1 + $0x9c4] ss:$24 sps:$4 sm:$0xff] (!%p138_p2)   ;;  %v5286_v18 = vld [vmem:[%s8058_s1 + $0xc0] ss:$24 sps:$4 sm:$0xff] (!%p138_p2)   ;;  %v5288_v20 = vld [vmem:[%s8058_s1 + $0xf4] ss:$24 sps:$4 sm:$0xff] (!%p138_p2)  }
   0xc   : > { %3833 = vmatpush1.bf16.msra.mxu0 (!%p138_p2), %v5269_v7  ;;  %3711 = vmatprep.subr.bf16.mxu1 (!%p138_p2), %v5270_v8  ;;  %v5287_v19 = vld [vmem:[%s8058_s1 + $0x9c0] ss:$24 sps:$4 sm:$0xff] (!%p138_p2)   ;;  %v5290_v21 = vld [vmem:[%s8058_s1 + $0x9f4] ss:$24 sps:$4 sm:$0xff] (!%p138_p2)   ;;  %v5292_v22 = vld [vmem:[%s8058_s1 + $0xf0] ss:$24 sps:$4 sm:$0xff] (!%p138_p2)  }
   0xd   : > { %3834 = vmatprep.subr.bf16.mxu0 %v5272_v9  ;;  %v5293_v23 = vld [vmem:[%s8058_s1 + $0x9f0] ss:$24 sps:$4 sm:$0xff]   ;;  %v5294_v24 = vld [vmem:[%s8058_s1 + $0x124] ss:$24 sps:$4 sm:$0xff]   ;;  %v5298_v26 = vld [vmem:[%s8058_s1 + $0x120] ss:$24 sps:$4 sm:$0xff]  }
   0xe   : > { %v5296_v25 = vld [vmem:[%s8058_s1 + $0xa24] ss:$24 sps:$4 sm:$0xff]   ;;  %v5299_v27 = vld [vmem:[%s8058_s1 + $0xa20] ss:$24 sps:$4 sm:$0xff]   ;;  %v5300_v28 = vld [vmem:[%s8058_s1 + $0x154] ss:$24 sps:$4 sm:$0xff]  }
   0xf   : > { %3712 = vmatpush1.bf16.msra.mxu1 %v5274_v10  ;;  %v5302_v29 = vld [vmem:[%s8058_s1 + $0xa54] ss:$24 sps:$4 sm:$0xff]   ;;  %v5304_v30 = vld [vmem:[%s8058_s1 + $0x150] ss:$24 sps:$4 sm:$0xff]   ;;  %v5306_v32 = vld [vmem:[%s8058_s1 + $0x184] ss:$24 sps:$4 sm:$0xff]  }
  0x10   : > { %3835 = vmatpush1.bf16.msra.mxu0 %v5275_v11  ;;  %3713 = vmatprep.subr.bf16.mxu1 %v5276_v12  ;;  %v5305_v31 = vld [vmem:[%s8058_s1 + $0xa50] ss:$24 sps:$4 sm:$0xff]   ;;  %v5308_v33 = vld [vmem:[%s8058_s1 + $0xa84] ss:$24 sps:$4 sm:$0xff]   ;;  %v5310_v34 = vld [vmem:[%s8058_s1 + $0x180] ss:$24 sps:$4 sm:$0xff]  }
  0x11   : > { %3836 = vmatprep.subr.bf16.mxu0 %v5278_v13  ;;  %v5311_v35 = vld [vmem:[%s8058_s1 + $0xa80] ss:$24 sps:$4 sm:$0xff]   ;;  %s8062_s13 = smov (!%p161_p3, %s4581_s13), 1  ;;  %v5312_v36 = vld [vmem:[%s8058_s1 + $0x1b4] ss:$24 sps:$4 sm:$0xff]  }
  0x12   : > { %v5314_v37 = vld [vmem:[%s8058_s1 + $0xab4] ss:$24 sps:$4 sm:$0xff]   ;;  %v5316_v38 = vld [vmem:[%s8058_s1 + $0x1b0] ss:$24 sps:$4 sm:$0xff]   ;;  %s5248_s17 = smul.u32 48, %s8062_s13 }
  0x13   : > { %3714 = vmatpush1.bf16.msra.mxu1 %v5280_v14  ;;  %v5317_v39 = vld [vmem:[%s8058_s1 + $0xab0] ss:$24 sps:$4 sm:$0xff]   ;;  %v5318_v40 = vld [vmem:[%s8058_s1 + $0x1e4] ss:$24 sps:$4 sm:$0xff]   ;;  %v5322_v42 = vld [vmem:[%s8058_s1 + $0x1e0] ss:$24 sps:$4 sm:$0xff]  }
  0x14   : > { %3837 = vmatpush1.bf16.msra.mxu0 %v5281_v15  ;;  %3715 = vmatprep.subr.bf16.mxu1 %v5282_v16  ;;  %v5320_v41 = vld [vmem:[%s8058_s1 + $0xae4] ss:$24 sps:$4 sm:$0xff]   ;;  %v5323_v43 = vld [vmem:[%s8058_s1 + $0xae0] ss:$24 sps:$4 sm:$0xff]   ;;  %s6324_s30 = scalar_lea.vmem %s8057_s0, %s5248_s17  ;;  %v5324_v44 = vld [vmem:[%s8058_s1 + $0x214] ss:$24 sps:$4 sm:$0xff]  }
  0x15   : > { %3838 = vmatprep.subr.bf16.mxu0 %v5284_v17  ;;  %v5326_v45 = vld [vmem:[%s8058_s1 + $0xb14] ss:$24 sps:$4 sm:$0xff]   ;;  %v171_v46 = vld [vmem:[%s6324_s30] sm:$0xff]  ;;  %v5328_v47 = vld [vmem:[%s8058_s1 + $0x210] ss:$24 sps:$4 sm:$0xff]   ;;  %s5249_s27 = smul.u32 24, %s8062_s13 }
  0x16   : > { %v6336_v48 = vcombine.high %v171_v46, %v171_v46  ;;  %v5329_v49 = vld [vmem:[%s8058_s1 + $0xb10] ss:$24 sps:$4 sm:$0xff]   ;;  %v174_v50 = vld [vmem:[%s6324_s30 + $0x18] sm:$0xff]  ;;  %v5336_v56 = vld [vmem:[%s8058_s1 + $0x274] ss:$24 sps:$4 sm:$0xff]   ;;  %v6400_v6 = vcombine.low %v171_v46, %v171_v46 }
  0x17   : > { %3716 = vmatpush1.bf16.msra.mxu1 %v5286_v18  ;;  %v5330_v51 = vld [vmem:[%s8058_s1 + $0x244] ss:$24 sps:$4 sm:$0xff]   ;;  %v6348_v53 = vcombine.high %v174_v50, %v174_v50  ;;  %v5334_v54 = vld [vmem:[%s8058_s1 + $0x240] ss:$24 sps:$4 sm:$0xff]   ;;  %v5338_v57 = vld [vmem:[%s8058_s1 + $0xb74] ss:$24 sps:$4 sm:$0xff]   ;;  %v6402_v7 = vcombine.low %v174_v50, %v174_v50  ;;  %s7629_s11 = scalar_lea.vmem %s8060_s3, %s5249_s27 }
  0x18   : > { %3839 = vmatpush1.bf16.msra.mxu0 %v5287_v19  ;;  %3717 = vmatprep.subr.bf16.mxu1 %v5288_v20  ;;  %v5332_v52 = vld [vmem:[%s8058_s1 + $0xb44] ss:$24 sps:$4 sm:$0xff]   ;;  %v5335_v55 = vld [vmem:[%s8058_s1 + $0xb40] ss:$24 sps:$4 sm:$0xff]   ;;  %v5340_v58 = vld [vmem:[%s8058_s1 + $0x270] ss:$24 sps:$4 sm:$0xff]  }
  0x19   : > { %3840 = vmatprep.subr.bf16.mxu0 %v5290_v21  ;;  %3739 = vmatprep.mubr.bf16.mxu1 %v6336_v48  ;;  %v5341_v59 = vld [vmem:[%s8058_s1 + $0xb70] ss:$24 sps:$4 sm:$0xff]   ;;  %v5342_v60 = vld [vmem:[%s8058_s1 + $0x2a4] ss:$24 sps:$4 sm:$0xff]   ;;  %v5346_v62 = vld [vmem:[%s8058_s1 + $0x2a0] ss:$24 sps:$4 sm:$0xff]  }
  0x1a   : > { %3862 = vmatprep.mubr.bf16.mxu0 %v6348_v53  ;;  %v5344_v61 = vld [vmem:[%s8058_s1 + $0xba4] ss:$24 sps:$4 sm:$0xff]   ;;  %v5347_v63 = vld [vmem:[%s8058_s1 + $0xba0] ss:$24 sps:$4 sm:$0xff]   ;;  %v5348_v0 = vld [vmem:[%s8058_s1 + $0x2d4] ss:$24 sps:$4 sm:$0xff]  }
  0x1b   : > { %3718 = vmatpush1.bf16.msra.mxu1 %v5292_v22  ;;  %v5350_v1 = vld [vmem:[%s8058_s1 + $0xbd4] ss:$24 sps:$4 sm:$0xff]   ;;  %v5352_v2 = vld [vmem:[%s8058_s1 + $0x2d0] ss:$24 sps:$4 sm:$0xff]   ;;  %v5357_v4 = vld [vmem:[%s8058_s1 + $0x304] ss:$24 sps:$4 sm:$0xff]  }
  0x1c   : > { %3841 = vmatpush1.bf16.msra.mxu0 %v5293_v23  ;;  %3719 = vmatprep.subr.bf16.mxu1 %v5294_v24  ;;  %v5353_v3 = vld [vmem:[%s8058_s1 + $0xbd0] ss:$24 sps:$4 sm:$0xff]   ;;  %v5361_v5 = vld [vmem:[%s8058_s1 + $0xc04] ss:$24 sps:$4 sm:$0xff]   ;;  %v5355_v8 = vld [vmem:[%s8058_s1 + $0x300] ss:$24 sps:$4 sm:$0xff]  }
  0x1d   : > { %3842 = vmatprep.subr.bf16.mxu0 %v5296_v25  ;;  %v5359_v9 = vld [vmem:[%s8058_s1 + $0xc00] ss:$24 sps:$4 sm:$0xff]   ;;  %v5366_v10 = vld [vmem:[%s8058_s1 + $0x334] ss:$24 sps:$4 sm:$0xff]   ;;  %v5364_v12 = vld [vmem:[%s8058_s1 + $0x330] ss:$24 sps:$4 sm:$0xff]  }
  0x1e   : > { %v5369_v11 = vld [vmem:[%s8058_s1 + $0xc34] ss:$24 sps:$4 sm:$0xff]   ;;  %v5367_v13 = vld [vmem:[%s8058_s1 + $0xc30] ss:$24 sps:$4 sm:$0xff]   ;;  %v5372_v14 = vld [vmem:[%s8058_s1 + $0x364] ss:$24 sps:$4 sm:$0xff]  }
  0x1f   : > { %3720 = vmatpush1.bf16.msra.mxu1 %v5298_v26  ;;  %v5375_v15 = vld [vmem:[%s8058_s1 + $0xc64] ss:$24 sps:$4 sm:$0xff]   ;;  %v5370_v16 = vld [vmem:[%s8058_s1 + $0x360] ss:$24 sps:$4 sm:$0xff]   ;;  %v5378_v18 = vld [vmem:[%s8058_s1 + $0x394] ss:$24 sps:$4 sm:$0xff]  }
  0x20   : > { %3843 = vmatpush1.bf16.msra.mxu0 %v5299_v27  ;;  %3721 = vmatprep.subr.bf16.mxu1 %v5300_v28  ;;  %v5373_v17 = vld [vmem:[%s8058_s1 + $0xc60] ss:$24 sps:$4 sm:$0xff]   ;;  %v5381_v19 = vld [vmem:[%s8058_s1 + $0xc94] ss:$24 sps:$4 sm:$0xff]   ;;  %v5376_v20 = vld [vmem:[%s8058_s1 + $0x390] ss:$24 sps:$4 sm:$0xff]  }
  0x21   : > { %3844 = vmatprep.subr.bf16.mxu0 %v5302_v29  ;;  %v5379_v21 = vld [vmem:[%s8058_s1 + $0xc90] ss:$24 sps:$4 sm:$0xff]   ;;  %v5384_v22 = vld [vmem:[%s8058_s1 + $0x3c4] ss:$24 sps:$4 sm:$0xff]   ;;  %v5382_v24 = vld [vmem:[%s8058_s1 + $0x3c0] ss:$24 sps:$4 sm:$0xff]  }
  0x22   : > { %v5387_v23 = vld [vmem:[%s8058_s1 + $0xcc4] ss:$24 sps:$4 sm:$0xff]   ;;  %v5385_v25 = vld [vmem:[%s8058_s1 + $0xcc0] ss:$24 sps:$4 sm:$0xff]   ;;  %v5390_v26 = vld [vmem:[%s8058_s1 + $0x3f4] ss:$24 sps:$4 sm:$0xff]  }
  0x23   : > { %3722 = vmatpush1.bf16.msra.mxu1 %v5304_v30  ;;  %v5393_v27 = vld [vmem:[%s8058_s1 + $0xcf4] ss:$24 sps:$4 sm:$0xff]   ;;  %v5388_v28 = vld [vmem:[%s8058_s1 + $0x3f0] ss:$24 sps:$4 sm:$0xff]   ;;  %v5396_v30 = vld [vmem:[%s8058_s1 + $0x424] ss:$24 sps:$4 sm:$0xff]  }
  0x24   : > { %3845 = vmatpush1.bf16.msra.mxu0 %v5305_v31  ;;  %3723 = vmatprep.subr.bf16.mxu1 %v5306_v32  ;;  %v5391_v29 = vld [vmem:[%s8058_s1 + $0xcf0] ss:$24 sps:$4 sm:$0xff]   ;;  %v5399_v31 = vld [vmem:[%s8058_s1 + $0xd24] ss:$24 sps:$4 sm:$0xff]   ;;  %v5414_v46 = vld [vmem:[%s8058_s1 + $0x4b4] ss:$24 sps:$4 sm:$0xff]  }
  0x25   : > { %3846 = vmatprep.subr.bf16.mxu0 %v5308_v33  ;;  %v6479_v32 = vld [vmem:[%s6324_s30 + $0x8] sm:$0xff]  ;;  %v5394_v33 = vld [vmem:[%s8058_s1 + $0x420] ss:$24 sps:$4 sm:$0xff]  }
  0x26   : > { %v5415_v50 = vld [vmem:[%s8058_s1 + $0xdb0] ss:$24 sps:$4 sm:$0xff]  }
  0x27   : > { %3724 = vmatpush1.bf16.msra.mxu1 %v5310_v34  ;;  %v5397_v34 = vld [vmem:[%s8058_s1 + $0xd20] ss:$24 sps:$4 sm:$0xff]  }
  0x28   : > { %3847 = vmatpush1.bf16.msra.mxu0 %v5311_v35  ;;  %3725 = vmatprep.subr.bf16.mxu1 %v5312_v36  ;;  %v6489_v35 = vcombine.high %v6479_v32, %v6479_v32  ;;  %v6492_v36 = vld [vmem:[%s6324_s30 + $0x20] sm:$0xff] }
  0x29   : > { %3848 = vmatprep.subr.bf16.mxu0 %v5314_v37  ;;  %v5402_v37 = vld [vmem:[%s8058_s1 + $0x454] ss:$24 sps:$4 sm:$0xff]  }
  0x2b   : > { %3726 = vmatpush1.bf16.msra.mxu1 %v5316_v38  ;;  %v6499_v38 = vcombine.high %v6492_v36, %v6492_v36 }
  0x2c   : > { %3849 = vmatpush1.bf16.msra.mxu0 %v5317_v39  ;;  %3727 = vmatprep.subr.bf16.mxu1 %v5318_v40  ;;  %v5405_v39 = vld [vmem:[%s8058_s1 + $0xd54] ss:$24 sps:$4 sm:$0xff]   ;;  %v5400_v40 = vld [vmem:[%s8058_s1 + $0x450] ss:$24 sps:$4 sm:$0xff]  }
  0x2d   : > { %3850 = vmatprep.subr.bf16.mxu0 %v5320_v41  ;;  %v5403_v41 = vld [vmem:[%s8058_s1 + $0xd50] ss:$24 sps:$4 sm:$0xff]  }
  0x2f   : > { %3728 = vmatpush1.bf16.msra.mxu1 %v5322_v42  ;;  %v5408_v42 = vld [vmem:[%s8058_s1 + $0x484] ss:$24 sps:$4 sm:$0xff]  }
  0x30   : > { %3851 = vmatpush1.bf16.msra.mxu0 %v5323_v43  ;;  %3729 = vmatprep.subr.bf16.mxu1 %v5324_v44  ;;  %v5411_v43 = vld [vmem:[%s8058_s1 + $0xd84] ss:$24 sps:$4 sm:$0xff]   ;;  %v5406_v44 = vld [vmem:[%s8058_s1 + $0x480] ss:$24 sps:$4 sm:$0xff]  }
  0x31   : > { %3852 = vmatprep.subr.bf16.mxu0 %v5326_v45  ;;  %v5409_v45 = vld [vmem:[%s8058_s1 + $0xd80] ss:$24 sps:$4 sm:$0xff]  }
  0x33   : > { %3730 = vmatpush1.bf16.msra.mxu1 %v5328_v47  ;;  %v5417_v47 = vld [vmem:[%s8058_s1 + $0xdb4] ss:$24 sps:$4 sm:$0xff]  }
  0x34   : > { %3853 = vmatpush1.bf16.msra.mxu0 %v5329_v49  ;;  %3731 = vmatprep.subr.bf16.mxu1 %v5330_v51  ;;  %v5412_v49 = vld [vmem:[%s8058_s1 + $0x4b0] ss:$24 sps:$4 sm:$0xff]   ;;  %v5420_v51 = vld [vmem:[%s8058_s1 + $0x4e4] ss:$24 sps:$4 sm:$0xff]  }
  0x35   : > { %3854 = vmatprep.subr.bf16.mxu0 %v5332_v52  ;;  %v5423_v52 = vld [vmem:[%s8058_s1 + $0xde4] ss:$24 sps:$4 sm:$0xff]  }
  0x37   : > { %3732 = vmatpush1.bf16.msra.mxu1 %v5334_v54  ;;  %v5418_v54 = vld [vmem:[%s8058_s1 + $0x4e0] ss:$24 sps:$4 sm:$0xff]  }
  0x38   : > { %3855 = vmatpush1.bf16.msra.mxu0 %v5335_v55  ;;  %3733 = vmatprep.subr.bf16.mxu1 %v5336_v56  ;;  %v5421_v55 = vld [vmem:[%s8058_s1 + $0xde0] ss:$24 sps:$4 sm:$0xff]   ;;  %v5426_v56 = vld [vmem:[%s8058_s1 + $0x514] ss:$24 sps:$4 sm:$0xff]  }
  0x39   : > { %3856 = vmatprep.subr.bf16.mxu0 %v5338_v57  ;;  %v5429_v57 = vld [vmem:[%s8058_s1 + $0xe14] ss:$24 sps:$4 sm:$0xff]  }
  0x3b   : > { %3734 = vmatpush1.bf16.msra.mxu1 %v5340_v58  ;;  %v5424_v58 = vld [vmem:[%s8058_s1 + $0x510] ss:$24 sps:$4 sm:$0xff]  }
  0x3c   : > { %3857 = vmatpush1.bf16.msra.mxu0 %v5341_v59  ;;  %3735 = vmatprep.subr.bf16.mxu1 %v5342_v60  ;;  %v5427_v59 = vld [vmem:[%s8058_s1 + $0xe10] ss:$24 sps:$4 sm:$0xff]   ;;  %v5432_v60 = vld [vmem:[%s8058_s1 + $0x544] ss:$24 sps:$4 sm:$0xff]  }
  0x3d   : > { %3858 = vmatprep.subr.bf16.mxu0 %v5344_v61  ;;  %v5435_v61 = vld [vmem:[%s8058_s1 + $0xe44] ss:$24 sps:$4 sm:$0xff]  }
  0x3f   : > { %3736 = vmatpush1.bf16.msra.mxu1 %v5346_v62  ;;  %v5430_v62 = vld [vmem:[%s8058_s1 + $0x540] ss:$24 sps:$4 sm:$0xff]  }
  0x40   : > { %3859 = vmatpush1.bf16.msra.mxu0 %v5347_v63  ;;  %3737 = vmatprep.subr.bf16.mxu1 %v5348_v0  ;;  %v5433_v63 = vld [vmem:[%s8058_s1 + $0xe40] ss:$24 sps:$4 sm:$0xff]   ;;  %v5438_v0 = vld [vmem:[%s8058_s1 + $0x574] ss:$24 sps:$4 sm:$0xff]  }
  0x41   : > { %3860 = vmatprep.subr.bf16.mxu0 %v5350_v1  ;;  %v5441_v1 = vld [vmem:[%s8058_s1 + $0xe74] ss:$24 sps:$4 sm:$0xff]  }
  0x43   : > { %3738 = vmatpush1.bf16.msra.mxu1 %v5352_v2  ;;  %v5436_v2 = vld [vmem:[%s8058_s1 + $0x570] ss:$24 sps:$4 sm:$0xff]  }
  0x44   : > { %3861 = vmatpush1.bf16.msra.mxu0 %v5353_v3  ;;  %3748 = vmatprep.subr.bf16.mxu1 %v5357_v4  ;;  %v5439_v3 = vld [vmem:[%s8058_s1 + $0xe70] ss:$24 sps:$4 sm:$0xff]   ;;  %v5444_v4 = vld [vmem:[%s8058_s1 + $0x5a4] ss:$24 sps:$4 sm:$0xff]  }
  0x45   : > { %3871 = vmatprep.subr.bf16.mxu0 %v5361_v5  ;;  %v5447_v5 = vld [vmem:[%s8058_s1 + $0xea4] ss:$24 sps:$4 sm:$0xff]  }
  0x46   : > { %3740 = vmatmul.mubr.bf16.vlgmr.msra.gmra.mrb[0].mxu1 %v6400_v6 }
  0x47   : > { %3863 = vmatmul.mubr.bf16.vlgmr.msra.gmra.mrb[0].mxu0 %v6402_v7  ;;  %3749 = vmatpush1.bf16.msra.mxu1 %v5355_v8  ;;  %v5442_v8 = vld [vmem:[%s8058_s1 + $0x5a0] ss:$24 sps:$4 sm:$0xff]  }
  0x48   : > { %3872 = vmatpush1.bf16.msra.mxu0 %v5359_v9  ;;  %3750 = vmatprep.subr.bf16.mxu1 %v5366_v10  ;;  %v5445_v9 = vld [vmem:[%s8058_s1 + $0xea0] ss:$24 sps:$4 sm:$0xff]   ;;  %v5450_v10 = vld [vmem:[%s8058_s1 + $0x5d4] ss:$24 sps:$4 sm:$0xff]  }
  0x49   : > { %3873 = vmatprep.subr.bf16.mxu0 %v5369_v11  ;;  %3780 = vmatprep.mubr.bf16.mxu1 %v6489_v35  ;;  %v5453_v11 = vld [vmem:[%s8058_s1 + $0xed4] ss:$24 sps:$4 sm:$0xff]  }
  0x4a   : > { %3903 = vmatprep.mubr.bf16.mxu0 %v6499_v38 }
  0x4b   : > { %3751 = vmatpush1.bf16.msra.mxu1 %v5364_v12  ;;  %v5448_v12 = vld [vmem:[%s8058_s1 + $0x5d0] ss:$24 sps:$4 sm:$0xff]  }
  0x4c   : > { %3874 = vmatpush1.bf16.msra.mxu0 %v5367_v13  ;;  %3752 = vmatprep.subr.bf16.mxu1 %v5372_v14  ;;  %v5451_v13 = vld [vmem:[%s8058_s1 + $0xed0] ss:$24 sps:$4 sm:$0xff]   ;;  %v5458_v14 = vld [vmem:[%s8058_s1 + $0x604] ss:$24 sps:$4 sm:$0xff]  }
  0x4d   : > { %3875 = vmatprep.subr.bf16.mxu0 %v5375_v15  ;;  %v5463_v15 = vld [vmem:[%s8058_s1 + $0xf04] ss:$24 sps:$4 sm:$0xff]  }
  0x4f   : > { %3753 = vmatpush1.bf16.msra.mxu1 %v5370_v16  ;;  %v6616_v16 = vcombine.low %v6479_v32, %v6479_v32  ;;  %v5478_v32 = vld [vmem:[%s8058_s1 + $0x694] ss:$24 sps:$4 sm:$0xff]  }
  0x50   : > { %3876 = vmatpush1.bf16.msra.mxu0 %v5373_v17  ;;  %3754 = vmatprep.subr.bf16.mxu1 %v5378_v18  ;;  %v5456_v17 = vld [vmem:[%s8058_s1 + $0x600] ss:$24 sps:$4 sm:$0xff]   ;;  %v6623_v18 = vcombine.low %v6492_v36, %v6492_v36  ;;  %v5479_v36 = vld [vmem:[%s8058_s1 + $0xf90] ss:$24 sps:$4 sm:$0xff]  }
  0x51   : > { %3877 = vmatprep.subr.bf16.mxu0 %v5381_v19  ;;  %v5461_v19 = vld [vmem:[%s8058_s1 + $0xf00] ss:$24 sps:$4 sm:$0xff]  }
  0x53   : > { %3755 = vmatpush1.bf16.msra.mxu1 %v5376_v20  ;;  %v5466_v20 = vld [vmem:[%s8058_s1 + $0x634] ss:$24 sps:$4 sm:$0xff]  }
  0x54   : > { %3878 = vmatpush1.bf16.msra.mxu0 %v5379_v21  ;;  %3756 = vmatprep.subr.bf16.mxu1 %v5384_v22  ;;  %v5469_v21 = vld [vmem:[%s8058_s1 + $0xf34] ss:$24 sps:$4 sm:$0xff]  }
  0x55   : > { %3879 = vmatprep.subr.bf16.mxu0 %v5387_v23  ;;  %v6635_v22 = vld [vmem:[%s6324_s30 + $0x10] sm:$0xff]  ;;  %v6638_v23 = vld [vmem:[%s6324_s30 + $0x28] sm:$0xff] }
  0x57   : > { %3757 = vmatpush1.bf16.msra.mxu1 %v5382_v24  ;;  %v6642_v24 = vcombine.high %v6635_v22, %v6635_v22 }
  0x58   : > { %3880 = vmatpush1.bf16.msra.mxu0 %v5385_v25  ;;  %3758 = vmatprep.subr.bf16.mxu1 %v5390_v26  ;;  %v6646_v25 = vcombine.high %v6638_v23, %v6638_v23  ;;  %v5464_v26 = vld [vmem:[%s8058_s1 + $0x630] ss:$24 sps:$4 sm:$0xff]  }
  0x59   : > { %3881 = vmatprep.subr.bf16.mxu0 %v5393_v27  ;;  %v5467_v27 = vld [vmem:[%s8058_s1 + $0xf30] ss:$24 sps:$4 sm:$0xff]  }
  0x5b   : > { %3759 = vmatpush1.bf16.msra.mxu1 %v5388_v28  ;;  %v5472_v28 = vld [vmem:[%s8058_s1 + $0x664] ss:$24 sps:$4 sm:$0xff]  }
  0x5c   : > { %3882 = vmatpush1.bf16.msra.mxu0 %v5391_v29  ;;  %3760 = vmatprep.subr.bf16.mxu1 %v5396_v30  ;;  %v5475_v29 = vld [vmem:[%s8058_s1 + $0xf64] ss:$24 sps:$4 sm:$0xff]   ;;  %v5470_v30 = vld [vmem:[%s8058_s1 + $0x660] ss:$24 sps:$4 sm:$0xff]  }
  0x5d   : > { %3883 = vmatprep.subr.bf16.mxu0 %v5399_v31  ;;  %v5473_v31 = vld [vmem:[%s8058_s1 + $0xf60] ss:$24 sps:$4 sm:$0xff]  }
  0x5f   : > { %3761 = vmatpush1.bf16.msra.mxu1 %v5394_v33  ;;  %v5481_v33 = vld [vmem:[%s8058_s1 + $0xf94] ss:$24 sps:$4 sm:$0xff]  }
  0x60   : > { %3884 = vmatpush1.bf16.msra.mxu0 %v5397_v34  ;;  %3762 = vmatprep.subr.bf16.mxu1 %v5402_v37  ;;  %v5476_v34 = vld [vmem:[%s8058_s1 + $0x690] ss:$24 sps:$4 sm:$0xff]   ;;  %v5484_v37 = vld [vmem:[%s8058_s1 + $0x6c4] ss:$24 sps:$4 sm:$0xff]  }
  0x61   : > { %3885 = vmatprep.subr.bf16.mxu0 %v5405_v39  ;;  %v5487_v39 = vld [vmem:[%s8058_s1 + $0xfc4] ss:$24 sps:$4 sm:$0xff]  }
  0x63   : > { %3763 = vmatpush1.bf16.msra.mxu1 %v5400_v40  ;;  %v5482_v40 = vld [vmem:[%s8058_s1 + $0x6c0] ss:$24 sps:$4 sm:$0xff]  }
  0x64   : > { %3886 = vmatpush1.bf16.msra.mxu0 %v5403_v41  ;;  %3764 = vmatprep.subr.bf16.mxu1 %v5408_v42  ;;  %v5485_v41 = vld [vmem:[%s8058_s1 + $0xfc0] ss:$24 sps:$4 sm:$0xff]   ;;  %v5490_v42 = vld [vmem:[%s8058_s1 + $0x6f4] ss:$24 sps:$4 sm:$0xff]  }
  0x65   : > { %3887 = vmatprep.subr.bf16.mxu0 %v5411_v43  ;;  %v5493_v43 = vld [vmem:[%s8058_s1 + $0xff4] ss:$24 sps:$4 sm:$0xff]  }
  0x67   : > { %3765 = vmatpush1.bf16.msra.mxu1 %v5406_v44  ;;  %v5488_v44 = vld [vmem:[%s8058_s1 + $0x6f0] ss:$24 sps:$4 sm:$0xff]  }
  0x68   : > { %3888 = vmatpush1.bf16.msra.mxu0 %v5409_v45  ;;  %3766 = vmatprep.subr.bf16.mxu1 %v5414_v46  ;;  %v5491_v45 = vld [vmem:[%s8058_s1 + $0xff0] ss:$24 sps:$4 sm:$0xff]   ;;  %v5496_v46 = vld [vmem:[%s8058_s1 + $0x724] ss:$24 sps:$4 sm:$0xff]  }
  0x69   : > { %3889 = vmatprep.subr.bf16.mxu0 %v5417_v47  ;;  %v5499_v47 = vld [vmem:[%s8058_s1 + $0x1024] ss:$24 sps:$4 sm:$0xff]  }
  0x6b   : > { %3767 = vmatpush1.bf16.msra.mxu1 %v5412_v49  ;;  %v5494_v49 = vld [vmem:[%s8058_s1 + $0x720] ss:$24 sps:$4 sm:$0xff]  }
  0x6c   : > { %3890 = vmatpush1.bf16.msra.mxu0 %v5415_v50  ;;  %3768 = vmatprep.subr.bf16.mxu1 %v5420_v51  ;;  %v5497_v50 = vld [vmem:[%s8058_s1 + $0x1020] ss:$24 sps:$4 sm:$0xff]   ;;  %v5502_v51 = vld [vmem:[%s8058_s1 + $0x754] ss:$24 sps:$4 sm:$0xff]  }
  0x6d   : > { %3891 = vmatprep.subr.bf16.mxu0 %v5423_v52  ;;  %v5505_v52 = vld [vmem:[%s8058_s1 + $0x1054] ss:$24 sps:$4 sm:$0xff]  }
  0x6f   : > { %3769 = vmatpush1.bf16.msra.mxu1 %v5418_v54  ;;  %v5500_v54 = vld [vmem:[%s8058_s1 + $0x750] ss:$24 sps:$4 sm:$0xff]  }
  0x70   : > { %3892 = vmatpush1.bf16.msra.mxu0 %v5421_v55  ;;  %3770 = vmatprep.subr.bf16.mxu1 %v5426_v56  ;;  %v5503_v55 = vld [vmem:[%s8058_s1 + $0x1050] ss:$24 sps:$4 sm:$0xff]   ;;  %v5508_v56 = vld [vmem:[%s8058_s1 + $0x784] ss:$24 sps:$4 sm:$0xff]  }
  0x71   : > { %3893 = vmatprep.subr.bf16.mxu0 %v5429_v57  ;;  %v5511_v57 = vld [vmem:[%s8058_s1 + $0x1084] ss:$24 sps:$4 sm:$0xff]  }
  0x73   : > { %3771 = vmatpush1.bf16.msra.mxu1 %v5424_v58  ;;  %v5506_v58 = vld [vmem:[%s8058_s1 + $0x780] ss:$24 sps:$4 sm:$0xff]  }
  0x74   : > { %3894 = vmatpush1.bf16.msra.mxu0 %v5427_v59  ;;  %3772 = vmatprep.subr.bf16.mxu1 %v5432_v60  ;;  %v5509_v59 = vld [vmem:[%s8058_s1 + $0x1080] ss:$24 sps:$4 sm:$0xff]   ;;  %v5514_v60 = vld [vmem:[%s8058_s1 + $0x7b4] ss:$24 sps:$4 sm:$0xff]  }
  0x75   : > { %3895 = vmatprep.subr.bf16.mxu0 %v5435_v61  ;;  %v5517_v61 = vld [vmem:[%s8058_s1 + $0x10b4] ss:$24 sps:$4 sm:$0xff]  }
  0x77   : > { %3773 = vmatpush1.bf16.msra.mxu1 %v5430_v62  ;;  %v5512_v62 = vld [vmem:[%s8058_s1 + $0x7b0] ss:$24 sps:$4 sm:$0xff]  }
  0x78   : > { %3896 = vmatpush1.bf16.msra.mxu0 %v5433_v63  ;;  %3774 = vmatprep.subr.bf16.mxu1 %v5438_v0  ;;  %v5515_v63 = vld [vmem:[%s8058_s1 + $0x10b0] ss:$24 sps:$4 sm:$0xff]   ;;  %v5520_v0 = vld [vmem:[%s8058_s1 + $0x7e4] ss:$24 sps:$4 sm:$0xff]  }
  0x79   : > { %3897 = vmatprep.subr.bf16.mxu0 %v5441_v1  ;;  %v5523_v1 = vld [vmem:[%s8058_s1 + $0x10e4] ss:$24 sps:$4 sm:$0xff]  }
  0x7b   : > { %3775 = vmatpush1.bf16.msra.mxu1 %v5436_v2  ;;  %v5518_v2 = vld [vmem:[%s8058_s1 + $0x7e0] ss:$24 sps:$4 sm:$0xff]  }
  0x7c   : > { %3898 = vmatpush1.bf16.msra.mxu0 %v5439_v3  ;;  %3776 = vmatprep.subr.bf16.mxu1 %v5444_v4  ;;  %v5521_v3 = vld [vmem:[%s8058_s1 + $0x10e0] ss:$24 sps:$4 sm:$0xff]   ;;  %v5526_v4 = vld [vmem:[%s8058_s1 + $0x814] ss:$24 sps:$4 sm:$0xff]  }
  0x7d   : > { %3899 = vmatprep.subr.bf16.mxu0 %v5447_v5  ;;  %v5529_v5 = vld [vmem:[%s8058_s1 + $0x1114] ss:$24 sps:$4 sm:$0xff]  }
  0x7f   : > { %3777 = vmatpush1.bf16.msra.mxu1 %v5442_v8  ;;  %v5524_v8 = vld [vmem:[%s8058_s1 + $0x810] ss:$24 sps:$4 sm:$0xff]  }
  0x80   : > { %3900 = vmatpush1.bf16.msra.mxu0 %v5445_v9  ;;  %3778 = vmatprep.subr.bf16.mxu1 %v5450_v10  ;;  %v5527_v9 = vld [vmem:[%s8058_s1 + $0x1110] ss:$24 sps:$4 sm:$0xff]   ;;  %v5532_v10 = vld [vmem:[%s8058_s1 + $0x844] ss:$24 sps:$4 sm:$0xff]  }
  0x81   : > { %3901 = vmatprep.subr.bf16.mxu0 %v5453_v11  ;;  %v5535_v11 = vld [vmem:[%s8058_s1 + $0x1144] ss:$24 sps:$4 sm:$0xff]  }
  0x83   : > { %3779 = vmatpush1.bf16.msra.mxu1 %v5448_v12  ;;  %v5530_v12 = vld [vmem:[%s8058_s1 + $0x840] ss:$24 sps:$4 sm:$0xff]  }
  0x84   : > { %3902 = vmatpush1.bf16.msra.mxu0 %v5451_v13  ;;  %3789 = vmatprep.subr.bf16.mxu1 %v5458_v14  ;;  %v5533_v13 = vld [vmem:[%s8058_s1 + $0x1140] ss:$24 sps:$4 sm:$0xff]   ;;  %v5538_v14 = vld [vmem:[%s8058_s1 + $0x874] ss:$24 sps:$4 sm:$0xff]  }
  0x85   : > { %3912 = vmatprep.subr.bf16.mxu0 %v5463_v15  ;;  %v5541_v15 = vld [vmem:[%s8058_s1 + $0x1174] ss:$24 sps:$4 sm:$0xff]  }
  0x86   : > { %3781 = vmatmul.mubr.bf16.vlgmr.msra.gmra.mrb[0].mxu1 %v6616_v16 }
  0x87   : > { %3904 = vmatmul.mubr.bf16.vlgmr.msra.gmra.mrb[0].mxu0 %v6623_v18  ;;  %3790 = vmatpush1.bf16.msra.mxu1 %v5456_v17  ;;  %v5536_v17 = vld [vmem:[%s8058_s1 + $0x870] ss:$24 sps:$4 sm:$0xff]  }
  0x88   : > { %3913 = vmatpush1.bf16.msra.mxu0 %v5461_v19  ;;  %3791 = vmatprep.subr.bf16.mxu1 %v5466_v20  ;;  %v5539_v19 = vld [vmem:[%s8058_s1 + $0x1170] ss:$24 sps:$4 sm:$0xff]   ;;  %v5544_v20 = vld [vmem:[%s8058_s1 + $0x8a4] ss:$24 sps:$4 sm:$0xff]  }
  0x89   : > { %3914 = vmatprep.subr.bf16.mxu0 %v5469_v21  ;;  %3821 = vmatprep.mubr.bf16.mxu1 %v6642_v24  ;;  %v5547_v21 = vld [vmem:[%s8058_s1 + $0x11a4] ss:$24 sps:$4 sm:$0xff]  }
  0x8a   : > { %3944 = vmatprep.mubr.bf16.mxu0 %v6646_v25 }
  0x8b   : > { %3792 = vmatpush1.bf16.msra.mxu1 %v5464_v26  ;;  %v5542_v26 = vld [vmem:[%s8058_s1 + $0x8a0] ss:$24 sps:$4 sm:$0xff]  }
  0x8c   : > { %3915 = vmatpush1.bf16.msra.mxu0 %v5467_v27  ;;  %3793 = vmatprep.subr.bf16.mxu1 %v5472_v28  ;;  %v5545_v27 = vld [vmem:[%s8058_s1 + $0x11a0] ss:$24 sps:$4 sm:$0xff]   ;;  %v5550_v28 = vld [vmem:[%s8058_s1 + $0x8d4] ss:$24 sps:$4 sm:$0xff]  }
  0x8d   : > { %3916 = vmatprep.subr.bf16.mxu0 %v5475_v29  ;;  %v5553_v29 = vld [vmem:[%s8058_s1 + $0x11d4] ss:$24 sps:$4 sm:$0xff]  }
  0x8f   : > { %3794 = vmatpush1.bf16.msra.mxu1 %v5470_v30  ;;  %v5548_v30 = vld [vmem:[%s8058_s1 + $0x8d0] ss:$24 sps:$4 sm:$0xff]  }
  0x90   : > { %3917 = vmatpush1.bf16.msra.mxu0 %v5473_v31  ;;  %3795 = vmatprep.subr.bf16.mxu1 %v5478_v32  ;;  %v5551_v31 = vld [vmem:[%s8058_s1 + $0x11d0] ss:$24 sps:$4 sm:$0xff]   ;;  %v5560_v32 = vld [vmem:[%s8058_s1 + $0xc] ss:$24 sps:$4 sm:$0xff]  }
  0x91   : > { %3918 = vmatprep.subr.bf16.mxu0 %v5481_v33  ;;  %v5563_v33 = vld [vmem:[%s8058_s1 + $0x14] ss:$24 sps:$4 sm:$0xff]  }
  0x93   : > { %3796 = vmatpush1.bf16.msra.mxu1 %v5476_v34  ;;  %v6834_v34 = vcombine.low %v6635_v22, %v6635_v22  ;;  %v5566_v22 = vld [vmem:[%s8058_s1 + $0x3c] ss:$24 sps:$4 sm:$0xff]  }
  0x94   : > { %3919 = vmatpush1.bf16.msra.mxu0 %v5479_v36  ;;  %3797 = vmatprep.subr.bf16.mxu1 %v5484_v37  ;;  %v6838_v36 = vcombine.low %v6638_v23, %v6638_v23  ;;  %v5558_v37 = vld [vmem:[%s8058_s1 + $0x8] ss:$24 sps:$4 sm:$0xff]   ;;  %v5569_v23 = vld [vmem:[%s8058_s1 + $0x44] ss:$24 sps:$4 sm:$0xff]  }
  0x95   : > { %3920 = vmatprep.subr.bf16.mxu0 %v5487_v39  ;;  %v5561_v39 = vld [vmem:[%s8058_s1 + $0x10] ss:$24 sps:$4 sm:$0xff]  }
  0x97   : > { %3798 = vmatpush1.bf16.msra.mxu1 %v5482_v40  ;;  %v5564_v40 = vld [vmem:[%s8058_s1 + $0x38] ss:$24 sps:$4 sm:$0xff]  }
  0x98   : > { %3921 = vmatpush1.bf16.msra.mxu0 %v5485_v41  ;;  %3799 = vmatprep.subr.bf16.mxu1 %v5490_v42  ;;  %v5567_v41 = vld [vmem:[%s8058_s1 + $0x40] ss:$24 sps:$4 sm:$0xff]   ;;  %v5572_v42 = vld [vmem:[%s8058_s1 + $0x6c] ss:$24 sps:$4 sm:$0xff]  }
  0x99   : > { %3922 = vmatprep.subr.bf16.mxu0 %v5493_v43  ;;  %v5575_v43 = vld [vmem:[%s8058_s1 + $0x74] ss:$24 sps:$4 sm:$0xff]  }
  0x9b   : > { %3800 = vmatpush1.bf16.msra.mxu1 %v5488_v44  ;;  %v5570_v44 = vld [vmem:[%s8058_s1 + $0x68] ss:$24 sps:$4 sm:$0xff]  }
  0x9c   : > { %3923 = vmatpush1.bf16.msra.mxu0 %v5491_v45  ;;  %3801 = vmatprep.subr.bf16.mxu1 %v5496_v46  ;;  %v5573_v45 = vld [vmem:[%s8058_s1 + $0x70] ss:$24 sps:$4 sm:$0xff]   ;;  %v5578_v46 = vld [vmem:[%s8058_s1 + $0x9c] ss:$24 sps:$4 sm:$0xff]  }
  0x9d   : > { %3924 = vmatprep.subr.bf16.mxu0 %v5499_v47  ;;  %v5576_v47 = vld [vmem:[%s8058_s1 + $0x98] ss:$24 sps:$4 sm:$0xff]  }
  0x9f   : > { %3802 = vmatpush1.bf16.msra.mxu1 %v5494_v49  ;;  %v5579_v49 = vld [vmem:[%s8058_s1 + $0xa0] ss:$24 sps:$4 sm:$0xff]  }
  0xa0   : > { %3925 = vmatpush1.bf16.msra.mxu0 %v5497_v50  ;;  %3803 = vmatprep.subr.bf16.mxu1 %v5502_v51  ;;  %v5584_v50 = vld [vmem:[%s8058_s1 + $0xcc] ss:$24 sps:$4 sm:$0xff]  }
  0xa1   : > { %3926 = vmatprep.subr.bf16.mxu0 %v5505_v52  ;;  %v5587_v51 = vld [vmem:[%s8058_s1 + $0xd4] ss:$24 sps:$4 sm:$0xff]   ;;  %v5582_v52 = vld [vmem:[%s8058_s1 + $0xc8] ss:$24 sps:$4 sm:$0xff]  }
  0xa3   : > { %3804 = vmatpush1.bf16.msra.mxu1 %v5500_v54  ;;  %v5585_v54 = vld [vmem:[%s8058_s1 + $0xd0] ss:$24 sps:$4 sm:$0xff]  }
  0xa4   : > { %3927 = vmatpush1.bf16.msra.mxu0 %v5503_v55  ;;  %3805 = vmatprep.subr.bf16.mxu1 %v5508_v56  ;;  %v5590_v55 = vld [vmem:[%s8058_s1 + $0xfc] ss:$24 sps:$4 sm:$0xff]  }
  0xa5   : > { %3928 = vmatprep.subr.bf16.mxu0 %v5511_v57  ;;  %v5593_v56 = vld [vmem:[%s8058_s1 + $0x104] ss:$24 sps:$4 sm:$0xff]   ;;  %v5588_v57 = vld [vmem:[%s8058_s1 + $0xf8] ss:$24 sps:$4 sm:$0xff]  }
  0xa7   : > { %3806 = vmatpush1.bf16.msra.mxu1 %v5506_v58  ;;  %v5591_v58 = vld [vmem:[%s8058_s1 + $0x100] ss:$24 sps:$4 sm:$0xff]  }
  0xa8   : > { %3929 = vmatpush1.bf16.msra.mxu0 %v5509_v59  ;;  %3807 = vmatprep.subr.bf16.mxu1 %v5514_v60  ;;  %v5596_v59 = vld [vmem:[%s8058_s1 + $0x12c] ss:$24 sps:$4 sm:$0xff]  }
  0xa9   : > { %3930 = vmatprep.subr.bf16.mxu0 %v5517_v61  ;;  %v5599_v60 = vld [vmem:[%s8058_s1 + $0x134] ss:$24 sps:$4 sm:$0xff]   ;;  %v5594_v61 = vld [vmem:[%s8058_s1 + $0x128] ss:$24 sps:$4 sm:$0xff]  }
  0xab   : > { %3808 = vmatpush1.bf16.msra.mxu1 %v5512_v62  ;;  %v5597_v62 = vld [vmem:[%s8058_s1 + $0x130] ss:$24 sps:$4 sm:$0xff]  }
  0xac   : > { %3931 = vmatpush1.bf16.msra.mxu0 %v5515_v63  ;;  %3809 = vmatprep.subr.bf16.mxu1 %v5520_v0  ;;  %v5602_v63 = vld [vmem:[%s8058_s1 + $0x15c] ss:$24 sps:$4 sm:$0xff]  }
  0xad   : > { %3932 = vmatprep.subr.bf16.mxu0 %v5523_v1  ;;  %v5605_v0 = vld [vmem:[%s8058_s1 + $0x164] ss:$24 sps:$4 sm:$0xff]   ;;  %v5600_v1 = vld [vmem:[%s8058_s1 + $0x158] ss:$24 sps:$4 sm:$0xff]  }
  0xaf   : > { %3810 = vmatpush1.bf16.msra.mxu1 %v5518_v2  ;;  %v5603_v2 = vld [vmem:[%s8058_s1 + $0x160] ss:$24 sps:$4 sm:$0xff]  }
  0xb0   : > { %3933 = vmatpush1.bf16.msra.mxu0 %v5521_v3  ;;  %3811 = vmatprep.subr.bf16.mxu1 %v5526_v4  ;;  %v5608_v3 = vld [vmem:[%s8058_s1 + $0x18c] ss:$24 sps:$4 sm:$0xff]  }
  0xb1   : > { %3934 = vmatprep.subr.bf16.mxu0 %v5529_v5  ;;  %v5611_v4 = vld [vmem:[%s8058_s1 + $0x194] ss:$24 sps:$4 sm:$0xff]   ;;  %v5606_v5 = vld [vmem:[%s8058_s1 + $0x188] ss:$24 sps:$4 sm:$0xff]  }
  0xb3   : > { %3812 = vmatpush1.bf16.msra.mxu1 %v5524_v8  ;;  %v5609_v8 = vld [vmem:[%s8058_s1 + $0x190] ss:$24 sps:$4 sm:$0xff]  }
  0xb4   : > { %3935 = vmatpush1.bf16.msra.mxu0 %v5527_v9  ;;  %3813 = vmatprep.subr.bf16.mxu1 %v5532_v10  ;;  %v5614_v9 = vld [vmem:[%s8058_s1 + $0x1bc] ss:$24 sps:$4 sm:$0xff]  }
  0xb5   : > { %3936 = vmatprep.subr.bf16.mxu0 %v5535_v11  ;;  %v5617_v10 = vld [vmem:[%s8058_s1 + $0x1c4] ss:$24 sps:$4 sm:$0xff]   ;;  %v5612_v11 = vld [vmem:[%s8058_s1 + $0x1b8] ss:$24 sps:$4 sm:$0xff]  }
  0xb7   : > { %3814 = vmatpush1.bf16.msra.mxu1 %v5530_v12  ;;  %v5615_v12 = vld [vmem:[%s8058_s1 + $0x1c0] ss:$24 sps:$4 sm:$0xff]  }
  0xb8   : > { %3937 = vmatpush1.bf16.msra.mxu0 %v5533_v13  ;;  %3815 = vmatprep.subr.bf16.mxu1 %v5538_v14  ;;  %v5620_v13 = vld [vmem:[%s8058_s1 + $0x1ec] ss:$24 sps:$4 sm:$0xff]  }
  0xb9   : > { %3938 = vmatprep.subr.bf16.mxu0 %v5541_v15  ;;  %v5623_v14 = vld [vmem:[%s8058_s1 + $0x1f4] ss:$24 sps:$4 sm:$0xff]   ;;  %v5618_v15 = vld [vmem:[%s8058_s1 + $0x1e8] ss:$24 sps:$4 sm:$0xff]  }
  0xbb   : > { %3816 = vmatpush1.bf16.msra.mxu1 %v5536_v17  ;;  %v5621_v17 = vld [vmem:[%s8058_s1 + $0x1f0] ss:$24 sps:$4 sm:$0xff]  }
  0xbc   : > { %3939 = vmatpush1.bf16.msra.mxu0 %v5539_v19  ;;  %3817 = vmatprep.subr.bf16.mxu1 %v5544_v20  ;;  %v5626_v19 = vld [vmem:[%s8058_s1 + $0x21c] ss:$24 sps:$4 sm:$0xff]  }
  0xbd   : > { %3940 = vmatprep.subr.bf16.mxu0 %v5547_v21  ;;  %v5629_v20 = vld [vmem:[%s8058_s1 + $0x224] ss:$24 sps:$4 sm:$0xff]   ;;  %v5624_v21 = vld [vmem:[%s8058_s1 + $0x218] ss:$24 sps:$4 sm:$0xff]  }
  0xbf   : > { %3818 = vmatpush1.bf16.msra.mxu1 %v5542_v26  ;;  %v5627_v26 = vld [vmem:[%s8058_s1 + $0x220] ss:$24 sps:$4 sm:$0xff]  }
  0xc0   : > { %3941 = vmatpush1.bf16.msra.mxu0 %v5545_v27  ;;  %3819 = vmatprep.subr.bf16.mxu1 %v5550_v28  ;;  %v5632_v27 = vld [vmem:[%s8058_s1 + $0x24c] ss:$24 sps:$4 sm:$0xff]  }
  0xc1   : > { %3942 = vmatprep.subr.bf16.mxu0 %v5553_v29  ;;  %v5635_v28 = vld [vmem:[%s8058_s1 + $0x254] ss:$24 sps:$4 sm:$0xff]   ;;  %v5630_v29 = vld [vmem:[%s8058_s1 + $0x248] ss:$24 sps:$4 sm:$0xff]  }
  0xc3   : > { %3820 = vmatpush1.bf16.msra.mxu1 %v5548_v30  ;;  %v5633_v30 = vld [vmem:[%s8058_s1 + $0x250] ss:$24 sps:$4 sm:$0xff]  }
  0xc4   : > { %3943 = vmatpush1.bf16.msra.mxu0 %v5551_v31  ;;  %3953 = vmatprep.subr.bf16.mxu1 %v5560_v32  ;;  %v5638_v31 = vld [vmem:[%s8058_s1 + $0x27c] ss:$24 sps:$4 sm:$0xff]  }
  0xc5   : > { %4199 = vmatprep.subr.bf16.mxu0 %v5563_v33  ;;  %v5641_v32 = vld [vmem:[%s8058_s1 + $0x284] ss:$24 sps:$4 sm:$0xff]   ;;  %v5636_v33 = vld [vmem:[%s8058_s1 + $0x278] ss:$24 sps:$4 sm:$0xff]  }
  0xc6   : > { %3822 = vmatmul.mubr.bf16.vlgmr.msra.gmra.mrb[0].mxu1 %v6834_v34 }
  0xc7   : > { %3945 = vmatmul.mubr.bf16.vlgmr.msra.gmra.mrb[0].mxu0 %v6838_v36  ;;  %3954 = vmatpush1.bf16.msra.mxu1 %v5558_v37  ;;  %v5639_v37 = vld [vmem:[%s8058_s1 + $0x280] ss:$24 sps:$4 sm:$0xff]  }
  0xc8   : > { %4200 = vmatpush1.bf16.msra.mxu0 %v5561_v39  ;;  %3955 = vmatprep.subr.bf16.mxu1 %v5566_v22  ;;  %v5644_v39 = vld [vmem:[%s8058_s1 + $0x2ac] ss:$24 sps:$4 sm:$0xff]  }
  0xc9   : > { %4201 = vmatprep.subr.bf16.mxu0 %v5569_v23  ;;  %3985 = vmatprep.mubr.bf16.mxu1 %v6336_v48  ;;  %v5647_v22 = vld [vmem:[%s8058_s1 + $0x2b4] ss:$24 sps:$4 sm:$0xff]   ;;  %v5642_v23 = vld [vmem:[%s8058_s1 + $0x2a8] ss:$24 sps:$4 sm:$0xff]  }
  0xca   : > { %4231 = vmatprep.mubr.bf16.mxu0 %v6336_v48  ;;  %v5581_v48 = vld [vmem:[%s8058_s1 + $0xa4] ss:$24 sps:$4 sm:$0xff]  }
  0xcb   : > { %3956 = vmatpush1.bf16.msra.mxu1 %v5564_v40  ;;  %v5645_v40 = vld [vmem:[%s8058_s1 + $0x2b0] ss:$24 sps:$4 sm:$0xff]  }
  0xcc   : > { %4202 = vmatpush1.bf16.msra.mxu0 %v5567_v41  ;;  %3957 = vmatprep.subr.bf16.mxu1 %v5572_v42  ;;  %v5650_v41 = vld [vmem:[%s8058_s1 + $0x2dc] ss:$24 sps:$4 sm:$0xff]  }
  0xcd   : > { %4203 = vmatprep.subr.bf16.mxu0 %v5575_v43  ;;  %v5653_v42 = vld [vmem:[%s8058_s1 + $0x2e4] ss:$24 sps:$4 sm:$0xff]   ;;  %v5648_v43 = vld [vmem:[%s8058_s1 + $0x2d8] ss:$24 sps:$4 sm:$0xff]  }
  0xcf   : > { %3958 = vmatpush1.bf16.msra.mxu1 %v5570_v44  ;;  %v5651_v44 = vld [vmem:[%s8058_s1 + $0x2e0] ss:$24 sps:$4 sm:$0xff]  }
  0xd0   : > { %4204 = vmatpush1.bf16.msra.mxu0 %v5573_v45  ;;  %3959 = vmatprep.subr.bf16.mxu1 %v5578_v46  ;;  %v5656_v45 = vld [vmem:[%s8058_s1 + $0x30c] ss:$24 sps:$4 sm:$0xff]  }
  0xd1   : > { %4205 = vmatprep.subr.bf16.mxu0 %v5581_v48  ;;  %v5659_v46 = vld [vmem:[%s8058_s1 + $0x314] ss:$24 sps:$4 sm:$0xff]   ;;  %v5654_v48 = vld [vmem:[%s8058_s1 + $0x308] ss:$24 sps:$4 sm:$0xff]  }
  0xd3   : > { %3960 = vmatpush1.bf16.msra.mxu1 %v5576_v47  ;;  %v5657_v47 = vld [vmem:[%s8058_s1 + $0x310] ss:$24 sps:$4 sm:$0xff]  }
  0xd4   : > { %4206 = vmatpush1.bf16.msra.mxu0 %v5579_v49  ;;  %3961 = vmatprep.subr.bf16.mxu1 %v5584_v50  ;;  %v5662_v49 = vld [vmem:[%s8058_s1 + $0x33c] ss:$24 sps:$4 sm:$0xff]  }
  0xd5   : > { %4207 = vmatprep.subr.bf16.mxu0 %v5587_v51  ;;  %v5665_v50 = vld [vmem:[%s8058_s1 + $0x344] ss:$24 sps:$4 sm:$0xff]   ;;  %v5660_v51 = vld [vmem:[%s8058_s1 + $0x338] ss:$24 sps:$4 sm:$0xff]  }
  0xd7   : > { %3962 = vmatpush1.bf16.msra.mxu1 %v5582_v52  ;;  %v5663_v52 = vld [vmem:[%s8058_s1 + $0x340] ss:$24 sps:$4 sm:$0xff]  }
  0xd8   : > { %4208 = vmatpush1.bf16.msra.mxu0 %v5585_v54  ;;  %3963 = vmatprep.subr.bf16.mxu1 %v5590_v55  ;;  %v5668_v54 = vld [vmem:[%s8058_s1 + $0x36c] ss:$24 sps:$4 sm:$0xff]   ;;  %v5666_v55 = vld [vmem:[%s8058_s1 + $0x368] ss:$24 sps:$4 sm:$0xff]  }
  0xd9   : > { %4209 = vmatprep.subr.bf16.mxu0 %v5593_v56  ;;  %v5669_v56 = vld [vmem:[%s8058_s1 + $0x370] ss:$24 sps:$4 sm:$0xff]  }
  0xdb   : > { %3964 = vmatpush1.bf16.msra.mxu1 %v5588_v57  ;;  %v5674_v57 = vld [vmem:[%s8058_s1 + $0x39c] ss:$24 sps:$4 sm:$0xff]  }
  0xdc   : > { %4210 = vmatpush1.bf16.msra.mxu0 %v5591_v58  ;;  %3965 = vmatprep.subr.bf16.mxu1 %v5596_v59  ;;  %v5672_v58 = vld [vmem:[%s8058_s1 + $0x398] ss:$24 sps:$4 sm:$0xff]  }
  0xdd   : > { %4211 = vmatprep.subr.bf16.mxu0 %v5599_v60  ;;  %v5675_v59 = vld [vmem:[%s8058_s1 + $0x3a0] ss:$24 sps:$4 sm:$0xff]   ;;  %v5680_v60 = vld [vmem:[%s8058_s1 + $0x3cc] ss:$24 sps:$4 sm:$0xff]  }
  0xdf   : > { %3966 = vmatpush1.bf16.msra.mxu1 %v5594_v61  ;;  %v5683_v61 = vld [vmem:[%s8058_s1 + $0x3d4] ss:$24 sps:$4 sm:$0xff]  }
  0xe0   : > { %4212 = vmatpush1.bf16.msra.mxu0 %v5597_v62  ;;  %3967 = vmatprep.subr.bf16.mxu1 %v5602_v63  ;;  %v5678_v62 = vld [vmem:[%s8058_s1 + $0x3c8] ss:$24 sps:$4 sm:$0xff]  }
  0xe1   : > { %4213 = vmatprep.subr.bf16.mxu0 %v5605_v0  ;;  %v5681_v63 = vld [vmem:[%s8058_s1 + $0x3d0] ss:$24 sps:$4 sm:$0xff]   ;;  %v5686_v0 = vld [vmem:[%s8058_s1 + $0x3fc] ss:$24 sps:$4 sm:$0xff]  }
  0xe3   : > { %3968 = vmatpush1.bf16.msra.mxu1 %v5600_v1  ;;  %v5689_v1 = vld [vmem:[%s8058_s1 + $0x404] ss:$24 sps:$4 sm:$0xff]  }
  0xe4   : > { %4214 = vmatpush1.bf16.msra.mxu0 %v5603_v2  ;;  %3969 = vmatprep.subr.bf16.mxu1 %v5608_v3  ;;  %v5684_v2 = vld [vmem:[%s8058_s1 + $0x3f8] ss:$24 sps:$4 sm:$0xff]  }
  0xe5   : > { %4215 = vmatprep.subr.bf16.mxu0 %v5611_v4  ;;  %v5687_v3 = vld [vmem:[%s8058_s1 + $0x400] ss:$24 sps:$4 sm:$0xff]   ;;  %v5692_v4 = vld [vmem:[%s8058_s1 + $0x42c] ss:$24 sps:$4 sm:$0xff]  }
  0xe7   : > { %3970 = vmatpush1.bf16.msra.mxu1 %v5606_v5  ;;  %v5695_v5 = vld [vmem:[%s8058_s1 + $0x434] ss:$24 sps:$4 sm:$0xff]  }
  0xe8   : > { %4216 = vmatpush1.bf16.msra.mxu0 %v5609_v8  ;;  %3971 = vmatprep.subr.bf16.mxu1 %v5614_v9  ;;  %v5690_v8 = vld [vmem:[%s8058_s1 + $0x428] ss:$24 sps:$4 sm:$0xff]  }
  0xe9   : > { %4217 = vmatprep.subr.bf16.mxu0 %v5617_v10  ;;  %v5693_v9 = vld [vmem:[%s8058_s1 + $0x430] ss:$24 sps:$4 sm:$0xff]   ;;  %v5698_v10 = vld [vmem:[%s8058_s1 + $0x45c] ss:$24 sps:$4 sm:$0xff]  }
  0xeb   : > { %3972 = vmatpush1.bf16.msra.mxu1 %v5612_v11  ;;  %v5701_v11 = vld [vmem:[%s8058_s1 + $0x464] ss:$24 sps:$4 sm:$0xff]  }
  0xec   : > { %4218 = vmatpush1.bf16.msra.mxu0 %v5615_v12  ;;  %3973 = vmatprep.subr.bf16.mxu1 %v5620_v13  ;;  %v5696_v12 = vld [vmem:[%s8058_s1 + $0x458] ss:$24 sps:$4 sm:$0xff]  }
  0xed   : > { %4219 = vmatprep.subr.bf16.mxu0 %v5623_v14  ;;  %v5699_v13 = vld [vmem:[%s8058_s1 + $0x460] ss:$24 sps:$4 sm:$0xff]   ;;  %v5704_v14 = vld [vmem:[%s8058_s1 + $0x48c] ss:$24 sps:$4 sm:$0xff]  }
  0xef   : > { %3974 = vmatpush1.bf16.msra.mxu1 %v5618_v15  ;;  %v5707_v15 = vld [vmem:[%s8058_s1 + $0x494] ss:$24 sps:$4 sm:$0xff]  }
  0xf0   : > { %4220 = vmatpush1.bf16.msra.mxu0 %v5621_v17  ;;  %3975 = vmatprep.subr.bf16.mxu1 %v5626_v19  ;;  %v5702_v17 = vld [vmem:[%s8058_s1 + $0x488] ss:$24 sps:$4 sm:$0xff]  }
  0xf1   : > { %4221 = vmatprep.subr.bf16.mxu0 %v5629_v20  ;;  %v5705_v19 = vld [vmem:[%s8058_s1 + $0x490] ss:$24 sps:$4 sm:$0xff]   ;;  %v5710_v20 = vld [vmem:[%s8058_s1 + $0x4bc] ss:$24 sps:$4 sm:$0xff]  }
  0xf3   : > { %3976 = vmatpush1.bf16.msra.mxu1 %v5624_v21  ;;  %v5713_v21 = vld [vmem:[%s8058_s1 + $0x4c4] ss:$24 sps:$4 sm:$0xff]  }
  0xf4   : > { %4222 = vmatpush1.bf16.msra.mxu0 %v5627_v26  ;;  %3977 = vmatprep.subr.bf16.mxu1 %v5632_v27  ;;  %v5708_v26 = vld [vmem:[%s8058_s1 + $0x4b8] ss:$24 sps:$4 sm:$0xff]  }
  0xf5   : > { %4223 = vmatprep.subr.bf16.mxu0 %v5635_v28  ;;  %v5711_v27 = vld [vmem:[%s8058_s1 + $0x4c0] ss:$24 sps:$4 sm:$0xff]   ;;  %v5716_v28 = vld [vmem:[%s8058_s1 + $0x4ec] ss:$24 sps:$4 sm:$0xff]  }
  0xf7   : > { %3978 = vmatpush1.bf16.msra.mxu1 %v5630_v29  ;;  %v5719_v29 = vld [vmem:[%s8058_s1 + $0x4f4] ss:$24 sps:$4 sm:$0xff]  }
  0xf8   : > { %4224 = vmatpush1.bf16.msra.mxu0 %v5633_v30  ;;  %3979 = vmatprep.subr.bf16.mxu1 %v5638_v31  ;;  %v5714_v30 = vld [vmem:[%s8058_s1 + $0x4e8] ss:$24 sps:$4 sm:$0xff]  }
  0xf9   : > { %4225 = vmatprep.subr.bf16.mxu0 %v5641_v32  ;;  %v5717_v31 = vld [vmem:[%s8058_s1 + $0x4f0] ss:$24 sps:$4 sm:$0xff]   ;;  %v5722_v32 = vld [vmem:[%s8058_s1 + $0x51c] ss:$24 sps:$4 sm:$0xff]  }
  0xfb   : > { %3980 = vmatpush1.bf16.msra.mxu1 %v5636_v33  ;;  %v5725_v33 = vld [vmem:[%s8058_s1 + $0x524] ss:$24 sps:$4 sm:$0xff]  }
  0xfc   : > { %4226 = vmatpush1.bf16.msra.mxu0 %v5639_v37  ;;  %3981 = vmatprep.subr.bf16.mxu1 %v5644_v39  ;;  %v5720_v37 = vld [vmem:[%s8058_s1 + $0x518] ss:$24 sps:$4 sm:$0xff]  }
  0xfd   : > { %4227 = vmatprep.subr.bf16.mxu0 %v5647_v22  ;;  %v5723_v39 = vld [vmem:[%s8058_s1 + $0x520] ss:$24 sps:$4 sm:$0xff]   ;;  %v5728_v22 = vld [vmem:[%s8058_s1 + $0x54c] ss:$24 sps:$4 sm:$0xff]  }
  0xff   : > { %3982 = vmatpush1.bf16.msra.mxu1 %v5642_v23  ;;  %v5731_v23 = vld [vmem:[%s8058_s1 + $0x554] ss:$24 sps:$4 sm:$0xff]  }
 0x100   : > { %4228 = vmatpush1.bf16.msra.mxu0 %v5645_v40  ;;  %3983 = vmatprep.subr.bf16.mxu1 %v5650_v41  ;;  %v5726_v40 = vld [vmem:[%s8058_s1 + $0x548] ss:$24 sps:$4 sm:$0xff]  }
 0x101   : > { %4229 = vmatprep.subr.bf16.mxu0 %v5653_v42  ;;  %v5729_v41 = vld [vmem:[%s8058_s1 + $0x550] ss:$24 sps:$4 sm:$0xff]   ;;  %v5734_v42 = vld [vmem:[%s8058_s1 + $0x57c] ss:$24 sps:$4 sm:$0xff]  }
 0x103   : > { %3984 = vmatpush1.bf16.msra.mxu1 %v5648_v43  ;;  %v5737_v43 = vld [vmem:[%s8058_s1 + $0x584] ss:$24 sps:$4 sm:$0xff]  }
 0x104   : > { %4230 = vmatpush1.bf16.msra.mxu0 %v5651_v44  ;;  %3994 = vmatprep.subr.bf16.mxu1 %v5656_v45  ;;  %v5732_v44 = vld [vmem:[%s8058_s1 + $0x578] ss:$24 sps:$4 sm:$0xff]  }
 0x105   : > { %4240 = vmatprep.subr.bf16.mxu0 %v5659_v46  ;;  %v5735_v45 = vld [vmem:[%s8058_s1 + $0x580] ss:$24 sps:$4 sm:$0xff]   ;;  %v5740_v46 = vld [vmem:[%s8058_s1 + $0x5ac] ss:$24 sps:$4 sm:$0xff]  }
 0x106   : > { %3986 = vmatmul.mubr.bf16.vlgmr.msra.gmra.mrb[4].mxu1 %v6400_v6 }
 0x107   : > { %4232 = vmatmul.mubr.bf16.vlgmr.msra.gmra.mrb[4].mxu0 %v6400_v6  ;;  %3995 = vmatpush1.bf16.msra.mxu1 %v5654_v48  ;;  %v5671_v6 = vld [vmem:[%s8058_s1 + $0x374] ss:$24 sps:$4 sm:$0xff]  }
 0x108   : > { %4241 = vmatpush1.bf16.msra.mxu0 %v5657_v47  ;;  %3996 = vmatprep.subr.bf16.mxu1 %v5662_v49  ;;  %v5743_v48 = vld [vmem:[%s8058_s1 + $0x5b4] ss:$24 sps:$4 sm:$0xff]   ;;  %v5738_v47 = vld [vmem:[%s8058_s1 + $0x5a8] ss:$24 sps:$4 sm:$0xff]  }
 0x109   : > { %4242 = vmatprep.subr.bf16.mxu0 %v5665_v50  ;;  %4026 = vmatprep.mubr.bf16.mxu1 %v6489_v35  ;;  %v5741_v49 = vld [vmem:[%s8058_s1 + $0x5b0] ss:$24 sps:$4 sm:$0xff]   ;;  %v5746_v50 = vld [vmem:[%s8058_s1 + $0x5dc] ss:$24 sps:$4 sm:$0xff]  }
 0x10a   : > { %4272 = vmatprep.mubr.bf16.mxu0 %v6489_v35  ;;  %v5677_v35 = vld [vmem:[%s8058_s1 + $0x3a4] ss:$24 sps:$4 sm:$0xff]  }
 0x10b   : > { %3997 = vmatpush1.bf16.msra.mxu1 %v5660_v51  ;;  %v5749_v51 = vld [vmem:[%s8058_s1 + $0x5e4] ss:$24 sps:$4 sm:$0xff]  }
 0x10c   : > { %4243 = vmatpush1.bf16.msra.mxu0 %v5663_v52  ;;  %3998 = vmatprep.subr.bf16.mxu1 %v5668_v54  ;;  %v5744_v52 = vld [vmem:[%s8058_s1 + $0x5d8] ss:$24 sps:$4 sm:$0xff]  }
 0x10d   : > { %4244 = vmatprep.subr.bf16.mxu0 %v5671_v6  ;;  %v5747_v54 = vld [vmem:[%s8058_s1 + $0x5e0] ss:$24 sps:$4 sm:$0xff]   ;;  %v5752_v6 = vld [vmem:[%s8058_s1 + $0x60c] ss:$24 sps:$4 sm:$0xff]  }
 0x10f   : > { %3999 = vmatpush1.bf16.msra.mxu1 %v5666_v55  ;;  %v5755_v55 = vld [vmem:[%s8058_s1 + $0x614] ss:$24 sps:$4 sm:$0xff]  }
 0x110   : > { %4245 = vmatpush1.bf16.msra.mxu0 %v5669_v56  ;;  %4000 = vmatprep.subr.bf16.mxu1 %v5674_v57  ;;  %v5750_v56 = vld [vmem:[%s8058_s1 + $0x608] ss:$24 sps:$4 sm:$0xff]  }
 0x111   : > { %4246 = vmatprep.subr.bf16.mxu0 %v5677_v35  ;;  %v5753_v57 = vld [vmem:[%s8058_s1 + $0x610] ss:$24 sps:$4 sm:$0xff]   ;;  %v5758_v35 = vld [vmem:[%s8058_s1 + $0x63c] ss:$24 sps:$4 sm:$0xff]  }
 0x113   : > { %4001 = vmatpush1.bf16.msra.mxu1 %v5672_v58  ;;  %v5761_v58 = vld [vmem:[%s8058_s1 + $0x644] ss:$24 sps:$4 sm:$0xff]  }
 0x114   : > { %4247 = vmatpush1.bf16.msra.mxu0 %v5675_v59  ;;  %4002 = vmatprep.subr.bf16.mxu1 %v5680_v60  ;;  %v5756_v59 = vld [vmem:[%s8058_s1 + $0x638] ss:$24 sps:$4 sm:$0xff]  }
 0x115   : > { %4248 = vmatprep.subr.bf16.mxu0 %v5683_v61  ;;  %v5759_v60 = vld [vmem:[%s8058_s1 + $0x640] ss:$24 sps:$4 sm:$0xff]   ;;  %v5764_v61 = vld [vmem:[%s8058_s1 + $0x66c] ss:$24 sps:$4 sm:$0xff]  }
 0x117   : > { %4003 = vmatpush1.bf16.msra.mxu1 %v5678_v62  ;;  %v5762_v62 = vld [vmem:[%s8058_s1 + $0x668] ss:$24 sps:$4 sm:$0xff]  }
 0x118   : > { %4249 = vmatpush1.bf16.msra.mxu0 %v5681_v63  ;;  %4004 = vmatprep.subr.bf16.mxu1 %v5686_v0  ;;  %v5765_v63 = vld [vmem:[%s8058_s1 + $0x670] ss:$24 sps:$4 sm:$0xff]   ;;  %v5770_v0 = vld [vmem:[%s8058_s1 + $0x69c] ss:$24 sps:$4 sm:$0xff]  }
 0x119   : > { %4250 = vmatprep.subr.bf16.mxu0 %v5689_v1  ;;  %v5768_v1 = vld [vmem:[%s8058_s1 + $0x698] ss:$24 sps:$4 sm:$0xff]  }
 0x11b   : > { %4005 = vmatpush1.bf16.msra.mxu1 %v5684_v2  ;;  %v5771_v2 = vld [vmem:[%s8058_s1 + $0x6a0] ss:$24 sps:$4 sm:$0xff]  }
 0x11c   : > { %4251 = vmatpush1.bf16.msra.mxu0 %v5687_v3  ;;  %4006 = vmatprep.subr.bf16.mxu1 %v5692_v4  ;;  %v5776_v3 = vld [vmem:[%s8058_s1 + $0x6cc] ss:$24 sps:$4 sm:$0xff]  }
 0x11d   : > { %4252 = vmatprep.subr.bf16.mxu0 %v5695_v5  ;;  %v5779_v4 = vld [vmem:[%s8058_s1 + $0x6d4] ss:$24 sps:$4 sm:$0xff]   ;;  %v5774_v5 = vld [vmem:[%s8058_s1 + $0x6c8] ss:$24 sps:$4 sm:$0xff]  }
 0x11f   : > { %4007 = vmatpush1.bf16.msra.mxu1 %v5690_v8  ;;  %v5777_v8 = vld [vmem:[%s8058_s1 + $0x6d0] ss:$24 sps:$4 sm:$0xff]  }
 0x120   : > { %4253 = vmatpush1.bf16.msra.mxu0 %v5693_v9  ;;  %4008 = vmatprep.subr.bf16.mxu1 %v5698_v10  ;;  %v5782_v9 = vld [vmem:[%s8058_s1 + $0x6fc] ss:$24 sps:$4 sm:$0xff]  }
 0x121   : > { %4254 = vmatprep.subr.bf16.mxu0 %v5701_v11  ;;  %v5785_v10 = vld [vmem:[%s8058_s1 + $0x704] ss:$24 sps:$4 sm:$0xff]   ;;  %v5780_v11 = vld [vmem:[%s8058_s1 + $0x6f8] ss:$24 sps:$4 sm:$0xff]  }
 0x123   : > { %4009 = vmatpush1.bf16.msra.mxu1 %v5696_v12  ;;  %v5783_v12 = vld [vmem:[%s8058_s1 + $0x700] ss:$24 sps:$4 sm:$0xff]  }
 0x124   : > { %4255 = vmatpush1.bf16.msra.mxu0 %v5699_v13  ;;  %4010 = vmatprep.subr.bf16.mxu1 %v5704_v14  ;;  %v5788_v13 = vld [vmem:[%s8058_s1 + $0x72c] ss:$24 sps:$4 sm:$0xff]  }
 0x125   : > { %4256 = vmatprep.subr.bf16.mxu0 %v5707_v15  ;;  %v5791_v14 = vld [vmem:[%s8058_s1 + $0x734] ss:$24 sps:$4 sm:$0xff]   ;;  %v5786_v15 = vld [vmem:[%s8058_s1 + $0x728] ss:$24 sps:$4 sm:$0xff]  }
 0x127   : > { %4011 = vmatpush1.bf16.msra.mxu1 %v5702_v17  ;;  %v5789_v17 = vld [vmem:[%s8058_s1 + $0x730] ss:$24 sps:$4 sm:$0xff]  }
 0x128   : > { %4257 = vmatpush1.bf16.msra.mxu0 %v5705_v19  ;;  %4012 = vmatprep.subr.bf16.mxu1 %v5710_v20  ;;  %v5794_v19 = vld [vmem:[%s8058_s1 + $0x75c] ss:$24 sps:$4 sm:$0xff]  }
 0x129   : > { %4258 = vmatprep.subr.bf16.mxu0 %v5713_v21  ;;  %v5797_v20 = vld [vmem:[%s8058_s1 + $0x764] ss:$24 sps:$4 sm:$0xff]   ;;  %v5792_v21 = vld [vmem:[%s8058_s1 + $0x758] ss:$24 sps:$4 sm:$0xff]  }
 0x12b   : > { %4013 = vmatpush1.bf16.msra.mxu1 %v5708_v26  ;;  %v5795_v26 = vld [vmem:[%s8058_s1 + $0x760] ss:$24 sps:$4 sm:$0xff]  }
 0x12c   : > { %4259 = vmatpush1.bf16.msra.mxu0 %v5711_v27  ;;  %4014 = vmatprep.subr.bf16.mxu1 %v5716_v28  ;;  %v5800_v27 = vld [vmem:[%s8058_s1 + $0x78c] ss:$24 sps:$4 sm:$0xff]  }
 0x12d   : > { %4260 = vmatprep.subr.bf16.mxu0 %v5719_v29  ;;  %v5803_v28 = vld [vmem:[%s8058_s1 + $0x794] ss:$24 sps:$4 sm:$0xff]   ;;  %v5798_v29 = vld [vmem:[%s8058_s1 + $0x788] ss:$24 sps:$4 sm:$0xff]  }
 0x12f   : > { %4015 = vmatpush1.bf16.msra.mxu1 %v5714_v30  ;;  %v5801_v30 = vld [vmem:[%s8058_s1 + $0x790] ss:$24 sps:$4 sm:$0xff]  }
 0x130   : > { %4261 = vmatpush1.bf16.msra.mxu0 %v5717_v31  ;;  %4016 = vmatprep.subr.bf16.mxu1 %v5722_v32  ;;  %v5806_v31 = vld [vmem:[%s8058_s1 + $0x7bc] ss:$24 sps:$4 sm:$0xff]  }
 0x131   : > { %4262 = vmatprep.subr.bf16.mxu0 %v5725_v33  ;;  %v5809_v32 = vld [vmem:[%s8058_s1 + $0x7c4] ss:$24 sps:$4 sm:$0xff]   ;;  %v5804_v33 = vld [vmem:[%s8058_s1 + $0x7b8] ss:$24 sps:$4 sm:$0xff]  }
 0x133   : > { %4017 = vmatpush1.bf16.msra.mxu1 %v5720_v37  ;;  %v5807_v37 = vld [vmem:[%s8058_s1 + $0x7c0] ss:$24 sps:$4 sm:$0xff]  }
 0x134   : > { %4263 = vmatpush1.bf16.msra.mxu0 %v5723_v39  ;;  %4018 = vmatprep.subr.bf16.mxu1 %v5728_v22  ;;  %v5812_v39 = vld [vmem:[%s8058_s1 + $0x7ec] ss:$24 sps:$4 sm:$0xff]  }
 0x135   : > { %4264 = vmatprep.subr.bf16.mxu0 %v5731_v23  ;;  %v5815_v22 = vld [vmem:[%s8058_s1 + $0x7f4] ss:$24 sps:$4 sm:$0xff]   ;;  %v5810_v23 = vld [vmem:[%s8058_s1 + $0x7e8] ss:$24 sps:$4 sm:$0xff]  }
 0x137   : > { %4019 = vmatpush1.bf16.msra.mxu1 %v5726_v40  ;;  %v5813_v40 = vld [vmem:[%s8058_s1 + $0x7f0] ss:$24 sps:$4 sm:$0xff]  }
 0x138   : > { %4265 = vmatpush1.bf16.msra.mxu0 %v5729_v41  ;;  %4020 = vmatprep.subr.bf16.mxu1 %v5734_v42  ;;  %v5818_v41 = vld [vmem:[%s8058_s1 + $0x81c] ss:$24 sps:$4 sm:$0xff]  }
 0x139   : > { %4266 = vmatprep.subr.bf16.mxu0 %v5737_v43  ;;  %v5821_v42 = vld [vmem:[%s8058_s1 + $0x824] ss:$24 sps:$4 sm:$0xff]   ;;  %v5816_v43 = vld [vmem:[%s8058_s1 + $0x818] ss:$24 sps:$4 sm:$0xff]  }
 0x13b   : > { %4021 = vmatpush1.bf16.msra.mxu1 %v5732_v44  ;;  %v5819_v44 = vld [vmem:[%s8058_s1 + $0x820] ss:$24 sps:$4 sm:$0xff]  }
 0x13c   : > { %4267 = vmatpush1.bf16.msra.mxu0 %v5735_v45  ;;  %4022 = vmatprep.subr.bf16.mxu1 %v5740_v46  ;;  %v5824_v45 = vld [vmem:[%s8058_s1 + $0x84c] ss:$24 sps:$4 sm:$0xff]  }
 0x13d   : > { %4268 = vmatprep.subr.bf16.mxu0 %v5743_v48  ;;  %v5827_v46 = vld [vmem:[%s8058_s1 + $0x854] ss:$24 sps:$4 sm:$0xff]   ;;  %v5822_v48 = vld [vmem:[%s8058_s1 + $0x848] ss:$24 sps:$4 sm:$0xff]  }
 0x13f   : > { %4023 = vmatpush1.bf16.msra.mxu1 %v5738_v47  ;;  %v5825_v47 = vld [vmem:[%s8058_s1 + $0x850] ss:$24 sps:$4 sm:$0xff]  }
 0x140   : > { %4269 = vmatpush1.bf16.msra.mxu0 %v5741_v49  ;;  %4024 = vmatprep.subr.bf16.mxu1 %v5746_v50  ;;  %v5830_v49 = vld [vmem:[%s8058_s1 + $0x87c] ss:$24 sps:$4 sm:$0xff]  }
 0x141   : > { %4270 = vmatprep.subr.bf16.mxu0 %v5749_v51  ;;  %v5833_v50 = vld [vmem:[%s8058_s1 + $0x884] ss:$24 sps:$4 sm:$0xff]   ;;  %v5828_v51 = vld [vmem:[%s8058_s1 + $0x878] ss:$24 sps:$4 sm:$0xff]  }
 0x143   : > { %4025 = vmatpush1.bf16.msra.mxu1 %v5744_v52  ;;  %v5831_v52 = vld [vmem:[%s8058_s1 + $0x880] ss:$24 sps:$4 sm:$0xff]  }
 0x144   : > { %4271 = vmatpush1.bf16.msra.mxu0 %v5747_v54  ;;  %4035 = vmatprep.subr.bf16.mxu1 %v5752_v6  ;;  %v5836_v54 = vld [vmem:[%s8058_s1 + $0x8ac] ss:$24 sps:$4 sm:$0xff]  }
 0x145   : > { %4281 = vmatprep.subr.bf16.mxu0 %v5755_v55  ;;  %v5839_v6 = vld [vmem:[%s8058_s1 + $0x8b4] ss:$24 sps:$4 sm:$0xff]   ;;  %v5834_v55 = vld [vmem:[%s8058_s1 + $0x8a8] ss:$24 sps:$4 sm:$0xff]  }
 0x146   : > { %4027 = vmatmul.mubr.bf16.vlgmr.msra.gmra.mrb[4].mxu1 %v6616_v16 }
 0x147   : > { %4273 = vmatmul.mubr.bf16.vlgmr.msra.gmra.mrb[4].mxu0 %v6616_v16  ;;  %4036 = vmatpush1.bf16.msra.mxu1 %v5750_v56  ;;  %v5767_v16 = vld [vmem:[%s8058_s1 + $0x674] ss:$24 sps:$4 sm:$0xff]   ;;  %v5837_v56 = vld [vmem:[%s8058_s1 + $0x8b0] ss:$24 sps:$4 sm:$0xff]  }
 0x148   : > { %4282 = vmatpush1.bf16.msra.mxu0 %v5753_v57  ;;  %4037 = vmatprep.subr.bf16.mxu1 %v5758_v35  ;;  %v5842_v57 = vld [vmem:[%s8058_s1 + $0x8dc] ss:$24 sps:$4 sm:$0xff]  }
 0x149   : > { %4283 = vmatprep.subr.bf16.mxu0 %v5761_v58  ;;  %4067 = vmatprep.mubr.bf16.mxu1 %v6642_v24  ;;  %v5845_v35 = vld [vmem:[%s8058_s1 + $0x8e4] ss:$24 sps:$4 sm:$0xff]   ;;  %v5840_v58 = vld [vmem:[%s8058_s1 + $0x8d8] ss:$24 sps:$4 sm:$0xff]  }
 0x14a   : > { %4313 = vmatprep.mubr.bf16.mxu0 %v6642_v24  ;;  %v5773_v24 = vld [vmem:[%s8058_s1 + $0x6a4] ss:$24 sps:$4 sm:$0xff]  }
 0x14b   : > { %4038 = vmatpush1.bf16.msra.mxu1 %v5756_v59  ;;  %v5843_v59 = vld [vmem:[%s8058_s1 + $0x8e0] ss:$24 sps:$4 sm:$0xff]  }
 0x14c   : > { %4284 = vmatpush1.bf16.msra.mxu0 %v5759_v60  ;;  %4039 = vmatprep.subr.bf16.mxu1 %v5764_v61  ;;  %v5848_v60 = vld [vmem:[%s8058_s1 + $0x90c] ss:$24 sps:$4 sm:$0xff]  }
 0x14d   : > { %4285 = vmatprep.subr.bf16.mxu0 %v5767_v16  ;;  %v5851_v61 = vld [vmem:[%s8058_s1 + $0x914] ss:$24 sps:$4 sm:$0xff]   ;;  %v5846_v16 = vld [vmem:[%s8058_s1 + $0x908] ss:$24 sps:$4 sm:$0xff]  }
 0x14f   : > { %4040 = vmatpush1.bf16.msra.mxu1 %v5762_v62  ;;  %v5849_v62 = vld [vmem:[%s8058_s1 + $0x910] ss:$24 sps:$4 sm:$0xff]  }
 0x150   : > { %4286 = vmatpush1.bf16.msra.mxu0 %v5765_v63  ;;  %4041 = vmatprep.subr.bf16.mxu1 %v5770_v0  ;;  %v5854_v63 = vld [vmem:[%s8058_s1 + $0x93c] ss:$24 sps:$4 sm:$0xff]  }
 0x151   : > { %4287 = vmatprep.subr.bf16.mxu0 %v5773_v24  ;;  %v5857_v0 = vld [vmem:[%s8058_s1 + $0x944] ss:$24 sps:$4 sm:$0xff]   ;;  %v5852_v24 = vld [vmem:[%s8058_s1 + $0x938] ss:$24 sps:$4 sm:$0xff]  }
 0x153   : > { %4042 = vmatpush1.bf16.msra.mxu1 %v5768_v1  ;;  %v5855_v1 = vld [vmem:[%s8058_s1 + $0x940] ss:$24 sps:$4 sm:$0xff]  }
 0x154   : > { %4288 = vmatpush1.bf16.msra.mxu0 %v5771_v2  ;;  %4043 = vmatprep.subr.bf16.mxu1 %v5776_v3  ;;  %v5860_v2 = vld [vmem:[%s8058_s1 + $0x96c] ss:$24 sps:$4 sm:$0xff]   ;;  %v755_v3 = vlaneseq }
 0x155   : > { %4289 = vmatprep.subr.bf16.mxu0 %v5779_v4  ;;  %v5858_v4 = vld [vmem:[%s8058_s1 + $0x968] ss:$24 sps:$4 sm:$0xff]  }
 0x157   : > { %4044 = vmatpush1.bf16.msra.mxu1 %v5774_v5  ;;  %v5861_v5 = vld [vmem:[%s8058_s1 + $0x970] ss:$24 sps:$4 sm:$0xff]  }
 0x158   : > { %4290 = vmatpush1.bf16.msra.mxu0 %v5777_v8  ;;  %4045 = vmatprep.subr.bf16.mxu1 %v5782_v9  ;;  %v5866_v8 = vld [vmem:[%s8058_s1 + $0x99c] ss:$24 sps:$4 sm:$0xff]   ;;  %v7468_v9 = vshrl.u32 %v755_v3, 7  ;;  %v5908_v3 = vld [vmem:[%s8058_s1 + $0xaec] ss:$24 sps:$4 sm:$0xff]  }
 0x159   : > { %4291 = vmatprep.subr.bf16.mxu0 %v5785_v10  ;;  %v5864_v10 = vld [vmem:[%s8058_s1 + $0x998] ss:$24 sps:$4 sm:$0xff]  }
 0x15b   : > { %4046 = vmatpush1.bf16.msra.mxu1 %v5780_v11  ;;  %v5867_v11 = vld [vmem:[%s8058_s1 + $0x9a0] ss:$24 sps:$4 sm:$0xff]  }
 0x15c   : > { %4292 = vmatpush1.bf16.msra.mxu0 %v5783_v12  ;;  %4047 = vmatprep.subr.bf16.mxu1 %v5788_v13  ;;  %v5872_v12 = vld [vmem:[%s8058_s1 + $0x9cc] ss:$24 sps:$4 sm:$0xff]  }
 0x15d   : > { %4293 = vmatprep.subr.bf16.mxu0 %v5791_v14  ;;  %v5875_v13 = vld [vmem:[%s8058_s1 + $0x9d4] ss:$24 sps:$4 sm:$0xff]   ;;  %v5870_v14 = vld [vmem:[%s8058_s1 + $0x9c8] ss:$24 sps:$4 sm:$0xff]  }
 0x15f   : > { %4048 = vmatpush1.bf16.msra.mxu1 %v5786_v15  ;;  %v757_v15 = vsub.s32 0, %v7468_v9 }
 0x160   : > { %4294 = vmatpush1.bf16.msra.mxu0 %v5789_v17  ;;  %4049 = vmatprep.subr.bf16.mxu1 %v5794_v19  ;;  %v5873_v17 = vld [vmem:[%s8058_s1 + $0x9d0] ss:$24 sps:$4 sm:$0xff]   ;;  %v7492_v19 = vld [vmem:[%s8059_s2] sm:$0x3f] }
 0x161   : > { %4295 = vmatprep.subr.bf16.mxu0 %v5797_v20  ;;  %v761_v20 = vsub.s32 1, %v7468_v9 }
 0x163   : > { %4050 = vmatpush1.bf16.msra.mxu1 %v5792_v21  ;;  %v5878_v21 = vld [vmem:[%s8058_s1 + $0x9fc] ss:$24 sps:$4 sm:$0xff]  }
 0x164   : > { %4296 = vmatpush1.bf16.msra.mxu0 %v5795_v26  ;;  %4051 = vmatprep.subr.bf16.mxu1 %v5800_v27  ;;  %v5881_v26 = vld [vmem:[%s8058_s1 + $0xa04] ss:$24 sps:$4 sm:$0xff]   ;;  %v758_v27 = vrot.slane %v7492_v19, %v757_v15 }
 0x165   : > { %4297 = vmatprep.subr.bf16.mxu0 %v5803_v28  ;;  %v762_v28 = vrot.slane %v7492_v19, %v761_v20 }
 0x167   : > { %4052 = vmatpush1.bf16.msra.mxu1 %v5798_v29  ;;  %v5876_v29 = vld [vmem:[%s8058_s1 + $0x9f8] ss:$24 sps:$4 sm:$0xff]  }
 0x168   : > { %4298 = vmatpush1.bf16.msra.mxu0 %v5801_v30  ;;  %4053 = vmatprep.subr.bf16.mxu1 %v5806_v31  ;;  %v5879_v30 = vld [vmem:[%s8058_s1 + $0xa00] ss:$24 sps:$4 sm:$0xff]   ;;  %v5884_v31 = vld [vmem:[%s8058_s1 + $0xa2c] ss:$24 sps:$4 sm:$0xff]  }
 0x169   : > { %4299 = vmatprep.subr.bf16.mxu0 %v5809_v32  ;;  %v5887_v32 = vld [vmem:[%s8058_s1 + $0xa34] ss:$24 sps:$4 sm:$0xff]  }
 0x16b   : > { %4054 = vmatpush1.bf16.msra.mxu1 %v5804_v33 }
 0x16c   : > { %4300 = vmatpush1.bf16.msra.mxu0 %v5807_v37  ;;  %4055 = vmatprep.subr.bf16.mxu1 %v5812_v39 }
 0x16d   : > { %4301 = vmatprep.subr.bf16.mxu0 %v5815_v22 }
 0x16f   : > { %4056 = vmatpush1.bf16.msra.mxu1 %v5810_v23 }
 0x170   : > { %4302 = vmatpush1.bf16.msra.mxu0 %v5813_v40  ;;  %4057 = vmatprep.subr.bf16.mxu1 %v5818_v41 }
 0x171   : > { %4303 = vmatprep.subr.bf16.mxu0 %v5821_v42 }
 0x173   : > { %4058 = vmatpush1.bf16.msra.mxu1 %v5816_v43  ;;  %v5882_v43 = vld [vmem:[%s8058_s1 + $0xa28] ss:$24 sps:$4 sm:$0xff]  }
 0x174   : > { %4304 = vmatpush1.bf16.msra.mxu0 %v5819_v44  ;;  %4059 = vmatprep.subr.bf16.mxu1 %v5824_v45  ;;  %v5885_v44 = vld [vmem:[%s8058_s1 + $0xa30] ss:$24 sps:$4 sm:$0xff]  }
 0x175   : > { %4305 = vmatprep.subr.bf16.mxu0 %v5827_v46 }
 0x177   : > { %4060 = vmatpush1.bf16.msra.mxu1 %v5822_v48 }
 0x178   : > { %4306 = vmatpush1.bf16.msra.mxu0 %v5825_v47  ;;  %4061 = vmatprep.subr.bf16.mxu1 %v5830_v49  ;;  %v5890_v47 = vld [vmem:[%s8058_s1 + $0xa5c] ss:$24 sps:$4 sm:$0xff]  }
 0x179   : > { %4307 = vmatprep.subr.bf16.mxu0 %v5833_v50  ;;  %v5893_v49 = vld [vmem:[%s8058_s1 + $0xa64] ss:$24 sps:$4 sm:$0xff]  }
 0x17b   : > { %4062 = vmatpush1.bf16.msra.mxu1 %v5828_v51 }
 0x17c   : > { %4308 = vmatpush1.bf16.msra.mxu0 %v5831_v52  ;;  %4063 = vmatprep.subr.bf16.mxu1 %v5836_v54  ;;  %v5888_v54 = vld [vmem:[%s8058_s1 + $0xa58] ss:$24 sps:$4 sm:$0xff]  }
 0x17d   : > { %4309 = vmatprep.subr.bf16.mxu0 %v5839_v6  ;;  %v5891_v6 = vld [vmem:[%s8058_s1 + $0xa60] ss:$24 sps:$4 sm:$0xff]  }
 0x17f   : > { %4064 = vmatpush1.bf16.msra.mxu1 %v5834_v55 }
 0x180   : > { %4310 = vmatpush1.bf16.msra.mxu0 %v5837_v56  ;;  %4065 = vmatprep.subr.bf16.mxu1 %v5842_v57  ;;  %v5896_v56 = vld [vmem:[%s8058_s1 + $0xa8c] ss:$24 sps:$4 sm:$0xff]  }
 0x181   : > { %4311 = vmatprep.subr.bf16.mxu0 %v5845_v35  ;;  %v5899_v57 = vld [vmem:[%s8058_s1 + $0xa94] ss:$24 sps:$4 sm:$0xff]  }
 0x183   : > { %4066 = vmatpush1.bf16.msra.mxu1 %v5840_v58 }
 0x184   : > { %4312 = vmatpush1.bf16.msra.mxu0 %v5843_v59  ;;  %4076 = vmatprep.subr.bf16.mxu1 %v5848_v60  ;;  %v5894_v60 = vld [vmem:[%s8058_s1 + $0xa88] ss:$24 sps:$4 sm:$0xff]  }
 0x185   : > { %4322 = vmatprep.subr.bf16.mxu0 %v5851_v61  ;;  %v5897_v61 = vld [vmem:[%s8058_s1 + $0xa90] ss:$24 sps:$4 sm:$0xff]  }
 0x186   : > { %4068 = vmatmul.mubr.bf16.vlgmr.msra.gmra.mrb[4].mxu1 %v6834_v34 }
 0x187   : > { %4314 = vmatmul.mubr.bf16.vlgmr.msra.gmra.mrb[4].mxu0 %v6834_v34  ;;  %4077 = vmatpush1.bf16.msra.mxu1 %v5846_v16  ;;  %v5863_v34 = vld [vmem:[%s8058_s1 + $0x974] ss:$24 sps:$4 sm:$0xff]  }
 0x188   : > { %4323 = vmatpush1.bf16.msra.mxu0 %v5849_v62  ;;  %4078 = vmatprep.subr.bf16.mxu1 %v5854_v63  ;;  %v5902_v62 = vld [vmem:[%s8058_s1 + $0xabc] ss:$24 sps:$4 sm:$0xff]  }
 0x189   : > { %4324 = vmatprep.subr.bf16.mxu0 %v5857_v0  ;;  %4108 = vmatprep.mubr.bf16.mxu1 %v6348_v53  ;;  %v5905_v63 = vld [vmem:[%s8058_s1 + $0xac4] ss:$24 sps:$4 sm:$0xff]  }
 0x18a   : > { %4354 = vmatprep.mubr.bf16.mxu0 %v6348_v53  ;;  %v5869_v53 = vld [vmem:[%s8058_s1 + $0x9a4] ss:$24 sps:$4 sm:$0xff]  }
 0x18b   : > { %4079 = vmatpush1.bf16.msra.mxu1 %v5852_v24 }
 0x18c   : > { %4325 = vmatpush1.bf16.msra.mxu0 %v5855_v1  ;;  %4080 = vmatprep.subr.bf16.mxu1 %v5860_v2  ;;  %v5900_v2 = vld [vmem:[%s8058_s1 + $0xab8] ss:$24 sps:$4 sm:$0xff]  }
 0x18d   : > { %4326 = vmatprep.subr.bf16.mxu0 %v5863_v34  ;;  %v5903_v34 = vld [vmem:[%s8058_s1 + $0xac0] ss:$24 sps:$4 sm:$0xff]  }
 0x18f   : > { %4081 = vmatpush1.bf16.msra.mxu1 %v5858_v4  ;;  %v5911_v4 = vld [vmem:[%s8058_s1 + $0xaf4] ss:$24 sps:$4 sm:$0xff]  }
 0x190   : > { %4327 = vmatpush1.bf16.msra.mxu0 %v5861_v5  ;;  %4082 = vmatprep.subr.bf16.mxu1 %v5866_v8  ;;  %v5906_v5 = vld [vmem:[%s8058_s1 + $0xae8] ss:$24 sps:$4 sm:$0xff]  }
 0x191   : > { %4328 = vmatprep.subr.bf16.mxu0 %v5869_v53  ;;  %v5909_v8 = vld [vmem:[%s8058_s1 + $0xaf0] ss:$24 sps:$4 sm:$0xff]   ;;  %v5914_v53 = vld [vmem:[%s8058_s1 + $0xb1c] ss:$24 sps:$4 sm:$0xff]  }
 0x193   : > { %4083 = vmatpush1.bf16.msra.mxu1 %v5864_v10  ;;  %v5917_v10 = vld [vmem:[%s8058_s1 + $0xb24] ss:$24 sps:$4 sm:$0xff]  }
 0x194   : > { %4329 = vmatpush1.bf16.msra.mxu0 %v5867_v11  ;;  %4084 = vmatprep.subr.bf16.mxu1 %v5872_v12  ;;  %v5912_v11 = vld [vmem:[%s8058_s1 + $0xb18] ss:$24 sps:$4 sm:$0xff]  }
 0x195   : > { %4330 = vmatprep.subr.bf16.mxu0 %v5875_v13  ;;  %v5915_v12 = vld [vmem:[%s8058_s1 + $0xb20] ss:$24 sps:$4 sm:$0xff]   ;;  %v5920_v13 = vld [vmem:[%s8058_s1 + $0xb4c] ss:$24 sps:$4 sm:$0xff]  }
 0x197   : > { %4085 = vmatpush1.bf16.msra.mxu1 %v5870_v14  ;;  %v5923_v14 = vld [vmem:[%s8058_s1 + $0xb54] ss:$24 sps:$4 sm:$0xff]  }
 0x198   : > { %4331 = vmatpush1.bf16.msra.mxu0 %v5873_v17  ;;  %4086 = vmatprep.subr.bf16.mxu1 %v5878_v21  ;;  %v5918_v21 = vld [vmem:[%s8058_s1 + $0xb48] ss:$24 sps:$4 sm:$0xff]  }
 0x199   : > { %4332 = vmatprep.subr.bf16.mxu0 %v5881_v26  ;;  %v3823_v33 = vpop.f32.mrb[0].mxu1  ;;  %v5921_v26 = vld [vmem:[%s8058_s1 + $0xb50] ss:$24 sps:$4 sm:$0xff]  }
 0x19a   : > { %v3946_v37 = vpop.f32.mrb[0].mxu0  ;;  %v5184_v39 = vadd.f32 %v3823_v33, %v758_v27  ;;  %v3825_v22 = vpop.f32.mrb[1].mxu1  ;;  %v5924_v33 = vld [vmem:[%s8058_s1 + $0xb78] ss:$24 sps:$4 sm:$0xff]  }
 0x19b   : > { %v3948_v23 = vpop.f32.mrb[1].mxu0  ;;  %v5186_v40 = vadd.f32 %v3825_v22, %v762_v28  ;;  %v3827_v41 = vpop.f32.mrb[2].mxu1  ;;  %4087 = vmatpush1.bf16.msra.mxu1 %v5876_v29  ;;  %v5926_v28 = vld [vmem:[%s8058_s1 + $0xb7c] ss:$24 sps:$4 sm:$0xff]   ;;  %v5932_v22 = vld [vmem:[%s8058_s1 + $0xbac] ss:$24 sps:$4 sm:$0xff]  }
 0x19c   : > { %v3950_v42 = vpop.f32.mrb[2].mxu0  ;;  %4333 = vmatpush1.bf16.msra.mxu0 %v5879_v30  ;;  %v7521_v45 = vadd.f32 %v5184_v39, %v3946_v37  ;;  %v3828_v46 = vpop.f32.mrb[3].mxu1  ;;  %4088 = vmatprep.subr.bf16.mxu1 %v5884_v31  ;;  %v5929_v29 = vld [vmem:[%s8058_s1 + $0xb84] ss:$24 sps:$4 sm:$0xff]   ;;  %v5927_v37 = vld [vmem:[%s8058_s1 + $0xb80] ss:$24 sps:$4 sm:$0xff]  }
 0x19d   : > { %v3951_v48 = vpop.f32.mrb[3].mxu0  ;;  %4334 = vmatprep.subr.bf16.mxu0 %v5887_v32  ;;  %v7529_v50 = vadd.f32 %v5186_v40, %v3948_v23  ;;  %v5935_v23 = vld [vmem:[%s8058_s1 + $0xbb4] ss:$24 sps:$4 sm:$0xff]   ;;  %v5930_v41 = vld [vmem:[%s8058_s1 + $0xba8] ss:$24 sps:$4 sm:$0xff]  }
 0x19e   : > { %v4445_v51 = vmul.f32 %v7521_v45, %v7521_v45  ;;  %v5933_v42 = vld [vmem:[%s8058_s1 + $0xbb0] ss:$24 sps:$4 sm:$0xff]   ;;  %v5939_v46 = vld [vmem:[%s8058_s1 + $0xbe0] ss:$24 sps:$4 sm:$0xff]   ;;  %v5944_v48 = vld [vmem:[%s8058_s1 + $0xc0c] ss:$24 sps:$4 sm:$0xff]  }
 0x19f   : > { %v4446_v52 = vmul.f32 %v7529_v50, %v7529_v50  ;;  %4089 = vmatpush1.bf16.msra.mxu1 %v5882_v43  ;;  %v5938_v43 = vld [vmem:[%s8058_s1 + $0xbdc] ss:$24 sps:$4 sm:$0xff]  }
 0x1a0   : > { %4335 = vmatpush1.bf16.msra.mxu0 %v5885_v44  ;;  %v4451_v55 = vmul.f32 %v7521_v45, %v4445_v51  ;;  %4090 = vmatprep.subr.bf16.mxu1 %v5890_v47  ;;  %v5941_v44 = vld [vmem:[%s8058_s1 + $0xbe4] ss:$24 sps:$4 sm:$0xff]   ;;  %v5947_v47 = vld [vmem:[%s8058_s1 + $0xc14] ss:$24 sps:$4 sm:$0xff]  }
 0x1a1   : > { %4336 = vmatprep.subr.bf16.mxu0 %v5893_v49  ;;  %v4452_v35 = vmul.f32 %v7529_v50, %v4446_v52  ;;  %v5942_v49 = vld [vmem:[%s8058_s1 + $0xc08] ss:$24 sps:$4 sm:$0xff]   ;;  %v5950_v51 = vld [vmem:[%s8058_s1 + $0xc3c] ss:$24 sps:$4 sm:$0xff]  }
 0x1a2   : > { %v4457_v58 = vmul.f32 0.044715, %v4451_v55  ;;  %v5953_v52 = vld [vmem:[%s8058_s1 + $0xc44] ss:$24 sps:$4 sm:$0xff]  }
 0x1a3   : > { %v4458_v59 = vmul.f32 0.044715, %v4452_v35  ;;  %4091 = vmatpush1.bf16.msra.mxu1 %v5888_v54  ;;  %v5948_v54 = vld [vmem:[%s8058_s1 + $0xc38] ss:$24 sps:$4 sm:$0xff]   ;;  %v5956_v55 = vld [vmem:[%s8058_s1 + $0xc6c] ss:$24 sps:$4 sm:$0xff]  }
 0x1a4   : > { %4337 = vmatpush1.bf16.msra.mxu0 %v5891_v6  ;;  %v4463_v16 = vadd.f32 %v7521_v45, %v4457_v58  ;;  %4092 = vmatprep.subr.bf16.mxu1 %v5896_v56  ;;  %v5951_v6 = vld [vmem:[%s8058_s1 + $0xc40] ss:$24 sps:$4 sm:$0xff]   ;;  %v5962_v35 = vld [vmem:[%s8058_s1 + $0xc9c] ss:$24 sps:$4 sm:$0xff]  }
 0x1a5   : > { %4338 = vmatprep.subr.bf16.mxu0 %v5899_v57  ;;  %v4464_v0 = vadd.f32 %v7529_v50, %v4458_v59  ;;  %v5954_v56 = vld [vmem:[%s8058_s1 + $0xc68] ss:$24 sps:$4 sm:$0xff]   ;;  %v5960_v58 = vld [vmem:[%s8058_s1 + $0xc98] ss:$24 sps:$4 sm:$0xff]  }
 0x1a6   : > { %v4469_v24 = vmul.f32 0.7978846, %v4463_v16  ;;  %v5957_v57 = vld [vmem:[%s8058_s1 + $0xc70] ss:$24 sps:$4 sm:$0xff]   ;;  %v5963_v59 = vld [vmem:[%s8058_s1 + $0xca0] ss:$24 sps:$4 sm:$0xff]  }
 0x1a7   : > { %v4470_v1 = vmul.f32 0.7978846, %v4464_v0  ;;  %4093 = vmatpush1.bf16.msra.mxu1 %v5894_v60  ;;  %v5968_v60 = vld [vmem:[%s8058_s1 + $0xccc] ss:$24 sps:$4 sm:$0xff]   ;;  %v5966_v16 = vld [vmem:[%s8058_s1 + $0xcc8] ss:$24 sps:$4 sm:$0xff]  }
 0x1a8   : > { %4339 = vmatpush1.bf16.msra.mxu0 %v5897_v61  ;;  %6134 = vtanh.f32 %v4469_v24  ;;  %4094 = vmatprep.subr.bf16.mxu1 %v5902_v62  ;;  %v5971_v61 = vld [vmem:[%s8058_s1 + $0xcd4] ss:$24 sps:$4 sm:$0xff]   ;;  %v5969_v62 = vld [vmem:[%s8058_s1 + $0xcd0] ss:$24 sps:$4 sm:$0xff]   ;;  %v5977_v0 = vld [vmem:[%s8058_s1 + $0xd04] ss:$24 sps:$4 sm:$0xff]  }
 0x1a9   : > { %4340 = vmatprep.subr.bf16.mxu0 %v5905_v63  ;;  %6136 = vtanh.f32 %v4470_v1  ;;  %v5974_v63 = vld [vmem:[%s8058_s1 + $0xcfc] ss:$24 sps:$4 sm:$0xff]   ;;  %v5972_v24 = vld [vmem:[%s8058_s1 + $0xcf8] ss:$24 sps:$4 sm:$0xff]  }
 0x1aa   : > { %v5975_v1 = vld [vmem:[%s8058_s1 + $0xd00] ss:$24 sps:$4 sm:$0xff]  }
 0x1ab   : > { %4095 = vmatpush1.bf16.msra.mxu1 %v5900_v2  ;;  %v5980_v2 = vld [vmem:[%s8058_s1 + $0xd2c] ss:$24 sps:$4 sm:$0xff]  }
 0x1ac   : > { %4341 = vmatpush1.bf16.msra.mxu0 %v5903_v34  ;;  %4096 = vmatprep.subr.bf16.mxu1 %v5908_v3  ;;  %v5983_v34 = vld [vmem:[%s8058_s1 + $0xd34] ss:$24 sps:$4 sm:$0xff]   ;;  %v5978_v3 = vld [vmem:[%s8058_s1 + $0xd28] ss:$24 sps:$4 sm:$0xff]  }
 0x1ad   : > { %4342 = vmatprep.subr.bf16.mxu0 %v5911_v4  ;;  %v5981_v4 = vld [vmem:[%s8058_s1 + $0xd30] ss:$24 sps:$4 sm:$0xff]  }
 0x1af   : > { %4097 = vmatpush1.bf16.msra.mxu1 %v5906_v5  ;;  %v5986_v5 = vld [vmem:[%s8058_s1 + $0xd5c] ss:$24 sps:$4 sm:$0xff]  }
 0x1b0   : > { %4343 = vmatpush1.bf16.msra.mxu0 %v5909_v8  ;;  %4098 = vmatprep.subr.bf16.mxu1 %v5914_v53  ;;  %v5989_v8 = vld [vmem:[%s8058_s1 + $0xd64] ss:$24 sps:$4 sm:$0xff]   ;;  %v5984_v53 = vld [vmem:[%s8058_s1 + $0xd58] ss:$24 sps:$4 sm:$0xff]  }
 0x1b1   : > { %4344 = vmatprep.subr.bf16.mxu0 %v5917_v10  ;;  %v5987_v10 = vld [vmem:[%s8058_s1 + $0xd60] ss:$24 sps:$4 sm:$0xff]  }
 0x1b2   : > { %v6135_v15 = vpop.eup %6134 }
 0x1b3   : > { %v6137_v17 = vpop.eup %6136  ;;  %v4481_v20 = vadd.f32 1.0, %v6135_v15  ;;  %4099 = vmatpush1.bf16.msra.mxu1 %v5912_v11  ;;  %v5992_v11 = vld [vmem:[%s8058_s1 + $0xd8c] ss:$24 sps:$4 sm:$0xff]   ;;  %v5998_v15 = vld [vmem:[%s8058_s1 + $0xdbc] ss:$24 sps:$4 sm:$0xff]  }
 0x1b4   : > { %4345 = vmatpush1.bf16.msra.mxu0 %v5915_v12  ;;  %v4482_v27 = vadd.f32 1.0, %v6137_v17  ;;  %4100 = vmatprep.subr.bf16.mxu1 %v5920_v13  ;;  %v5995_v12 = vld [vmem:[%s8058_s1 + $0xd94] ss:$24 sps:$4 sm:$0xff]   ;;  %v5990_v13 = vld [vmem:[%s8058_s1 + $0xd88] ss:$24 sps:$4 sm:$0xff]  }
 0x1b5   : > { %4346 = vmatprep.subr.bf16.mxu0 %v5923_v14  ;;  %v4487_v30 = vmul.f32 0.5, %v4481_v20  ;;  %v5993_v14 = vld [vmem:[%s8058_s1 + $0xd90] ss:$24 sps:$4 sm:$0xff]   ;;  %v6001_v17 = vld [vmem:[%s8058_s1 + $0xdc4] ss:$24 sps:$4 sm:$0xff]  }
 0x1b6   : > { %v4488_v31 = vmul.f32 0.5, %v4482_v27  ;;  %v5996_v20 = vld [vmem:[%s8058_s1 + $0xdb8] ss:$24 sps:$4 sm:$0xff]   ;;  %v6007_v27 = vld [vmem:[%s8058_s1 + $0xdf4] ss:$24 sps:$4 sm:$0xff]  }
 0x1b7   : > { %v4493_v32 = vmul.f32 %v7521_v45, %v4487_v30  ;;  %4101 = vmatpush1.bf16.msra.mxu1 %v5918_v21  ;;  %v5936_v45 = vld [vmem:[%s8058_s1 + $0xbd8] ss:$24 sps:$4 sm:$0xff]   ;;  %v6010_v30 = vld [vmem:[%s8058_s1 + $0xe1c] ss:$24 sps:$4 sm:$0xff]  }
 0x1b8   : > { %4347 = vmatpush1.bf16.msra.mxu0 %v5921_v26  ;;  %v4494_v39 = vmul.f32 %v7529_v50, %v4488_v31  ;;  %4102 = vmatprep.subr.bf16.mxu1 %v5926_v28  ;;  %v5945_v50 = vld [vmem:[%s8058_s1 + $0xc10] ss:$24 sps:$4 sm:$0xff]   ;;  %v5999_v21 = vld [vmem:[%s8058_s1 + $0xdc0] ss:$24 sps:$4 sm:$0xff]   ;;  %v6004_v26 = vld [vmem:[%s8058_s1 + $0xdec] ss:$24 sps:$4 sm:$0xff]  }
 0x1b9   : > { %4348 = vmatprep.subr.bf16.mxu0 %v5929_v29  ;;  %v6002_v28 = vld [vmem:[%s8058_s1 + $0xde8] ss:$24 sps:$4 sm:$0xff]   ;;  %v6013_v31 = vld [vmem:[%s8058_s1 + $0xe24] ss:$24 sps:$4 sm:$0xff]  }
 0x1ba   : > { %v5181_v40 = vpack.c.bf16 %v4494_v39, %v4493_v32  ;;  %v6005_v29 = vld [vmem:[%s8058_s1 + $0xdf0] ss:$24 sps:$4 sm:$0xff]   ;;  %v6019_v39 = vld [vmem:[%s8058_s1 + $0xe54] ss:$24 sps:$4 sm:$0xff]  }
 0x1bb   : > { %4103 = vmatpush1.bf16.msra.mxu1 %v5924_v33  ;;  %v6008_v32 = vld [vmem:[%s8058_s1 + $0xe18] ss:$24 sps:$4 sm:$0xff]  }
 0x1bc   : > { %4349 = vmatpush1.bf16.msra.mxu0 %v5927_v37  ;;  %4523 = vst [vmem:[%s7629_s11] sm:$0xff] %v5181_v40  ;;  %4104 = vmatprep.subr.bf16.mxu1 %v5932_v22  ;;  %v6011_v33 = vld [vmem:[%s8058_s1 + $0xe20] ss:$24 sps:$4 sm:$0xff]   ;;  %v6016_v37 = vld [vmem:[%s8058_s1 + $0xe4c] ss:$24 sps:$4 sm:$0xff]   ;;  %v6022_v40 = vld [vmem:[%s8058_s1 + $0xe7c] ss:$24 sps:$4 sm:$0xff]  }
 0x1bd   : > { %4350 = vmatprep.subr.bf16.mxu0 %v5935_v23  ;;  %v6014_v22 = vld [vmem:[%s8058_s1 + $0xe48] ss:$24 sps:$4 sm:$0xff]  }
 0x1be   : > { %v6017_v23 = vld [vmem:[%s8058_s1 + $0xe50] ss:$24 sps:$4 sm:$0xff]  }
 0x1bf   : > { %4105 = vmatpush1.bf16.msra.mxu1 %v5930_v41  ;;  %v6025_v41 = vld [vmem:[%s8058_s1 + $0xe84] ss:$24 sps:$4 sm:$0xff]  }
 0x1c0   : > { %4351 = vmatpush1.bf16.msra.mxu0 %v5933_v42  ;;  %4106 = vmatprep.subr.bf16.mxu1 %v5938_v43  ;;  %v6020_v42 = vld [vmem:[%s8058_s1 + $0xe78] ss:$24 sps:$4 sm:$0xff]  }
 0x1c1   : > { %4352 = vmatprep.subr.bf16.mxu0 %v5941_v44  ;;  %v6023_v43 = vld [vmem:[%s8058_s1 + $0xe80] ss:$24 sps:$4 sm:$0xff]   ;;  %v6028_v44 = vld [vmem:[%s8058_s1 + $0xeac] ss:$24 sps:$4 sm:$0xff]  }
 0x1c3   : > { %4107 = vmatpush1.bf16.msra.mxu1 %v5936_v45  ;;  %v6031_v45 = vld [vmem:[%s8058_s1 + $0xeb4] ss:$24 sps:$4 sm:$0xff]  }
 0x1c4   : > { %4353 = vmatpush1.bf16.msra.mxu0 %v5939_v46  ;;  %4117 = vmatprep.subr.bf16.mxu1 %v5944_v48  ;;  %v6026_v46 = vld [vmem:[%s8058_s1 + $0xea8] ss:$24 sps:$4 sm:$0xff]  }
 0x1c5   : > { %4363 = vmatprep.subr.bf16.mxu0 %v5947_v47  ;;  %v6029_v48 = vld [vmem:[%s8058_s1 + $0xeb0] ss:$24 sps:$4 sm:$0xff]   ;;  %v6034_v47 = vld [vmem:[%s8058_s1 + $0xedc] ss:$24 sps:$4 sm:$0xff]  }
 0x1c6   : > { %4109 = vmatmul.mubr.bf16.vlgmr.msra.gmra.mrb[4].mxu1 %v6402_v7 }
 0x1c7   : > { %4355 = vmatmul.mubr.bf16.vlgmr.msra.gmra.mrb[4].mxu0 %v6402_v7  ;;  %4118 = vmatpush1.bf16.msra.mxu1 %v5942_v49  ;;  %v5959_v7 = vld [vmem:[%s8058_s1 + $0xc74] ss:$24 sps:$4 sm:$0xff]   ;;  %v6037_v49 = vld [vmem:[%s8058_s1 + $0xee4] ss:$24 sps:$4 sm:$0xff]  }
 0x1c8   : > { %4364 = vmatpush1.bf16.msra.mxu0 %v5945_v50  ;;  %4119 = vmatprep.subr.bf16.mxu1 %v5950_v51  ;;  %v6032_v50 = vld [vmem:[%s8058_s1 + $0xed8] ss:$24 sps:$4 sm:$0xff]  }
 0x1c9   : > { %4365 = vmatprep.subr.bf16.mxu0 %v5953_v52  ;;  %4149 = vmatprep.mubr.bf16.mxu1 %v6499_v38  ;;  %v6035_v51 = vld [vmem:[%s8058_s1 + $0xee0] ss:$24 sps:$4 sm:$0xff]   ;;  %v6040_v52 = vld [vmem:[%s8058_s1 + $0xf0c] ss:$24 sps:$4 sm:$0xff]  }
 0x1ca   : > { %4395 = vmatprep.mubr.bf16.mxu0 %v6499_v38  ;;  %v5965_v38 = vld [vmem:[%s8058_s1 + $0xca4] ss:$24 sps:$4 sm:$0xff]  }
 0x1cb   : > { %4120 = vmatpush1.bf16.msra.mxu1 %v5948_v54  ;;  %v6043_v54 = vld [vmem:[%s8058_s1 + $0xf14] ss:$24 sps:$4 sm:$0xff]  }
 0x1cc   : > { %4366 = vmatpush1.bf16.msra.mxu0 %v5951_v6  ;;  %4121 = vmatprep.subr.bf16.mxu1 %v5956_v55  ;;  %v6038_v6 = vld [vmem:[%s8058_s1 + $0xf08] ss:$24 sps:$4 sm:$0xff]  }
 0x1cd   : > { %4367 = vmatprep.subr.bf16.mxu0 %v5959_v7  ;;  %v6041_v55 = vld [vmem:[%s8058_s1 + $0xf10] ss:$24 sps:$4 sm:$0xff]   ;;  %v6046_v7 = vld [vmem:[%s8058_s1 + $0xf3c] ss:$24 sps:$4 sm:$0xff]  }
 0x1cf   : > { %4122 = vmatpush1.bf16.msra.mxu1 %v5954_v56  ;;  %v6049_v56 = vld [vmem:[%s8058_s1 + $0xf44] ss:$24 sps:$4 sm:$0xff]  }
 0x1d0   : > { %4368 = vmatpush1.bf16.msra.mxu0 %v5957_v57  ;;  %4123 = vmatprep.subr.bf16.mxu1 %v5962_v35  ;;  %v6044_v57 = vld [vmem:[%s8058_s1 + $0xf38] ss:$24 sps:$4 sm:$0xff]  }
 0x1d1   : > { %4369 = vmatprep.subr.bf16.mxu0 %v5965_v38  ;;  %v6047_v35 = vld [vmem:[%s8058_s1 + $0xf40] ss:$24 sps:$4 sm:$0xff]   ;;  %v6052_v38 = vld [vmem:[%s8058_s1 + $0xf6c] ss:$24 sps:$4 sm:$0xff]  }
 0x1d3   : > { %4124 = vmatpush1.bf16.msra.mxu1 %v5960_v58  ;;  %v6050_v58 = vld [vmem:[%s8058_s1 + $0xf68] ss:$24 sps:$4 sm:$0xff]  }
 0x1d4   : > { %4370 = vmatpush1.bf16.msra.mxu0 %v5963_v59  ;;  %4125 = vmatprep.subr.bf16.mxu1 %v5968_v60  ;;  %v6053_v59 = vld [vmem:[%s8058_s1 + $0xf70] ss:$24 sps:$4 sm:$0xff]   ;;  %v6058_v60 = vld [vmem:[%s8058_s1 + $0xf9c] ss:$24 sps:$4 sm:$0xff]  }
 0x1d5   : > { %4371 = vmatprep.subr.bf16.mxu0 %v5971_v61  ;;  %v6056_v61 = vld [vmem:[%s8058_s1 + $0xf98] ss:$24 sps:$4 sm:$0xff]  }
 0x1d7   : > { %4126 = vmatpush1.bf16.msra.mxu1 %v5966_v16  ;;  %v6059_v16 = vld [vmem:[%s8058_s1 + $0xfa0] ss:$24 sps:$4 sm:$0xff]  }
 0x1d8   : > { %4372 = vmatpush1.bf16.msra.mxu0 %v5969_v62  ;;  %4127 = vmatprep.subr.bf16.mxu1 %v5974_v63  ;;  %v6064_v62 = vld [vmem:[%s8058_s1 + $0xfcc] ss:$24 sps:$4 sm:$0xff]  }
 0x1d9   : > { %4373 = vmatprep.subr.bf16.mxu0 %v5977_v0  ;;  %v6067_v63 = vld [vmem:[%s8058_s1 + $0xfd4] ss:$24 sps:$4 sm:$0xff]   ;;  %v6062_v0 = vld [vmem:[%s8058_s1 + $0xfc8] ss:$24 sps:$4 sm:$0xff]  }
 0x1db   : > { %4128 = vmatpush1.bf16.msra.mxu1 %v5972_v24  ;;  %v6065_v24 = vld [vmem:[%s8058_s1 + $0xfd0] ss:$24 sps:$4 sm:$0xff]  }
 0x1dc   : > { %4374 = vmatpush1.bf16.msra.mxu0 %v5975_v1  ;;  %4129 = vmatprep.subr.bf16.mxu1 %v5980_v2  ;;  %v6070_v1 = vld [vmem:[%s8058_s1 + $0xffc] ss:$24 sps:$4 sm:$0xff]  }
 0x1dd   : > { %4375 = vmatprep.subr.bf16.mxu0 %v5983_v34  ;;  %v6073_v2 = vld [vmem:[%s8058_s1 + $0x1004] ss:$24 sps:$4 sm:$0xff]   ;;  %v6068_v34 = vld [vmem:[%s8058_s1 + $0xff8] ss:$24 sps:$4 sm:$0xff]  }
 0x1df   : > { %4130 = vmatpush1.bf16.msra.mxu1 %v5978_v3  ;;  %v6071_v3 = vld [vmem:[%s8058_s1 + $0x1000] ss:$24 sps:$4 sm:$0xff]  }
 0x1e0   : > { %4376 = vmatpush1.bf16.msra.mxu0 %v5981_v4  ;;  %4131 = vmatprep.subr.bf16.mxu1 %v5986_v5  ;;  %v6076_v4 = vld [vmem:[%s8058_s1 + $0x102c] ss:$24 sps:$4 sm:$0xff]  }
 0x1e1   : > { %4377 = vmatprep.subr.bf16.mxu0 %v5989_v8  ;;  %v6079_v5 = vld [vmem:[%s8058_s1 + $0x1034] ss:$24 sps:$4 sm:$0xff]   ;;  %v6074_v8 = vld [vmem:[%s8058_s1 + $0x1028] ss:$24 sps:$4 sm:$0xff]  }
 0x1e3   : > { %4132 = vmatpush1.bf16.msra.mxu1 %v5984_v53  ;;  %v6077_v53 = vld [vmem:[%s8058_s1 + $0x1030] ss:$24 sps:$4 sm:$0xff]  }
 0x1e4   : > { %4378 = vmatpush1.bf16.msra.mxu0 %v5987_v10  ;;  %4133 = vmatprep.subr.bf16.mxu1 %v5992_v11  ;;  %v6082_v10 = vld [vmem:[%s8058_s1 + $0x105c] ss:$24 sps:$4 sm:$0xff]  }
 0x1e5   : > { %4379 = vmatprep.subr.bf16.mxu0 %v5995_v12  ;;  %v6085_v11 = vld [vmem:[%s8058_s1 + $0x1064] ss:$24 sps:$4 sm:$0xff]   ;;  %v6080_v12 = vld [vmem:[%s8058_s1 + $0x1058] ss:$24 sps:$4 sm:$0xff]  }
 0x1e7   : > { %4134 = vmatpush1.bf16.msra.mxu1 %v5990_v13  ;;  %v6083_v13 = vld [vmem:[%s8058_s1 + $0x1060] ss:$24 sps:$4 sm:$0xff]  }
 0x1e8   : > { %4380 = vmatpush1.bf16.msra.mxu0 %v5993_v14  ;;  %4135 = vmatprep.subr.bf16.mxu1 %v5998_v15  ;;  %v6088_v14 = vld [vmem:[%s8058_s1 + $0x108c] ss:$24 sps:$4 sm:$0xff]  }
 0x1e9   : > { %4381 = vmatprep.subr.bf16.mxu0 %v6001_v17  ;;  %v6091_v15 = vld [vmem:[%s8058_s1 + $0x1094] ss:$24 sps:$4 sm:$0xff]   ;;  %v6086_v17 = vld [vmem:[%s8058_s1 + $0x1088] ss:$24 sps:$4 sm:$0xff]  }
 0x1eb   : > { %4136 = vmatpush1.bf16.msra.mxu1 %v5996_v20  ;;  %v6089_v20 = vld [vmem:[%s8058_s1 + $0x1090] ss:$24 sps:$4 sm:$0xff]  }
 0x1ec   : > { %4382 = vmatpush1.bf16.msra.mxu0 %v5999_v21  ;;  %4137 = vmatprep.subr.bf16.mxu1 %v6004_v26  ;;  %v6094_v21 = vld [vmem:[%s8058_s1 + $0x10bc] ss:$24 sps:$4 sm:$0xff]  }
 0x1ed   : > { %4383 = vmatprep.subr.bf16.mxu0 %v6007_v27  ;;  %v6097_v26 = vld [vmem:[%s8058_s1 + $0x10c4] ss:$24 sps:$4 sm:$0xff]   ;;  %v6092_v27 = vld [vmem:[%s8058_s1 + $0x10b8] ss:$24 sps:$4 sm:$0xff]  }
 0x1ef   : > { %4138 = vmatpush1.bf16.msra.mxu1 %v6002_v28  ;;  %v6095_v28 = vld [vmem:[%s8058_s1 + $0x10c0] ss:$24 sps:$4 sm:$0xff]  }
 0x1f0   : > { %4384 = vmatpush1.bf16.msra.mxu0 %v6005_v29  ;;  %4139 = vmatprep.subr.bf16.mxu1 %v6010_v30  ;;  %v6100_v29 = vld [vmem:[%s8058_s1 + $0x10ec] ss:$24 sps:$4 sm:$0xff]  }
 0x1f1   : > { %4385 = vmatprep.subr.bf16.mxu0 %v6013_v31  ;;  %v6103_v30 = vld [vmem:[%s8058_s1 + $0x10f4] ss:$24 sps:$4 sm:$0xff]   ;;  %v6098_v31 = vld [vmem:[%s8058_s1 + $0x10e8] ss:$24 sps:$4 sm:$0xff]  }
 0x1f3   : > { %4140 = vmatpush1.bf16.msra.mxu1 %v6008_v32  ;;  %v6101_v32 = vld [vmem:[%s8058_s1 + $0x10f0] ss:$24 sps:$4 sm:$0xff]  }
 0x1f4   : > { %4386 = vmatpush1.bf16.msra.mxu0 %v6011_v33  ;;  %4141 = vmatprep.subr.bf16.mxu1 %v6016_v37  ;;  %v6106_v33 = vld [vmem:[%s8058_s1 + $0x111c] ss:$24 sps:$4 sm:$0xff]  }
 0x1f5   : > { %4387 = vmatprep.subr.bf16.mxu0 %v6019_v39  ;;  %v6109_v37 = vld [vmem:[%s8058_s1 + $0x1124] ss:$24 sps:$4 sm:$0xff]   ;;  %v6104_v39 = vld [vmem:[%s8058_s1 + $0x1118] ss:$24 sps:$4 sm:$0xff]  }
 0x1f7   : > { %4142 = vmatpush1.bf16.msra.mxu1 %v6014_v22  ;;  %v6107_v22 = vld [vmem:[%s8058_s1 + $0x1120] ss:$24 sps:$4 sm:$0xff]  }
 0x1f8   : > { %4388 = vmatpush1.bf16.msra.mxu0 %v6017_v23  ;;  %4143 = vmatprep.subr.bf16.mxu1 %v6022_v40  ;;  %v6112_v23 = vld [vmem:[%s8058_s1 + $0x114c] ss:$24 sps:$4 sm:$0xff]  }
 0x1f9   : > { %4389 = vmatprep.subr.bf16.mxu0 %v6025_v41  ;;  %v6115_v40 = vld [vmem:[%s8058_s1 + $0x1154] ss:$24 sps:$4 sm:$0xff]   ;;  %v6110_v41 = vld [vmem:[%s8058_s1 + $0x1148] ss:$24 sps:$4 sm:$0xff]  }
 0x1fb   : > { %4144 = vmatpush1.bf16.msra.mxu1 %v6020_v42  ;;  %v6113_v42 = vld [vmem:[%s8058_s1 + $0x1150] ss:$24 sps:$4 sm:$0xff]  }
 0x1fc   : > { %4390 = vmatpush1.bf16.msra.mxu0 %v6023_v43  ;;  %4145 = vmatprep.subr.bf16.mxu1 %v6028_v44  ;;  %v6118_v43 = vld [vmem:[%s8058_s1 + $0x117c] ss:$24 sps:$4 sm:$0xff]  }
 0x1fd   : > { %4391 = vmatprep.subr.bf16.mxu0 %v6031_v45  ;;  %v6121_v44 = vld [vmem:[%s8058_s1 + $0x1184] ss:$24 sps:$4 sm:$0xff]   ;;  %v6116_v45 = vld [vmem:[%s8058_s1 + $0x1178] ss:$24 sps:$4 sm:$0xff]  }
 0x1ff   : > { %4146 = vmatpush1.bf16.msra.mxu1 %v6026_v46  ;;  %v6119_v46 = vld [vmem:[%s8058_s1 + $0x1180] ss:$24 sps:$4 sm:$0xff]  }
 0x200   : > { %4392 = vmatpush1.bf16.msra.mxu0 %v6029_v48  ;;  %4147 = vmatprep.subr.bf16.mxu1 %v6034_v47  ;;  %v6124_v48 = vld [vmem:[%s8058_s1 + $0x11ac] ss:$24 sps:$4 sm:$0xff]  }
 0x201   : > { %4393 = vmatprep.subr.bf16.mxu0 %v6037_v49  ;;  %v6127_v47 = vld [vmem:[%s8058_s1 + $0x11b4] ss:$24 sps:$4 sm:$0xff]   ;;  %v6122_v49 = vld [vmem:[%s8058_s1 + $0x11a8] ss:$24 sps:$4 sm:$0xff]  }
 0x203   : > { %4148 = vmatpush1.bf16.msra.mxu1 %v6032_v50  ;;  %v6125_v50 = vld [vmem:[%s8058_s1 + $0x11b0] ss:$24 sps:$4 sm:$0xff]  }
 0x204   : > { %4394 = vmatpush1.bf16.msra.mxu0 %v6035_v51  ;;  %4158 = vmatprep.subr.bf16.mxu1 %v6040_v52  ;;  %v6130_v51 = vld [vmem:[%s8058_s1 + $0x11dc] ss:$24 sps:$4 sm:$0xff]  }
 0x205   : > { %4404 = vmatprep.subr.bf16.mxu0 %v6043_v54  ;;  %v6133_v52 = vld [vmem:[%s8058_s1 + $0x11e4] ss:$24 sps:$4 sm:$0xff]   ;;  %v6128_v54 = vld [vmem:[%s8058_s1 + $0x11d8] ss:$24 sps:$4 sm:$0xff]  }
 0x206   : > { %4150 = vmatmul.mubr.bf16.vlgmr.msra.gmra.mrb[4].mxu1 %v6623_v18 }
 0x207   : > { %4396 = vmatmul.mubr.bf16.vlgmr.msra.gmra.mrb[4].mxu0 %v6623_v18  ;;  %4159 = vmatpush1.bf16.msra.mxu1 %v6038_v6  ;;  %v6055_v18 = vld [vmem:[%s8058_s1 + $0xf74] ss:$24 sps:$4 sm:$0xff]   ;;  %v6131_v6 = vld [vmem:[%s8058_s1 + $0x11e0] ss:$24 sps:$4 sm:$0xff]  }
 0x208   : > { %4405 = vmatpush1.bf16.msra.mxu0 %v6041_v55  ;;  %4160 = vmatprep.subr.bf16.mxu1 %v6046_v7  ;;  %v765_v55 = vsub.s32 2, %v7468_v9  ;;  %v773_v7 = vsub.s32 4, %v7468_v9 }
 0x209   : > { %4406 = vmatprep.subr.bf16.mxu0 %v6049_v56  ;;  %4190 = vmatprep.mubr.bf16.mxu1 %v6646_v25  ;;  %v769_v56 = vsub.s32 3, %v7468_v9 }
 0x20a   : > { %4436 = vmatprep.mubr.bf16.mxu0 %v6646_v25  ;;  %v6061_v25 = vld [vmem:[%s8058_s1 + $0xfa4] ss:$24 sps:$4 sm:$0xff]  }
 0x20b   : > { %4161 = vmatpush1.bf16.msra.mxu1 %v6044_v57  ;;  %v777_v57 = vsub.s32 5, %v7468_v9 }
 0x20c   : > { %4407 = vmatpush1.bf16.msra.mxu0 %v6047_v35  ;;  %4162 = vmatprep.subr.bf16.mxu1 %v6052_v38  ;;  %v766_v35 = vrot.slane %v7492_v19, %v765_v55  ;;  %v774_v38 = vrot.slane %v7492_v19, %v773_v7 }
 0x20d   : > { %4408 = vmatprep.subr.bf16.mxu0 %v6055_v18  ;;  %v770_v18 = vrot.slane %v7492_v19, %v769_v56 }
 0x20f   : > { %4163 = vmatpush1.bf16.msra.mxu1 %v6050_v58  ;;  %v778_v58 = vrot.slane %v7492_v19, %v777_v57 }
 0x210   : > { %4409 = vmatpush1.bf16.msra.mxu0 %v6053_v59  ;;  %4164 = vmatprep.subr.bf16.mxu1 %v6058_v60 }
 0x211   : > { %4410 = vmatprep.subr.bf16.mxu0 %v6061_v25 }
 0x213   : > { %4165 = vmatpush1.bf16.msra.mxu1 %v6056_v61 }
 0x214   : > { %4411 = vmatpush1.bf16.msra.mxu0 %v6059_v16  ;;  %4166 = vmatprep.subr.bf16.mxu1 %v6064_v62 }
 0x215   : > { %4412 = vmatprep.subr.bf16.mxu0 %v6067_v63 }
 0x217   : > { %4167 = vmatpush1.bf16.msra.mxu1 %v6062_v0 }
 0x218   : > { %4413 = vmatpush1.bf16.msra.mxu0 %v6065_v24  ;;  %4168 = vmatprep.subr.bf16.mxu1 %v6070_v1 }
 0x219   : > { %4414 = vmatprep.subr.bf16.mxu0 %v6073_v2 }
 0x21b   : > { %4169 = vmatpush1.bf16.msra.mxu1 %v6068_v34 }
 0x21c   : > { %4415 = vmatpush1.bf16.msra.mxu0 %v6071_v3  ;;  %4170 = vmatprep.subr.bf16.mxu1 %v6076_v4 }
 0x21d   : > { %4416 = vmatprep.subr.bf16.mxu0 %v6079_v5 }
 0x21f   : > { %4171 = vmatpush1.bf16.msra.mxu1 %v6074_v8 }
 0x220   : > { %4417 = vmatpush1.bf16.msra.mxu0 %v6077_v53  ;;  %4172 = vmatprep.subr.bf16.mxu1 %v6082_v10 }
 0x221   : > { %4418 = vmatprep.subr.bf16.mxu0 %v6085_v11 }
 0x223   : > { %4173 = vmatpush1.bf16.msra.mxu1 %v6080_v12 }
 0x224   : > { %4419 = vmatpush1.bf16.msra.mxu0 %v6083_v13  ;;  %4174 = vmatprep.subr.bf16.mxu1 %v6088_v14 }
 0x225   : > { %4420 = vmatprep.subr.bf16.mxu0 %v6091_v15 }
 0x227   : > { %4175 = vmatpush1.bf16.msra.mxu1 %v6086_v17 }
 0x228   : > { %4421 = vmatpush1.bf16.msra.mxu0 %v6089_v20  ;;  %4176 = vmatprep.subr.bf16.mxu1 %v6094_v21 }
 0x229   : > { %4422 = vmatprep.subr.bf16.mxu0 %v6097_v26 }
 0x22b   : > { %4177 = vmatpush1.bf16.msra.mxu1 %v6092_v27 }
 0x22c   : > { %4423 = vmatpush1.bf16.msra.mxu0 %v6095_v28  ;;  %4178 = vmatprep.subr.bf16.mxu1 %v6100_v29 }
 0x22d   : > { %4424 = vmatprep.subr.bf16.mxu0 %v6103_v30 }
 0x22f   : > { %4179 = vmatpush1.bf16.msra.mxu1 %v6098_v31 }
 0x230   : > { %4425 = vmatpush1.bf16.msra.mxu0 %v6101_v32  ;;  %4180 = vmatprep.subr.bf16.mxu1 %v6106_v33 }
 0x231   : > { %4426 = vmatprep.subr.bf16.mxu0 %v6109_v37 }
 0x233   : > { %4181 = vmatpush1.bf16.msra.mxu1 %v6104_v39 }
 0x234   : > { %4427 = vmatpush1.bf16.msra.mxu0 %v6107_v22  ;;  %4182 = vmatprep.subr.bf16.mxu1 %v6112_v23 }
 0x235   : > { %4428 = vmatprep.subr.bf16.mxu0 %v6115_v40 }
 0x237   : > { %4183 = vmatpush1.bf16.msra.mxu1 %v6110_v41 }
 0x238   : > { %4429 = vmatpush1.bf16.msra.mxu0 %v6113_v42  ;;  %4184 = vmatprep.subr.bf16.mxu1 %v6118_v43 }
 0x239   : > { %4430 = vmatprep.subr.bf16.mxu0 %v6121_v44 }
 0x23b   : > { %4185 = vmatpush1.bf16.msra.mxu1 %v6116_v45 }
 0x23c   : > { %4431 = vmatpush1.bf16.msra.mxu0 %v6119_v46  ;;  %4186 = vmatprep.subr.bf16.mxu1 %v6124_v48 }
 0x23d   : > { %4432 = vmatprep.subr.bf16.mxu0 %v6127_v47 }
 0x23f   : > { %4187 = vmatpush1.bf16.msra.mxu1 %v6122_v49 }
 0x240   : > { %4433 = vmatpush1.bf16.msra.mxu0 %v6125_v50  ;;  %4188 = vmatprep.subr.bf16.mxu1 %v6130_v51 }
 0x241   : > { %4434 = vmatprep.subr.bf16.mxu0 %v6133_v52 }
 0x243   : > { %4189 = vmatpush1.bf16.msra.mxu1 %v6128_v54 }
 0x244   : > { %4435 = vmatpush1.bf16.msra.mxu0 %v6131_v6 }
 0x246   : > { %4191 = vmatmul.mubr.bf16.vlgmr.msra.gmra.mrb[4].mxu1 %v6838_v36 }
 0x247   : > { %4437 = vmatmul.mubr.bf16.vlgmr.msra.gmra.mrb[4].mxu0 %v6838_v36 }
 0x319   : > { %v4192_v59 = vpop.f32.mrb[4].mxu1 }
 0x31a   : > { %v4438_v60 = vpop.f32.mrb[4].mxu0  ;;  %v5188_v25 = vadd.f32 %v4192_v59, %v766_v35  ;;  %v4194_v61 = vpop.f32.mrb[5].mxu1 }
 0x31b   : > { %v5190_v36 = vadd.f32 %v4438_v60, %v774_v38  ;;  %v4440_v16 = vpop.f32.mrb[5].mxu0  ;;  %v5189_v62 = vadd.f32 %v4194_v61, %v770_v18  ;;  %v4196_v0 = vpop.f32.mrb[6].mxu1 }
 0x31c   : > { %v5191_v63 = vadd.f32 %v4440_v16, %v778_v58  ;;  %v4442_v24 = vpop.f32.mrb[6].mxu0  ;;  %v4447_v1 = vmul.f32 %v5188_v25, %v5188_v25  ;;  %v4197_v2 = vpop.f32.mrb[7].mxu1 }
 0x31d   : > { %v4449_v9 = vmul.f32 %v5190_v36, %v5190_v36  ;;  %v4443_v34 = vpop.f32.mrb[7].mxu0  ;;  %v4448_v3 = vmul.f32 %v5189_v62, %v5189_v62 }
 0x31e   : > { %v4450_v4 = vmul.f32 %v5191_v63, %v5191_v63  ;;  %v4453_v5 = vmul.f32 %v5188_v25, %v4447_v1 }
 0x31f   : > { %v4455_v8 = vmul.f32 %v5190_v36, %v4449_v9  ;;  %v4454_v53 = vmul.f32 %v5189_v62, %v4448_v3 }
 0x320   : > { %v4456_v19 = vmul.f32 %v5191_v63, %v4450_v4  ;;  %v4459_v10 = vmul.f32 0.044715, %v4453_v5 }
 0x321   : > { %v4461_v11 = vmul.f32 0.044715, %v4455_v8  ;;  %v4460_v12 = vmul.f32 0.044715, %v4454_v53 }
 0x322   : > { %v4462_v13 = vmul.f32 0.044715, %v4456_v19  ;;  %v4465_v14 = vadd.f32 %v5188_v25, %v4459_v10 }
 0x323   : > { %v4467_v15 = vadd.f32 %v5190_v36, %v4461_v11  ;;  %v4466_v17 = vadd.f32 %v5189_v62, %v4460_v12 }
 0x324   : > { %v4468_v20 = vadd.f32 %v5191_v63, %v4462_v13  ;;  %v4471_v21 = vmul.f32 0.7978846, %v4465_v14 }
 0x325   : > { %v4473_v26 = vmul.f32 0.7978846, %v4467_v15  ;;  %v4472_v27 = vmul.f32 0.7978846, %v4466_v17 }
 0x326   : > { %v4474_v28 = vmul.f32 0.7978846, %v4468_v20  ;;  %6138 = vtanh.f32 %v4471_v21 }
 0x327   : > { %6140 = vtanh.f32 %v4473_v26 }
 0x328   : > { %6142 = vtanh.f32 %v4472_v27 }
 0x329   : > { %6144 = vtanh.f32 %v4474_v28 }
 0x330   : > { %v6139_v29 = vpop.eup %6138 }
 0x331   : > { %v6141_v30 = vpop.eup %6140  ;;  %v4483_v31 = vadd.f32 1.0, %v6139_v29 }
 0x332   : > { %v6143_v32 = vpop.eup %6142  ;;  %v4485_v33 = vadd.f32 1.0, %v6141_v30 }
 0x333   : > { %v6145_v37 = vpop.eup %6144  ;;  %v4489_v39 = vmul.f32 0.5, %v4483_v31  ;;  %v4484_v22 = vadd.f32 1.0, %v6143_v32 }
 0x334   : > { %v4491_v23 = vmul.f32 0.5, %v4485_v33  ;;  %v4486_v40 = vadd.f32 1.0, %v6145_v37 }
 0x335   : > { %v4495_v41 = vmul.f32 %v5188_v25, %v4489_v39  ;;  %v4490_v42 = vmul.f32 0.5, %v4484_v22 }
 0x336   : > { %v4497_v43 = vmul.f32 %v5190_v36, %v4491_v23  ;;  %v4492_v44 = vmul.f32 0.5, %v4486_v40 }
 0x337   : > { %v4496_v45 = vmul.f32 %v5189_v62, %v4490_v42 }
 0x338   : > { %v4498_v46 = vmul.f32 %v5191_v63, %v4492_v44 }
 0x339   : > { %v5182_v48 = vpack.c.bf16 %v4496_v45, %v4495_v41 }
 0x33a   : > { %v5183_v47 = vpack.c.bf16 %v4498_v46, %v4497_v43 }
 0x33b   : > { %4524 = vst [vmem:[%s7629_s11 + $0x8] sm:$0xff] %v5182_v48 }
 0x33c   : > { %4525 = vst [vmem:[%s7629_s11 + $0x10] sm:$0xff] %v5183_v47 }
 0x33d PF: > { %s13_s12 = sadd.s32 1, %s6152_s12  }
 0x33e   : > { %p10_p4 = scmp.ge.s32.totalorder %s13_s12, 4  }
 0x340   :  { %12 = sbr.rel (!%p10_p4) target bundleno = 1 (0x1), region = 62 }

// kernel: transformer_net_forward.20
= control target key start
LH: loop header
LB: loop body
LE: loop exit
PB: predicated region body
PF: predicated region fallthrough
CT: control target
= control target key end

     0   :  { %s724_s9 = smov 0   ;;  %s792_s0 = inlined_call_operand.vmem [shape: bf16[8,4], index: 0, kind: input, shape index: {}]   ;;  %s793_s1 = inlined_call_operand.vmem [shape: bf16[16,4,128], index: 1, kind: input, shape index: {}]   ;;  %s794_s2 = inlined_call_operand.vmem [shape: bf16[16,8,128], index: 2, kind: output, shape index: {}]  }
   0x1 LB: > { %s592_s10 = sadd.s32 4294967295, %s705_s9   ;;  %p596_p0 = scmp.ge.s32.totalorder %s705_s9, 1  ;;  %s705_s9 = sphi %s724_s9, %s12_s9  }
   0x2   : > { %p113_p1 = scmp.lt.s32.totalorder %s705_s9, 3 }
   0x4   : > { %p114_p2 = pnand %p596_p0, %p113_p1 }
   0x5   : > { %s597_s11 = sshll.u32 (!%p114_p2), %s592_s10, 3  ;;  %v707_v0 = vmov (!%p114_p2), 0.0   ;;  %vm708_vm0 = vmmov (!%p114_p2), 0   ;;  %vm154_vm1 = vcmask (!%p114_p2), 1041408   ;;  %v148_v7 = vld [vmem:[%s792_s0] sm:$0xf] (!%p114_p2) }
   0x6   : > { %117 = sbr.rel (%p114_p2) target bundleno = 260 (0x104), region = 28  ;;  %641 = vmatprep.subr.bf16.mxu0 (!%p114_p2), %v707_v0  ;;  %647 = vmatprep.subr.bf16.mxu1 (!%p114_p2), %v707_v0  ;;  %p136_p3 = scmp.lt.s32.totalorder (!%p114_p2), %s597_s11, 15  ;;  %vm150_vm2 = vcmask (!%p114_p2), 31744  }
   0x7   : > { %643 = vmatprep.mubr.msk.bf16.mxu0 (!%p114_p2), %vm708_vm0, %v707_v0  ;;  %649 = vmatprep.mubr.msk.bf16.mxu1 (!%p114_p2), %vm708_vm0, %v707_v0 }
   0xd   : > { %s796_s11 = smov (!%p136_p3, %s597_s11), 15 }
   0xe   : > { %s598_s12 = sshll.u32 %s796_s11, 1  ;;  %s600_s18 = sshll.u32 %s796_s11, 2 }
   0xf   : > { %s740_s15 = scalar_lea.vmem %s793_s1, %s598_s12  ;;  %s779_s21 = scalar_lea.vmem %s794_s2, %s600_s18 }
  0x10   : > { %v149_v1 = vld [vmem:[%s740_s15] sm:$0x3]  ;;  %v602_v2 = vld [vmem:[%s740_s15 + $0x2] sm:$0x3]  ;;  %v605_v3 = vld [vmem:[%s740_s15 + $0x4] sm:$0x3] }
  0x11   : > { %v156_v4 = vsel %vm154_vm1, %v149_v1, 0  ;;  %v203_v5 = vsel %vm154_vm1, %v602_v2, 0  ;;  %v608_v6 = vld [vmem:[%s740_s15 + $0x6] sm:$0x3]  ;;  %v251_v8 = vsel %vm154_vm1, %v605_v3, 0 }
  0x12   : > { %642 = vmatpush3.bf16.msra.mxu0 %v156_v4  ;;  %648 = vmatpush3.bf16.msra.mxu1 %v203_v5  ;;  %v299_v9 = vsel %vm154_vm1, %v608_v6, 0  ;;  %v611_v10 = vld [vmem:[%s740_s15 + $0x8] sm:$0x3]  ;;  %v614_v11 = vld [vmem:[%s740_s15 + $0xa] sm:$0x3] }
  0x13   : > { %653 = vmatprep.subr.bf16.mxu0 %v707_v0  ;;  %659 = vmatprep.subr.bf16.mxu1 %v707_v0  ;;  %v347_v12 = vsel %vm154_vm1, %v611_v10, 0  ;;  %v395_v13 = vsel %vm154_vm1, %v614_v11, 0  ;;  %v617_v14 = vld [vmem:[%s740_s15 + $0xc] sm:$0x3]  ;;  %v620_v15 = vld [vmem:[%s740_s15 + $0xe] sm:$0x3] }
  0x14   : > { %v443_v16 = vsel %vm154_vm1, %v617_v14, 0  ;;  %v491_v17 = vsel %vm154_vm1, %v620_v15, 0 }
  0x15   : > { %644 = vmatmul.mubr.msk.bf16.vlgmr.msra.gmra.mrb[0].mxu0 %vm150_vm2, %v148_v7  ;;  %650 = vmatmul.mubr.msk.bf16.vlgmr.msra.gmra.mrb[0].mxu1 %vm150_vm2, %v148_v7 }
  0x16   : > { %654 = vmatpush3.bf16.msra.mxu0 %v251_v8  ;;  %660 = vmatpush3.bf16.msra.mxu1 %v299_v9 }
  0x17   : > { %655 = vmatprep.mubr.msk.bf16.mxu0 %vm708_vm0, %v707_v0  ;;  %661 = vmatprep.mubr.msk.bf16.mxu1 %vm708_vm0, %v707_v0 }
  0x18   : > { %665 = vmatprep.subr.bf16.mxu0 %v707_v0  ;;  %671 = vmatprep.subr.bf16.mxu1 %v707_v0 }
  0x1d   : > { %656 = vmatmul.mubr.msk.bf16.vlgmr.msra.gmra.mrb[4].mxu0 %vm150_vm2, %v148_v7  ;;  %662 = vmatmul.mubr.msk.bf16.vlgmr.msra.gmra.mrb[4].mxu1 %vm150_vm2, %v148_v7 }
  0x1e   : > { %666 = vmatpush3.bf16.msra.mxu0 %v347_v12  ;;  %672 = vmatpush3.bf16.msra.mxu1 %v395_v13 }
  0x1f   : > { %667 = vmatprep.mubr.msk.bf16.mxu0 %vm708_vm0, %v707_v0  ;;  %673 = vmatprep.mubr.msk.bf16.mxu1 %vm708_vm0, %v707_v0 }
  0x20   : > { %677 = vmatprep.subr.bf16.mxu0 %v707_v0  ;;  %683 = vmatprep.subr.bf16.mxu1 %v707_v0 }
  0x25   : > { %668 = vmatmul.mubr.msk.bf16.vlgmr.msra.gmra.mrb[8].mxu0 %vm150_vm2, %v148_v7  ;;  %674 = vmatmul.mubr.msk.bf16.vlgmr.msra.gmra.mrb[8].mxu1 %vm150_vm2, %v148_v7 }
  0x26   : > { %678 = vmatpush3.bf16.msra.mxu0 %v443_v16  ;;  %684 = vmatpush3.bf16.msra.mxu1 %v491_v17 }
  0x27   : > { %679 = vmatprep.mubr.msk.bf16.mxu0 %vm708_vm0, %v707_v0  ;;  %685 = vmatprep.mubr.msk.bf16.mxu1 %vm708_vm0, %v707_v0 }
  0x2d   : > { %680 = vmatmul.mubr.msk.bf16.vlgmr.msra.gmra.mrb[12].mxu0 %vm150_vm2, %v148_v7  ;;  %686 = vmatmul.mubr.msk.bf16.vlgmr.msra.gmra.mrb[12].mxu1 %vm150_vm2, %v148_v7 }
  0xe8   : > { %v192_v18 = vpop.f32.mrb[0].mxu0  ;;  %v239_v19 = vpop.f32.mrb[0].mxu1 }
  0xe9   : > { %v198_v20 = vpack.c.bf16 %v192_v18, %v192_v18  ;;  %v245_v21 = vpack.c.bf16 %v239_v19, %v239_v19  ;;  %v645_v22 = vpop.f32.mrb[1].mxu0  ;;  %v651_v23 = vpop.f32.mrb[1].mxu1 }
  0xea   : > { %v195_v24 = vpop.f32.mrb[2].mxu0  ;;  %v242_v25 = vpop.f32.mrb[2].mxu1 }
  0xeb   : > { %199 = vst [vmem:[%s779_s21] sm:$0xf] %v198_v20  ;;  %604 = vst [vmem:[%s779_s21 + $0x4] sm:$0xf] %v245_v21  ;;  %v646_v26 = vpop.f32.mrb[3].mxu0  ;;  %v652_v27 = vpop.f32.mrb[3].mxu1 }
  0xf0   : > { %v287_v28 = vpop.f32.mrb[4].mxu0  ;;  %v335_v29 = vpop.f32.mrb[4].mxu1 }
  0xf1   : > { %v293_v30 = vpack.c.bf16 %v287_v28, %v287_v28  ;;  %v341_v31 = vpack.c.bf16 %v335_v29, %v335_v29  ;;  %v657_v32 = vpop.f32.mrb[5].mxu0  ;;  %v663_v33 = vpop.f32.mrb[5].mxu1 }
  0xf2   : > { %v290_v34 = vpop.f32.mrb[6].mxu0  ;;  %v338_v35 = vpop.f32.mrb[6].mxu1 }
  0xf3   : > { %607 = vst [vmem:[%s779_s21 + $0x8] sm:$0xf] %v293_v30  ;;  %610 = vst [vmem:[%s779_s21 + $0xc] sm:$0xf] %v341_v31  ;;  %v658_v36 = vpop.f32.mrb[7].mxu0  ;;  %v664_v37 = vpop.f32.mrb[7].mxu1 }
  0xf8   : > { %v383_v38 = vpop.f32.mrb[8].mxu0  ;;  %v431_v39 = vpop.f32.mrb[8].mxu1 }
  0xf9   : > { %v389_v40 = vpack.c.bf16 %v383_v38, %v383_v38  ;;  %v437_v41 = vpack.c.bf16 %v431_v39, %v431_v39  ;;  %v669_v42 = vpop.f32.mrb[9].mxu0  ;;  %v675_v43 = vpop.f32.mrb[9].mxu1 }
  0xfa   : > { %v386_v44 = vpop.f32.mrb[10].mxu0  ;;  %v434_v45 = vpop.f32.mrb[10].mxu1 }
  0xfb   : > { %613 = vst [vmem:[%s779_s21 + $0x10] sm:$0xf] %v389_v40  ;;  %616 = vst [vmem:[%s779_s21 + $0x14] sm:$0xf] %v437_v41  ;;  %v670_v46 = vpop.f32.mrb[11].mxu0  ;;  %v676_v47 = vpop.f32.mrb[11].mxu1 }
 0x100   : > { %v479_v48 = vpop.f32.mrb[12].mxu0  ;;  %v527_v49 = vpop.f32.mrb[12].mxu1 }
 0x101   : > { %v485_v50 = vpack.c.bf16 %v479_v48, %v479_v48  ;;  %v533_v51 = vpack.c.bf16 %v527_v49, %v527_v49  ;;  %v681_v52 = vpop.f32.mrb[13].mxu0  ;;  %v687_v53 = vpop.f32.mrb[13].mxu1 }
 0x102   : > { %v482_v54 = vpop.f32.mrb[14].mxu0  ;;  %v530_v55 = vpop.f32.mrb[14].mxu1 }
 0x103   : > { %619 = vst [vmem:[%s779_s21 + $0x18] sm:$0xf] %v485_v50  ;;  %622 = vst [vmem:[%s779_s21 + $0x1c] sm:$0xf] %v533_v51  ;;  %v682_v56 = vpop.f32.mrb[15].mxu0  ;;  %v688_v57 = vpop.f32.mrb[15].mxu1 }
 0x104 PF: > { %s12_s9 = sadd.s32 1, %s705_s9  }
 0x105   : > { %p9_p4 = scmp.ge.s32.totalorder %s12_s9, 4  }
 0x107   :  { %11 = sbr.rel (!%p9_p4) target bundleno = 1 (0x1), region = 72 }

// kernel: transformer_net_forward.26
= control target key start
LH: loop header
LB: loop body
LE: loop exit
PB: predicated region body
PF: predicated region fallthrough
CT: control target
= control target key end

     0   :  { %s674_s9 = smov 0   ;;  %s757_s0 = inlined_call_operand.vmem [shape: f32[32,8], index: 0, kind: input, shape index: {}]   ;;  %s758_s1 = inlined_call_operand.vmem [shape: f32[2,8,1024], index: 1, kind: input, shape index: {}]   ;;  %s759_s2 = inlined_call_operand.vmem [shape: f32[2,32,1024], index: 2, kind: output, shape index: {}]  }
   0x1 LB: > { %s612_s10 = sadd.s32 4294967295, %s656_s9   ;;  %p616_p0 = scmp.ge.s32.totalorder %s656_s9, 1  ;;  %s656_s9 = sphi %s674_s9, %s12_s9  }
   0x2   : > { %p112_p1 = scmp.lt.s32.totalorder %s656_s9, 3 }
   0x4   : > { %p113_p2 = pnand %p616_p0, %p112_p1 }
   0x5   : > { %p134_p3 = scmp.lt.s32.totalorder (!%p113_p2), %s612_s10, 1  ;;  %v658_v0 = vmov (!%p113_p2), 0.0   ;;  %v144_v1 = vld [vmem:[%s757_s0] sm:$0xff] (!%p113_p2)  ;;  %vm156_vm0 = vcmask (!%p113_p2), 64512   ;;  %v145_v10 = vld [vmem:[%s757_s0 + $0x8] sm:$0xff] (!%p113_p2)  ;;  %v146_v11 = vld [vmem:[%s757_s0 + $0x10] sm:$0xff] (!%p113_p2) }
   0x6   : > { %116 = sbr.rel (%p113_p2) target bundleno = 261 (0x105), region = 28  ;;  %233 = vmatprep.mubr.f32.mxu0 (!%p113_p2), %v658_v0  ;;  %322 = vmatprep.mubr.f32.mxu1 (!%p113_p2), %v658_v0  ;;  %v147_v12 = vld [vmem:[%s757_s0 + $0x18] sm:$0xff] (!%p113_p2) }
   0xd   : > { %s761_s10 = smov (!%p134_p3, %s612_s10), 1 }
   0xe   : > { %s639_s11 = sshll.u32 %s761_s10, 6  ;;  %s640_s23 = sshll.u32 %s761_s10, 8 }
   0xf   : > { %s138_s14 = scalar_lea.vmem %s758_s1, %s639_s11  ;;  %s720_s26 = scalar_lea.vmem %s759_s2, %s640_s23 }
  0x10   : > { %v149_v2 = vld [vmem:[%s138_s14 + $0x8] sm:$0xff]  ;;  %v151_v3 = vld [vmem:[%s138_s14 + $0x18] sm:$0xff]  ;;  %v148_v4 = vld [vmem:[%s138_s14] sm:$0xff] }
  0x11   : > { %169 = vmatprep.subr.mxu0 %v149_v2  ;;  %258 = vmatprep.subr.mxu1 %v151_v3  ;;  %v150_v5 = vld [vmem:[%s138_s14 + $0x10] sm:$0xff]  ;;  %v153_v6 = vld [vmem:[%s138_s14 + $0x28] sm:$0xff]  ;;  %v155_v7 = vld [vmem:[%s138_s14 + $0x38] sm:$0xff] }
  0x12   : > { %170 = vmatpush1.msra.mxu0 %v148_v4  ;;  %259 = vmatpush1.msra.mxu1 %v150_v5  ;;  %v152_v8 = vld [vmem:[%s138_s14 + $0x20] sm:$0xff]  ;;  %v154_v9 = vld [vmem:[%s138_s14 + $0x30] sm:$0xff] }
  0x13   : > { %621 = vmatmul.mubr.msk.f32.vlgmr.msra.gmra.mrb[0].mxu0 %vm156_vm0, %v144_v1  ;;  %625 = vmatmul.mubr.msk.f32.vlgmr.msra.gmra.mrb[0].mxu1 %vm156_vm0, %v144_v1 }
  0x14   : > { %347 = vmatprep.subr.mxu0 %v153_v6  ;;  %436 = vmatprep.subr.mxu1 %v155_v7 }
  0x15   : > { %348 = vmatpush1.msra.mxu0 %v152_v8  ;;  %437 = vmatpush1.msra.mxu1 %v154_v9 }
  0x16   : > { %239 = vmatprep.mubr.f32.mxu0 %v658_v0  ;;  %328 = vmatprep.mubr.f32.mxu1 %v658_v0 }
  0x17   : > { %622 = vmatmul.mubr.msk.f32.gmra.mrb[2].mxu0 %vm156_vm0, %v145_v10  ;;  %626 = vmatmul.mubr.msk.f32.gmra.mrb[2].mxu1 %vm156_vm0, %v145_v10 }
  0x18   : > { %245 = vmatprep.mubr.f32.mxu0 %v658_v0  ;;  %334 = vmatprep.mubr.f32.mxu1 %v658_v0 }
  0x1b   : > { %623 = vmatmul.mubr.msk.f32.gmra.mrb[4].mxu0 %vm156_vm0, %v146_v11  ;;  %627 = vmatmul.mubr.msk.f32.gmra.mrb[4].mxu1 %vm156_vm0, %v146_v11 }
  0x1c   : > { %251 = vmatprep.mubr.f32.mxu0 %v658_v0  ;;  %340 = vmatprep.mubr.f32.mxu1 %v658_v0 }
  0x1f   : > { %624 = vmatmul.mubr.msk.f32.gmra.mrb[6].mxu0 %vm156_vm0, %v147_v12  ;;  %628 = vmatmul.mubr.msk.f32.gmra.mrb[6].mxu1 %vm156_vm0, %v147_v12 }
  0x20   : > { %411 = vmatprep.mubr.f32.mxu0 %v658_v0  ;;  %500 = vmatprep.mubr.f32.mxu1 %v658_v0 }
  0x23   : > { %629 = vmatmul.mubr.msk.f32.vlgmr.msra.gmra.mrb[8].mxu0 %vm156_vm0, %v144_v1  ;;  %633 = vmatmul.mubr.msk.f32.vlgmr.msra.gmra.mrb[8].mxu1 %vm156_vm0, %v144_v1 }
  0x24   : > { %417 = vmatprep.mubr.f32.mxu0 %v658_v0  ;;  %506 = vmatprep.mubr.f32.mxu1 %v658_v0 }
  0x27   : > { %630 = vmatmul.mubr.msk.f32.gmra.mrb[10].mxu0 %vm156_vm0, %v145_v10  ;;  %634 = vmatmul.mubr.msk.f32.gmra.mrb[10].mxu1 %vm156_vm0, %v145_v10 }
  0x28   : > { %423 = vmatprep.mubr.f32.mxu0 %v658_v0  ;;  %512 = vmatprep.mubr.f32.mxu1 %v658_v0 }
  0x2b   : > { %631 = vmatmul.mubr.msk.f32.gmra.mrb[12].mxu0 %vm156_vm0, %v146_v11  ;;  %635 = vmatmul.mubr.msk.f32.gmra.mrb[12].mxu1 %vm156_vm0, %v146_v11 }
  0x2c   : > { %429 = vmatprep.mubr.f32.mxu0 %v658_v0  ;;  %518 = vmatprep.mubr.f32.mxu1 %v658_v0 }
  0x2f   : > { %632 = vmatmul.mubr.msk.f32.gmra.mrb[14].mxu0 %vm156_vm0, %v147_v12  ;;  %636 = vmatmul.mubr.msk.f32.gmra.mrb[14].mxu1 %vm156_vm0, %v147_v12 }
  0xe6   : > { %v235_v13 = vpop.f32.mrb[0].mxu0  ;;  %v324_v14 = vpop.f32.mrb[0].mxu1 }
  0xe7   : > { %525 = vst [vmem:[%s720_s26] sm:$0xff] %v235_v13  ;;  %527 = vst [vmem:[%s720_s26 + $0x10] sm:$0xff] %v324_v14  ;;  %v237_v15 = vpop.f32.mrb[1].mxu0  ;;  %v326_v16 = vpop.f32.mrb[1].mxu1 }
  0xe8   : > { %526 = vst [vmem:[%s720_s26 + $0x8] sm:$0xff] %v237_v15  ;;  %528 = vst [vmem:[%s720_s26 + $0x18] sm:$0xff] %v326_v16 }
  0xea   : > { %v241_v17 = vpop.f32.mrb[2].mxu0  ;;  %v330_v18 = vpop.f32.mrb[2].mxu1 }
  0xeb   : > { %533 = vst [vmem:[%s720_s26 + $0x40] sm:$0xff] %v241_v17  ;;  %535 = vst [vmem:[%s720_s26 + $0x50] sm:$0xff] %v330_v18  ;;  %v243_v19 = vpop.f32.mrb[3].mxu0  ;;  %v332_v20 = vpop.f32.mrb[3].mxu1 }
  0xec   : > { %534 = vst [vmem:[%s720_s26 + $0x48] sm:$0xff] %v243_v19  ;;  %536 = vst [vmem:[%s720_s26 + $0x58] sm:$0xff] %v332_v20 }
  0xee   : > { %v247_v21 = vpop.f32.mrb[4].mxu0  ;;  %v336_v22 = vpop.f32.mrb[4].mxu1 }
  0xef   : > { %541 = vst [vmem:[%s720_s26 + $0x80] sm:$0xff] %v247_v21  ;;  %543 = vst [vmem:[%s720_s26 + $0x90] sm:$0xff] %v336_v22  ;;  %v249_v23 = vpop.f32.mrb[5].mxu0  ;;  %v338_v24 = vpop.f32.mrb[5].mxu1 }
  0xf0   : > { %542 = vst [vmem:[%s720_s26 + $0x88] sm:$0xff] %v249_v23  ;;  %544 = vst [vmem:[%s720_s26 + $0x98] sm:$0xff] %v338_v24 }
  0xf2   : > { %v253_v25 = vpop.f32.mrb[6].mxu0  ;;  %v342_v26 = vpop.f32.mrb[6].mxu1 }
  0xf3   : > { %549 = vst [vmem:[%s720_s26 + $0xc0] sm:$0xff] %v253_v25  ;;  %551 = vst [vmem:[%s720_s26 + $0xd0] sm:$0xff] %v342_v26  ;;  %v255_v27 = vpop.f32.mrb[7].mxu0  ;;  %v344_v28 = vpop.f32.mrb[7].mxu1 }
  0xf4   : > { %550 = vst [vmem:[%s720_s26 + $0xc8] sm:$0xff] %v255_v27  ;;  %552 = vst [vmem:[%s720_s26 + $0xd8] sm:$0xff] %v344_v28 }
  0xf6   : > { %v413_v29 = vpop.f32.mrb[8].mxu0  ;;  %v502_v30 = vpop.f32.mrb[8].mxu1 }
  0xf7   : > { %529 = vst [vmem:[%s720_s26 + $0x20] sm:$0xff] %v413_v29  ;;  %531 = vst [vmem:[%s720_s26 + $0x30] sm:$0xff] %v502_v30  ;;  %v415_v31 = vpop.f32.mrb[9].mxu0  ;;  %v504_v32 = vpop.f32.mrb[9].mxu1 }
  0xf8   : > { %530 = vst [vmem:[%s720_s26 + $0x28] sm:$0xff] %v415_v31  ;;  %532 = vst [vmem:[%s720_s26 + $0x38] sm:$0xff] %v504_v32 }
  0xfa   : > { %v419_v33 = vpop.f32.mrb[10].mxu0  ;;  %v508_v34 = vpop.f32.mrb[10].mxu1 }
  0xfb   : > { %537 = vst [vmem:[%s720_s26 + $0x60] sm:$0xff] %v419_v33  ;;  %539 = vst [vmem:[%s720_s26 + $0x70] sm:$0xff] %v508_v34  ;;  %v421_v35 = vpop.f32.mrb[11].mxu0  ;;  %v510_v36 = vpop.f32.mrb[11].mxu1 }
  0xfc   : > { %538 = vst [vmem:[%s720_s26 + $0x68] sm:$0xff] %v421_v35  ;;  %540 = vst [vmem:[%s720_s26 + $0x78] sm:$0xff] %v510_v36 }
  0xfe   : > { %v425_v37 = vpop.f32.mrb[12].mxu0  ;;  %v514_v38 = vpop.f32.mrb[12].mxu1 }
  0xff   : > { %545 = vst [vmem:[%s720_s26 + $0xa0] sm:$0xff] %v425_v37  ;;  %547 = vst [vmem:[%s720_s26 + $0xb0] sm:$0xff] %v514_v38  ;;  %v427_v39 = vpop.f32.mrb[13].mxu0  ;;  %v516_v40 = vpop.f32.mrb[13].mxu1 }
 0x100   : > { %546 = vst [vmem:[%s720_s26 + $0xa8] sm:$0xff] %v427_v39  ;;  %548 = vst [vmem:[%s720_s26 + $0xb8] sm:$0xff] %v516_v40 }
 0x102   : > { %v431_v41 = vpop.f32.mrb[14].mxu0  ;;  %v520_v42 = vpop.f32.mrb[14].mxu1 }
 0x103   : > { %553 = vst [vmem:[%s720_s26 + $0xe0] sm:$0xff] %v431_v41  ;;  %555 = vst [vmem:[%s720_s26 + $0xf0] sm:$0xff] %v520_v42  ;;  %v433_v43 = vpop.f32.mrb[15].mxu0  ;;  %v522_v44 = vpop.f32.mrb[15].mxu1 }
 0x104   : > { %554 = vst [vmem:[%s720_s26 + $0xe8] sm:$0xff] %v433_v43  ;;  %556 = vst [vmem:[%s720_s26 + $0xf8] sm:$0xff] %v522_v44 }
 0x105 PF: > { %s12_s9 = sadd.s32 1, %s656_s9  }
 0x106   : > { %p9_p4 = scmp.ge.s32.totalorder %s12_s9, 4  }
 0x108   :  { %11 = sbr.rel (!%p9_p4) target bundleno = 1 (0x1), region = 58 }

// kernel: transformer_net_forward.25
= control target key start
LH: loop header
LB: loop body
LE: loop exit
PB: predicated region body
PF: predicated region fallthrough
CT: control target
= control target key end

     0   :  { %s1685_s13 = smov 0   ;;  %s2074_s0 = inlined_call_operand.vmem [shape: bf16[128,128], index: 0, kind: input, shape index: {}]   ;;  %s2075_s1 = inlined_call_operand.vmem [shape: bf16[128,128], index: 1, kind: input, shape index: {}]   ;;  %s2076_s2 = inlined_call_operand.vmem [shape: bf16[128,128], index: 2, kind: input, shape index: {}]   ;;  %s2077_s3 = inlined_call_operand.vmem [shape: bf16[128,128], index: 3, kind: input, shape index: {}]   ;;  %s2078_s4 = inlined_call_operand.vmem [shape: bf16[128,128], index: 4, kind: input, shape index: {}]   ;;  %s2079_s5 = inlined_call_operand.vmem [shape: f32[1,128], index: 5, kind: input, shape index: {}]   ;;  %s2080_s6 = inlined_call_operand.vmem [shape: bf16[128,192], index: 6, kind: input, shape index: {}]   ;;  %s2081_s7 = inlined_call_operand.vmem [shape: f32[1,192], index: 7, kind: input, shape index: {}]   ;;  %s2082_s8 = inlined_call_operand.vmem [shape: bf16[192,128], index: 8, kind: input, shape index: {}]   ;;  %s2083_s9 = inlined_call_operand.vmem [shape: f32[1,128], index: 9, kind: input, shape index: {}]   ;;  %s2084_s10 = inlined_call_operand.vmem [shape: f32[128,128], index: 10, kind: output, shape index: {}]  }
   0x1 LB: > { %s1360_s14 = sadd.s32 4294967295, %s1627_s13   ;;  %p1364_p0 = scmp.ge.s32.totalorder %s1627_s13, 1  ;;  %s1627_s13 = sphi %s1685_s13, %s20_s13  }
   0x2   : > { %p346_p1 = scmp.lt.s32.totalorder %s1627_s13, 3 }
   0x4   : > { %p347_p2 = pnand %p1364_p0, %p346_p1 }
   0x5   : > { %v1525_v0 = vld [vmem:[%s2078_s4] sm:$0xff] (!%p347_p2)   ;;  %s1365_s17 = sshll.u32 (!%p347_p2), %s1360_s14, 3  ;;  %v1526_v1 = vld [vmem:[%s2078_s4 + $0x8] sm:$0xff] (!%p347_p2)   ;;  %v1527_v2 = vld [vmem:[%s2078_s4 + $0x10] sm:$0xff] (!%p347_p2)   ;;  %v1629_v28 = vmov (!%p347_p2), 0   ;;  %vm1182_vm0 = vcmask (!%p347_p2), 523264  }
   0x6   : > { %350 = sbr.rel (%p347_p2) target bundleno = 785 (0x311), region = 60  ;;  %p400_p3 = scmp.lt.s32.totalorder (!%p347_p2), %s1365_s17, 15  ;;  %1492 = vmatprep.subr.bf16.mxu1 (!%p347_p2), %v1525_v0  ;;  %v1528_v3 = vld [vmem:[%s2078_s4 + $0x18] sm:$0xff] (!%p347_p2)   ;;  %v1529_v5 = vld [vmem:[%s2078_s4 + $0x20] sm:$0xff] (!%p347_p2)   ;;  %v1530_v6 = vld [vmem:[%s2078_s4 + $0x28] sm:$0xff] (!%p347_p2)   ;;  %1195 = vmatprep.subr.bf16.mxu0 (!%p347_p2), %v1629_v28 }
   0x7   : > { %1493 = vmatpush3.bf16.msra.mxu1 (!%p347_p2), %v1525_v0  ;;  %v1531_v7 = vld [vmem:[%s2078_s4 + $0x30] sm:$0xff] (!%p347_p2)   ;;  %v1532_v8 = vld [vmem:[%s2078_s4 + $0x38] sm:$0xff] (!%p347_p2)   ;;  %v1539_v12 = vld [vmem:[%s2080_s6 + $0x4] ss:$8 sps:$4 sm:$0xff] (!%p347_p2)  }
   0x8   : > { %1494 = vmatprep.subr.bf16.mxu1 (!%p347_p2), %v1526_v1  ;;  %v1537_v13 = vld [vmem:[%s2080_s6] ss:$8 sps:$4 sm:$0xff] (!%p347_p2)   ;;  %v1542_v14 = vld [vmem:[%s2080_s6 + $0x14] ss:$8 sps:$4 sm:$0xff] (!%p347_p2)   ;;  %v1540_v15 = vld [vmem:[%s2080_s6 + $0x10] ss:$8 sps:$4 sm:$0xff] (!%p347_p2)  }
   0x9   : > { %v1545_v16 = vld [vmem:[%s2080_s6 + $0x24] ss:$8 sps:$4 sm:$0xff] (!%p347_p2)   ;;  %v1543_v17 = vld [vmem:[%s2080_s6 + $0x20] ss:$8 sps:$4 sm:$0xff] (!%p347_p2)   ;;  %v1548_v18 = vld [vmem:[%s2080_s6 + $0x34] ss:$8 sps:$4 sm:$0xff] (!%p347_p2)  }
   0xa   : > { %v1546_v19 = vld [vmem:[%s2080_s6 + $0x30] ss:$8 sps:$4 sm:$0xff] (!%p347_p2)   ;;  %v1551_v20 = vld [vmem:[%s2080_s6 + $0x44] ss:$8 sps:$4 sm:$0xff] (!%p347_p2)   ;;  %v1549_v21 = vld [vmem:[%s2080_s6 + $0x40] ss:$8 sps:$4 sm:$0xff] (!%p347_p2)  }
   0xb   : > { %1495 = vmatpush3.bf16.msra.mxu1 (!%p347_p2), %v1526_v1  ;;  %v1554_v22 = vld [vmem:[%s2080_s6 + $0x54] ss:$8 sps:$4 sm:$0xff] (!%p347_p2)   ;;  %v1552_v23 = vld [vmem:[%s2080_s6 + $0x50] ss:$8 sps:$4 sm:$0xff] (!%p347_p2)   ;;  %v1557_v24 = vld [vmem:[%s2080_s6 + $0x64] ss:$8 sps:$4 sm:$0xff] (!%p347_p2)  }
   0xc   : > { %1496 = vmatprep.subr.bf16.mxu1 (!%p347_p2), %v1527_v2  ;;  %v1555_v25 = vld [vmem:[%s2080_s6 + $0x60] ss:$8 sps:$4 sm:$0xff] (!%p347_p2)   ;;  %v1560_v26 = vld [vmem:[%s2080_s6 + $0x74] ss:$8 sps:$4 sm:$0xff] (!%p347_p2)   ;;  %v1558_v27 = vld [vmem:[%s2080_s6 + $0x70] ss:$8 sps:$4 sm:$0xff] (!%p347_p2)  }
   0xd   : > { %s2086_s17 = smov (!%p400_p3, %s1365_s17), 15  ;;  %v1561_v29 = vld [vmem:[%s2082_s8] sm:$0xff]   ;;  %v1562_v30 = vld [vmem:[%s2082_s8 + $0x8] sm:$0xff]   ;;  %v1563_v31 = vld [vmem:[%s2082_s8 + $0x10] sm:$0xff]  }
   0xe   : > { %s1705_s22 = sshll.u32 %s2086_s17, 2  ;;  %1196 = vmatpush1.bf16.msra.mxu0 %v1561_v29  ;;  %v1375_v32 = vld [vmem:[%s2079_s5] ss:$0 sm:$0xff]  ;;  %s1374_s16 = sshll.u32 %s2086_s17, 3 }
   0xf   : > { %s403_s25 = scalar_lea.vmem %s2074_s0, %s1705_s22  ;;  %1497 = vmatpush3.bf16.msra.mxu1 %v1527_v2  ;;  %1197 = vmatprep.subr.bf16.mxu0 %v1629_v28  ;;  %s1848_s30 = scalar_lea.vmem %s2076_s2, %s1705_s22 }
  0x10   : > { %v1533_v4 = vld [vmem:[%s403_s25] sm:$0xff]   ;;  %1498 = vmatprep.subr.bf16.mxu1 %v1528_v3  ;;  %v1534_v9 = vld [vmem:[%s403_s25 + $0x8] sm:$0xff]   ;;  %v1535_v10 = vld [vmem:[%s403_s25 + $0x10] sm:$0xff]   ;;  %s1856_s14 = scalar_lea.vmem %s2077_s3, %s1705_s22  ;;  %s2061_s23 = scalar_lea.vmem %s2084_s10, %s1374_s16 }
  0x11   : > { %1508 = vmatprep.mubr.bf16.mxu1 %v1533_v4  ;;  %v1536_v11 = vld [vmem:[%s403_s25 + $0x18] sm:$0xff]   ;;  %s1841_s25 = scalar_lea.vmem %s2075_s1, %s1705_s22  ;;  %v1474_v29 = vld [vmem:[%s1848_s30 + $0x8] sm:$0xff]  }
  0x12   : > { %1198 = vmatpush1.bf16.msra.mxu0 %v1562_v30 }
  0x13   : > { %1499 = vmatpush3.bf16.msra.mxu1 %v1528_v3  ;;  %1199 = vmatprep.subr.bf16.mxu0 %v1629_v28 }
  0x14   : > { %1500 = vmatprep.subr.bf16.mxu1 %v1529_v5 }
  0x16   : > { %1200 = vmatpush1.bf16.msra.mxu0 %v1563_v31 }
  0x17   : > { %1501 = vmatpush3.bf16.msra.mxu1 %v1529_v5  ;;  %1201 = vmatprep.subr.bf16.mxu0 %v1629_v28 }
  0x18   : > { %1502 = vmatprep.subr.bf16.mxu1 %v1530_v6 }
  0x1b   : > { %1503 = vmatpush3.bf16.msra.mxu1 %v1530_v6 }
  0x1c   : > { %1504 = vmatprep.subr.bf16.mxu1 %v1531_v7 }
  0x1f   : > { %1505 = vmatpush3.bf16.msra.mxu1 %v1531_v7 }
  0x20   : > { %1506 = vmatprep.subr.bf16.mxu1 %v1532_v8 }
  0x23   : > { %1507 = vmatpush3.bf16.msra.mxu1 %v1532_v8 }
  0x24   : > { %854 = vmatprep.subr.bf16.mxu1 %v1539_v12 }
  0x26   : > { %1509 = vmatmul.mubr.bf16.vlgmr.msra.gmra.mrb[0].mxu1 %v1534_v9 }
  0x27   : > { %1512 = vmatprep.mubr.bf16.mxu1 %v1535_v10  ;;  %855 = vmatpush1.bf16.msra.mxu1 %v1537_v13 }
  0x28   : > { %856 = vmatprep.subr.bf16.mxu1 %v1542_v14 }
  0x2b   : > { %857 = vmatpush1.bf16.msra.mxu1 %v1540_v15 }
  0x2c   : > { %858 = vmatprep.subr.bf16.mxu1 %v1545_v16 }
  0x2e   : > { %1513 = vmatmul.mubr.bf16.gmra.mrb[4].mxu1 %v1536_v11 }
  0x2f   : > { %859 = vmatpush1.bf16.msra.mxu1 %v1543_v17  ;;  %886 = vmatprep.mubr.bf16.mxu1 %v1629_v28 }
  0x30   : > { %860 = vmatprep.subr.bf16.mxu1 %v1548_v18 }
  0x33   : > { %861 = vmatpush1.bf16.msra.mxu1 %v1546_v19 }
  0x34   : > { %862 = vmatprep.subr.bf16.mxu1 %v1551_v20 }
  0x37   : > { %863 = vmatpush1.bf16.msra.mxu1 %v1549_v21 }
  0x38   : > { %864 = vmatprep.subr.bf16.mxu1 %v1554_v22 }
  0x3b   : > { %865 = vmatpush1.bf16.msra.mxu1 %v1552_v23 }
  0x3c   : > { %866 = vmatprep.subr.bf16.mxu1 %v1557_v24  ;;  %v1424_v24 = vld [vmem:[%s1841_s25] sm:$0xff]  }
  0x3f   : > { %867 = vmatpush1.bf16.msra.mxu1 %v1555_v25 }
  0x40   : > { %868 = vmatprep.subr.bf16.mxu1 %v1560_v26  ;;  %v1471_v26 = vld [vmem:[%s1841_s25 + $0x8] sm:$0xff]  }
  0x43   : > { %869 = vmatpush1.bf16.msra.mxu1 %v1558_v27 }
  0xf9   : > { %v1510_v33 = vpop.f32.mrb[0].mxu1 }
  0xfa   : > { %v1791_v34 = vadd.f32 %v1510_v33, %v1375_v32  ;;  %v567_v35 = vpop.f32.mrb[1].mxu1 }
  0xfb   : > { %v1793_v36 = vadd.f32 %v1375_v32, %v567_v35  ;;  %v1511_v37 = vpop.f32.mrb[2].mxu1 }
  0xfc   : > { %v600_v38 = vmul.f32 %v1791_v34, %v1791_v34  ;;  %v1797_v39 = vadd.f32 %v1511_v37, %v1375_v32  ;;  %v570_v40 = vpop.f32.mrb[3].mxu1  ;;  %v1425_v37 = vunpack.c.l.bf16 %v1424_v24 }
  0xfd   : > { %v598_v41 = vmul.f32 %v1793_v36, %v1793_v36  ;;  %v1801_v42 = vadd.f32 %v1375_v32, %v570_v40  ;;  %v1477_v40 = vld [vmem:[%s1856_s14 + $0x8] sm:$0xff]  }
  0xfe   : > { %v608_v43 = vmul.f32 %v600_v38, %v1791_v34  ;;  %v601_v44 = vmul.f32 %v1797_v39, %v1797_v39  ;;  %v1429_v38 = vunpack.c.l.bf16 %v1471_v26 }
  0xff   : > { %v606_v45 = vmul.f32 %v598_v41, %v1793_v36  ;;  %v599_v46 = vmul.f32 %v1801_v42, %v1801_v42 }
 0x100   : > { %v616_v47 = vmul.f32 0.044715, %v608_v43  ;;  %v609_v48 = vmul.f32 %v601_v44, %v1797_v39 }
 0x101   : > { %v614_v49 = vmul.f32 0.044715, %v606_v45  ;;  %v607_v50 = vmul.f32 %v599_v46, %v1801_v42  ;;  %v1514_v51 = vpop.f32.mrb[4].mxu1  ;;  %v1456_v45 = vld [vmem:[%s1856_s14] sm:$0xff]   ;;  %v1430_v46 = vunpack.c.h.bf16 %v1471_v26 }
 0x102   : > { %v624_v52 = vadd.f32 %v616_v47, %v1791_v34  ;;  %v617_v53 = vmul.f32 0.044715, %v609_v48  ;;  %v1812_v54 = vadd.f32 %v1514_v51, %v1375_v32  ;;  %v583_v55 = vpop.f32.mrb[5].mxu1  ;;  %v1445_v47 = vunpack.c.l.bf16 %v1474_v29 }
 0x103   : > { %v622_v56 = vadd.f32 %v614_v49, %v1793_v36  ;;  %v615_v57 = vmul.f32 0.044715, %v607_v50  ;;  %v1815_v58 = vadd.f32 %v1375_v32, %v583_v55  ;;  %v1515_v59 = vpop.f32.mrb[6].mxu1  ;;  %v1426_v51 = vunpack.c.h.bf16 %v1424_v24 }
 0x104   : > { %v632_v60 = vmul.f32 0.7978846, %v624_v52  ;;  %v625_v61 = vadd.f32 %v617_v53, %v1797_v39  ;;  %v604_v62 = vmul.f32 %v1812_v54, %v1812_v54  ;;  %v1820_v63 = vadd.f32 %v1515_v59, %v1375_v32  ;;  %v586_v0 = vpop.f32.mrb[7].mxu1  ;;  %v1473_v59 = vld [vmem:[%s1841_s25 + $0x18] sm:$0xff]  }
 0x105   : > { %v630_v1 = vmul.f32 0.7978846, %v622_v56  ;;  %v623_v2 = vadd.f32 %v615_v57, %v1801_v42  ;;  %v602_v3 = vmul.f32 %v1815_v58, %v1815_v58  ;;  %v1825_v4 = vadd.f32 %v1375_v32, %v586_v0  ;;  %v1440_v32 = vld [vmem:[%s1848_s30] sm:$0xff]   ;;  %v1472_v57 = vld [vmem:[%s1841_s25 + $0x10] sm:$0xff]  }
 0x106   : > { %1573 = vtanh.f32 %v632_v60  ;;  %v633_v5 = vmul.f32 0.7978846, %v625_v61  ;;  %v612_v6 = vmul.f32 %v604_v62, %v1812_v54  ;;  %v605_v7 = vmul.f32 %v1820_v63, %v1820_v63 }
 0x107   : > { %1575 = vtanh.f32 %v630_v1  ;;  %v631_v8 = vmul.f32 0.7978846, %v623_v2  ;;  %v610_v9 = vmul.f32 %v602_v3, %v1815_v58  ;;  %v603_v10 = vmul.f32 %v1825_v4, %v1825_v4 }
 0x108   : > { %1577 = vtanh.f32 %v633_v5  ;;  %v620_v11 = vmul.f32 0.044715, %v612_v6  ;;  %v613_v12 = vmul.f32 %v605_v7, %v1820_v63  ;;  %v1441_v49 = vunpack.c.l.bf16 %v1440_v32  ;;  %v1476_v6 = vld [vmem:[%s1848_s30 + $0x18] sm:$0xff]  }
 0x109   : > { %1579 = vtanh.f32 %v631_v8  ;;  %v618_v13 = vmul.f32 0.044715, %v610_v9  ;;  %v611_v14 = vmul.f32 %v603_v10, %v1825_v4  ;;  %v1446_v55 = vunpack.c.h.bf16 %v1474_v29 }
 0x10a   : > { %v628_v15 = vadd.f32 %v620_v11, %v1812_v54  ;;  %v621_v16 = vmul.f32 0.044715, %v613_v12  ;;  %v1461_v56 = vunpack.c.l.bf16 %v1477_v40  ;;  %v1442_v62 = vunpack.c.h.bf16 %v1440_v32 }
 0x10b   : > { %v626_v17 = vadd.f32 %v618_v13, %v1815_v58  ;;  %v619_v18 = vmul.f32 0.044715, %v611_v14  ;;  %v1457_v0 = vunpack.c.l.bf16 %v1456_v45  ;;  %v1458_v2 = vunpack.c.h.bf16 %v1456_v45  ;;  %v1475_v14 = vld [vmem:[%s1848_s30 + $0x10] sm:$0xff]  }
 0x10c   : > { %v636_v19 = vmul.f32 0.7978846, %v628_v15  ;;  %v629_v20 = vadd.f32 %v621_v16, %v1820_v63  ;;  %v1462_v5 = vunpack.c.h.bf16 %v1477_v40  ;;  %v1433_v9 = vunpack.c.l.bf16 %v1472_v57  ;;  %v1479_v40 = vld [vmem:[%s1856_s14 + $0x18] sm:$0xff]  }
 0x10d   : > { %v634_v21 = vmul.f32 0.7978846, %v626_v17  ;;  %v627_v22 = vadd.f32 %v619_v18, %v1825_v4  ;;  %v1437_v10 = vunpack.c.l.bf16 %v1473_v59  ;;  %v1438_v15 = vunpack.c.h.bf16 %v1473_v59 }
 0x10e   : > { %1581 = vtanh.f32 %v636_v19  ;;  %v637_v23 = vmul.f32 0.7978846, %v629_v20  ;;  %v1453_v19 = vunpack.c.l.bf16 %v1476_v6  ;;  %v1434_v24 = vunpack.c.h.bf16 %v1472_v57 }
 0x10f   : > { %1583 = vtanh.f32 %v634_v21  ;;  %v635_v25 = vmul.f32 0.7978846, %v627_v22 }
 0x110   : > { %v1574_v27 = vpop.eup %1573  ;;  %1585 = vtanh.f32 %v637_v23 }
 0x111   : > { %v1576_v30 = vpop.eup %1575  ;;  %v648_v31 = vadd.f32 1.0, %v1574_v27  ;;  %1587 = vtanh.f32 %v635_v25  ;;  %v1449_v27 = vunpack.c.l.bf16 %v1475_v14 }
 0x112   : > { %v1578_v33 = vpop.eup %1577  ;;  %v646_v35 = vadd.f32 1.0, %v1576_v30 }
 0x113   : > { %v1580_v41 = vpop.eup %1579  ;;  %v656_v43 = vmul.f32 0.5, %v648_v31  ;;  %v649_v44 = vadd.f32 1.0, %v1578_v33 }
 0x114   : > { %v654_v48 = vmul.f32 0.5, %v646_v35  ;;  %v647_v50 = vadd.f32 1.0, %v1580_v41 }
 0x115   : > { %v664_v52 = vmul.f32 %v656_v43, %v1791_v34  ;;  %v657_v53 = vmul.f32 0.5, %v649_v44  ;;  %v1478_v44 = vld [vmem:[%s1856_s14 + $0x10] sm:$0xff]  }
 0x116   : > { %v662_v60 = vmul.f32 %v654_v48, %v1793_v36  ;;  %v655_v61 = vmul.f32 0.5, %v647_v50  ;;  %v1466_v57 = vunpack.c.h.bf16 %v1478_v44 }
 0x117   : > { %v665_v1 = vmul.f32 %v657_v53, %v1797_v39  ;;  %v688_v3 = vadd.f32 %v1429_v38, %v664_v52  ;;  %v1469_v52 = vunpack.c.l.bf16 %v1479_v40  ;;  %v1470_v53 = vunpack.c.h.bf16 %v1479_v40 }
 0x118   : > { %v1582_v7 = vpop.eup %1581  ;;  %v686_v8 = vadd.f32 %v1425_v37, %v662_v60  ;;  %v663_v34 = vmul.f32 %v655_v61, %v1801_v42 }
 0x119   : > { %v1584_v11 = vpop.eup %1583  ;;  %v652_v12 = vadd.f32 1.0, %v1582_v7  ;;  %v689_v13 = vadd.f32 %v1430_v46, %v665_v1  ;;  %v712_v36 = vadd.f32 %v1445_v47, %v688_v3  ;;  %v1454_v46 = vunpack.c.h.bf16 %v1476_v6  ;;  %v1565_v3 = vld [vmem:[%s2082_s8 + $0x20] sm:$0xff]   ;;  %v1567_v6 = vld [vmem:[%s2082_s8 + $0x30] sm:$0xff]   ;;  %v1568_v7 = vld [vmem:[%s2082_s8 + $0x38] sm:$0xff]  }
 0x11a   : > { %v1586_v16 = vpop.eup %1585  ;;  %v710_v17 = vadd.f32 %v1441_v49, %v686_v8  ;;  %v687_v18 = vadd.f32 %v1426_v51, %v663_v34  ;;  %v650_v39 = vadd.f32 1.0, %v1584_v11  ;;  %v1569_v8 = vld [vmem:[%s2082_s8 + $0x40] sm:$0xff]   ;;  %v1570_v34 = vld [vmem:[%s2082_s8 + $0x48] sm:$0xff]   ;;  %v764_v11 = vlaneseq }
 0x11b   : > { %v1588_v20 = vpop.eup %1587  ;;  %v660_v21 = vmul.f32 0.5, %v652_v12  ;;  %v653_v22 = vadd.f32 1.0, %v1586_v16  ;;  %v713_v23 = vadd.f32 %v1446_v55, %v689_v13  ;;  %v736_v31 = vadd.f32 %v1461_v56, %v712_v36  ;;  %v762_v36 = vld [vmem:[%s2081_s7] sm:$0x3] }
 0x11c   : > { %v711_v42 = vadd.f32 %v1442_v62, %v687_v18  ;;  %v658_v25 = vmul.f32 0.5, %v650_v39  ;;  %v651_v26 = vadd.f32 1.0, %v1588_v20  ;;  %v734_v37 = vadd.f32 %v1457_v0, %v710_v17 }
 0x11d   : > { %v668_v29 = vmul.f32 %v660_v21, %v1812_v54  ;;  %v661_v30 = vmul.f32 0.5, %v653_v22  ;;  %v737_v32 = vadd.f32 %v1462_v5, %v713_v23  ;;  %v1450_v54 = vunpack.c.h.bf16 %v1475_v14  ;;  %v1566_v5 = vld [vmem:[%s2082_s8 + $0x28] sm:$0xff]  }
 0x11e   : > { %v666_v33 = vmul.f32 %v658_v25, %v1815_v58  ;;  %v659_v35 = vmul.f32 0.5, %v651_v26  ;;  %v735_v38 = vadd.f32 %v1458_v2, %v711_v42  ;;  %v1465_v56 = vunpack.c.l.bf16 %v1478_v44  ;;  %v1564_v2 = vld [vmem:[%s2082_s8 + $0x18] sm:$0xff]  }
 0x11f   : > { %v669_v41 = vmul.f32 %v661_v30, %v1820_v63  ;;  %v743_v43 = vpack.c.bf16 %v737_v32, %v736_v31  ;;  %v692_v45 = vadd.f32 %v1437_v10, %v668_v29  ;;  %1202 = vmatpush1.bf16.msra.mxu0 %v1564_v2  ;;  %v1572_v10 = vld [vmem:[%s2082_s8 + $0x58] sm:$0xff]   ;;  %v765_v12 = vshrl.u32 %v764_v11, 7 }
 0x120   : > { %v667_v47 = vmul.f32 %v659_v35, %v1825_v4  ;;  %v742_v48 = vpack.c.bf16 %v735_v38, %v734_v37  ;;  %v690_v49 = vadd.f32 %v1433_v9, %v666_v33  ;;  %1203 = vmatprep.subr.bf16.mxu0 %v1629_v28  ;;  %v1571_v9 = vld [vmem:[%s2082_s8 + $0x50] sm:$0xff]  }
 0x121   : > { %v693_v50 = vadd.f32 %v1438_v15, %v669_v41  ;;  %v716_v51 = vadd.f32 %v1453_v19, %v692_v45  ;;  %v766_v13 = vsub.s32 0, %v765_v12  ;;  %v770_v14 = vsub.s32 1, %v765_v12 }
 0x122   : > { %887 = vmatmul.mubr.bf16.vlgmr.msra.gmra.mrb[8].mxu1 %v742_v48  ;;  %v691_v58 = vadd.f32 %v1434_v24, %v667_v47  ;;  %v714_v55 = vadd.f32 %v1449_v27, %v690_v49 }
 0x123   : > { %896 = vmatprep.mubr.bf16.mxu1 %v1629_v28  ;;  %v717_v63 = vadd.f32 %v1454_v46, %v693_v50  ;;  %v740_v60 = vadd.f32 %v1469_v52, %v716_v51  ;;  %1204 = vmatpush1.bf16.msra.mxu0 %v1565_v3  ;;  %v1918_v15 = vrot.slane %v762_v36, %v766_v13 }
 0x124   : > { %v715_v59 = vadd.f32 %v1450_v54, %v691_v58  ;;  %v738_v62 = vadd.f32 %v1465_v56, %v714_v55  ;;  %1205 = vmatprep.subr.bf16.mxu0 %v1629_v28  ;;  %v1920_v16 = vrot.slane %v762_v36, %v770_v14 }
 0x125   : > { %v741_v61 = vadd.f32 %v1470_v53, %v717_v63 }
 0x126   : > { %v739_v4 = vadd.f32 %v1466_v57, %v715_v59 }
 0x127   : > { %v745_v0 = vpack.c.bf16 %v741_v61, %v740_v60  ;;  %1206 = vmatpush1.bf16.msra.mxu0 %v1566_v5 }
 0x128   : > { %v744_v1 = vpack.c.bf16 %v739_v4, %v738_v62  ;;  %1207 = vmatprep.subr.bf16.mxu0 %v1629_v28 }
 0x12a   : > { %897 = vmatmul.mubr.bf16.gmra.mrb[12].mxu1 %v743_v43 }
 0x12b   : > { %906 = vmatprep.mubr.bf16.mxu1 %v1629_v28  ;;  %1208 = vmatpush1.bf16.msra.mxu0 %v1567_v6 }
 0x12c   : > { %1209 = vmatprep.subr.bf16.mxu0 %v1629_v28 }
 0x12f   : > { %1210 = vmatpush1.bf16.msra.mxu0 %v1568_v7 }
 0x130   : > { %1211 = vmatprep.subr.bf16.mxu0 %v1629_v28 }
 0x132   : > { %907 = vmatmul.mubr.bf16.gmra.mrb[16].mxu1 %v744_v1 }
 0x133   : > { %916 = vmatprep.mubr.bf16.mxu1 %v1629_v28  ;;  %1212 = vmatpush1.bf16.msra.mxu0 %v1569_v8 }
 0x134   : > { %1213 = vmatprep.subr.bf16.mxu0 %v1629_v28 }
 0x137   : > { %1214 = vmatpush1.bf16.msra.mxu0 %v1570_v34 }
 0x138   : > { %1215 = vmatprep.subr.bf16.mxu0 %v1629_v28 }
 0x13a   : > { %917 = vmatmul.mubr.bf16.gmra.mrb[20].mxu1 %v745_v0 }
 0x13b   : > { %1216 = vmatpush1.bf16.msra.mxu0 %v1571_v9 }
 0x13c   : > { %1217 = vmatprep.subr.bf16.mxu0 %v1629_v28 }
 0x13f   : > { %1218 = vmatpush1.bf16.msra.mxu0 %v1572_v10 }
 0x1f5   : > { %v888_v17 = vpop.f32.mrb[8].mxu1 }
 0x1f6   : > { %v1923_v28 = vadd.f32 %v888_v17, %v1918_v15  ;;  %v890_v18 = vpop.f32.mrb[9].mxu1 }
 0x1f7   : > { %v1926_v39 = vadd.f32 %v890_v18, %v1920_v16  ;;  %v892_v19 = vpop.f32.mrb[10].mxu1 }
 0x1f8   : > { %v927_v20 = vmul.f32 %v1923_v28, %v1923_v28  ;;  %v1931_v21 = vadd.f32 %v892_v19, %v1918_v15  ;;  %v894_v22 = vpop.f32.mrb[11].mxu1 }
 0x1f9   : > { %v928_v23 = vmul.f32 %v1926_v39, %v1926_v39  ;;  %v1936_v24 = vadd.f32 %v894_v22, %v1920_v16 }
 0x1fa   : > { %v943_v42 = vmul.f32 %v927_v20, %v1923_v28  ;;  %v929_v25 = vmul.f32 %v1931_v21, %v1931_v21 }
 0x1fb   : > { %v944_v26 = vmul.f32 %v928_v23, %v1926_v39  ;;  %v930_v27 = vmul.f32 %v1936_v24, %v1936_v24 }
 0x1fc   : > { %v959_v29 = vmul.f32 0.044715, %v943_v42  ;;  %v945_v30 = vmul.f32 %v929_v25, %v1931_v21 }
 0x1fd   : > { %v960_v31 = vmul.f32 0.044715, %v944_v26  ;;  %v946_v32 = vmul.f32 %v930_v27, %v1936_v24  ;;  %v898_v33 = vpop.f32.mrb[12].mxu1 }
 0x1fe   : > { %v975_v35 = vadd.f32 %v959_v29, %v1923_v28  ;;  %v961_v37 = vmul.f32 0.044715, %v945_v30  ;;  %v1948_v38 = vadd.f32 %v898_v33, %v1918_v15  ;;  %v900_v40 = vpop.f32.mrb[13].mxu1 }
 0x1ff   : > { %v976_v41 = vadd.f32 %v960_v31, %v1926_v39  ;;  %v962_v43 = vmul.f32 0.044715, %v946_v32  ;;  %v1952_v44 = vadd.f32 %v900_v40, %v1920_v16  ;;  %v902_v45 = vpop.f32.mrb[14].mxu1 }
 0x200   : > { %v991_v46 = vmul.f32 0.7978846, %v975_v35  ;;  %v977_v47 = vadd.f32 %v961_v37, %v1931_v21  ;;  %v931_v48 = vmul.f32 %v1948_v38, %v1948_v38  ;;  %v1958_v49 = vadd.f32 %v902_v45, %v1918_v15  ;;  %v904_v54 = vpop.f32.mrb[15].mxu1 }
 0x201   : > { %v992_v50 = vmul.f32 0.7978846, %v976_v41  ;;  %v978_v51 = vadd.f32 %v962_v43, %v1936_v24  ;;  %v932_v52 = vmul.f32 %v1952_v44, %v1952_v44  ;;  %v1964_v53 = vadd.f32 %v904_v54, %v1920_v16 }
 0x202   : > { %1589 = vtanh.f32 %v991_v46  ;;  %v993_v58 = vmul.f32 0.7978846, %v977_v47  ;;  %v947_v55 = vmul.f32 %v931_v48, %v1948_v38  ;;  %v933_v56 = vmul.f32 %v1958_v49, %v1958_v49 }
 0x203   : > { %v994_v57 = vmul.f32 0.7978846, %v978_v51  ;;  %v948_v63 = vmul.f32 %v932_v52, %v1952_v44  ;;  %v934_v59 = vmul.f32 %v1964_v53, %v1964_v53  ;;  %1591 = vtanh.f32 %v992_v50 }
 0x204   : > { %1593 = vtanh.f32 %v993_v58  ;;  %v963_v60 = vmul.f32 0.044715, %v947_v55  ;;  %v949_v61 = vmul.f32 %v933_v56, %v1958_v49 }
 0x205   : > { %v964_v62 = vmul.f32 0.044715, %v948_v63  ;;  %v950_v4 = vmul.f32 %v934_v59, %v1964_v53  ;;  %v908_v0 = vpop.f32.mrb[16].mxu1  ;;  %1595 = vtanh.f32 %v994_v57 }
 0x206   : > { %v979_v1 = vadd.f32 %v963_v60, %v1948_v38  ;;  %v965_v2 = vmul.f32 0.044715, %v949_v61  ;;  %v1976_v3 = vadd.f32 %v908_v0, %v1918_v15  ;;  %v910_v5 = vpop.f32.mrb[17].mxu1 }
 0x207   : > { %v980_v6 = vadd.f32 %v964_v62, %v1952_v44  ;;  %v966_v7 = vmul.f32 0.044715, %v950_v4  ;;  %v1980_v8 = vadd.f32 %v910_v5, %v1920_v16  ;;  %v912_v34 = vpop.f32.mrb[18].mxu1 }
 0x208   : > { %v995_v9 = vmul.f32 0.7978846, %v979_v1  ;;  %v981_v10 = vadd.f32 %v965_v2, %v1958_v49  ;;  %v935_v11 = vmul.f32 %v1976_v3, %v1976_v3  ;;  %v1986_v12 = vadd.f32 %v912_v34, %v1918_v15  ;;  %v914_v13 = vpop.f32.mrb[19].mxu1 }
 0x209   : > { %v996_v36 = vmul.f32 0.7978846, %v980_v6  ;;  %v982_v14 = vadd.f32 %v966_v7, %v1964_v53  ;;  %v936_v17 = vmul.f32 %v1980_v8, %v1980_v8  ;;  %v1992_v18 = vadd.f32 %v914_v13, %v1920_v16 }
 0x20a   : > { %1597 = vtanh.f32 %v995_v9  ;;  %v997_v19 = vmul.f32 0.7978846, %v981_v10  ;;  %v951_v20 = vmul.f32 %v935_v11, %v1976_v3  ;;  %v937_v22 = vmul.f32 %v1986_v12, %v1986_v12 }
 0x20b   : > { %1599 = vtanh.f32 %v996_v36  ;;  %v998_v23 = vmul.f32 0.7978846, %v982_v14  ;;  %v952_v42 = vmul.f32 %v936_v17, %v1980_v8  ;;  %v938_v25 = vmul.f32 %v1992_v18, %v1992_v18 }
 0x20c   : > { %v1590_v26 = vpop.eup %1589  ;;  %1601 = vtanh.f32 %v997_v19  ;;  %v967_v27 = vmul.f32 0.044715, %v951_v20  ;;  %v953_v29 = vmul.f32 %v937_v22, %v1986_v12 }
 0x20d   : > { %v1592_v30 = vpop.eup %1591  ;;  %1603 = vtanh.f32 %v998_v23  ;;  %v968_v31 = vmul.f32 0.044715, %v952_v42  ;;  %v954_v32 = vmul.f32 %v938_v25, %v1992_v18  ;;  %v918_v33 = vpop.f32.mrb[20].mxu1  ;;  %v1023_v35 = vadd.f32 1.0, %v1590_v26 }
 0x20e   : > { %v1594_v37 = vpop.eup %1593  ;;  %v983_v40 = vadd.f32 %v967_v27, %v1976_v3  ;;  %v969_v41 = vmul.f32 0.044715, %v953_v29  ;;  %v2004_v43 = vadd.f32 %v918_v33, %v1918_v15  ;;  %v920_v45 = vpop.f32.mrb[21].mxu1  ;;  %v1024_v46 = vadd.f32 1.0, %v1592_v30 }
 0x20f   : > { %v984_v47 = vadd.f32 %v968_v31, %v1980_v8  ;;  %v970_v48 = vmul.f32 0.044715, %v954_v32  ;;  %v2008_v54 = vadd.f32 %v920_v45, %v1920_v16  ;;  %v922_v50 = vpop.f32.mrb[22].mxu1  ;;  %v1025_v51 = vadd.f32 1.0, %v1594_v37  ;;  %v1596_v63 = vpop.eup %1595 }
 0x210   : > { %v999_v52 = vmul.f32 0.7978846, %v983_v40  ;;  %v985_v58 = vadd.f32 %v969_v41, %v1986_v12  ;;  %v939_v55 = vmul.f32 %v2004_v43, %v2004_v43  ;;  %v2014_v56 = vadd.f32 %v922_v50, %v1918_v15  ;;  %v924_v57 = vpop.f32.mrb[23].mxu1 }
 0x211   : > { %v1000_v59 = vmul.f32 0.7978846, %v984_v47  ;;  %v986_v60 = vadd.f32 %v970_v48, %v1992_v18  ;;  %v940_v61 = vmul.f32 %v2008_v54, %v2008_v54  ;;  %v2020_v62 = vadd.f32 %v924_v57, %v1920_v16 }
 0x212   : > { %1605 = vtanh.f32 %v999_v52  ;;  %v1001_v4 = vmul.f32 0.7978846, %v985_v58  ;;  %v955_v0 = vmul.f32 %v939_v55, %v2004_v43  ;;  %v941_v1 = vmul.f32 %v2014_v56, %v2014_v56 }
 0x213   : > { %1607 = vtanh.f32 %v1000_v59  ;;  %v1002_v15 = vmul.f32 0.7978846, %v986_v60  ;;  %v956_v2 = vmul.f32 %v940_v61, %v2008_v54  ;;  %v942_v5 = vmul.f32 %v2020_v62, %v2020_v62 }
 0x214   : > { %v1598_v6 = vpop.eup %1597  ;;  %1609 = vtanh.f32 %v1001_v4  ;;  %v971_v7 = vmul.f32 0.044715, %v955_v0  ;;  %v957_v16 = vmul.f32 %v941_v1, %v2014_v56  ;;  %v1026_v34 = vadd.f32 1.0, %v1596_v63 }
 0x215   : > { %v1600_v9 = vpop.eup %1599  ;;  %1611 = vtanh.f32 %v1002_v15  ;;  %v972_v10 = vmul.f32 0.044715, %v956_v2  ;;  %v958_v11 = vmul.f32 %v942_v5, %v2020_v62  ;;  %v1040_v13 = vmul.f32 0.5, %v1024_v46 }
 0x216   : > { %v1602_v36 = vpop.eup %1601  ;;  %v1028_v14 = vadd.f32 1.0, %v1600_v9  ;;  %v987_v17 = vadd.f32 %v971_v7, %v2004_v43  ;;  %v973_v19 = vmul.f32 0.044715, %v957_v16  ;;  %v1042_v20 = vmul.f32 0.5, %v1026_v34 }
 0x217   : > { %v1604_v22 = vpop.eup %1603  ;;  %v988_v23 = vadd.f32 %v972_v10, %v2008_v54  ;;  %v974_v42 = vmul.f32 0.044715, %v958_v11  ;;  %v1056_v25 = vmul.f32 %v1040_v13, %v1926_v39  ;;  %v1039_v26 = vmul.f32 0.5, %v1023_v35 }
 0x218   : > { %v1044_v27 = vmul.f32 0.5, %v1028_v14  ;;  %v1030_v29 = vadd.f32 1.0, %v1604_v22  ;;  %v1003_v30 = vmul.f32 0.7978846, %v987_v17  ;;  %v989_v31 = vadd.f32 %v973_v19, %v2014_v56 }
 0x219   : > { %v1004_v32 = vmul.f32 0.7978846, %v988_v23  ;;  %v990_v33 = vadd.f32 %v974_v42, %v2020_v62  ;;  %v1058_v37 = vmul.f32 %v1042_v20, %v1936_v24  ;;  %v1041_v40 = vmul.f32 0.5, %v1025_v51 }
 0x21a   : > { %v1060_v41 = vmul.f32 %v1044_v27, %v1952_v44  ;;  %v1046_v45 = vmul.f32 0.5, %v1030_v29  ;;  %1613 = vtanh.f32 %v1003_v30  ;;  %v1005_v46 = vmul.f32 0.7978846, %v989_v31  ;;  %v1404_v29 = vld [vmem:[%s2083_s9] ss:$0 sm:$0xff] }
 0x21b   : > { %1615 = vtanh.f32 %v1004_v32  ;;  %v1006_v47 = vmul.f32 0.7978846, %v990_v33  ;;  %v1072_v39 = vpack.c.bf16 %v1058_v37, %v1056_v25  ;;  %v1055_v35 = vmul.f32 %v1039_v26, %v1923_v28 }
 0x21c   : > { %v1606_v48 = vpop.eup %1605  ;;  %v1062_v50 = vmul.f32 %v1046_v45, %v1964_v53  ;;  %1617 = vtanh.f32 %v1005_v46  ;;  %v1057_v52 = vmul.f32 %v1041_v40, %v1931_v21  ;;  %v1027_v58 = vadd.f32 1.0, %v1598_v6 }
 0x21d   : > { %v1608_v55 = vpop.eup %1607  ;;  %1619 = vtanh.f32 %v1006_v47  ;;  %1417 = vmatprep.mubr.msk.bf16.mxu0 %vm1182_vm0, %v1072_v39  ;;  %v1029_v24 = vadd.f32 1.0, %v1602_v36  ;;  %v1031_v44 = vadd.f32 1.0, %v1606_v48 }
 0x21e   : > { %v1610_v51 = vpop.eup %1609  ;;  %v1032_v57 = vadd.f32 1.0, %v1608_v55  ;;  %v1071_v63 = vpack.c.bf16 %v1057_v52, %v1055_v35  ;;  %v1074_v59 = vpack.c.bf16 %v1062_v50, %v1060_v41  ;;  %v1043_v60 = vmul.f32 0.5, %v1027_v58 }
 0x21f   : > { %v1612_v61 = vpop.eup %1611  ;;  %v1045_v28 = vmul.f32 0.5, %v1029_v24  ;;  %v1033_v4 = vadd.f32 1.0, %v1610_v51  ;;  %v1047_v0 = vmul.f32 0.5, %v1031_v44 }
 0x220   : > { %v1048_v53 = vmul.f32 0.5, %v1032_v57  ;;  %v1034_v1 = vadd.f32 1.0, %v1612_v61  ;;  %1228 = vmatmul.mubr.bf16.vlgmr.msra.gmra.mrb[0].mxu0 %v1071_v63  ;;  %v1059_v21 = vmul.f32 %v1043_v60, %v1948_v38 }
 0x221   : > { %1418 = vmatprep.mubr.msk.bf16.mxu0 %vm1182_vm0, %v1074_v59  ;;  %v1061_v15 = vmul.f32 %v1045_v28, %v1958_v49  ;;  %v1049_v2 = vmul.f32 0.5, %v1033_v4  ;;  %v1063_v7 = vmul.f32 %v1047_v0, %v1976_v3 }
 0x222   : > { %v1050_v5 = vmul.f32 0.5, %v1034_v1  ;;  %v1064_v9 = vmul.f32 %v1048_v53, %v1980_v8 }
 0x223   : > { %v1073_v6 = vpack.c.bf16 %v1061_v15, %v1059_v21  ;;  %v1065_v16 = vmul.f32 %v1049_v2, %v1986_v12 }
 0x224   : > { %v1614_v34 = vpop.eup %1613  ;;  %v1066_v10 = vmul.f32 %v1050_v5, %v1992_v18 }
 0x225   : > { %v1616_v11 = vpop.eup %1615  ;;  %v1075_v13 = vpack.c.bf16 %v1065_v16, %v1063_v7  ;;  %v1035_v36 = vadd.f32 1.0, %v1614_v34 }
 0x226   : > { %v1618_v14 = vpop.eup %1617  ;;  %v1036_v17 = vadd.f32 1.0, %v1616_v11  ;;  %v1076_v38 = vpack.c.bf16 %v1066_v10, %v1064_v9 }
 0x227   : > { %v1620_v19 = vpop.eup %1619  ;;  %v1037_v49 = vadd.f32 1.0, %v1618_v14  ;;  %v1051_v20 = vmul.f32 0.5, %v1035_v36 }
 0x228   : > { %v1052_v22 = vmul.f32 0.5, %v1036_v17  ;;  %v1038_v23 = vadd.f32 1.0, %v1620_v19  ;;  %1236 = vmatmul.mubr.bf16.gmra.mrb[4].mxu0 %v1073_v6 }
 0x229   : > { %1419 = vmatprep.mubr.msk.bf16.mxu0 %vm1182_vm0, %v1076_v38  ;;  %v1053_v3 = vmul.f32 0.5, %v1037_v49  ;;  %v1067_v8 = vmul.f32 %v1051_v20, %v2004_v43 }
 0x22a   : > { %v1054_v12 = vmul.f32 0.5, %v1038_v23  ;;  %v1068_v42 = vmul.f32 %v1052_v22, %v2008_v54 }
 0x22b   : > { %v1069_v18 = vmul.f32 %v1053_v3, %v2014_v56 }
 0x22c   : > { %v1070_v25 = vmul.f32 %v1054_v12, %v2020_v62 }
 0x22d   : > { %v1077_v26 = vpack.c.bf16 %v1069_v18, %v1067_v8 }
 0x22e   : > { %v1078_v27 = vpack.c.bf16 %v1070_v25, %v1068_v42 }
 0x230   : > { %1244 = vmatmul.mubr.bf16.gmra.mrb[8].mxu0 %v1075_v13 }
 0x231   : > { %1420 = vmatprep.mubr.msk.bf16.mxu0 %vm1182_vm0, %v1078_v27 }
 0x238   : > { %1252 = vmatmul.mubr.bf16.gmra.mrb[12].mxu0 %v1077_v26 }
 0x2f3   : > { %v1229_v43 = vpop.f32.mrb[0].mxu0 }
 0x2f4   : > { %v1230_v54 = vadd.f32 %v1404_v29, %v1229_v43  ;;  %v1231_v56 = vpop.f32.mrb[1].mxu0 }
 0x2f5   : > { %v1232_v62 = vpop.f32.mrb[2].mxu0 }
 0x2f6   : > { %1260 = vst [vmem:[%s2061_s23] sm:$0xff] %v1230_v54  ;;  %v1233_v30 = vadd.f32 %v1404_v29, %v1232_v62  ;;  %v1234_v31 = vpop.f32.mrb[3].mxu0 }
 0x2f8   : > { %1261 = vst [vmem:[%s2061_s23 + $0x8] sm:$0xff] %v1233_v30 }
 0x2fb   : > { %v1237_v32 = vpop.f32.mrb[4].mxu0 }
 0x2fc   : > { %v1238_v33 = vadd.f32 %v1404_v29, %v1237_v32  ;;  %v1239_v37 = vpop.f32.mrb[5].mxu0 }
 0x2fd   : > { %v1240_v40 = vpop.f32.mrb[6].mxu0 }
 0x2fe   : > { %1262 = vst [vmem:[%s2061_s23 + $0x10] sm:$0xff] %v1238_v33  ;;  %v1241_v41 = vadd.f32 %v1404_v29, %v1240_v40  ;;  %v1242_v45 = vpop.f32.mrb[7].mxu0 }
 0x300   : > { %1263 = vst [vmem:[%s2061_s23 + $0x18] sm:$0xff] %v1241_v41 }
 0x303   : > { %v1245_v46 = vpop.f32.mrb[8].mxu0 }
 0x304   : > { %v1246_v47 = vadd.f32 %v1404_v29, %v1245_v46  ;;  %v1247_v39 = vpop.f32.mrb[9].mxu0 }
 0x305   : > { %v1248_v35 = vpop.f32.mrb[10].mxu0 }
 0x306   : > { %1264 = vst [vmem:[%s2061_s23 + $0x20] sm:$0xff] %v1246_v47  ;;  %v1249_v48 = vadd.f32 %v1404_v29, %v1248_v35  ;;  %v1250_v50 = vpop.f32.mrb[11].mxu0 }
 0x308   : > { %1265 = vst [vmem:[%s2061_s23 + $0x28] sm:$0xff] %v1249_v48 }
 0x30b   : > { %v1253_v52 = vpop.f32.mrb[12].mxu0 }
 0x30c   : > { %v1254_v58 = vadd.f32 %v1404_v29, %v1253_v52  ;;  %v1255_v55 = vpop.f32.mrb[13].mxu0 }
 0x30d   : > { %v1256_v24 = vpop.f32.mrb[14].mxu0 }
 0x30e   : > { %1266 = vst [vmem:[%s2061_s23 + $0x30] sm:$0xff] %v1254_v58  ;;  %v1257_v44 = vadd.f32 %v1404_v29, %v1256_v24  ;;  %v1258_v51 = vpop.f32.mrb[15].mxu0 }
 0x310   : > { %1267 = vst [vmem:[%s2061_s23 + $0x38] sm:$0xff] %v1257_v44 }
 0x311 PF: > { %s20_s13 = sadd.s32 1, %s1627_s13  }
 0x312   : > { %p17_p4 = scmp.ge.s32.totalorder %s20_s13, 4  }
 0x314   :  { %19 = sbr.rel (!%p17_p4) target bundleno = 1 (0x1), region = 99 }

// kernel: transformer_net_forward.27
= control target key start
LH: loop header
LB: loop body
LE: loop exit
PB: predicated region body
PF: predicated region fallthrough
CT: control target
= control target key end

     0   :  { %s1173_s9 = smov 0   ;;  %s1282_s0 = inlined_call_operand.vmem [shape: f32[32,8], index: 0, kind: input, shape index: {}]   ;;  %s1283_s1 = inlined_call_operand.vmem [shape: f32[64,8,128], index: 1, kind: input, shape index: {}]   ;;  %s1284_s2 = inlined_call_operand.vmem [shape: f32[64,32,128], index: 2, kind: output, shape index: {}]  }
   0x1 LB: > { %s958_s10 = sadd.s32 4294967295, %s1156_s9   ;;  %p962_p0 = scmp.ge.s32.totalorder %s1156_s9, 1  ;;  %s1156_s9 = sphi %s1173_s9, %s12_s9  }
   0x2   : > { %p113_p1 = scmp.lt.s32.totalorder %s1156_s9, 9 }
   0x4   : > { %p114_p2 = pnand %p962_p0, %p113_p1 }
   0x5   : > { %s963_s11 = sshll.u32 (!%p114_p2), %s958_s10, 3  ;;  %v149_v0 = vld [vmem:[%s1282_s0] sm:$0xff] (!%p114_p2)  ;;  %vm154_vm0 = vcmask (!%p114_p2), 64512   ;;  %v150_v3 = vld [vmem:[%s1282_s0 + $0x8] sm:$0xff] (!%p114_p2)  ;;  %v151_v6 = vld [vmem:[%s1282_s0 + $0x10] sm:$0xff] (!%p114_p2) }
   0x6   : > { %117 = sbr.rel (%p114_p2) target bundleno = 261 (0x105), region = 28  ;;  %p137_p3 = scmp.lt.s32.totalorder (!%p114_p2), %s963_s11, 63  ;;  %1080 = vmatprep.mubr.msk.f32.mxu0 (!%p114_p2), %vm154_vm0, %v149_v0  ;;  %1088 = vmatprep.mubr.msk.f32.mxu1 (!%p114_p2), %vm154_vm0, %v149_v0  ;;  %v152_v7 = vld [vmem:[%s1282_s0 + $0x18] sm:$0xff] (!%p114_p2) }
   0xd   : > { %s1286_s11 = smov (!%p137_p3, %s963_s11), 63 }
   0xe   : > { %s964_s14 = sshll.u32 %s1286_s11, 3  ;;  %s1037_s24 = sshll.u32 %s1286_s11, 5 }
   0xf   : > { %s1192_s17 = scalar_lea.vmem %s1283_s1, %s964_s14  ;;  %s1245_s27 = scalar_lea.vmem %s1284_s2, %s1037_s24 }
  0x10   : > { %v153_v1 = vld [vmem:[%s1192_s17] sm:$0xff]  ;;  %v972_v2 = vld [vmem:[%s1192_s17 + $0x8] sm:$0xff]  ;;  %v981_v4 = vld [vmem:[%s1192_s17 + $0x10] sm:$0xff] }
  0x11   : > { %1078 = vmatprep.subr.mxu0 %v153_v1  ;;  %1086 = vmatprep.subr.mxu1 %v972_v2  ;;  %v990_v5 = vld [vmem:[%s1192_s17 + $0x18] sm:$0xff]  ;;  %v999_v8 = vld [vmem:[%s1192_s17 + $0x20] sm:$0xff]  ;;  %v1008_v9 = vld [vmem:[%s1192_s17 + $0x28] sm:$0xff] }
  0x12   : > { %1079 = vmatpush3.msra.mxu0 %v153_v1  ;;  %1087 = vmatpush3.msra.mxu1 %v972_v2  ;;  %v1017_v10 = vld [vmem:[%s1192_s17 + $0x30] sm:$0xff]  ;;  %v1026_v11 = vld [vmem:[%s1192_s17 + $0x38] sm:$0xff] }
  0x13   : > { %1081 = vmatmul.mubr.msk.f32.vlgmr.msra.gmra.mrb[0].mxu0 %vm154_vm0, %v150_v3  ;;  %1089 = vmatmul.mubr.msk.f32.vlgmr.msra.gmra.mrb[0].mxu1 %vm154_vm0, %v150_v3 }
  0x14   : > { %1094 = vmatprep.subr.mxu0 %v981_v4  ;;  %1102 = vmatprep.subr.mxu1 %v990_v5 }
  0x15   : > { %1095 = vmatpush3.msra.mxu0 %v981_v4  ;;  %1103 = vmatpush3.msra.mxu1 %v990_v5 }
  0x16   : > { %1083 = vmatprep.mubr.msk.f32.mxu0 %vm154_vm0, %v151_v6  ;;  %1091 = vmatprep.mubr.msk.f32.mxu1 %vm154_vm0, %v151_v6 }
  0x17   : > { %1084 = vmatmul.mubr.msk.f32.gmra.mrb[2].mxu0 %vm154_vm0, %v152_v7  ;;  %1092 = vmatmul.mubr.msk.f32.gmra.mrb[2].mxu1 %vm154_vm0, %v152_v7 }
  0x18   : > { %1096 = vmatprep.mubr.msk.f32.mxu0 %vm154_vm0, %v149_v0  ;;  %1104 = vmatprep.mubr.msk.f32.mxu1 %vm154_vm0, %v149_v0 }
  0x19   : > { %1110 = vmatprep.subr.mxu0 %v999_v8  ;;  %1118 = vmatprep.subr.mxu1 %v1008_v9 }
  0x1b   : > { %1097 = vmatmul.mubr.msk.f32.vlgmr.msra.gmra.mrb[4].mxu0 %vm154_vm0, %v150_v3  ;;  %1105 = vmatmul.mubr.msk.f32.vlgmr.msra.gmra.mrb[4].mxu1 %vm154_vm0, %v150_v3 }
  0x1c   : > { %1111 = vmatpush3.msra.mxu0 %v999_v8  ;;  %1119 = vmatpush3.msra.mxu1 %v1008_v9 }
  0x1d   : > { %1099 = vmatprep.mubr.msk.f32.mxu0 %vm154_vm0, %v151_v6  ;;  %1107 = vmatprep.mubr.msk.f32.mxu1 %vm154_vm0, %v151_v6 }
  0x1e   : > { %1126 = vmatprep.subr.mxu0 %v1017_v10  ;;  %1134 = vmatprep.subr.mxu1 %v1026_v11 }
  0x1f   : > { %1100 = vmatmul.mubr.msk.f32.gmra.mrb[6].mxu0 %vm154_vm0, %v152_v7  ;;  %1108 = vmatmul.mubr.msk.f32.gmra.mrb[6].mxu1 %vm154_vm0, %v152_v7 }
  0x20   : > { %1112 = vmatprep.mubr.msk.f32.mxu0 %vm154_vm0, %v149_v0  ;;  %1120 = vmatprep.mubr.msk.f32.mxu1 %vm154_vm0, %v149_v0 }
  0x23   : > { %1113 = vmatmul.mubr.msk.f32.vlgmr.msra.gmra.mrb[8].mxu0 %vm154_vm0, %v150_v3  ;;  %1121 = vmatmul.mubr.msk.f32.vlgmr.msra.gmra.mrb[8].mxu1 %vm154_vm0, %v150_v3 }
  0x24   : > { %1127 = vmatpush3.msra.mxu0 %v1017_v10  ;;  %1135 = vmatpush3.msra.mxu1 %v1026_v11 }
  0x25   : > { %1115 = vmatprep.mubr.msk.f32.mxu0 %vm154_vm0, %v151_v6  ;;  %1123 = vmatprep.mubr.msk.f32.mxu1 %vm154_vm0, %v151_v6 }
  0x27   : > { %1116 = vmatmul.mubr.msk.f32.gmra.mrb[10].mxu0 %vm154_vm0, %v152_v7  ;;  %1124 = vmatmul.mubr.msk.f32.gmra.mrb[10].mxu1 %vm154_vm0, %v152_v7 }
  0x28   : > { %1128 = vmatprep.mubr.msk.f32.mxu0 %vm154_vm0, %v149_v0  ;;  %1136 = vmatprep.mubr.msk.f32.mxu1 %vm154_vm0, %v149_v0 }
  0x2b   : > { %1129 = vmatmul.mubr.msk.f32.vlgmr.msra.gmra.mrb[12].mxu0 %vm154_vm0, %v150_v3  ;;  %1137 = vmatmul.mubr.msk.f32.vlgmr.msra.gmra.mrb[12].mxu1 %vm154_vm0, %v150_v3 }
  0x2c   : > { %1131 = vmatprep.mubr.msk.f32.mxu0 %vm154_vm0, %v151_v6  ;;  %1139 = vmatprep.mubr.msk.f32.mxu1 %vm154_vm0, %v151_v6 }
  0x2f   : > { %1132 = vmatmul.mubr.msk.f32.gmra.mrb[14].mxu0 %vm154_vm0, %v152_v7  ;;  %1140 = vmatmul.mubr.msk.f32.gmra.mrb[14].mxu1 %vm154_vm0, %v152_v7 }
  0xe6   : > { %v1082_v12 = vpop.f32.mrb[0].mxu0  ;;  %v1090_v13 = vpop.f32.mrb[0].mxu1 }
  0xe7   : > { %253 = vst [vmem:[%s1245_s27 + $0x8] sm:$0xff] %v1082_v12  ;;  %978 = vst [vmem:[%s1245_s27 + $0x28] sm:$0xff] %v1090_v13  ;;  %v233_v14 = vpop.f32.mrb[1].mxu0  ;;  %v324_v15 = vpop.f32.mrb[1].mxu1 }
  0xe8   : > { %252 = vst [vmem:[%s1245_s27] sm:$0xff] %v233_v14  ;;  %977 = vst [vmem:[%s1245_s27 + $0x20] sm:$0xff] %v324_v15 }
  0xea   : > { %v1085_v16 = vpop.f32.mrb[2].mxu0  ;;  %v1093_v17 = vpop.f32.mrb[2].mxu1 }
  0xeb   : > { %255 = vst [vmem:[%s1245_s27 + $0x18] sm:$0xff] %v1085_v16  ;;  %980 = vst [vmem:[%s1245_s27 + $0x38] sm:$0xff] %v1093_v17  ;;  %v243_v18 = vpop.f32.mrb[3].mxu0  ;;  %v334_v19 = vpop.f32.mrb[3].mxu1 }
  0xec   : > { %254 = vst [vmem:[%s1245_s27 + $0x10] sm:$0xff] %v243_v18  ;;  %979 = vst [vmem:[%s1245_s27 + $0x30] sm:$0xff] %v334_v19 }
  0xee   : > { %v1098_v20 = vpop.f32.mrb[4].mxu0  ;;  %v1106_v21 = vpop.f32.mrb[4].mxu1 }
  0xef   : > { %987 = vst [vmem:[%s1245_s27 + $0x48] sm:$0xff] %v1098_v20  ;;  %996 = vst [vmem:[%s1245_s27 + $0x68] sm:$0xff] %v1106_v21  ;;  %v416_v22 = vpop.f32.mrb[5].mxu0  ;;  %v508_v23 = vpop.f32.mrb[5].mxu1 }
  0xf0   : > { %986 = vst [vmem:[%s1245_s27 + $0x40] sm:$0xff] %v416_v22  ;;  %995 = vst [vmem:[%s1245_s27 + $0x60] sm:$0xff] %v508_v23 }
  0xf2   : > { %v1101_v24 = vpop.f32.mrb[6].mxu0  ;;  %v1109_v25 = vpop.f32.mrb[6].mxu1 }
  0xf3   : > { %989 = vst [vmem:[%s1245_s27 + $0x58] sm:$0xff] %v1101_v24  ;;  %998 = vst [vmem:[%s1245_s27 + $0x78] sm:$0xff] %v1109_v25  ;;  %v426_v26 = vpop.f32.mrb[7].mxu0  ;;  %v518_v27 = vpop.f32.mrb[7].mxu1 }
  0xf4   : > { %988 = vst [vmem:[%s1245_s27 + $0x50] sm:$0xff] %v426_v26  ;;  %997 = vst [vmem:[%s1245_s27 + $0x70] sm:$0xff] %v518_v27 }
  0xf6   : > { %v1114_v28 = vpop.f32.mrb[8].mxu0  ;;  %v1122_v29 = vpop.f32.mrb[8].mxu1 }
  0xf7   : > { %1005 = vst [vmem:[%s1245_s27 + $0x88] sm:$0xff] %v1114_v28  ;;  %1014 = vst [vmem:[%s1245_s27 + $0xa8] sm:$0xff] %v1122_v29  ;;  %v600_v30 = vpop.f32.mrb[9].mxu0  ;;  %v692_v31 = vpop.f32.mrb[9].mxu1 }
  0xf8   : > { %1004 = vst [vmem:[%s1245_s27 + $0x80] sm:$0xff] %v600_v30  ;;  %1013 = vst [vmem:[%s1245_s27 + $0xa0] sm:$0xff] %v692_v31 }
  0xfa   : > { %v1117_v32 = vpop.f32.mrb[10].mxu0  ;;  %v1125_v33 = vpop.f32.mrb[10].mxu1 }
  0xfb   : > { %1007 = vst [vmem:[%s1245_s27 + $0x98] sm:$0xff] %v1117_v32  ;;  %1016 = vst [vmem:[%s1245_s27 + $0xb8] sm:$0xff] %v1125_v33  ;;  %v610_v34 = vpop.f32.mrb[11].mxu0  ;;  %v702_v35 = vpop.f32.mrb[11].mxu1 }
  0xfc   : > { %1006 = vst [vmem:[%s1245_s27 + $0x90] sm:$0xff] %v610_v34  ;;  %1015 = vst [vmem:[%s1245_s27 + $0xb0] sm:$0xff] %v702_v35 }
  0xfe   : > { %v1130_v36 = vpop.f32.mrb[12].mxu0  ;;  %v1138_v37 = vpop.f32.mrb[12].mxu1 }
  0xff   : > { %1023 = vst [vmem:[%s1245_s27 + $0xc8] sm:$0xff] %v1130_v36  ;;  %1032 = vst [vmem:[%s1245_s27 + $0xe8] sm:$0xff] %v1138_v37  ;;  %v784_v38 = vpop.f32.mrb[13].mxu0  ;;  %v876_v39 = vpop.f32.mrb[13].mxu1 }
 0x100   : > { %1022 = vst [vmem:[%s1245_s27 + $0xc0] sm:$0xff] %v784_v38  ;;  %1031 = vst [vmem:[%s1245_s27 + $0xe0] sm:$0xff] %v876_v39 }
 0x102   : > { %v1133_v40 = vpop.f32.mrb[14].mxu0  ;;  %v1141_v41 = vpop.f32.mrb[14].mxu1 }
 0x103   : > { %1025 = vst [vmem:[%s1245_s27 + $0xd8] sm:$0xff] %v1133_v40  ;;  %1034 = vst [vmem:[%s1245_s27 + $0xf8] sm:$0xff] %v1141_v41  ;;  %v794_v42 = vpop.f32.mrb[15].mxu0  ;;  %v886_v43 = vpop.f32.mrb[15].mxu1 }
 0x104   : > { %1024 = vst [vmem:[%s1245_s27 + $0xd0] sm:$0xff] %v794_v42  ;;  %1033 = vst [vmem:[%s1245_s27 + $0xf0] sm:$0xff] %v886_v43 }
 0x105 PF: > { %s12_s9 = sadd.s32 1, %s1156_s9  }
 0x106   : > { %p9_p4 = scmp.ge.s32.totalorder %s12_s9, 10  }
 0x108   :  { %11 = sbr.rel (!%p9_p4) target bundleno = 1 (0x1), region = 72 }

</bundles_post_ra>
